<compile_context>
chip_gen: v6e
topology: v6e:2x2x1
jax: 0.10.0
libtpu: 0.0.40
codegen_flags: <defaults>
</compile_context>

<pallas_src>
import math

import jax
import jax.numpy as jnp
from jax.experimental import pallas as pl
from jax.experimental.pallas import tpu as pltpu


_INV_SQRT2 = 1.0 / math.sqrt(2.0)
_SQRT_2_OVER_PI = math.sqrt(2.0 / math.pi)


def _round_up(x, m):
    return ((x + m - 1) // m) * m


def _device_kind():
    try:
        return jax.devices()[0].device_kind.lower()
    except Exception:
        return ""


def _is_pre_v6():
    kind = _device_kind()
    return any(tag in kind for tag in ("v2", "v3", "v4", "v5"))


def _make_kernel(matmul_dtype, gelu_dtype, gelu_kind, precision):
    def gelu(x):
        x = x.astype(gelu_dtype)
        if gelu_kind == "tanh":
            # nn.GELU(approximate='tanh'): tanh goes to the (idle) EUP slot.
            inner = _SQRT_2_OVER_PI * (x + 0.044715 * (x * x * x))
            y = 0.5 * x * (1.0 + jnp.tanh(inner))
        else:
            # Exact nn.GELU() (erf polynomial on the VALU).
            y = 0.5 * x * (1.0 + jax.lax.erf(x * _INV_SQRT2))
        return y.astype(matmul_dtype)

    def kernel(z_ref, w1_ref, b1_ref, w2_ref, b2_ref, w3_ref, b3_ref,
               w4t_ref, logz_ref, out_ref):
        x = z_ref[...]
        h = jnp.dot(x, w1_ref[...], preferred_element_type=jnp.float32,
                    precision=precision) + b1_ref[...]
        h = gelu(h)
        h = jnp.dot(h, w2_ref[...], preferred_element_type=jnp.float32,
                    precision=precision) + b2_ref[...]
        h = gelu(h)
        h = jnp.dot(h, w3_ref[...], preferred_element_type=jnp.float32,
                    precision=precision) + b3_ref[...]
        h = gelu(h)
        # Final no-bias layer, computed transposed: contract the lane-packed
        # feature axis of BOTH operands (A @ B^T form, MXU-native).  Result is
        # (P, rows_per_tile): lane-dense, unmasked stores, dense writeback DMA.
        e = jax.lax.dot_general(
            w4t_ref[...], h, (((1,), (1,)), ((), ())),
            preferred_element_type=jnp.float32, precision=precision)
        out_ref[...] = (e + logz_ref[0]).astype(out_ref.dtype)

    return kernel


def e_mnist_gelu_forward(z, params, *, tb=8192, matmul_dtype=jnp.float32,
                         gelu="tanh", gelu_dtype=None, pack_lanes=None,
                         precision=None):
    """E_MNIST_GELU forward. z: (B, nz, 1, 1) or (B, nz). Returns (B, 1).

    gelu="tanh" (default, fast): matches torch nn.GELU(approximate='tanh').
    gelu="erf": exact-GELU parity with the original module's nn.GELU().
    """
    assert gelu in ("tanh", "erf")
    z2d = z.reshape(z.shape[0], -1) if z.ndim != 2 else z
    B, nz = z2d.shape
    ndf = params["w1"].shape[1]
    mdt = jnp.dtype(matmul_dtype)

    if precision is None:
        precision = (jax.lax.Precision.HIGHEST if mdt == jnp.dtype(jnp.float32)
                     else jax.lax.Precision.DEFAULT)
    if pack_lanes is None:
        # v6e/v7x MXU is 256 wide; v5e (and earlier) is 128 wide.
        pack_lanes = 128 if _is_pre_v6() else 256
    if gelu_dtype is None:
        use_bf16_gelu = (mdt == jnp.dtype(jnp.bfloat16) and gelu == "tanh"
                         and not _is_pre_v6())      # v5e has no bf16 VALU
        gelu_dtype = jnp.bfloat16 if use_bf16_gelu else jnp.float32

    # Lane packing: P independent batch rows share one wide row, so VPU/EUP and
    # MXU operate at full width.  Weights -> block-diagonal kron(I_P, W).
    if ndf <= pack_lanes and pack_lanes % ndf == 0:
        P = pack_lanes // ndf
    elif ndf <= 128 and 128 % ndf == 0:
        P = 128 // ndf
    else:
        P = 1

    # TB must be a multiple of 128*P: packed rows stay sublane-aligned and the
    # transposed output block's lane dim stays a multiple of 128.
    row_quant = 128 * P
    half = _round_up(pl.cdiv(B, 2), row_quant)   # aim for >= 2 grid steps (megacore)
    TB = max(row_quant, min(_round_up(tb, row_quant), half))
    num_tiles = pl.cdiv(B, TB)
    B_pad = num_tiles * TB
    rows_per_tile = TB // P

    # ---- one-time wrapper-side packing (outside the hot path) --------------
    z_use = z2d if B_pad == B else jnp.zeros((B_pad, nz), z2d.dtype).at[:B].set(z2d)
    z_packed = z_use.reshape(B_pad // P, P * nz).astype(mdt)

    eye = jnp.eye(P, dtype=jnp.float32)
    w1p = jnp.kron(eye, params["w1"].astype(jnp.float32)).astype(mdt)
    w2p = jnp.kron(eye, params["w2"].astype(jnp.float32)).astype(mdt)
    w3p = jnp.kron(eye, params["w3"].astype(jnp.float32)).astype(mdt)
    # Last layer pre-transposed: (P, P*ndf) so the kernel does w4t @ h^T.
    w4t = jnp.kron(eye, params["w4"].astype(jnp.float32).T).astype(mdt)
    b1p = jnp.tile(params["b1"].astype(jnp.float32), (1, P))
    b2p = jnp.tile(params["b2"].astype(jnp.float32), (1, P))
    b3p = jnp.tile(params["b3"].astype(jnp.float32), (1, P))
    logz = params["log_partition"].astype(jnp.float32).reshape(1)

    def stream_in(i):          # z: advance along packed-batch rows
        return (i, 0)

    def stream_out(i):         # transposed output: advance along the lane axis
        return (0, i)

    def const_map(i):          # weights / biases stay VMEM-resident across grid
        return (0, 0)

    def resident(a):
        return pl.BlockSpec(a.shape, const_map)

    weight_bytes = sum(int(a.size) * int(a.dtype.itemsize)
                       for a in (w1p, b1p, w2p, b2p, w3p, b3p, w4t))
    cost = pl.CostEstimate(
        flops=2 * B_pad * (nz * ndf + 2 * ndf * ndf + ndf),
        transcendentals=3 * B_pad * ndf,
        bytes_accessed=B_pad * nz * mdt.itemsize + B_pad * 4 + weight_bytes,
    )

    out_t = pl.pallas_call(
        _make_kernel(mdt, gelu_dtype, gelu, precision),
        out_shape=jax.ShapeDtypeStruct((P, B_pad // P), jnp.float32),
        grid_spec=pltpu.PrefetchScalarGridSpec(
            num_scalar_prefetch=0,
            grid=(num_tiles,),
            in_specs=[
                pl.BlockSpec((rows_per_tile, P * nz), stream_in),   # z (streamed)
                resident(w1p), resident(b1p),
                resident(w2p), resident(b2p),
                resident(w3p), resident(b3p),
                resident(w4t),
                pl.BlockSpec(memory_space=pltpu.MemorySpace.SMEM),  # log_partition
            ],
            out_specs=pl.BlockSpec((P, rows_per_tile), stream_out),
        ),
        compiler_params=pltpu.CompilerParams(
            dimension_semantics=("parallel",),    # megacore sharding on v7x
        ),
        cost_estimate=cost,
    )(z_packed, w1p, b1p, w2p, b2p, w3p, b3p, w4t, logz)

    # out_t[p, r] holds the energy of batch item r*P + p.
    return out_t.T.reshape(B_pad, 1)[:B]


def init_params(key, nz, ndf):
    """nn.Linear-style init (uniform +-1/sqrt(fan_in)); weights stored (in, out)."""
    ks = jax.random.split(key, 7)

    def lin(kw, kb, fan_in, fan_out, bias=True):
        bound = 1.0 / math.sqrt(fan_in)
        w = jax.random.uniform(kw, (fan_in, fan_out), jnp.float32, -bound, bound)
        b = (jax.random.uniform(kb, (1, fan_out), jnp.float32, -bound, bound)
             if bias else None)
        return w, b

    w1, b1 = lin(ks[0], ks[1], nz, ndf)
    w2, b2 = lin(ks[2], ks[3], ndf, ndf)
    w3, b3 = lin(ks[4], ks[5], ndf, ndf)
    w4, _ = lin(ks[6], ks[6], ndf, 1, bias=False)
    return {
        "w1": w1, "b1": b1,
        "w2": w2, "b2": b2,
        "w3": w3, "b3": b3,
        "w4": w4,
        "log_partition": jnp.zeros((1,), jnp.float32),  # nn.Parameter(tensor(0.0))
    }


def reference_forward(z, params, *, approximate=False):
    hi = jax.lax.Precision.HIGHEST
    z2d = z.reshape(z.shape[0], -1)
    h = jax.nn.gelu(jnp.dot(z2d, params["w1"], precision=hi) + params["b1"],
                    approximate=approximate)
    h = jax.nn.gelu(jnp.dot(h, params["w2"], precision=hi) + params["b2"],
                    approximate=approximate)
    h = jax.nn.gelu(jnp.dot(h, params["w3"], precision=hi) + params["b3"],
                    approximate=approximate)
    return jnp.dot(h, params["w4"], precision=hi) + params["log_partition"][0]


if __name__ == "__main__":
    nz, ndf = 16, 32
    B = 2

    key = jax.random.PRNGKey(0)
    k_param, k_z = jax.random.split(key)
    params = init_params(k_param, nz, ndf)

    # Latent input in PyTorch NCHW convention: (B, nz, 1, 1); squeezed -> (B, nz).
    z = jax.random.normal(k_z, (B, nz, 1, 1), dtype=jnp.float32)

    ref_exact = reference_forward(z, params, approximate=False)
    ref_tanh = reference_forward(z, params, approximate=True)

    # 1) Exact-GELU parity path: erf GELU + f32 matmuls at Precision.HIGHEST
    #    (numerically matches the original nn.GELU() module).
    out_exact = jax.block_until_ready(e_mnist_gelu_forward(z, params, gelu="erf"))
    assert out_exact.shape == (B, 1), out_exact.shape
    assert jnp.allclose(out_exact, ref_exact, atol=1e-5, rtol=1e-5), (out_exact, ref_exact)

    # 2) Default fast path: tanh GELU on the EUP (== nn.GELU(approximate='tanh')).
    out_fast = jax.block_until_ready(e_mnist_gelu_forward(z, params))
    assert out_fast.shape == (B, 1), out_fast.shape
    assert jnp.allclose(out_fast, ref_tanh, atol=1e-4, rtol=1e-4), (out_fast, ref_tanh)

    # 3) bf16 matmul path (bf16 GELU auto-enabled on v6e/v7x, f32 GELU on v5e);
    #    loose numeric sanity check against the f32 tanh reference.
    out_bf16 = jax.block_until_ready(
        e_mnist_gelu_forward(z, params, matmul_dtype=jnp.bfloat16))
    assert out_bf16.shape == (B, 1), out_bf16.shape
    assert jnp.allclose(out_bf16, ref_tanh, atol=1e-1, rtol=1e-1), (out_bf16, ref_tanh)

    print("KERNEL_OK")
</pallas_src>

<mosaic_0001>
module attributes {stable_mosaic.version = 11 : i64} {
  func.func @kernel(%arg0: i32, %arg1: memref<128x128xf32, #tpu.memory_space<vmem>>, %arg2: memref<128x256xf32, #tpu.memory_space<vmem>>, %arg3: memref<1x256xf32, #tpu.memory_space<vmem>>, %arg4: memref<256x256xf32, #tpu.memory_space<vmem>>, %arg5: memref<1x256xf32, #tpu.memory_space<vmem>>, %arg6: memref<256x256xf32, #tpu.memory_space<vmem>>, %arg7: memref<1x256xf32, #tpu.memory_space<vmem>>, %arg8: memref<8x256xf32, #tpu.memory_space<vmem>>, %arg9: memref<1xf32, #tpu.memory_space<smem>>, %arg10: memref<8x128xf32, #tpu.memory_space<vmem>>) attributes {dimension_semantics = [#tpu.dimension_semantics<parallel>], iteration_bounds = array<i64: 1>, scalar_prefetch = 0 : i64, scratch_operands = 0 : i64, tpu.core_type = #tpu.core_type<tc>, window_params = [{transform_indices = @transform_0, window_bounds = array<i64: 128, 128>}, {pipeline_mode = #tpu.pipeline_mode<synchronous>, transform_indices = @transform_1, window_bounds = array<i64: 128, 256>}, {pipeline_mode = #tpu.pipeline_mode<synchronous>, transform_indices = @transform_2, window_bounds = array<i64: 1, 256>}, {pipeline_mode = #tpu.pipeline_mode<synchronous>, transform_indices = @transform_3, window_bounds = array<i64: 256, 256>}, {pipeline_mode = #tpu.pipeline_mode<synchronous>, transform_indices = @transform_4, window_bounds = array<i64: 1, 256>}, {pipeline_mode = #tpu.pipeline_mode<synchronous>, transform_indices = @transform_5, window_bounds = array<i64: 256, 256>}, {pipeline_mode = #tpu.pipeline_mode<synchronous>, transform_indices = @transform_6, window_bounds = array<i64: 1, 256>}, {pipeline_mode = #tpu.pipeline_mode<synchronous>, transform_indices = @transform_7, window_bounds = array<i64: 8, 256>}, {transform_indices = @transform_8, window_bounds = array<i64: 1>}, {transform_indices = @transform_9, window_bounds = array<i64: 8, 128>}]} {
    %c0 = arith.constant 0 : index
    %c0_0 = arith.constant 0 : index
    %0 = vector.load %arg1[%c0, %c0_0] : memref<128x128xf32, #tpu.memory_space<vmem>>, vector<128x128xf32>
    %c0_1 = arith.constant 0 : index
    %c0_2 = arith.constant 0 : index
    %1 = vector.load %arg2[%c0_1, %c0_2] : memref<128x256xf32, #tpu.memory_space<vmem>>, vector<128x256xf32>
    %cst = arith.constant dense<0.000000e+00> : vector<128x256xf32>
    %2 = tpu.matmul %0, %1, %cst {dimension_numbers = #tpu.dot_dimension_numbers<[1], [0], [0], [1], [0, 0, 1, 1], [], []>, precision = #tpu.contract_precision<fp32>} : vector<128x128xf32>, vector<128x256xf32>, vector<128x256xf32> -> vector<128x256xf32>
    %c0_3 = arith.constant 0 : index
    %c0_4 = arith.constant 0 : index
    %3 = vector.load %arg3[%c0_3, %c0_4] : memref<1x256xf32, #tpu.memory_space<vmem>>, vector<1x256xf32>
    %4 = vector.broadcast %3 : vector<1x256xf32> to vector<128x256xf32>
    %5 = arith.addf %2, %4 : vector<128x256xf32>
    %cst_5 = arith.constant 5.000000e-01 : f32
    %6 = vector.broadcast %cst_5 : f32 to vector<128x256xf32>
    %7 = arith.mulf %6, %5 : vector<128x256xf32>
    %cst_6 = arith.constant 0.707106769 : f32
    %8 = vector.broadcast %cst_6 : f32 to vector<128x256xf32>
    %9 = arith.mulf %5, %8 : vector<128x256xf32>
    %10 = math.erf %9 : vector<128x256xf32>
    %cst_7 = arith.constant 1.000000e+00 : f32
    %11 = vector.broadcast %cst_7 : f32 to vector<128x256xf32>
    %12 = arith.addf %11, %10 : vector<128x256xf32>
    %13 = arith.mulf %7, %12 : vector<128x256xf32>
    %c0_8 = arith.constant 0 : index
    %c0_9 = arith.constant 0 : index
    %14 = vector.load %arg4[%c0_8, %c0_9] : memref<256x256xf32, #tpu.memory_space<vmem>>, vector<256x256xf32>
    %cst_10 = arith.constant dense<0.000000e+00> : vector<128x256xf32>
    %15 = tpu.matmul %13, %14, %cst_10 {dimension_numbers = #tpu.dot_dimension_numbers<[1], [0], [0], [1], [0, 0, 1, 1], [], []>, precision = #tpu.contract_precision<fp32>} : vector<128x256xf32>, vector<256x256xf32>, vector<128x256xf32> -> vector<128x256xf32>
    %c0_11 = arith.constant 0 : index
    %c0_12 = arith.constant 0 : index
    %16 = vector.load %arg5[%c0_11, %c0_12] : memref<1x256xf32, #tpu.memory_space<vmem>>, vector<1x256xf32>
    %17 = vector.broadcast %16 : vector<1x256xf32> to vector<128x256xf32>
    %18 = arith.addf %15, %17 : vector<128x256xf32>
    %cst_13 = arith.constant 5.000000e-01 : f32
    %19 = vector.broadcast %cst_13 : f32 to vector<128x256xf32>
    %20 = arith.mulf %19, %18 : vector<128x256xf32>
    %cst_14 = arith.constant 0.707106769 : f32
    %21 = vector.broadcast %cst_14 : f32 to vector<128x256xf32>
    %22 = arith.mulf %18, %21 : vector<128x256xf32>
    %23 = math.erf %22 : vector<128x256xf32>
    %cst_15 = arith.constant 1.000000e+00 : f32
    %24 = vector.broadcast %cst_15 : f32 to vector<128x256xf32>
    %25 = arith.addf %24, %23 : vector<128x256xf32>
    %26 = arith.mulf %20, %25 : vector<128x256xf32>
    %c0_16 = arith.constant 0 : index
    %c0_17 = arith.constant 0 : index
    %27 = vector.load %arg6[%c0_16, %c0_17] : memref<256x256xf32, #tpu.memory_space<vmem>>, vector<256x256xf32>
    %cst_18 = arith.constant dense<0.000000e+00> : vector<128x256xf32>
    %28 = tpu.matmul %26, %27, %cst_18 {dimension_numbers = #tpu.dot_dimension_numbers<[1], [0], [0], [1], [0, 0, 1, 1], [], []>, precision = #tpu.contract_precision<fp32>} : vector<128x256xf32>, vector<256x256xf32>, vector<128x256xf32> -> vector<128x256xf32>
    %c0_19 = arith.constant 0 : index
    %c0_20 = arith.constant 0 : index
    %29 = vector.load %arg7[%c0_19, %c0_20] : memref<1x256xf32, #tpu.memory_space<vmem>>, vector<1x256xf32>
    %30 = vector.broadcast %29 : vector<1x256xf32> to vector<128x256xf32>
    %31 = arith.addf %28, %30 : vector<128x256xf32>
    %cst_21 = arith.constant 5.000000e-01 : f32
    %32 = vector.broadcast %cst_21 : f32 to vector<128x256xf32>
    %33 = arith.mulf %32, %31 : vector<128x256xf32>
    %cst_22 = arith.constant 0.707106769 : f32
    %34 = vector.broadcast %cst_22 : f32 to vector<128x256xf32>
    %35 = arith.mulf %31, %34 : vector<128x256xf32>
    %36 = math.erf %35 : vector<128x256xf32>
    %cst_23 = arith.constant 1.000000e+00 : f32
    %37 = vector.broadcast %cst_23 : f32 to vector<128x256xf32>
    %38 = arith.addf %37, %36 : vector<128x256xf32>
    %39 = arith.mulf %33, %38 : vector<128x256xf32>
    %c0_24 = arith.constant 0 : index
    %c0_25 = arith.constant 0 : index
    %40 = vector.load %arg8[%c0_24, %c0_25] : memref<8x256xf32, #tpu.memory_space<vmem>>, vector<8x256xf32>
    %cst_26 = arith.constant dense<0.000000e+00> : vector<8x128xf32>
    %41 = tpu.matmul %40, %39, %cst_26 {dimension_numbers = #tpu.dot_dimension_numbers<[1], [1], [0], [0], [0, 0, 1, 0], [], []>, precision = #tpu.contract_precision<fp32>} : vector<8x256xf32>, vector<128x256xf32>, vector<8x128xf32> -> vector<8x128xf32>
    %c0_27 = arith.constant 0 : index
    %42 = memref.load %arg9[%c0_27] : memref<1xf32, #tpu.memory_space<smem>>
    %43 = vector.broadcast %42 : f32 to vector<8x128xf32>
    %44 = arith.addf %41, %43 : vector<8x128xf32>
    %c0_28 = arith.constant 0 : index
    %c0_29 = arith.constant 0 : index
    %45 = vector.load %arg10[%c0_28, %c0_29] : memref<8x128xf32, #tpu.memory_space<vmem>>, vector<8x128xf32>
    tpu.vector_store %arg10[%c0_28, %c0_29], %44 {strides = array<i32>} : memref<8x128xf32, #tpu.memory_space<vmem>>, vector<8x128xf32>,
    return
  }
  func.func @transform_0(%arg0: i32) -> (i32, i32) {
    %c0_i32 = arith.constant 0 : i32
    %c0_i32_0 = arith.constant 0 : i32
    return %arg0, %c0_i32 : i32, i32
  }
  func.func @transform_1(%arg0: i32) -> (i32, i32) {
    %c0_i32 = arith.constant 0 : i32
    %c0_i32_0 = arith.constant 0 : i32
    %c0_i32_1 = arith.constant 0 : i32
    return %c0_i32, %c0_i32_0 : i32, i32
  }
  func.func @transform_2(%arg0: i32) -> (i32, i32) {
    %c0_i32 = arith.constant 0 : i32
    %c0_i32_0 = arith.constant 0 : i32
    %c0_i32_1 = arith.constant 0 : i32
    return %c0_i32, %c0_i32_0 : i32, i32
  }
  func.func @transform_3(%arg0: i32) -> (i32, i32) {
    %c0_i32 = arith.constant 0 : i32
    %c0_i32_0 = arith.constant 0 : i32
    %c0_i32_1 = arith.constant 0 : i32
    return %c0_i32, %c0_i32_0 : i32, i32
  }
  func.func @transform_4(%arg0: i32) -> (i32, i32) {
    %c0_i32 = arith.constant 0 : i32
    %c0_i32_0 = arith.constant 0 : i32
    %c0_i32_1 = arith.constant 0 : i32
    return %c0_i32, %c0_i32_0 : i32, i32
  }
  func.func @transform_5(%arg0: i32) -> (i32, i32) {
    %c0_i32 = arith.constant 0 : i32
    %c0_i32_0 = arith.constant 0 : i32
    %c0_i32_1 = arith.constant 0 : i32
    return %c0_i32, %c0_i32_0 : i32, i32
  }
  func.func @transform_6(%arg0: i32) -> (i32, i32) {
    %c0_i32 = arith.constant 0 : i32
    %c0_i32_0 = arith.constant 0 : i32
    %c0_i32_1 = arith.constant 0 : i32
    return %c0_i32, %c0_i32_0 : i32, i32
  }
  func.func @transform_7(%arg0: i32) -> (i32, i32) {
    %c0_i32 = arith.constant 0 : i32
    %c0_i32_0 = arith.constant 0 : i32
    %c0_i32_1 = arith.constant 0 : i32
    return %c0_i32, %c0_i32_0 : i32, i32
  }
  func.func @transform_8(%arg0: i32) -> i32 {
    %c0_i32 = arith.constant 0 : i32
    %c0_i32_0 = arith.constant 0 : i32
    return %c0_i32 : i32
  }
  func.func @transform_9(%arg0: i32) -> (i32, i32) {
    %c0_i32 = arith.constant 0 : i32
    %c0_i32_0 = arith.constant 0 : i32
    return %c0_i32, %arg0 : i32, i32
  }
}

</mosaic_0001>

<bundles_post_ra>
// kernel: tpu_custom_call.1
= control target key start
LH: loop header
LB: loop body
LE: loop exit
PB: predicated region body
PF: predicated region fallthrough
CT: control target
= control target key end

     0   :  { %15 = vsyncpa [#allocation4], 0  ;;  %s14295_s0 = inlined_call_operand.hbm [shape: f32[128,128], index: 0, kind: input, shape index: {}]   ;;  %s14296_s1 = inlined_call_operand.hbm [shape: f32[128,256], index: 1, kind: input, shape index: {}]   ;;  %s14297_s2 = inlined_call_operand.vmem [shape: f32[1,256], index: 2, kind: input, shape index: {}]   ;;  %s14298_s3 = inlined_call_operand.hbm [shape: f32[256,256], index: 3, kind: input, shape index: {}]   ;;  %s14299_s4 = inlined_call_operand.vmem [shape: f32[1,256], index: 4, kind: input, shape index: {}]   ;;  %s14300_s5 = inlined_call_operand.hbm [shape: f32[256,256], index: 5, kind: input, shape index: {}]   ;;  %s14301_s6 = inlined_call_operand.vmem [shape: f32[1,256], index: 6, kind: input, shape index: {}]   ;;  %s14302_s7 = inlined_call_operand.hbm [shape: f32[8,256], index: 7, kind: input, shape index: {}]   ;;  %s14303_s8 = inlined_call_operand.<no memory space> [shape: f32[1], index: 8, kind: input, shape index: {}]   ;;  %s14304_s9 = inlined_call_operand.hbm [shape: f32[8,128], index: 9, kind: output, shape index: {}]  }
   0x1   :  { %16 = vsyncpa [#allocation7], 0 }
   0x2   :  { %17 = vsyncpa [#allocation10], 0 }
   0x3   :  { %18 = vsyncpa [#allocation5], 0  ;;  %s8027_s30 = smov [#allocation6]  }
   0x4   :  { %s36_s10 = sshll.u32 %s8027_s30, 4  ;;  %s37_s10 = int_to_ptr.vmem [resolvable:$true] %s36_s10 }
   0x5   :  { %s7907_s11 = scalar_lea.vmem %s37_s10, 4096  ;;  %p7912_p1 = scmp.lt.s32.totalorder %s37_s10, %s37_s10 }
   0x6   :  { %p7908_p0 = scmp.ne.s32.totalorder %s37_s10, %s7907_s11  ;;  %p7913_p2 = scmp.lt.s32.totalorder %s7907_s11, %s7907_s11 }
   0x8   :  { %p7914_p3 = por %p7913_p2, %p7912_p1 }
   0xa   :  { %p7915_p4 = pnand %p7914_p3, %p7908_p0 }
   0xc   :  { %7918 = shalt.err (!%p7915_p4)
}
   0xd   :  { %s8028_s12 = smov 256   ;;  %s8029_s13 = smov 16  }
   0xe   :  { %42 = dma.hbm_to_vmem [thread:$0]  %s14296_s1, 4096, %s37_s10, [#allocation7], %s8028_s12, %s8028_s12, %s8029_s13  }
   0xf   :  { %s8030_s16 = smov [#allocation9]   ;;  %s8031_s18 = smov [#allocation3]  }
  0x10   :  { %s64_s17 = sshll.u32 %s8030_s16, 4  ;;  %s24_s19 = sshll.u32 %s8031_s18, 4  ;;  %s65_s17 = int_to_ptr.vmem [resolvable:$true] %s64_s17  ;;  %s25_s19 = int_to_ptr.vmem [resolvable:$true] %s24_s19 }
  0x11   :  { %s7927_s20 = scalar_lea.vmem %s65_s17, 8192  ;;  %p7932_p6 = scmp.lt.s32.totalorder %s65_s17, %s65_s17 }
  0x12   :  { %p7928_p5 = scmp.ne.s32.totalorder %s65_s17, %s7927_s20  ;;  %p7933_p7 = scmp.lt.s32.totalorder %s7927_s20, %s7927_s20 }
  0x14   :  { %p7934_p8 = por %p7933_p7, %p7932_p6 }
  0x16   :  { %p7935_p9 = pnand %p7934_p8, %p7928_p5 }
  0x18   :  { %7938 = shalt.err (!%p7935_p9)
}
  0x19   :  { %70 = dma.hbm_to_vmem [thread:$0]  %s14300_s5, 8192, %s65_s17, [#allocation10], %s8028_s12, %s8028_s12, %s8029_s13  }
  0x1a   :  { %s7947_s1 = scalar_lea.vmem %s25_s19, 2048  ;;  %p7952_p11 = scmp.lt.s32.totalorder %s25_s19, %s25_s19 }
  0x1b   :  { %p7948_p10 = scmp.ne.s32.totalorder %s25_s19, %s7947_s1  ;;  %p7953_p12 = scmp.lt.s32.totalorder %s7947_s1, %s7947_s1 }
  0x1d   :  { %p7954_p13 = por %p7953_p12, %p7952_p11 }
  0x1f   :  { %p7955_p0 = pnand %p7954_p13, %p7948_p10 }
  0x21   :  { %7958 = shalt.err (!%p7955_p0)
}
  0x22   :  { %s8032_s23 = smov 128   ;;  %s8033_s24 = smov 8  }
  0x23   :  { %30 = dma.hbm_to_vmem [thread:$0]  %s14295_s0, 2048, %s25_s19, [#allocation4], %s8032_s23, %s8032_s23, %s8033_s24  }
  0x24   :  { %s8034_s27 = smov [#allocation8]   ;;  %s8035_s29 = smov [#allocation11]  }
  0x25   :  { %s50_s28 = sshll.u32 %s8034_s27, 4  ;;  %s79_s30 = sshll.u32 %s8035_s29, 4  ;;  %s51_s28 = int_to_ptr.vmem [resolvable:$true] %s50_s28  ;;  %s80_s30 = int_to_ptr.vmem [resolvable:$true] %s79_s30 }
  0x26   :  { %s7967_s5 = scalar_lea.vmem %s51_s28, 8192  ;;  %p7972_p2 = scmp.lt.s32.totalorder %s51_s28, %s51_s28 }
  0x27   :  { %p7968_p1 = scmp.ne.s32.totalorder %s51_s28, %s7967_s5  ;;  %p7973_p3 = scmp.lt.s32.totalorder %s7967_s5, %s7967_s5 }
  0x29   :  { %p7974_p4 = por %p7973_p3, %p7972_p2 }
  0x2b   :  { %p7975_p5 = pnand %p7974_p4, %p7968_p1 }
  0x2d   :  { %7978 = shalt.err (!%p7975_p5)
}
  0x2e   :  { %56 = dma.hbm_to_vmem [thread:$0]  %s14298_s3, 8192, %s51_s28, [#allocation7], %s8028_s12, %s8028_s12, %s8029_s13  }
  0x2f   :  { %s7987_s0 = scalar_lea.vmem %s80_s30, 256  ;;  %p7992_p7 = scmp.lt.s32.totalorder %s80_s30, %s80_s30 }
  0x30   :  { %p7988_p6 = scmp.ne.s32.totalorder %s80_s30, %s7987_s0  ;;  %p7993_p8 = scmp.lt.s32.totalorder %s7987_s0, %s7987_s0 }
  0x32   :  { %p7994_p9 = por %p7993_p8, %p7992_p7 }
  0x34   :  { %p7995_p10 = pnand %p7994_p9, %p7988_p6 }
  0x36   :  { %7998 = shalt.err (!%p7995_p10)
}
  0x37   :  { %82 = dma.hbm_to_vmem [thread:$0]  %s14302_s7, 256, %s80_s30, [#allocation10]  }
  0x38   :  { %8019 = dma.done.wait [#allocation4], 2048  }
  0x39   :  { %8020 = vsyncadd [#allocation4], 4294965248 }
  0x3a   :  { %8021 = dma.done.wait [#allocation7], 12288  }
  0x3b   :  { %8022 = vsyncadd [#allocation7], 4294955008 }
  0x3c   :  { %8023 = dma.done.wait [#allocation10], 8448  }
  0x3d   :  { %8024 = vsyncadd [#allocation10], 4294958848  ;;  %v14319_v0 = vmov 0.0   ;;  %v147_v1 = vld [vmem:[#allocation6 + $0xf8] sm:$0xff]  ;;  %v146_v2 = vld [vmem:[#allocation6 + $0xf0] sm:$0xff]  ;;  %s8037_s21 = smov [#allocation12]  }
  0x3e   :  { %256 = vmatprep.mubr.f32.mxu0 %v14319_v0  ;;  %657 = vmatprep.mubr.f32.mxu1 %v14319_v0  ;;  %v145_v3 = vld [vmem:[#allocation6 + $0xe8] sm:$0xff]  ;;  %v8114_v4 = vand.u32 4294901760, %v147_v1  ;;  %v8116_v5 = vand.u32 4294901760, %v146_v2  ;;  %v144_v7 = vld [vmem:[#allocation6 + $0xe0] sm:$0xff]  ;;  %v143_v8 = vld [vmem:[#allocation6 + $0xd8] sm:$0xff]  ;;  %s7683_s22 = sshll.u32 %s8037_s21, 4  ;;  %s7684_s22 = int_to_ptr.vmem [resolvable:$true] %s7683_s22 }
  0x3f   :  { %v8118_v6 = vand.u32 4294901760, %v145_v3  ;;  %v142_v9 = vld [vmem:[#allocation6 + $0xd0] sm:$0xff]  ;;  %v8120_v10 = vand.u32 4294901760, %v144_v7  ;;  %v8122_v11 = vand.u32 4294901760, %v143_v8  ;;  %v141_v13 = vld [vmem:[#allocation6 + $0xc8] sm:$0xff]  ;;  %v140_v14 = vld [vmem:[#allocation6 + $0xc0] sm:$0xff]  ;;  %p8004_p12 = scmp.lt.s32.totalorder %s7684_s22, %s7684_s22 }
  0x40   :  { %v8124_v12 = vand.u32 4294901760, %v142_v9  ;;  %v139_v15 = vld [vmem:[#allocation6 + $0xb8] sm:$0xff]  ;;  %161 = vmatprep.subr.mxu0 %v8114_v4  ;;  %v8127_v16 = vand.u32 4294901760, %v141_v13  ;;  %v8129_v17 = vand.u32 4294901760, %v140_v14  ;;  %v8134_v19 = vsub.f32 %v147_v1, %v8114_v4  ;;  %v8136_v20 = vld [vmem:[#allocation6 + $0xb0] sm:$0xff]  ;;  %v8138_v21 = vld [vmem:[#allocation6 + $0xa8] sm:$0xff] }
  0x41   :  { %v8131_v18 = vand.u32 4294901760, %v139_v15  ;;  %v8140_v22 = vld [vmem:[#allocation6 + $0xa0] sm:$0xff]  ;;  %163 = vmatpush1.msra.mxu0 %v8116_v5  ;;  %v8144_v23 = vand.u32 4294901760, %v8136_v20  ;;  %v8147_v24 = vsub.f32 %v146_v2, %v8116_v5  ;;  %v8150_v25 = vand.u32 4294901760, %v8138_v21  ;;  %v8155_v27 = vld [vmem:[#allocation6 + $0x98] sm:$0xff]  ;;  %v8157_v28 = vld [vmem:[#allocation6 + $0x90] sm:$0xff] }
  0x42   :  { %15264 = vst [vmem:[#allocation17_spill] sm:$0xff] %v8134_v19  ;;  %v8153_v26 = vsub.f32 %v145_v3, %v8118_v6  ;;  %v8159_v29 = vld [vmem:[#allocation6 + $0x88] sm:$0xff]  ;;  %165 = vmatprep.subr.mxu0 %v8118_v6  ;;  %v14317_v30 = vand.u32 4294901760, %v8134_v19  ;;  %v8164_v31 = vand.u32 4294901760, %v8140_v22  ;;  %v8167_v32 = vsub.f32 %v144_v7, %v8120_v10  ;;  %v8181_v38 = vld [vmem:[#allocation6 + $0x80] sm:$0xff]  ;;  %v8205_v47 = vld [vmem:[#allocation6 + $0x78] sm:$0xff] }
  0x43   :  { %15265 = vst [vmem:[#allocation18_spill] sm:$0xff] %v8147_v24  ;;  %v8170_v33 = vand.u32 4294901760, %v8155_v27  ;;  %167 = vmatpush1.msra.mxu0 %v8120_v10  ;;  %v14316_v34 = vand.u32 4294901760, %v8147_v24  ;;  %v8176_v36 = vsub.f32 %v143_v8, %v8122_v11  ;;  %v8179_v37 = vand.u32 4294901760, %v8157_v28  ;;  %v8215_v52 = vld [vmem:[#allocation6 + $0x70] sm:$0xff]  ;;  %v8222_v57 = vld [vmem:[#allocation6 + $0x68] sm:$0xff] }
  0x44   :  { %v14314_v35 = vand.u32 4294901760, %v8153_v26  ;;  %169 = vmatprep.subr.mxu0 %v8122_v11  ;;  %v436_v39 = vsub.f32 %v8134_v19, %v14317_v30  ;;  %v14312_v40 = vand.u32 4294901760, %v8167_v32  ;;  %v8189_v41 = vsub.f32 %v142_v9, %v8124_v12  ;;  %v8234_v62 = vld [vmem:[#allocation6 + $0x60] sm:$0xff]  ;;  %v8246_v7 = vld [vmem:[#allocation6 + $0x58] sm:$0xff] }
  0x45   :  { %15266 = vst [vmem:[#allocation19_spill] sm:$0xff] %v8179_v37  ;;  %v8192_v42 = vand.u32 4294901760, %v8159_v29  ;;  %171 = vmatpush1.msra.mxu0 %v8124_v12  ;;  %v442_v43 = vsub.f32 %v8147_v24, %v14316_v34  ;;  %v14311_v45 = vand.u32 4294901760, %v8176_v36  ;;  %v8203_v46 = vsub.f32 %v141_v13, %v8127_v16  ;;  %v8347_v34 = vld [vmem:[#allocation6 + $0x20] sm:$0xff] }
  0x46   :  { %v448_v44 = vsub.f32 %v8153_v26, %v14314_v35  ;;  %173 = vmatprep.subr.mxu0 %v8127_v16  ;;  %v437_v48 = vand.u32 4294901760, %v436_v39  ;;  %v454_v49 = vsub.f32 %v8167_v32, %v14312_v40  ;;  %v14309_v50 = vand.u32 4294901760, %v8189_v41  ;;  %v8337_v35 = vld [vmem:[#allocation6 + $0x28] sm:$0xff] }
  0x47   :  { %15267 = vst [vmem:[#allocation20_spill] sm:$0xff] %v8192_v42  ;;  %v8213_v51 = vand.u32 4294901760, %v8181_v38  ;;  %175 = vmatpush1.msra.mxu0 %v8129_v17  ;;  %v443_v53 = vand.u32 4294901760, %v442_v43  ;;  %v460_v55 = vsub.f32 %v8176_v36, %v14311_v45  ;;  %v14307_v56 = vand.u32 4294901760, %v8203_v46  ;;  %v8324_v45 = vld [vmem:[#allocation6 + $0x30] sm:$0xff] }
  0x48   :  { %v449_v54 = vand.u32 4294901760, %v448_v44  ;;  %177 = vmatprep.subr.mxu0 %v8131_v18  ;;  %438 = vmatprep.subr.mxu1 %v437_v48  ;;  %v455_v58 = vand.u32 4294901760, %v454_v49  ;;  %v466_v59 = vsub.f32 %v8189_v41, %v14309_v50  ;;  %v8229_v60 = vsub.f32 %v140_v14, %v8129_v17 }
  0x49   :  { %15268 = vst [vmem:[#allocation21_spill] sm:$0xff] %v8213_v51  ;;  %v8232_v61 = vand.u32 4294901760, %v8205_v47  ;;  %179 = vmatpush1.msra.mxu0 %v8144_v23  ;;  %444 = vmatpush1.msra.mxu1 %v443_v53  ;;  %v461_v63 = vand.u32 4294901760, %v460_v55  ;;  %v472_v1 = vsub.f32 %v8203_v46, %v14307_v56  ;;  %v8241_v2 = vsub.f32 %v139_v15, %v8131_v18  ;;  %v8257_v15 = vld [vmem:[#allocation6 + $0x50] sm:$0xff] }
  0x4a   :  { %v8244_v3 = vand.u32 4294901760, %v8215_v52  ;;  %181 = vmatprep.subr.mxu0 %v8150_v25  ;;  %450 = vmatprep.subr.mxu1 %v449_v54  ;;  %v467_v8 = vand.u32 4294901760, %v466_v59  ;;  %v14306_v9 = vand.u32 4294901760, %v8229_v60  ;;  %v8252_v13 = vsub.f32 %v8136_v20, %v8144_v23 }
  0x4b   :  { %15269 = vst [vmem:[#allocation22_spill] sm:$0xff] %v8232_v61  ;;  %v8255_v14 = vand.u32 4294901760, %v8222_v57  ;;  %183 = vmatpush1.msra.mxu0 %v8164_v31  ;;  %456 = vmatpush1.msra.mxu1 %v455_v58  ;;  %v473_v39 = vand.u32 4294901760, %v472_v1  ;;  %v14305_v43 = vand.u32 4294901760, %v8241_v2  ;;  %v8263_v44 = vsub.f32 %v8138_v21, %v8150_v25  ;;  %v8280_v21 = vld [vmem:[#allocation6 + $0x48] sm:$0xff] }
  0x4c   :  { %15270 = vst [vmem:[#allocation23_spill] sm:$0xff] %v8244_v3  ;;  %v8266_v48 = vand.u32 4294901760, %v8234_v62  ;;  %185 = vmatprep.subr.mxu0 %v8170_v33  ;;  %462 = vmatprep.subr.mxu1 %v461_v63  ;;  %v478_v20 = vsub.f32 %v8229_v60, %v14306_v9  ;;  %v14308_v49 = vand.u32 4294901760, %v8252_v13  ;;  %v8275_v53 = vsub.f32 %v8140_v22, %v8164_v31  ;;  %v8303_v9 = vld [vmem:[#allocation6 + $0x40] sm:$0xff] }
  0x4d   :  { %15271 = vst [vmem:[#allocation24_spill] sm:$0xff] %v8255_v14  ;;  %v8278_v54 = vand.u32 4294901760, %v8246_v7  ;;  %187 = vmatpush1.msra.mxu0 %v8179_v37  ;;  %468 = vmatpush1.msra.mxu1 %v467_v8  ;;  %v484_v55 = vsub.f32 %v8241_v2, %v14305_v43  ;;  %v14310_v58 = vand.u32 4294901760, %v8263_v44  ;;  %v8289_v59 = vsub.f32 %v8155_v27, %v8170_v33 }
  0x4e   :  { %15272 = vst [vmem:[#allocation25_spill] sm:$0xff] %v8266_v48  ;;  %v8292_v22 = vand.u32 4294901760, %v8257_v15  ;;  %189 = vmatprep.subr.mxu0 %v8192_v42  ;;  %474 = vmatprep.subr.mxu1 %v473_v39  ;;  %v479_v63 = vand.u32 4294901760, %v478_v20  ;;  %v490_v1 = vsub.f32 %v8252_v13, %v14308_v49  ;;  %v14313_v8 = vand.u32 4294901760, %v8275_v53  ;;  %v8313_v49 = vld [vmem:[#allocation6 + $0x38] sm:$0xff] }
  0x4f   :  { %15273 = vst [vmem:[#allocation26_spill] sm:$0xff] %v8278_v54  ;;  %v8301_v43 = vsub.f32 %v8157_v28, %v8179_v37  ;;  %191 = vmatpush1.msra.mxu0 %v8213_v51  ;;  %v485_v27 = vand.u32 4294901760, %v484_v55  ;;  %v496_v39 = vsub.f32 %v8263_v44, %v14310_v58  ;;  %v14315_v20 = vand.u32 4294901760, %v8289_v59  ;;  %v100_v37 = vld [vmem:[#allocation3] sm:$0xff] }
  0x50   :  { %15274 = vst [vmem:[#allocation27_spill] sm:$0xff] %v8292_v22  ;;  %v8311_v56 = vand.u32 4294901760, %v8280_v21  ;;  %480 = vmatpush1.msra.mxu1 %v479_v63  ;;  %193 = vmatprep.subr.mxu0 %v8232_v61  ;;  %v491_v28 = vand.u32 4294901760, %v490_v1  ;;  %v502_v50 = vsub.f32 %v8275_v53, %v14313_v8  ;;  %v8322_v58 = vsub.f32 %v8159_v29, %v8192_v42 }
  0x51   :  { %v14318_v55 = vand.u32 4294901760, %v8301_v43  ;;  %486 = vmatprep.subr.mxu1 %v485_v27  ;;  %195 = vmatpush1.msra.mxu0 %v8244_v3  ;;  %v497_v40 = vand.u32 4294901760, %v496_v39  ;;  %v508_v63 = vsub.f32 %v8289_v59, %v14315_v20  ;;  %v8331_v1 = vand.u32 4294901760, %v8303_v9 }
  0x52   :  { %15275 = vst [vmem:[#allocation28_spill] sm:$0xff] %v8311_v56  ;;  %v8335_v8 = vsub.f32 %v8181_v38, %v8213_v51  ;;  %492 = vmatpush1.msra.mxu1 %v491_v28  ;;  %197 = vmatprep.subr.mxu0 %v8255_v14  ;;  %v503_v29 = vand.u32 4294901760, %v502_v50  ;;  %v14323_v39 = vand.u32 4294901760, %v8322_v58  ;;  %v8345_v20 = vand.u32 4294901760, %v8313_v49 }
  0x53   :  { %15276 = vst [vmem:[#allocation29_spill] sm:$0xff] %v8331_v1  ;;  %v514_v27 = vsub.f32 %v8301_v43, %v14318_v55  ;;  %498 = vmatprep.subr.mxu1 %v497_v40  ;;  %199 = vmatpush1.msra.mxu0 %v8266_v48  ;;  %v509_v38 = vand.u32 4294901760, %v508_v63  ;;  %v8353_v50 = vsub.f32 %v8205_v47, %v8232_v61  ;;  %v8356_v30 = vand.u32 4294901760, %v8324_v45  ;;  %v8358_v55 = vld [vmem:[#allocation6 + $0x18] sm:$0xff] }
  0x54   :  { %15277 = vst [vmem:[#allocation30_spill] sm:$0xff] %v8335_v8  ;;  %15278 = vst [vmem:[#allocation31_spill] sm:$0xff] %v8345_v20  ;;  %v14326_v28 = vand.u32 4294901760, %v8335_v8  ;;  %504 = vmatpush1.msra.mxu1 %v503_v29  ;;  %201 = vmatprep.subr.mxu0 %v8278_v54  ;;  %v520_v40 = vsub.f32 %v8322_v58, %v14323_v39  ;;  %v8366_v63 = vsub.f32 %v8215_v52, %v8244_v3  ;;  %v8383_v52 = vld [vmem:[#allocation6 + $0x10] sm:$0xff] }
  0x55   :  { %15279 = vst [vmem:[#allocation32_spill] sm:$0xff] %v8353_v50  ;;  %15280 = vst [vmem:[#allocation33_spill] sm:$0xff] %v8356_v30  ;;  %v515_v0 = vand.u32 4294901760, %v514_v27  ;;  %v8369_v47 = vand.u32 4294901760, %v8337_v35  ;;  %510 = vmatprep.subr.mxu1 %v509_v38  ;;  %203 = vmatpush1.msra.mxu0 %v8292_v22  ;;  %v8378_v61 = vsub.f32 %v8222_v57, %v8255_v14  ;;  %v8381_v39 = vand.u32 4294901760, %v8347_v34  ;;  %v8394_v57 = vld [vmem:[#allocation6 + $0x8] sm:$0xff] }
  0x56   :  { %15281 = vst [vmem:[#allocation34_spill] sm:$0xff] %v8366_v63  ;;  %v526_v29 = vsub.f32 %v8335_v8, %v14326_v28  ;;  %205 = vmatprep.subr.mxu0 %v8311_v56  ;;  %v521_v38 = vand.u32 4294901760, %v520_v40  ;;  %v8389_v28 = vsub.f32 %v8234_v62, %v8266_v48  ;;  %v8392_v27 = vand.u32 4294901760, %v8358_v55  ;;  %v8417_v40 = vld [vmem:[#allocation6] sm:$0xff] }
  0x57   :  { %15282 = vst [vmem:[#allocation35_spill] sm:$0xff] %v8369_v47  ;;  %15283 = vst [vmem:[#allocation36_spill] sm:$0xff] %v8378_v61  ;;  %516 = vmatpush1.msra.mxu1 %v515_v0  ;;  %207 = vmatpush1.msra.mxu0 %v8331_v1  ;;  %v15287_v51 = vand.u32 4294901760, %v8353_v50  ;;  %v8403_v3 = vsub.f32 %v8246_v7, %v8278_v54  ;;  %v15289_v62 = vand.u32 4294901760, %v8366_v63  ;;  %v8425_v42 = vand.u32 4294901760, %v8394_v57 }
  0x58   :  { %15284 = vst [vmem:[#allocation37_spill] sm:$0xff] %v8381_v39  ;;  %15285 = vst [vmem:[#allocation38_spill] sm:$0xff] %v8389_v28  ;;  %v527_v14 = vand.u32 4294901760, %v526_v29  ;;  %522 = vmatprep.subr.mxu1 %v521_v38  ;;  %209 = vmatprep.subr.mxu0 %v8345_v20  ;;  %v8411_v29 = vand.u32 4294901760, %v8383_v52  ;;  %v15291_v38 = vand.u32 4294901760, %v8378_v61 }
  0x59   :  { %15286 = vst [vmem:[#allocation39_spill] sm:$0xff] %v8392_v27  ;;  %v532_v0 = vsub.f32 %v8353_v50, %v15287_v51  ;;  %15288 = vst [vmem:[#allocation40_spill] sm:$0xff] %v8403_v3  ;;  %v538_v48 = vsub.f32 %v8366_v63, %v15289_v62  ;;  %v8415_v51 = vsub.f32 %v8257_v15, %v8292_v22  ;;  %211 = vmatpush1.msra.mxu0 %v8356_v30 }
  0x5a   :  { %15290 = vst [vmem:[#allocation41_spill] sm:$0xff] %v8411_v29  ;;  %528 = vmatpush1.msra.mxu1 %v527_v14  ;;  %v544_v54 = vsub.f32 %v8378_v61, %v15291_v38  ;;  %v14347_v62 = vand.u32 4294901760, %v8403_v3  ;;  %15292 = vst [vmem:[#allocation42_spill] sm:$0xff] %v8425_v42  ;;  %213 = vmatprep.subr.mxu0 %v8369_v47  ;;  %v15293_v15 = vand.u32 4294901760, %v8389_v28  ;;  %v8441_v61 = vand.u32 4294901760, %v8417_v40 }
  0x5b   :  { %v533_v7 = vand.u32 4294901760, %v532_v0  ;;  %v539_v63 = vand.u32 4294901760, %v538_v48  ;;  %v8434_v22 = vsub.f32 %v8280_v21, %v8311_v56  ;;  %215 = vmatpush1.msra.mxu0 %v8381_v39  ;;  %v15295_v21 = vand.u32 4294901760, %v8415_v51 }
  0x5c   :  { %v550_v14 = vsub.f32 %v8389_v28, %v15293_v15  ;;  %v545_v38 = vand.u32 4294901760, %v544_v54  ;;  %v556_v48 = vsub.f32 %v8403_v3, %v14347_v62  ;;  %15294 = vst [vmem:[#allocation43_spill] sm:$0xff] %v8441_v61  ;;  %v8445_v15 = vsub.f32 %v8303_v9, %v8331_v1  ;;  %217 = vmatprep.subr.mxu0 %v8392_v27 }
  0x5d   :  { %534 = vmatprep.subr.mxu1 %v533_v7  ;;  %v562_v54 = vsub.f32 %v8415_v51, %v15295_v21  ;;  %v14350_v7 = vand.u32 4294901760, %v8434_v22  ;;  %v8452_v56 = vand.u32 4294901760, %v100_v37  ;;  %219 = vmatpush1.msra.mxu0 %v8411_v29  ;;  %v8458_v9 = vsub.f32 %v8313_v49, %v8345_v20 }
  0x5e   :  { %540 = vmatpush1.msra.mxu1 %v539_v63  ;;  %v551_v0 = vand.u32 4294901760, %v550_v14  ;;  %v557_v62 = vand.u32 4294901760, %v556_v48  ;;  %v14355_v3 = vand.u32 4294901760, %v8445_v15  ;;  %v8462_v63 = vsub.f32 %v8324_v45, %v8356_v30  ;;  %v101_v14 = vld [vmem:[#allocation3 + $0x8] sm:$0xff]  ;;  %221 = vmatprep.subr.mxu0 %v8425_v42 }
  0x5f   :  { %15296 = vst [vmem:[#allocation44_spill] sm:$0xff] %v8452_v56  ;;  %546 = vmatprep.subr.mxu1 %v545_v38  ;;  %v563_v21 = vand.u32 4294901760, %v562_v54  ;;  %v568_v38 = vsub.f32 %v8434_v22, %v14350_v7  ;;  %v8469_v48 = vsub.f32 %v100_v37, %v8452_v56  ;;  %v8473_v49 = vsub.f32 %v8337_v35, %v8369_v47 }
  0x60   :  { %552 = vmatpush1.msra.mxu1 %v551_v0  ;;  %223 = vmatpush1.msra.mxu0 %v8441_v61  ;;  %v574_v45 = vsub.f32 %v8445_v15, %v14355_v3  ;;  %v14357_v0 = vand.u32 4294901760, %v8458_v9  ;;  %v14358_v54 = vand.u32 4294901760, %v8462_v63  ;;  %v8483_v7 = vsub.f32 %v8347_v34, %v8381_v39 }
  0x61   :  { %15297 = vst [vmem:[#allocation45_spill] sm:$0xff] %v8469_v48  ;;  %558 = vmatprep.subr.mxu1 %v557_v62  ;;  %v569_v37 = vand.u32 4294901760, %v568_v38  ;;  %v14361_v35 = vand.u32 4294901760, %v8469_v48  ;;  %v14364_v62 = vand.u32 4294901760, %v8473_v49  ;;  %v8487_v47 = vand.u32 4294901760, %v101_v14  ;;  %772 = vmatprep.subr.mxu0 %v8134_v19 }
  0x62   :  { %564 = vmatpush1.msra.mxu1 %v563_v21  ;;  %v575_v30 = vand.u32 4294901760, %v574_v45  ;;  %v580_v3 = vsub.f32 %v8458_v9, %v14357_v0  ;;  %v586_v34 = vsub.f32 %v8462_v63, %v14358_v54  ;;  %v14371_v21 = vand.u32 4294901760, %v8483_v7 }
  0x63   :  { %15298 = vst [vmem:[#allocation46_spill] sm:$0xff] %v8487_v47  ;;  %570 = vmatprep.subr.mxu1 %v569_v37  ;;  %v260_v38 = vsub.f32 %v8469_v48, %v14361_v35  ;;  %v592_v19 = vsub.f32 %v8473_v49, %v14364_v62  ;;  %v8504_v45 = vsub.f32 %v101_v14, %v8487_v47  ;;  %v102_v48 = vld [vmem:[#allocation3 + $0x10] sm:$0xff]  ;;  %v103_v62 = vld [vmem:[#allocation3 + $0x18] sm:$0xff] }
  0x64   :  { %v8508_v0 = vsub.f32 %v8358_v55, %v8392_v27  ;;  %576 = vmatpush1.msra.mxu1 %v575_v30  ;;  %v581_v54 = vand.u32 4294901760, %v580_v3  ;;  %v587_v39 = vand.u32 4294901760, %v586_v34  ;;  %v598_v37 = vsub.f32 %v8483_v7, %v14371_v21  ;;  %v104_v27 = vld [vmem:[#allocation3 + $0x20] sm:$0xff] }
  0x65   :  { %15299 = vst [vmem:[#allocation47_spill] sm:$0xff] %v8504_v45  ;;  %v8515_v35 = vsub.f32 %v8383_v52, %v8411_v29  ;;  %v261_v20 = vand.u32 4294901760, %v260_v38  ;;  %v593_v14 = vand.u32 4294901760, %v592_v19  ;;  %v14372_v1 = vand.u32 4294901760, %v8504_v45 }
  0x66   :  { %v14373_v55 = vand.u32 4294901760, %v8508_v0  ;;  %582 = vmatprep.subr.mxu1 %v581_v54  ;;  %v599_v30 = vand.u32 4294901760, %v598_v37  ;;  %v8522_v34 = vsub.f32 %v8394_v57, %v8425_v42  ;;  %v8526_v52 = vsub.f32 %v8417_v40, %v8441_v61  ;;  %v106_v42 = vld [vmem:[#allocation3 + $0x30] sm:$0xff] }
  0x67   :  { %v14380_v3 = vand.u32 4294901760, %v8515_v35  ;;  %262 = vmatmul.mubr.f32.vlgmr.msra.gmra.mxu0 %v261_v20  ;;  %588 = vmatpush1.msra.mxu1 %v587_v39  ;;  %v271_v19 = vsub.f32 %v8504_v45, %v14372_v1  ;;  %v8534_v38 = vand.u32 4294901760, %v102_v48  ;;  %v8536_v37 = vand.u32 4294901760, %v103_v62  ;;  %v105_v1 = vld [vmem:[#allocation3 + $0x28] sm:$0xff] }
  0x68   :  { %15300 = vst [vmem:[#allocation48_spill] sm:$0xff] %v8522_v34  ;;  %15301 = vst [vmem:[#allocation49_spill] sm:$0xff] %v8526_v52  ;;  %v604_v54 = vsub.f32 %v8508_v0, %v14373_v55  ;;  %594 = vmatprep.subr.mxu1 %v593_v14  ;;  %v15304_v57 = vmov 0.0   ;;  %v14383_v39 = vand.u32 4294901760, %v8522_v34  ;;  %v8544_v21 = vand.u32 4294901760, %v104_v27  ;;  %775 = vmatpush1.msra.mxu0 %v8147_v24 }
  0x69   :  { %15302 = vst [vmem:[#allocation50_spill] sm:$0xff] %v8534_v38  ;;  %15303 = vst [vmem:[#allocation51_spill] sm:$0xff] %v8536_v37  ;;  %267 = vmatprep.mubr.f32.mxu0 %v15304_v57  ;;  %v610_v20 = vsub.f32 %v8515_v35, %v14380_v3  ;;  %600 = vmatpush1.msra.mxu1 %v599_v30  ;;  %v272_v55 = vand.u32 4294901760, %v271_v19  ;;  %v8548_v14 = vsub.f32 %v102_v48, %v8534_v38 }
  0x6a   :  { %15305 = vst [vmem:[#allocation52_spill] sm:$0xff] %v8544_v21  ;;  %v605_v61 = vand.u32 4294901760, %v604_v54  ;;  %v8551_v45 = vsub.f32 %v103_v62, %v8536_v37  ;;  %v616_v40 = vsub.f32 %v8522_v34, %v14383_v39  ;;  %v15306_v29 = vand.u32 4294901760, %v8526_v52  ;;  %778 = vmatprep.subr.mxu0 %v8153_v26 }
  0x6b   :  { %v611_v3 = vand.u32 4294901760, %v610_v20  ;;  %v8561_v19 = vsub.f32 %v104_v27, %v8544_v21  ;;  %273 = vmatmul.mubr.f32.gmra.mxu0 %v272_v55  ;;  %v14387_v48 = vand.u32 4294901760, %v8548_v14  ;;  %v8565_v54 = vand.u32 4294901760, %v105_v1 }
  0x6c   :  { %v622_v30 = vsub.f32 %v8526_v52, %v15306_v29  ;;  %606 = vmatprep.subr.mxu1 %v605_v61  ;;  %v14385_v62 = vand.u32 4294901760, %v8551_v45  ;;  %v617_v20 = vand.u32 4294901760, %v616_v40  ;;  %278 = vmatprep.mubr.f32.mxu0 %v15304_v57  ;;  %v8568_v24 = vand.u32 4294901760, %v106_v42 }
  0x6d   :  { %15307 = vst [vmem:[#allocation53_spill] sm:$0xff] %v8565_v54  ;;  %612 = vmatpush1.msra.mxu1 %v611_v3  ;;  %v282_v27 = vsub.f32 %v8548_v14, %v14387_v48  ;;  %781 = vmatpush1.msra.mxu0 %v8167_v32  ;;  %v14386_v29 = vand.u32 4294901760, %v8561_v19  ;;  %v8579_v55 = vsub.f32 %v105_v1, %v8565_v54  ;;  %v107_v3 = vld [vmem:[#allocation3 + $0x38] sm:$0xff] }
  0x6e   :  { %v623_v39 = vand.u32 4294901760, %v622_v30  ;;  %15308 = vst [vmem:[#allocation54_spill] sm:$0xff] %v8568_v24  ;;  %v293_v61 = vsub.f32 %v8551_v45, %v14385_v62  ;;  %618 = vmatprep.subr.mxu1 %v617_v20  ;;  %784 = vmatprep.subr.mxu0 %v8176_v36  ;;  %v8585_v30 = vand.u32 4294901760, %v107_v3 }
  0x6f   :  { %15309 = vst [vmem:[#allocation55_spill] sm:$0xff] %v8579_v55  ;;  %v283_v40 = vand.u32 4294901760, %v282_v27  ;;  %787 = vmatpush1.msra.mxu0 %v8189_v41  ;;  %v304_v1 = vsub.f32 %v8561_v19, %v14386_v29  ;;  %v14390_v20 = vand.u32 4294901760, %v8579_v55  ;;  %v108_v27 = vld [vmem:[#allocation3 + $0x40] sm:$0xff] }
  0x70   :  { %624 = vmatpush1.msra.mxu1 %v623_v39  ;;  %15310 = vst [vmem:[#allocation56_spill] sm:$0xff] %v8585_v30  ;;  %v294_v62 = vand.u32 4294901760, %v293_v61  ;;  %v8593_v39 = vsub.f32 %v106_v42, %v8568_v24  ;;  %790 = vmatprep.subr.mxu0 %v8203_v46  ;;  %v8602_v61 = vsub.f32 %v107_v3, %v8585_v30  ;;  %v8609_v48 = vand.u32 4294901760, %v108_v27 }
  0x71   :  { %659 = vmatmul.mubr.f32.vlgmr.msra.gmra.mxu1 %v8452_v56  ;;  %1028 = vmatprep.subr.mxu1 %v8114_v4  ;;  %v305_v42 = vand.u32 4294901760, %v304_v1  ;;  %v109_v56 = vld [vmem:[#allocation3 + $0x48] sm:$0xff] }
  0x72   :  { %284 = vmatmul.mubr.f32.gmra.mxu0 %v283_v40  ;;  %1030 = vmatpush1.msra.mxu1 %v8116_v5  ;;  %15311 = vst [vmem:[#allocation57_spill] sm:$0xff] %v8593_v39  ;;  %15312 = vst [vmem:[#allocation58_spill] sm:$0xff] %v8602_v61  ;;  %v315_v40 = vsub.f32 %v8579_v55, %v14390_v20  ;;  %v14395_v29 = vand.u32 4294901760, %v8593_v39  ;;  %v14400_v20 = vand.u32 4294901760, %v8602_v61  ;;  %v111_v55 = vld [vmem:[#allocation3 + $0x58] sm:$0xff] }
  0x73   :  { %289 = vmatprep.mubr.f32.mxu0 %v15304_v57  ;;  %664 = vmatprep.mubr.f32.mxu1 %v15304_v57  ;;  %15313 = vst [vmem:[#allocation59_spill] sm:$0xff] %v8609_v48 }
  0x74   :  { %1032 = vmatprep.subr.mxu1 %v8118_v6  ;;  %793 = vmatpush1.msra.mxu0 %v8229_v60  ;;  %v316_v3 = vand.u32 4294901760, %v315_v40  ;;  %v326_v1 = vsub.f32 %v8593_v39, %v14395_v29  ;;  %v337_v40 = vsub.f32 %v8602_v61, %v14400_v20  ;;  %v112_v61 = vld [vmem:[#allocation3 + $0x60] sm:$0xff] }
  0x75   :  { %666 = vmatmul.mubr.f32.gmra.mxu1 %v8487_v47  ;;  %796 = vmatprep.subr.mxu0 %v8241_v2  ;;  %v8625_v47 = vsub.f32 %v108_v27, %v8609_v48 }
  0x76   :  { %295 = vmatmul.mubr.f32.gmra.mxu0 %v294_v62  ;;  %1034 = vmatpush1.msra.mxu1 %v8120_v10  ;;  %v8617_v62 = vand.u32 4294901760, %v109_v56  ;;  %v327_v27 = vand.u32 4294901760, %v326_v1 }
  0x77   :  { %300 = vmatprep.mubr.f32.mxu0 %v15304_v57  ;;  %671 = vmatprep.mubr.f32.mxu1 %v15304_v57  ;;  %15315 = vst [vmem:[#allocation61_spill] sm:$0xff] %v8625_v47  ;;  %v14405_v29 = vand.u32 4294901760, %v8625_v47 }
  0x78   :  { %1036 = vmatprep.subr.mxu1 %v8122_v11  ;;  %799 = vmatpush1.msra.mxu0 %v8252_v13  ;;  %15314 = vst [vmem:[#allocation60_spill] sm:$0xff] %v8617_v62 }
  0x79   :  { %673 = vmatmul.mubr.f32.gmra.mxu1 %v8534_v38  ;;  %v110_v38 = vld [vmem:[#allocation3 + $0x50] sm:$0xff]  ;;  %802 = vmatprep.subr.mxu0 %v8263_v44  ;;  %v348_v1 = vsub.f32 %v8625_v47, %v14405_v29 }
  0x7a   :  { %306 = vmatmul.mubr.f32.gmra.mxu0 %v305_v42  ;;  %1038 = vmatpush1.msra.mxu1 %v8124_v12  ;;  %v8634_v42 = vsub.f32 %v109_v56, %v8617_v62  ;;  %v8641_v39 = vand.u32 4294901760, %v110_v38  ;;  %v8649_v56 = vand.u32 4294901760, %v111_v55 }
  0x7b   :  { %311 = vmatprep.mubr.f32.mxu0 %v15304_v57  ;;  %678 = vmatprep.mubr.f32.mxu1 %v15304_v57 }
  0x7c   :  { %1040 = vmatprep.subr.mxu1 %v8127_v16  ;;  %805 = vmatpush1.msra.mxu0 %v8275_v53  ;;  %15316 = vst [vmem:[#allocation62_spill] sm:$0xff] %v8634_v42  ;;  %15317 = vst [vmem:[#allocation63_spill] sm:$0xff] %v8641_v39  ;;  %v14410_v20 = vand.u32 4294901760, %v8634_v42 }
  0x7d   :  { %680 = vmatmul.mubr.f32.gmra.mxu1 %v8536_v37  ;;  %808 = vmatprep.subr.mxu0 %v8289_v59  ;;  %15318 = vst [vmem:[#allocation64_spill] sm:$0xff] %v8649_v56  ;;  %v8657_v37 = vsub.f32 %v110_v38, %v8641_v39  ;;  %v349_v38 = vand.u32 4294901760, %v348_v1 }
  0x7e   :  { %317 = vmatmul.mubr.f32.gmra.mxu0 %v316_v3  ;;  %1042 = vmatpush1.msra.mxu1 %v8129_v17  ;;  %v338_v3 = vand.u32 4294901760, %v337_v40  ;;  %v359_v40 = vsub.f32 %v8634_v42, %v14410_v20  ;;  %v15324_v20 = vld [vmem:[#allocation19_spill] sm:$0xff] }
  0x7f   :  { %322 = vmatprep.mubr.f32.mxu0 %v15304_v57  ;;  %685 = vmatprep.mubr.f32.mxu1 %v15304_v57  ;;  %15319 = vst [vmem:[#allocation65_spill] sm:$0xff] %v8657_v37  ;;  %v14419_v29 = vand.u32 4294901760, %v8657_v37 }
  0x80   :  { %1044 = vmatprep.subr.mxu1 %v8131_v18  ;;  %811 = vmatpush1.msra.mxu0 %v8301_v43 }
  0x81   :  { %687 = vmatmul.mubr.f32.gmra.mxu1 %v8544_v21  ;;  %814 = vmatprep.subr.mxu0 %v8322_v58  ;;  %v8673_v21 = vsub.f32 %v111_v55, %v8649_v56  ;;  %v360_v55 = vand.u32 4294901760, %v359_v40  ;;  %v370_v42 = vsub.f32 %v8657_v37, %v14419_v29  ;;  %v15329_v40 = vld [vmem:[#allocation21_spill] sm:$0xff] }
  0x82   :  { %328 = vmatmul.mubr.f32.gmra.mxu0 %v327_v27  ;;  %1046 = vmatpush1.msra.mxu1 %v8144_v23  ;;  %v8665_v27 = vand.u32 4294901760, %v112_v61 }
  0x83   :  { %333 = vmatprep.mubr.f32.mxu0 %v15304_v57  ;;  %692 = vmatprep.mubr.f32.mxu1 %v15304_v57  ;;  %15321 = vst [vmem:[#allocation67_spill] sm:$0xff] %v8673_v21  ;;  %v14424_v47 = vand.u32 4294901760, %v8673_v21  ;;  %v371_v29 = vand.u32 4294901760, %v370_v42 }
  0x84   :  { %1048 = vmatprep.subr.mxu1 %v8150_v25  ;;  %817 = vmatpush1.msra.mxu0 %v8335_v8  ;;  %15320 = vst [vmem:[#allocation66_spill] sm:$0xff] %v8665_v27  ;;  %v8682_v1 = vsub.f32 %v112_v61, %v8665_v27  ;;  %v15327_v61 = vld [vmem:[#allocation36_spill] sm:$0xff] }
  0x85   :  { %694 = vmatmul.mubr.f32.gmra.mxu1 %v8565_v54  ;;  %v113_v54 = vld [vmem:[#allocation3 + $0x68] sm:$0xff]  ;;  %820 = vmatprep.subr.mxu0 %v8353_v50  ;;  %v114_v50 = vld [vmem:[#allocation3 + $0x70] sm:$0xff]  ;;  %v381_v37 = vsub.f32 %v8673_v21, %v14424_v47 }
  0x86   :  { %339 = vmatmul.mubr.f32.gmra.mxu0 %v338_v3  ;;  %1050 = vmatpush1.msra.mxu1 %v8164_v31  ;;  %v15322_v3 = vld [vmem:[#allocation34_spill] sm:$0xff]  ;;  %15323 = vst [vmem:[#allocation68_spill] sm:$0xff] %v8682_v1  ;;  %v8689_v8 = vand.u32 4294901760, %v113_v54  ;;  %v15333_v47 = vld [vmem:[#allocation23_spill] sm:$0xff] }
  0x87   :  { %344 = vmatprep.mubr.f32.mxu0 %v15304_v57  ;;  %699 = vmatprep.mubr.f32.mxu1 %v15304_v57 }
  0x88   :  { %1052 = vmatprep.subr.mxu1 %v8170_v33  ;;  %823 = vmatpush1.msra.mxu0 %v15322_v3  ;;  %15325 = vst [vmem:[#allocation19_spill] sm:$0xff] %v8689_v8  ;;  %v14430_v3 = vand.u32 4294901760, %v8682_v1 }
  0x89   :  { %701 = vmatmul.mubr.f32.gmra.mxu1 %v8568_v24  ;;  %v15326_v24 = vld [vmem:[#allocation20_spill] sm:$0xff]  ;;  %826 = vmatprep.subr.mxu0 %v15327_v61  ;;  %v115_v61 = vld [vmem:[#allocation3 + $0x78] sm:$0xff] }
  0x8a   :  { %350 = vmatmul.mubr.f32.gmra.mxu0 %v349_v38  ;;  %1054 = vmatpush1.msra.mxu1 %v15324_v20  ;;  %v8697_v38 = vand.u32 4294901760, %v114_v50  ;;  %v8713_v42 = vand.u32 4294901760, %v115_v61  ;;  %v392_v21 = vsub.f32 %v8682_v1, %v14430_v3 }
  0x8b   :  { %355 = vmatprep.mubr.f32.mxu0 %v15304_v57  ;;  %706 = vmatprep.mubr.f32.mxu1 %v15304_v57 }
  0x8c   :  { %1056 = vmatprep.subr.mxu1 %v15326_v24  ;;  %829 = vmatpush1.msra.mxu0 %v8389_v28  ;;  %15328 = vst [vmem:[#allocation69_spill] sm:$0xff] %v8697_v38  ;;  %v8705_v24 = vsub.f32 %v113_v54, %v8689_v8  ;;  %v382_v54 = vand.u32 4294901760, %v381_v37  ;;  %v15335_v37 = vld [vmem:[#allocation25_spill] sm:$0xff]  ;;  %v8735_v1 = vsub.f32 %v115_v61, %v8713_v42 }
  0x8d   :  { %708 = vmatmul.mubr.f32.gmra.mxu1 %v8585_v30  ;;  %v15331_v30 = vld [vmem:[#allocation22_spill] sm:$0xff] }
  0x8e   :  { %361 = vmatmul.mubr.f32.gmra.mxu0 %v360_v55  ;;  %1058 = vmatpush1.msra.mxu1 %v15329_v40  ;;  %15330 = vst [vmem:[#allocation21_spill] sm:$0xff] %v8705_v24  ;;  %v15332_v55 = vld [vmem:[#allocation40_spill] sm:$0xff]  ;;  %v14435_v28 = vand.u32 4294901760, %v8705_v24 }
  0x8f   :  { %366 = vmatprep.mubr.f32.mxu0 %v15304_v57  ;;  %713 = vmatprep.mubr.f32.mxu1 %v15304_v57  ;;  %15336 = vst [vmem:[#allocation40_spill] sm:$0xff] %v8735_v1 }
  0x90   :  { %1060 = vmatprep.subr.mxu1 %v15331_v30  ;;  %832 = vmatprep.subr.mxu0 %v15332_v55  ;;  %v8721_v30 = vsub.f32 %v114_v50, %v8697_v38  ;;  %v403_v50 = vsub.f32 %v8705_v24, %v14435_v28  ;;  %v14441_v28 = vand.u32 4294901760, %v8735_v1  ;;  %v15339_v24 = vld [vmem:[#allocation28_spill] sm:$0xff] }
  0x91   :  { %715 = vmatmul.mubr.f32.gmra.mxu1 %v8609_v48  ;;  %835 = vmatpush1.msra.mxu0 %v8415_v51  ;;  %v15334_v48 = vld [vmem:[#allocation24_spill] sm:$0xff] }
  0x92   :  { %372 = vmatmul.mubr.f32.gmra.mxu0 %v371_v29  ;;  %1062 = vmatpush1.msra.mxu1 %v15333_v47  ;;  %v393_v29 = vand.u32 4294901760, %v392_v21  ;;  %v14438_v3 = vand.u32 4294901760, %v8721_v30  ;;  %v15338_v21 = vld [vmem:[#allocation27_spill] sm:$0xff] }
  0x93   :  { %377 = vmatprep.mubr.f32.mxu0 %v15304_v57  ;;  %720 = vmatprep.mubr.f32.mxu1 %v15304_v57 }
  0x94   :  { %1064 = vmatprep.subr.mxu1 %v15334_v48  ;;  %838 = vmatprep.subr.mxu0 %v8434_v22  ;;  %v414_v61 = vsub.f32 %v8721_v30, %v14438_v3  ;;  %v425_v3 = vsub.f32 %v8735_v1, %v14441_v28  ;;  %v15343_v28 = vld [vmem:[#allocation35_spill] sm:$0xff]  ;;  %v15348_v1 = vld [vmem:[#allocation45_spill] sm:$0xff] }
  0x95   :  { %722 = vmatmul.mubr.f32.gmra.mxu1 %v8617_v62  ;;  %841 = vmatpush1.msra.mxu0 %v8445_v15  ;;  %v15337_v62 = vld [vmem:[#allocation26_spill] sm:$0xff] }
  0x96   :  { %383 = vmatmul.mubr.f32.gmra.mxu0 %v382_v54  ;;  %1066 = vmatpush1.msra.mxu1 %v15335_v37  ;;  %v404_v54 = vand.u32 4294901760, %v403_v50  ;;  %v415_v50 = vand.u32 4294901760, %v414_v61  ;;  %v426_v61 = vand.u32 4294901760, %v425_v3  ;;  %v15345_v3 = vld [vmem:[#allocation39_spill] sm:$0xff] }
  0x97   :  { %388 = vmatprep.mubr.f32.mxu0 %v15304_v57  ;;  %727 = vmatprep.mubr.f32.mxu1 %v15304_v57 }
  0x98   :  { %1068 = vmatprep.subr.mxu1 %v15337_v62  ;;  %844 = vmatprep.subr.mxu0 %v8458_v9 }
  0x99   :  { %729 = vmatmul.mubr.f32.gmra.mxu1 %v8641_v39  ;;  %847 = vmatpush1.msra.mxu0 %v8462_v63  ;;  %v15341_v39 = vld [vmem:[#allocation31_spill] sm:$0xff] }
  0x9a   :  { %394 = vmatmul.mubr.f32.gmra.mxu0 %v393_v29  ;;  %1070 = vmatpush1.msra.mxu1 %v15338_v21  ;;  %v15340_v29 = vld [vmem:[#allocation29_spill] sm:$0xff] }
  0x9b   :  { %399 = vmatprep.mubr.f32.mxu0 %v15304_v57  ;;  %734 = vmatprep.mubr.f32.mxu1 %v15304_v57 }
  0x9c   :  { %1072 = vmatprep.subr.mxu1 %v15339_v24  ;;  %850 = vmatprep.subr.mxu0 %v8473_v49 }
  0x9d   :  { %736 = vmatmul.mubr.f32.gmra.mxu1 %v8649_v56  ;;  %853 = vmatpush1.msra.mxu0 %v8483_v7 }
  0x9e   :  { %405 = vmatmul.mubr.f32.gmra.mxu0 %v404_v54  ;;  %1074 = vmatpush1.msra.mxu1 %v15340_v29  ;;  %v15342_v54 = vld [vmem:[#allocation33_spill] sm:$0xff] }
  0x9f   :  { %410 = vmatprep.mubr.f32.mxu0 %v15304_v57  ;;  %741 = vmatprep.mubr.f32.mxu1 %v15304_v57 }
  0xa0   :  { %1076 = vmatprep.subr.mxu1 %v15341_v39  ;;  %856 = vmatprep.subr.mxu0 %v8508_v0 }
  0xa1   :  { %743 = vmatmul.mubr.f32.gmra.mxu1 %v8665_v27  ;;  %859 = vmatpush1.msra.mxu0 %v8515_v35  ;;  %v15344_v27 = vld [vmem:[#allocation37_spill] sm:$0xff] }
  0xa2   :  { %416 = vmatmul.mubr.f32.gmra.mxu0 %v415_v50  ;;  %1078 = vmatpush1.msra.mxu1 %v15342_v54  ;;  %v15346_v50 = vld [vmem:[#allocation17_spill] sm:$0xff] }
  0xa3   :  { %421 = vmatprep.mubr.f32.mxu0 %v15304_v57  ;;  %748 = vmatprep.mubr.f32.mxu1 %v15304_v57  ;;  %v15347_v56 = vand.u32 4294901760, %v15346_v50  ;;  %v15353_v50 = vand.u32 4294901760, %v8153_v26 }
  0xa4   :  { %1080 = vmatprep.subr.mxu1 %v15343_v28  ;;  %862 = vmatprep.subr.mxu0 %v8522_v34  ;;  %v15349_v34 = vld [vmem:[#allocation41_spill] sm:$0xff] }
  0xa5   :  { %750 = vmatmul.mubr.f32.gmra.mxu1 %v8689_v8  ;;  %865 = vmatpush1.msra.mxu0 %v8526_v52  ;;  %v15351_v8 = vld [vmem:[#allocation18_spill] sm:$0xff] }
  0xa6   :  { %427 = vmatmul.mubr.f32.gmra.mxu0 %v426_v61  ;;  %1082 = vmatpush1.msra.mxu1 %v15344_v27  ;;  %v15350_v61 = vld [vmem:[#allocation42_spill] sm:$0xff]  ;;  %v15352_v52 = vand.u32 4294901760, %v15351_v8  ;;  %v15357_v8 = vand.u32 4294901760, %v15348_v1 }
  0xa7   :  { %755 = vmatprep.mubr.f32.mxu1 %v15304_v57  ;;  %898 = vmatprep.mubr.f32.mxu0 %v15304_v57 }
  0xa8   :  { %1084 = vmatprep.subr.mxu1 %v15345_v3  ;;  %1271 = vmatprep.subr.mxu0 %v15347_v56  ;;  %v15354_v56 = vld [vmem:[#allocation47_spill] sm:$0xff] }
  0xa9   :  { %757 = vmatmul.mubr.f32.gmra.mxu1 %v8697_v38  ;;  %v15355_v38 = vld [vmem:[#allocation43_spill] sm:$0xff]  ;;  %v15360_v26 = vand.u32 4294901760, %v15354_v56 }
  0xaa   :  { %901 = vmatmul.mubr.f32.vlgmr.msra.gmra.mxu0 %v15348_v1  ;;  %1086 = vmatpush1.msra.mxu1 %v15349_v34 }
  0xab   :  { %762 = vmatprep.mubr.f32.mxu1 %v15304_v57  ;;  %906 = vmatprep.mubr.f32.mxu0 %v15304_v57 }
  0xac   :  { %1088 = vmatprep.subr.mxu1 %v15350_v61  ;;  %1275 = vmatpush1.msra.mxu0 %v15352_v52  ;;  %v15356_v61 = vand.u32 4294901760, %v8167_v32  ;;  %v15358_v52 = vand.u32 4294901760, %v8176_v36  ;;  %v15361_v32 = vand.u32 4294901760, %v8203_v46  ;;  %v15364_v36 = vand.u32 4294901760, %v8241_v2  ;;  %v15368_v46 = vld [vmem:[#allocation55_spill] sm:$0xff]  ;;  %v15372_v2 = vld [vmem:[#allocation57_spill] sm:$0xff] }
  0xad   :  { %764 = vmatmul.mubr.f32.gmra.mxu1 %v8713_v42  ;;  %1279 = vmatprep.subr.mxu0 %v15353_v50  ;;  %v15391_v50 = vld [vmem:[#allocation38_spill] sm:$0xff] }
  0xae   :  { %909 = vmatmul.mubr.f32.gmra.mxu0 %v15354_v56  ;;  %1090 = vmatpush1.msra.mxu1 %v15355_v38  ;;  %v15392_v56 = vand.u32 4294901760, %v15391_v50 }
  0xaf   :  { %914 = vmatprep.mubr.f32.mxu0 %v15304_v57  ;;  %1123 = vmatprep.mubr.f32.mxu1 %v15304_v57 }
  0xb0   :  { %1542 = vmatprep.subr.mxu1 %v8114_v4  ;;  %1283 = vmatpush1.msra.mxu0 %v15356_v61  ;;  %v15359_v4 = vand.u32 4294901760, %v8189_v41  ;;  %v15367_v41 = vand.u32 4294901760, %v8263_v44  ;;  %v15376_v44 = vld [vmem:[#allocation58_spill] sm:$0xff] }
  0xb1   :  { %1127 = vmatmul.mubr.f32.vlgmr.msra.gmra.mxu1 %v15357_v8  ;;  %1287 = vmatprep.subr.mxu0 %v15358_v52  ;;  %v15389_v61 = vld [vmem:[#allocation62_spill] sm:$0xff]  ;;  %v15394_v52 = vand.u32 4294901760, %v15332_v55  ;;  %v15399_v55 = vld [vmem:[#allocation67_spill] sm:$0xff] }
  0xb2   :  { %917 = vmatmul.mubr.f32.gmra.mxu0 %v8548_v14  ;;  %1544 = vmatpush1.msra.mxu1 %v8116_v5  ;;  %v15362_v5 = vand.u32 4294901760, %v8229_v60  ;;  %v15371_v60 = vand.u32 4294901760, %v8289_v59 }
  0xb3   :  { %922 = vmatprep.mubr.f32.mxu0 %v15304_v57  ;;  %1132 = vmatprep.mubr.f32.mxu1 %v15304_v57 }
  0xb4   :  { %1546 = vmatprep.subr.mxu1 %v8118_v6  ;;  %1291 = vmatpush1.msra.mxu0 %v15359_v4  ;;  %v15363_v6 = vand.u32 4294901760, %v8548_v14  ;;  %v15386_v14 = vand.u32 4294901760, %v15376_v44  ;;  %v15395_v4 = vld [vmem:[#allocation65_spill] sm:$0xff] }
  0xb5   :  { %1136 = vmatmul.mubr.f32.gmra.mxu1 %v15360_v26  ;;  %1295 = vmatprep.subr.mxu0 %v15361_v32  ;;  %v15397_v26 = vand.u32 4294901760, %v15389_v61  ;;  %v15398_v32 = vand.u32 4294901760, %v8434_v22  ;;  %v15403_v22 = vld [vmem:[#allocation68_spill] sm:$0xff] }
  0xb6   :  { %925 = vmatmul.mubr.f32.gmra.mxu0 %v8551_v45  ;;  %1548 = vmatpush1.msra.mxu1 %v8120_v10  ;;  %v15365_v10 = vand.u32 4294901760, %v8252_v13  ;;  %v15375_v13 = vand.u32 4294901760, %v8322_v58  ;;  %v15382_v58 = vld [vmem:[#allocation61_spill] sm:$0xff] }
  0xb7   :  { %930 = vmatprep.mubr.f32.mxu0 %v15304_v57  ;;  %1141 = vmatprep.mubr.f32.mxu1 %v15304_v57  ;;  %v15393_v8 = vand.u32 4294901760, %v15382_v58 }
  0xb8   :  { %1550 = vmatprep.subr.mxu1 %v8122_v11  ;;  %1299 = vmatpush1.msra.mxu0 %v15362_v5  ;;  %v15366_v11 = vand.u32 4294901760, %v8551_v45 }
  0xb9   :  { %1145 = vmatmul.mubr.f32.gmra.mxu1 %v15363_v6  ;;  %1303 = vmatprep.subr.mxu0 %v15364_v36  ;;  %v15422_v36 = vld [vmem:[#allocation46_spill] sm:$0xff] }
  0xba   :  { %933 = vmatmul.mubr.f32.gmra.mxu0 %v8561_v19  ;;  %1552 = vmatpush1.msra.mxu1 %v8124_v12  ;;  %v15369_v12 = vand.u32 4294901760, %v8275_v53  ;;  %v15380_v53 = vld [vmem:[#allocation32_spill] sm:$0xff] }
  0xbb   :  { %938 = vmatprep.mubr.f32.mxu0 %v15304_v57  ;;  %1150 = vmatprep.mubr.f32.mxu1 %v15304_v57  ;;  %v15381_v59 = vand.u32 4294901760, %v15380_v53 }
  0xbc   :  { %1554 = vmatprep.subr.mxu1 %v8127_v16  ;;  %1307 = vmatpush1.msra.mxu0 %v15365_v10  ;;  %v15370_v16 = vand.u32 4294901760, %v8561_v19  ;;  %v15387_v19 = vld [vmem:[#allocation36_spill] sm:$0xff]  ;;  %v15427_v10 = vld [vmem:[#allocation54_spill] sm:$0xff] }
  0xbd   :  { %1154 = vmatmul.mubr.f32.gmra.mxu1 %v15366_v11  ;;  %1311 = vmatprep.subr.mxu0 %v15367_v41  ;;  %v15388_v1 = vand.u32 4294901760, %v15387_v19  ;;  %v1941_v11 = vld [vmem:[#allocation8 + $0xf8] sm:$0xff]  ;;  %v15439_v19 = vld [vmem:[#allocation59_spill] sm:$0xff] }
  0xbe   :  { %941 = vmatmul.mubr.f32.gmra.mxu0 %v15368_v46  ;;  %1556 = vmatpush1.msra.mxu1 %v8129_v17  ;;  %v15373_v17 = vand.u32 4294901760, %v8301_v43  ;;  %v15379_v43 = vand.u32 4294901760, %v15372_v2  ;;  %v8982_v41 = vand.u32 4294901760, %v1941_v11 }
  0xbf   :  { %946 = vmatprep.mubr.f32.mxu0 %v15304_v57  ;;  %1159 = vmatprep.mubr.f32.mxu1 %v15304_v57 }
  0xc0   :  { %1558 = vmatprep.subr.mxu1 %v8131_v18  ;;  %1315 = vmatpush1.msra.mxu0 %v15369_v12  ;;  %v15374_v18 = vand.u32 4294901760, %v15368_v46  ;;  %15428 = vst [vmem:[#allocation23_spill] sm:$0xff] %v8982_v41  ;;  %v1940_v46 = vld [vmem:[#allocation8 + $0xf0] sm:$0xff] }
  0xc1   :  { %1163 = vmatmul.mubr.f32.gmra.mxu1 %v15370_v16  ;;  %1319 = vmatprep.subr.mxu0 %v15371_v60  ;;  %v8985_v12 = vand.u32 4294901760, %v1940_v46  ;;  %v1939_v16 = vld [vmem:[#allocation8 + $0xe8] sm:$0xff]  ;;  %v15430_v60 = vld [vmem:[#allocation56_spill] sm:$0xff] }
  0xc2   :  { %949 = vmatmul.mubr.f32.gmra.mxu0 %v15372_v2  ;;  %1560 = vmatpush1.msra.mxu1 %v8144_v23  ;;  %v15377_v23 = vld [vmem:[#allocation30_spill] sm:$0xff]  ;;  %v8990_v2 = vsub.f32 %v1941_v11, %v8982_v41  ;;  %v1927_v11 = vld [vmem:[#allocation8 + $0x88] sm:$0xff] }
  0xc3   :  { %954 = vmatprep.mubr.f32.mxu0 %v15304_v57  ;;  %1168 = vmatprep.mubr.f32.mxu1 %v15304_v57  ;;  %15429 = vst [vmem:[#allocation24_spill] sm:$0xff] %v8985_v12 }
  0xc4   :  { %1562 = vmatprep.subr.mxu1 %v8150_v25  ;;  %1323 = vmatpush1.msra.mxu0 %v15373_v17  ;;  %v15378_v25 = vand.u32 4294901760, %v15377_v23  ;;  %15431 = vst [vmem:[#allocation25_spill] sm:$0xff] %v8990_v2  ;;  %v8992_v17 = vand.u32 4294901760, %v1939_v16  ;;  %v1937_v23 = vld [vmem:[#allocation8 + $0xd8] sm:$0xff] }
  0xc5   :  { %1172 = vmatmul.mubr.f32.gmra.mxu1 %v15374_v18  ;;  %1327 = vmatprep.subr.mxu0 %v15375_v13  ;;  %v1938_v18 = vld [vmem:[#allocation8 + $0xe0] sm:$0xff]  ;;  %v8996_v13 = vsub.f32 %v1940_v46, %v8985_v12  ;;  %v9005_v53 = vand.u32 4294901760, %v1937_v23  ;;  %v15453_v46 = vld [vmem:[#allocation63_spill] sm:$0xff] }
  0xc6   :  { %957 = vmatmul.mubr.f32.gmra.mxu0 %v15376_v44  ;;  %1564 = vmatpush1.msra.mxu1 %v8164_v31  ;;  %v15383_v31 = vld [vmem:[#allocation20_spill] sm:$0xff]  ;;  %15432 = vst [vmem:[#allocation26_spill] sm:$0xff] %v8992_v17  ;;  %v8998_v44 = vand.u32 4294901760, %v1938_v18 }
  0xc7   :  { %962 = vmatprep.mubr.f32.mxu0 %v15304_v57  ;;  %1177 = vmatprep.mubr.f32.mxu1 %v15304_v57  ;;  %15433 = vst [vmem:[#allocation27_spill] sm:$0xff] %v8996_v13  ;;  %15436 = vst [vmem:[#allocation31_spill] sm:$0xff] %v9005_v53 }
  0xc8   :  { %1566 = vmatprep.subr.mxu1 %v8170_v33  ;;  %1331 = vmatpush1.msra.mxu0 %v15378_v25  ;;  %v15384_v33 = vld [vmem:[#allocation34_spill] sm:$0xff]  ;;  %15434 = vst [vmem:[#allocation28_spill] sm:$0xff] %v8998_v44  ;;  %v14468_v25 = vand.u32 4294901760, %v8990_v2 }
  0xc9   :  { %1181 = vmatmul.mubr.f32.gmra.mxu1 %v15379_v43  ;;  %1335 = vmatprep.subr.mxu0 %v15381_v59  ;;  %v15385_v45 = vand.u32 4294901760, %v15384_v33  ;;  %v9003_v43 = vsub.f32 %v1939_v16, %v8992_v17  ;;  %v1936_v59 = vld [vmem:[#allocation8 + $0xd0] sm:$0xff]  ;;  %v9011_v33 = vsub.f32 %v1938_v18, %v8998_v44 }
  0xca   :  { %965 = vmatmul.mubr.f32.gmra.mxu0 %v15382_v58  ;;  %1568 = vmatpush1.msra.mxu1 %v15324_v20  ;;  %v15390_v20 = vld [vmem:[#allocation22_spill] sm:$0xff]  ;;  %v150_v58 = vlaneseq }
  0xcb   :  { %970 = vmatprep.mubr.f32.mxu0 %v15304_v57  ;;  %1186 = vmatprep.mubr.f32.mxu1 %v15304_v57  ;;  %15435 = vst [vmem:[#allocation29_spill] sm:$0xff] %v9003_v43  ;;  %15437 = vst [vmem:[#allocation33_spill] sm:$0xff] %v9011_v33 }
  0xcc   :  { %1570 = vmatprep.subr.mxu1 %v15383_v31  ;;  %1339 = vmatpush1.msra.mxu0 %v15385_v45  ;;  %v14467_v31 = vand.u32 4294901760, %v8996_v13  ;;  %v9013_v45 = vand.u32 4294901760, %v1936_v59 }
  0xcd   :  { %1190 = vmatmul.mubr.f32.gmra.mxu1 %v15386_v14  ;;  %1343 = vmatprep.subr.mxu0 %v15388_v1  ;;  %v1935_v14 = vld [vmem:[#allocation8 + $0xc8] sm:$0xff]  ;;  %v2374_v1 = vsub.f32 %v8990_v2, %v14468_v25 }
  0xce   :  { %973 = vmatmul.mubr.f32.gmra.mxu0 %v15389_v61  ;;  %1572 = vmatpush1.msra.mxu1 %v15329_v40  ;;  %v15396_v40 = vand.u32 4294901760, %v8415_v51  ;;  %v15401_v51 = vand.u32 4294901760, %v15395_v4  ;;  %15438 = vst [vmem:[#allocation35_spill] sm:$0xff] %v9013_v45  ;;  %v14464_v61 = vand.u32 4294901760, %v9003_v43  ;;  %v9025_v50 = vand.u32 4294901760, %v1935_v14 }
  0xcf   :  { %978 = vmatprep.mubr.f32.mxu0 %v15304_v57  ;;  %1195 = vmatprep.mubr.f32.mxu1 %v15304_v57 }
  0xd0   :  { %1574 = vmatprep.subr.mxu1 %v15390_v20  ;;  %1347 = vmatpush1.msra.mxu0 %v15392_v56  ;;  %v9023_v20 = vsub.f32 %v1937_v23, %v9005_v53  ;;  %15441 = vst [vmem:[#allocation39_spill] sm:$0xff] %v9025_v50  ;;  %v1934_v56 = vld [vmem:[#allocation8 + $0xc0] sm:$0xff] }
  0xd1   :  { %1199 = vmatmul.mubr.f32.gmra.mxu1 %v15393_v8  ;;  %1351 = vmatprep.subr.mxu0 %v15394_v52  ;;  %v2380_v8 = vsub.f32 %v8996_v13, %v14467_v31  ;;  %v14462_v52 = vand.u32 4294901760, %v9011_v33 }
  0xd2   :  { %981 = vmatmul.mubr.f32.gmra.mxu0 %v15395_v4  ;;  %1576 = vmatpush1.msra.mxu1 %v15333_v47  ;;  %v15400_v47 = vand.u32 4294901760, %v8445_v15  ;;  %v15405_v15 = vand.u32 4294901760, %v15399_v55  ;;  %15440 = vst [vmem:[#allocation37_spill] sm:$0xff] %v9023_v20  ;;  %v9033_v4 = vsub.f32 %v1936_v59, %v9013_v45  ;;  %v1926_v59 = vld [vmem:[#allocation8 + $0x80] sm:$0xff] }
  0xd3   :  { %986 = vmatprep.mubr.f32.mxu0 %v15304_v57  ;;  %1204 = vmatprep.mubr.f32.mxu1 %v15304_v57 }
  0xd4   :  { %1578 = vmatprep.subr.mxu1 %v15334_v48  ;;  %1355 = vmatpush1.msra.mxu0 %v15396_v40  ;;  %v15402_v48 = vand.u32 4294901760, %v8458_v9  ;;  %v15407_v9 = vld [vmem:[#allocation21_spill] sm:$0xff]  ;;  %15442 = vst [vmem:[#allocation17_spill] sm:$0xff] %v9033_v4  ;;  %v9035_v40 = vand.u32 4294901760, %v1934_v56 }
  0xd5   :  { %1208 = vmatmul.mubr.f32.gmra.mxu1 %v15397_v26  ;;  %1359 = vmatprep.subr.mxu0 %v15398_v32  ;;  %v1933_v26 = vld [vmem:[#allocation8 + $0xb8] sm:$0xff]  ;;  %v2375_v32 = vand.u32 4294901760, %v2374_v1 }
  0xd6   :  { %989 = vmatmul.mubr.f32.gmra.mxu0 %v15399_v55  ;;  %1580 = vmatpush1.msra.mxu1 %v15335_v37  ;;  %v15406_v37 = vand.u32 4294901760, %v8473_v49  ;;  %v15411_v49 = vand.u32 4294901760, %v8515_v35  ;;  %v15419_v35 = vld [vmem:[#allocation44_spill] sm:$0xff]  ;;  %15443 = vst [vmem:[#allocation45_spill] sm:$0xff] %v9035_v40  ;;  %v2386_v55 = vsub.f32 %v9003_v43, %v14464_v61 }
  0xd7   :  { %994 = vmatprep.mubr.f32.mxu0 %v15304_v57  ;;  %1213 = vmatprep.mubr.f32.mxu1 %v15304_v57 }
  0xd8   :  { %1582 = vmatprep.subr.mxu1 %v15337_v62  ;;  %1363 = vmatpush1.msra.mxu0 %v15400_v47  ;;  %v15404_v62 = vand.u32 4294901760, %v8462_v63  ;;  %v15409_v63 = vand.u32 4294901760, %v15403_v22  ;;  %v14461_v47 = vand.u32 4294901760, %v9023_v20 }
  0xd9   :  { %1217 = vmatmul.mubr.f32.gmra.mxu1 %v15401_v51  ;;  %1367 = vmatprep.subr.mxu0 %v15402_v48  ;;  %v9043_v51 = vsub.f32 %v1935_v14, %v9025_v50  ;;  %v1932_v48 = vld [vmem:[#allocation8 + $0xb0] sm:$0xff] }
  0xda   :  { %997 = vmatmul.mubr.f32.gmra.mxu0 %v15403_v22  ;;  %1584 = vmatpush1.msra.mxu1 %v15338_v21  ;;  %v15410_v21 = vand.u32 4294901760, %v8508_v0  ;;  %v15415_v0 = vld [vmem:[#allocation40_spill] sm:$0xff]  ;;  %v2381_v22 = vand.u32 4294901760, %v2380_v8 }
  0xdb   :  { %1002 = vmatprep.mubr.f32.mxu0 %v15304_v57  ;;  %1222 = vmatprep.mubr.f32.mxu1 %v15304_v57  ;;  %v15421_v6 = vand.u32 4294901760, %v15415_v0  ;;  %15444 = vst [vmem:[#allocation41_spill] sm:$0xff] %v9043_v51 }
  0xdc   :  { %1586 = vmatprep.subr.mxu1 %v15339_v24  ;;  %1371 = vmatpush1.msra.mxu0 %v15404_v62  ;;  %v15408_v24 = vand.u32 4294901760, %v8483_v7  ;;  %v15412_v7 = vand.u32 4294901760, %v15407_v9  ;;  %v2392_v62 = vsub.f32 %v9011_v33, %v14462_v52 }
  0xdd   :  { %1226 = vmatmul.mubr.f32.gmra.mxu1 %v15405_v15  ;;  %1375 = vmatprep.subr.mxu0 %v15406_v37  ;;  %v14460_v15 = vand.u32 4294901760, %v9033_v4  ;;  %v9052_v37 = vsub.f32 %v1934_v56, %v9035_v40 }
  0xde   :  { %1005 = vmatmul.mubr.f32.gmra.mxu0 %v15407_v9  ;;  %1588 = vmatpush1.msra.mxu1 %v15340_v29  ;;  %v1931_v9 = vld [vmem:[#allocation8 + $0xa8] sm:$0xff] }
  0xdf   :  { %1010 = vmatprep.mubr.f32.mxu0 %v15304_v57  ;;  %1231 = vmatprep.mubr.f32.mxu1 %v15304_v57  ;;  %15445 = vst [vmem:[#allocation18_spill] sm:$0xff] %v9052_v37 }
  0xe0   :  { %1590 = vmatprep.subr.mxu1 %v15341_v39  ;;  %1379 = vmatpush1.msra.mxu0 %v15408_v24  ;;  %v15413_v39 = vld [vmem:[#allocation48_spill] sm:$0xff] }
  0xe1   :  { %1235 = vmatmul.mubr.f32.gmra.mxu1 %v15409_v63  ;;  %1383 = vmatprep.subr.mxu0 %v15410_v21  ;;  %v15414_v29 = vand.u32 4294901760, %v15413_v39  ;;  %v15446_v24 = vld [vmem:[#allocation60_spill] sm:$0xff]  ;;  %v2387_v63 = vand.u32 4294901760, %v2386_v55  ;;  %v2398_v21 = vsub.f32 %v9023_v20, %v14461_v47  ;;  %v1930_v39 = vld [vmem:[#allocation8 + $0xa0] sm:$0xff] }
  0xe2   :  { %1013 = vmatmul.mubr.f32.gmra.mxu0 %v8721_v30  ;;  %1592 = vmatpush1.msra.mxu1 %v15342_v54  ;;  %v15416_v54 = vld [vmem:[#allocation49_spill] sm:$0xff]  ;;  %v1954_v20 = vld [vmem:[#allocation8 + $0x160] sm:$0xff] }
  0xe3   :  { %1018 = vmatprep.mubr.f32.mxu0 %v15304_v57  ;;  %1240 = vmatprep.mubr.f32.mxu1 %v15304_v57  ;;  %v15417_v5 = vand.u32 4294901760, %v15416_v54  ;;  %v14458_v54 = vand.u32 4294901760, %v9052_v37 }
  0xe4   :  { %1594 = vmatprep.subr.mxu1 %v15343_v28  ;;  %1387 = vmatpush1.msra.mxu0 %v15411_v49  ;;  %v15418_v28 = vand.u32 4294901760, %v8721_v30  ;;  %v15424_v30 = vld [vmem:[#allocation51_spill] sm:$0xff]  ;;  %v14459_v49 = vand.u32 4294901760, %v9043_v51 }
  0xe5   :  { %1244 = vmatmul.mubr.f32.gmra.mxu1 %v15412_v7  ;;  %1391 = vmatprep.subr.mxu0 %v15414_v29  ;;  %v9061_v7 = vand.u32 4294901760, %v1933_v26  ;;  %v2393_v29 = vand.u32 4294901760, %v2392_v62  ;;  %v2416_v16 = vsub.f32 %v9052_v37, %v14458_v54  ;;  %v9125_v62 = vand.u32 4294901760, %v1926_v59 }
  0xe6   :  { %1021 = vmatmul.mubr.f32.gmra.mxu0 %v15415_v0  ;;  %1596 = vmatpush1.msra.mxu1 %v15344_v27  ;;  %v15420_v27 = vld [vmem:[#allocation42_spill] sm:$0xff]  ;;  %v2404_v0 = vsub.f32 %v9033_v4, %v14460_v15  ;;  %v1920_v15 = vld [vmem:[#allocation8 + $0x50] sm:$0xff] }
  0xe7   :  { %1249 = vmatprep.mubr.f32.mxu1 %v15304_v57  ;;  %1395 = vmatpush1.msra.mxu0 %v15417_v5  ;;  %15447 = vst [vmem:[#allocation47_spill] sm:$0xff] %v9061_v7  ;;  %v9068_v5 = vand.u32 4294901760, %v1932_v48  ;;  %15461 = vst [vmem:[#allocation38_spill] sm:$0xff] %v9125_v62  ;;  %v9213_v25 = vand.u32 4294901760, %v1920_v15 }
  0xe8   :  { %1428 = vmatprep.mubr.f32.mxu0 %v15304_v57  ;;  %1598 = vmatprep.subr.mxu1 %v15345_v3  ;;  %v15426_v3 = vld [vmem:[#allocation53_spill] sm:$0xff] }
  0xe9   :  { %1253 = vmatmul.mubr.f32.gmra.mxu1 %v15418_v28  ;;  %1987 = vmatprep.subr.mxu0 %v8982_v41  ;;  %15448 = vst [vmem:[#allocation43_spill] sm:$0xff] %v9068_v5  ;;  %v1929_v28 = vld [vmem:[#allocation8 + $0x98] sm:$0xff] }
  0xea   :  { %1430 = vmatmul.mubr.f32.vlgmr.msra.gmra.mxu0 %v15419_v35  ;;  %1600 = vmatpush1.msra.mxu1 %v15349_v34  ;;  %v15423_v34 = vld [vmem:[#allocation50_spill] sm:$0xff]  ;;  %v9096_v23 = vand.u32 4294901760, %v1929_v28 }
  0xeb   :  { %1258 = vmatprep.mubr.f32.mxu1 %v15304_v57  ;;  %1435 = vmatprep.mubr.f32.mxu0 %v15304_v57 }
  0xec   :  { %1602 = vmatprep.subr.mxu1 %v15420_v27  ;;  %1989 = vmatpush1.msra.mxu0 %v8985_v12  ;;  %v2410_v27 = vsub.f32 %v9043_v51, %v14459_v49  ;;  %15455 = vst [vmem:[#allocation61_spill] sm:$0xff] %v9096_v23 }
  0xed   :  { %1262 = vmatmul.mubr.f32.gmra.mxu1 %v15421_v6  ;;  %1991 = vmatprep.subr.mxu0 %v8992_v17  ;;  %v9074_v6 = vsub.f32 %v1933_v26, %v9061_v7  ;;  %v9110_v26 = vsub.f32 %v1929_v28, %v9096_v23 }
  0xee   :  { %1437 = vmatmul.mubr.f32.gmra.mxu0 %v15422_v36  ;;  %1604 = vmatpush1.msra.mxu1 %v15355_v38  ;;  %v15425_v38 = vld [vmem:[#allocation52_spill] sm:$0xff] }
  0xef   :  { %1442 = vmatprep.mubr.f32.mxu0 %v15304_v57  ;;  %1637 = vmatprep.mubr.f32.mxu1 %v15304_v57  ;;  %15449 = vst [vmem:[#allocation55_spill] sm:$0xff] %v9074_v6  ;;  %15458 = vst [vmem:[#allocation36_spill] sm:$0xff] %v9110_v26 }
  0xf0   :  { %1993 = vmatpush1.msra.mxu0 %v8998_v44  ;;  %2376 = vmatprep.subr.mxu1 %v2375_v32  ;;  %v9112_v32 = vand.u32 4294901760, %v1927_v11  ;;  %15476 = vst [vmem:[#allocation52_spill] sm:$0xff] %v9213_v25 }
  0xf1   :  { %1639 = vmatmul.mubr.f32.vlgmr.msra.gmra.mxu1 %v15419_v35  ;;  %1995 = vmatprep.subr.mxu0 %v9005_v53  ;;  %v2399_v35 = vand.u32 4294901760, %v2398_v21  ;;  %v14463_v21 = vand.u32 4294901760, %v9110_v26 }
  0xf2   :  { %1444 = vmatmul.mubr.f32.gmra.mxu0 %v15423_v34  ;;  %1644 = vmatprep.mubr.f32.mxu1 %v15304_v57  ;;  %15459 = vst [vmem:[#allocation62_spill] sm:$0xff] %v9112_v32 }
  0xf3   :  { %1449 = vmatprep.mubr.f32.mxu0 %v15304_v57  ;;  %1997 = vmatpush1.msra.mxu0 %v9013_v45 }
  0xf4   :  { %2382 = vmatpush1.msra.mxu1 %v2381_v22  ;;  %1999 = vmatprep.subr.mxu0 %v9025_v50  ;;  %v1942_v50 = vld [vmem:[#allocation8 + $0x100] sm:$0xff] }
  0xf5   :  { %1646 = vmatmul.mubr.f32.gmra.mxu1 %v15422_v36  ;;  %v9076_v36 = vand.u32 4294901760, %v1931_v9  ;;  %2388 = vmatprep.subr.mxu1 %v2387_v63  ;;  %v15462_v63 = vld [vmem:[#allocation64_spill] sm:$0xff] }
  0xf6   :  { %1451 = vmatmul.mubr.f32.gmra.mxu0 %v15424_v30  ;;  %1651 = vmatprep.mubr.f32.mxu1 %v15304_v57 }
  0xf7   :  { %1456 = vmatprep.mubr.f32.mxu0 %v15304_v57  ;;  %15450 = vst [vmem:[#allocation57_spill] sm:$0xff] %v9076_v36  ;;  %v9094_v18 = vsub.f32 %v1931_v9, %v9076_v36  ;;  %2394 = vmatpush1.msra.mxu1 %v2393_v29  ;;  %v1925_v9 = vld [vmem:[#allocation8 + $0x78] sm:$0xff]  ;;  %v1924_v29 = vld [vmem:[#allocation8 + $0x70] sm:$0xff] }
  0xf8   :  { %2400 = vmatprep.subr.mxu1 %v2399_v35  ;;  %2001 = vmatpush1.msra.mxu0 %v9035_v40 }
  0xf9   :  { %1653 = vmatmul.mubr.f32.gmra.mxu1 %v15423_v34  ;;  %v1928_v34 = vld [vmem:[#allocation8 + $0x90] sm:$0xff]  ;;  %15454 = vst [vmem:[#allocation32_spill] sm:$0xff] %v9094_v18  ;;  %v14454_v8 = vand.u32 4294901760, %v9094_v18  ;;  %2003 = vmatprep.subr.mxu0 %v9061_v7 }
  0xfa   :  { %1458 = vmatmul.mubr.f32.gmra.mxu0 %v15425_v38  ;;  %1658 = vmatprep.mubr.f32.mxu1 %v15304_v57  ;;  %v9103_v1 = vand.u32 4294901760, %v1928_v34 }
  0xfb   :  { %1463 = vmatprep.mubr.f32.mxu0 %v15304_v57  ;;  %2005 = vmatpush1.msra.mxu0 %v9068_v5 }
  0xfc   :  { %15457 = vst [vmem:[#allocation34_spill] sm:$0xff] %v9103_v1  ;;  %v9123_v22 = vsub.f32 %v1928_v34, %v9103_v1  ;;  %v1923_v34 = vld [vmem:[#allocation8 + $0x68] sm:$0xff]  ;;  %2007 = vmatprep.subr.mxu0 %v9076_v36  ;;  %v1946_v36 = vld [vmem:[#allocation8 + $0x120] sm:$0xff] }
  0xfd   :  { %1660 = vmatmul.mubr.f32.gmra.mxu1 %v15424_v30  ;;  %v9080_v30 = vshrl.u32 %v150_v58, 7  ;;  %v2411_v58 = vand.u32 4294901760, %v2410_v27  ;;  %v9147_v27 = vsub.f32 %v1926_v59, %v9125_v62  ;;  %v9173_v49 = vand.u32 4294901760, %v1923_v34 }
  0xfe   :  { %1465 = vmatmul.mubr.f32.gmra.mxu0 %v15426_v3  ;;  %1665 = vmatprep.mubr.f32.mxu1 %v15304_v57  ;;  %15460 = vst [vmem:[#allocation22_spill] sm:$0xff] %v9123_v22  ;;  %v14465_v35 = vand.u32 4294901760, %v9123_v22 }
  0xff   :  { %1470 = vmatprep.mubr.f32.mxu0 %v15304_v57  ;;  %15464 = vst [vmem:[#allocation67_spill] sm:$0xff] %v9147_v27  ;;  %v14471_v59 = vand.u32 4294901760, %v9147_v27  ;;  %15470 = vst [vmem:[#allocation49_spill] sm:$0xff] %v9173_v49 }
 0x101   :  { %1667 = vmatmul.mubr.f32.gmra.mxu1 %v15425_v38  ;;  %v2405_v38 = vand.u32 4294901760, %v2404_v0  ;;  %v2417_v0 = vand.u32 4294901760, %v2416_v16  ;;  %v9155_v16 = vsub.s32 0, %v9080_v30 }
 0x102   :  { %1472 = vmatmul.mubr.f32.gmra.mxu0 %v15427_v10  ;;  %1672 = vmatprep.mubr.f32.mxu1 %v15304_v57 }
 0x103   :  { %1477 = vmatprep.mubr.f32.mxu0 %v15304_v57  ;;  %2406 = vmatpush1.msra.mxu1 %v2405_v38  ;;  %v1922_v38 = vld [vmem:[#allocation8 + $0x60] sm:$0xff]  ;;  %15466 = vst [vmem:[#allocation21_spill] sm:$0xff] %v9155_v16 }
 0x104   :  { %2412 = vmatprep.subr.mxu1 %v2411_v58  ;;  %v1921_v58 = vld [vmem:[#allocation8 + $0x58] sm:$0xff] }
 0x105   :  { %1674 = vmatmul.mubr.f32.gmra.mxu1 %v15426_v3  ;;  %v9083_v3 = vsub.f32 %v1932_v48, %v9068_v5 }
 0x106   :  { %1479 = vmatmul.mubr.f32.gmra.mxu0 %v15430_v60  ;;  %1679 = vmatprep.mubr.f32.mxu1 %v15304_v57 }
 0x107   :  { %1484 = vmatprep.mubr.f32.mxu0 %v15304_v57  ;;  %15451 = vst [vmem:[#allocation58_spill] sm:$0xff] %v9083_v3  ;;  %v14455_v14 = vand.u32 4294901760, %v9083_v3  ;;  %2418 = vmatpush1.msra.mxu1 %v2417_v0  ;;  %v15477_v0 = vld [vmem:[#allocation19_spill] sm:$0xff] }
 0x109   :  { %1681 = vmatmul.mubr.f32.gmra.mxu1 %v15427_v10  ;;  %v9085_v10 = vand.u32 4294901760, %v1930_v39  ;;  %v9119_v55 = vsub.f32 %v9083_v3, %v14455_v14  ;;  %v9150_v14 = vand.u32 4294901760, %v1925_v9 }
 0x10a   :  { %1486 = vmatmul.mubr.f32.gmra.mxu0 %v15439_v19  ;;  %1686 = vmatprep.mubr.f32.mxu1 %v15304_v57 }
 0x10b   :  { %1491 = vmatprep.mubr.f32.mxu0 %v15304_v57  ;;  %15452 = vst [vmem:[#allocation30_spill] sm:$0xff] %v9085_v10  ;;  %15465 = vst [vmem:[#allocation68_spill] sm:$0xff] %v9150_v14  ;;  %2009 = vmatpush1.msra.mxu0 %v9085_v10 }
 0x10c   :  { %2011 = vmatprep.subr.mxu0 %v9096_v23  ;;  %v1947_v23 = vld [vmem:[#allocation8 + $0x128] sm:$0xff] }
 0x10d   :  { %1688 = vmatmul.mubr.f32.gmra.mxu1 %v15430_v60  ;;  %v14457_v60 = vand.u32 4294901760, %v9074_v6  ;;  %2013 = vmatpush1.msra.mxu0 %v9103_v1 }
 0x10e   :  { %1493 = vmatmul.mubr.f32.gmra.mxu0 %v15446_v24  ;;  %1693 = vmatprep.mubr.f32.mxu1 %v15304_v57 }
 0x10f   :  { %1498 = vmatprep.mubr.f32.mxu0 %v15304_v57  ;;  %v2422_v56 = vsub.f32 %v9074_v6, %v14457_v60  ;;  %v9159_v60 = vand.u32 4294901760, %v1924_v29  ;;  %2015 = vmatprep.subr.mxu0 %v9112_v32  ;;  %v1913_v6 = vld [vmem:[#allocation8 + $0x18] sm:$0xff] }
 0x110   :  { %2017 = vmatpush1.msra.mxu0 %v9125_v62  ;;  %v9310_v37 = vand.u32 4294901760, %v1913_v6 }
 0x111   :  { %1695 = vmatmul.mubr.f32.gmra.mxu1 %v15439_v19  ;;  %v9101_v19 = vsub.f32 %v1930_v39, %v9085_v10  ;;  %v9137_v39 = vsub.f32 %v1927_v11, %v9112_v32  ;;  %15467 = vst [vmem:[#allocation48_spill] sm:$0xff] %v9159_v60  ;;  %v9183_v52 = vsub.f32 %v1924_v29, %v9159_v60  ;;  %v1918_v29 = vld [vmem:[#allocation8 + $0x40] sm:$0xff] }
 0x112   :  { %1500 = vmatmul.mubr.f32.gmra.mxu0 %v15453_v46  ;;  %1700 = vmatprep.mubr.f32.mxu1 %v15304_v57  ;;  %15498 = vst [vmem:[#allocation73_spill] sm:$0xff] %v9310_v37 }
 0x113   :  { %1505 = vmatprep.mubr.f32.mxu0 %v15304_v57  ;;  %15456 = vst [vmem:[#allocation20_spill] sm:$0xff] %v9101_v19  ;;  %v14456_v48 = vand.u32 4294901760, %v9101_v19  ;;  %15463 = vst [vmem:[#allocation65_spill] sm:$0xff] %v9137_v39  ;;  %v14466_v11 = vand.u32 4294901760, %v9137_v39  ;;  %2019 = vmatprep.subr.mxu0 %v9150_v14 }
 0x114   :  { %15471 = vst [vmem:[#allocation44_spill] sm:$0xff] %v9183_v52  ;;  %2021 = vmatpush1.msra.mxu0 %v9159_v60 }
 0x115   :  { %1702 = vmatmul.mubr.f32.gmra.mxu1 %v15446_v24  ;;  %v9133_v24 = vsub.f32 %v9094_v18, %v14454_v8  ;;  %v9143_v28 = vsub.f32 %v9101_v19, %v14456_v48  ;;  %v2423_v8 = vand.u32 4294901760, %v2422_v56  ;;  %v2429_v48 = vand.u32 4294901760, %v9119_v55  ;;  %v15468_v56 = vld [vmem:[#allocation66_spill] sm:$0xff]  ;;  %2023 = vmatprep.subr.mxu0 %v9173_v49 }
 0x116   :  { %1507 = vmatmul.mubr.f32.gmra.mxu0 %v15462_v63  ;;  %1707 = vmatprep.mubr.f32.mxu1 %v15304_v57  ;;  %v9171_v55 = vsub.f32 %v1925_v9, %v9150_v14  ;;  %v1919_v9 = vld [vmem:[#allocation8 + $0x48] sm:$0xff]  ;;  %v9190_v61 = vsub.f32 %v9137_v39, %v14466_v11  ;;  %v9206_v11 = vsub.f32 %v9147_v27, %v14471_v59  ;;  %v15481_v27 = vand.u32 4294901760, %v9183_v52  ;;  %v1917_v59 = vld [vmem:[#allocation8 + $0x38] sm:$0xff] }
 0x117   :  { %1512 = vmatprep.mubr.f32.mxu0 %v15304_v57  ;;  %v2435_v54 = vand.u32 4294901760, %v9133_v24  ;;  %v2441_v47 = vand.u32 4294901760, %v9143_v28  ;;  %v9180_v24 = vsub.f32 %v9123_v22, %v14465_v35  ;;  %2424 = vmatprep.subr.mxu1 %v2423_v8  ;;  %v9194_v28 = vsub.f32 %v1923_v34, %v9173_v49  ;;  %v148_v8 = vld [vmem:[%s14297_s2] sm:$0x3] }
 0x118   :  { %15469 = vst [vmem:[#allocation40_spill] sm:$0xff] %v9171_v55  ;;  %v9197_v35 = vand.u32 4294901760, %v1921_v58  ;;  %2430 = vmatpush1.msra.mxu1 %v2429_v48  ;;  %v9232_v22 = vsub.f32 %v9183_v52, %v15481_v27 }
 0x119   :  { %1709 = vmatmul.mubr.f32.gmra.mxu1 %v15453_v46  ;;  %v9168_v46 = vsub.f32 %v9110_v26, %v14463_v21  ;;  %v9185_v21 = vand.u32 4294901760, %v1922_v38  ;;  %15473 = vst [vmem:[#allocation46_spill] sm:$0xff] %v9194_v28  ;;  %2436 = vmatprep.subr.mxu1 %v2435_v54  ;;  %v15484_v48 = vand.u32 4294901760, %v9194_v28  ;;  %v2453_v26 = vand.u32 4294901760, %v9180_v24 }
 0x11a   :  { %1514 = vmatmul.mubr.f32.gmra.mxu0 %v15468_v56  ;;  %1714 = vmatprep.mubr.f32.mxu1 %v15304_v57  ;;  %15474 = vst [vmem:[#allocation50_spill] sm:$0xff] %v9197_v35  ;;  %v9224_v31 = vsub.f32 %v1921_v58, %v9197_v35  ;;  %v9241_v58 = vrot.slane %v148_v8, %v9155_v16  ;;  %v1915_v16 = vld [vmem:[#allocation8 + $0x28] sm:$0xff]  ;;  %v2465_v24 = vand.u32 4294901760, %v9206_v11 }
 0x11b   :  { %1519 = vmatprep.mubr.f32.mxu0 %v15304_v57  ;;  %15472 = vst [vmem:[#allocation42_spill] sm:$0xff] %v9185_v21  ;;  %v9210_v34 = vsub.f32 %v1922_v38, %v9185_v21  ;;  %v9226_v38 = vand.u32 4294901760, %v1919_v9  ;;  %v2447_v19 = vand.u32 4294901760, %v9168_v46  ;;  %v9247_v18 = vsub.f32 %v9194_v28, %v15484_v48  ;;  %2442 = vmatpush1.msra.mxu1 %v2441_v47 }
 0x11c   :  { %15479 = vst [vmem:[#allocation53_spill] sm:$0xff] %v9224_v31  ;;  %v2477_v46 = vand.u32 4294901760, %v9232_v22  ;;  %v9284_v47 = vand.u32 4294901760, %v1915_v16  ;;  %v15493_v52 = vand.u32 4294901760, %v9224_v31  ;;  %2025 = vmatpush1.msra.mxu0 %v9185_v21 }
 0x11d   :  { %1716 = vmatmul.mubr.f32.gmra.mxu1 %v15462_v63  ;;  %15475 = vst [vmem:[#allocation51_spill] sm:$0xff] %v9210_v34  ;;  %v15478_v63 = vand.u32 4294901760, %v9171_v55  ;;  %15480 = vst [vmem:[#allocation54_spill] sm:$0xff] %v9226_v38  ;;  %v9251_v27 = vsub.f32 %v1919_v9, %v9226_v38  ;;  %v15486_v8 = vand.u32 4294901760, %v9210_v34  ;;  %v15488_v9 = vld [vmem:[#allocation69_spill] sm:$0xff]  ;;  %2448 = vmatprep.subr.mxu1 %v2447_v19 }
 0x11e   :  { %1521 = vmatmul.mubr.f32.gmra.mxu0 %v15477_v0  ;;  %1721 = vmatprep.mubr.f32.mxu1 %v15304_v57  ;;  %15492 = vst [vmem:[#allocation69_spill] sm:$0xff] %v9284_v47  ;;  %v9291_v19 = vsub.f32 %v9224_v31, %v15493_v52  ;;  %v9308_v31 = vsub.f32 %v1915_v16, %v9284_v47 }
 0x11f   :  { %v9220_v39 = vsub.f32 %v9171_v55, %v15478_v63  ;;  %1526 = vmatprep.mubr.f32.mxu0 %v15304_v57  ;;  %v9236_v63 = vsub.f32 %v1920_v15, %v9213_v25  ;;  %v9238_v55 = vand.u32 4294901760, %v1918_v29  ;;  %15485 = vst [vmem:[#allocation60_spill] sm:$0xff] %v9251_v27  ;;  %v1916_v15 = vld [vmem:[#allocation8 + $0x30] sm:$0xff]  ;;  %v9258_v54 = vsub.f32 %v9210_v34, %v15486_v8  ;;  %v1914_v34 = vld [vmem:[#allocation8 + $0x20] sm:$0xff] }
 0x120   :  { %v9270_v8 = vand.u32 4294901760, %v1917_v59  ;;  %v9276_v3 = vand.u32 4294901760, %v1916_v15  ;;  %v9297_v11 = vand.u32 4294901760, %v1914_v34  ;;  %15497 = vst [vmem:[#allocation72_spill] sm:$0xff] %v9308_v31  ;;  %2454 = vmatpush1.msra.mxu1 %v2453_v26  ;;  %2027 = vmatprep.subr.mxu0 %v9197_v35 }
 0x121   :  { %15482 = vst [vmem:[#allocation56_spill] sm:$0xff] %v9236_v63  ;;  %15483 = vst [vmem:[#allocation59_spill] sm:$0xff] %v9238_v55  ;;  %1723 = vmatmul.mubr.f32.gmra.mxu1 %v15468_v56  ;;  %v9263_v48 = vsub.f32 %v1918_v29, %v9238_v55  ;;  %v2459_v56 = vand.u32 4294901760, %v9190_v61  ;;  %v2471_v29 = vand.u32 4294901760, %v9220_v39  ;;  %v2483_v61 = vand.u32 4294901760, %v9247_v18  ;;  %v1912_v39 = vld [vmem:[#allocation8 + $0x10] sm:$0xff]  ;;  %2029 = vmatpush1.msra.mxu0 %v9213_v25 }
 0x122   :  { %1528 = vmatmul.mubr.f32.gmra.mxu0 %v15488_v9  ;;  %1728 = vmatprep.mubr.f32.mxu1 %v15304_v57  ;;  %15489 = vst [vmem:[#allocation64_spill] sm:$0xff] %v9270_v8  ;;  %15490 = vst [vmem:[#allocation66_spill] sm:$0xff] %v9276_v3  ;;  %v9282_v28 = vsub.f32 %v1917_v59, %v9270_v8  ;;  %v9295_v18 = vsub.f32 %v1916_v15, %v9276_v3  ;;  %v1911_v59 = vld [vmem:[#allocation8 + $0x8] sm:$0xff]  ;;  %v15499_v15 = vand.u32 4294901760, %v9251_v27 }
 0x123   :  { %15487 = vst [vmem:[#allocation63_spill] sm:$0xff] %v9263_v48  ;;  %1533 = vmatprep.mubr.f32.mxu0 %v15304_v57  ;;  %15495 = vst [vmem:[#allocation71_spill] sm:$0xff] %v9297_v11  ;;  %2460 = vmatprep.subr.mxu1 %v2459_v56  ;;  %v15502_v16 = vand.u32 4294901760, %v9263_v48  ;;  %v9334_v4 = vand.u32 4294901760, %v1911_v59 }
 0x124   :  { %15491 = vst [vmem:[#allocation19_spill] sm:$0xff] %v9282_v28  ;;  %15494 = vst [vmem:[#allocation70_spill] sm:$0xff] %v9295_v18  ;;  %v9315_v51 = vsub.f32 %v9251_v27, %v15499_v15  ;;  %v9332_v27 = vsub.f32 %v1913_v6, %v9310_v37  ;;  %v15506_v60 = vand.u32 4294901760, %v9295_v18  ;;  %2466 = vmatpush1.msra.mxu1 %v2465_v24  ;;  %2031 = vmatprep.subr.mxu0 %v9226_v38 }
 0x125   :  { %1730 = vmatmul.mubr.f32.gmra.mxu1 %v15477_v0  ;;  %v15496_v0 = vand.u32 4294901760, %v9236_v63  ;;  %v9327_v26 = vsub.f32 %v9263_v48, %v15502_v16  ;;  %15504 = vst [vmem:[#allocation77_spill] sm:$0xff] %v9334_v4  ;;  %v1910_v48 = vld [vmem:[#allocation8] sm:$0xff]  ;;  %v9363_v15 = vsub.f32 %v1911_v59, %v9334_v4  ;;  %2472 = vmatprep.subr.mxu1 %v2471_v29 }
 0x126   :  { %1535 = vmatmul.mubr.f32.gmra.mxu0 %v8713_v42  ;;  %1735 = vmatprep.mubr.f32.mxu1 %v15304_v57  ;;  %15503 = vst [vmem:[#allocation76_spill] sm:$0xff] %v9332_v27  ;;  %v9345_v16 = vsub.f32 %v9295_v18, %v15506_v60  ;;  %v2507_v21 = vand.u32 4294901760, %v9315_v51  ;;  %v15513_v51 = vand.u32 4294901760, %v9258_v54  ;;  %v15514_v35 = vand.u32 4294901760, %v9332_v27 }
 0x127   :  { %v9304_v22 = vsub.f32 %v9236_v63, %v15496_v0  ;;  %v9320_v0 = vsub.f32 %v1914_v34, %v9297_v11  ;;  %v9322_v63 = vand.u32 4294901760, %v1912_v39  ;;  %v263_v52 = vpop.f32.mrf.mxu0  ;;  %v15505_v34 = vand.u32 4294901760, %v9282_v28  ;;  %15509 = vst [vmem:[#allocation79_spill] sm:$0xff] %v9363_v15  ;;  %2478 = vmatpush1.msra.mxu1 %v2477_v46  ;;  %v1970_v46 = vld [vmem:[#allocation8 + $0x1e0] sm:$0xff]  ;;  %2033 = vmatpush1.msra.mxu0 %v9238_v55 }
 0x128   :  { %v264_v18 = vadd.f32 %v263_v52, %v9241_v58  ;;  %v2513_v29 = vand.u32 4294901760, %v9327_v26  ;;  %2484 = vmatprep.subr.mxu1 %v2483_v61  ;;  %2035 = vmatprep.subr.mxu0 %v9270_v8 }
 0x129   :  { %15500 = vst [vmem:[#allocation74_spill] sm:$0xff] %v9320_v0  ;;  %15501 = vst [vmem:[#allocation75_spill] sm:$0xff] %v9322_v63  ;;  %1737 = vmatmul.mubr.f32.gmra.mxu1 %v15488_v9  ;;  %v9340_v56 = vsub.f32 %v9282_v28, %v15505_v34  ;;  %v9350_v6 = vsub.f32 %v1912_v39, %v9322_v63  ;;  %v9352_v49 = vpop.f32.mrf.mxu0  ;;  %v2495_v9 = vand.u32 4294901760, %v9291_v19  ;;  %v15508_v34 = vand.u32 4294901760, %v9308_v31  ;;  %v1973_v39 = vld [vmem:[#allocation8 + $0x1f8] sm:$0xff] }
 0x12a   :  { %1742 = vmatprep.mubr.f32.mxu1 %v15304_v57  ;;  %v2501_v28 = vand.u32 4294901760, %v9304_v22  ;;  %v15510_v57 = vand.u32 4294901760, %v9320_v0  ;;  %v9378_v22 = vand.u32 4294901760, %v1910_v48  ;;  %v2525_v19 = vand.u32 4294901760, %v9345_v16  ;;  %2490 = vmatpush1.msra.mxu1 %v15513_v51  ;;  %v1969_v16 = vld [vmem:[#allocation8 + $0x1d8] sm:$0xff] }
 0x12b   :  { %15507 = vst [vmem:[#allocation78_spill] sm:$0xff] %v9350_v6  ;;  %v9359_v60 = vsub.f32 %v9308_v31, %v15508_v34  ;;  %v1972_v34 = vld [vmem:[#allocation8 + $0x1f0] sm:$0xff]  ;;  %v274_v59 = vpop.f32.mrf.mxu0  ;;  %v1971_v31 = vld [vmem:[#allocation8 + $0x1e8] sm:$0xff]  ;;  %2496 = vmatprep.subr.mxu1 %v2495_v9  ;;  %v15517_v54 = vand.u32 4294901760, %v9350_v6  ;;  %2037 = vmatpush1.msra.mxu0 %v9276_v3 }
 0x12c   :  { %v9370_v24 = vsub.f32 %v9320_v0, %v15510_v57  ;;  %15511 = vst [vmem:[#allocation80_spill] sm:$0xff] %v9378_v22  ;;  %v2519_v57 = vand.u32 4294901760, %v9340_v56  ;;  %v9384_v0 = vand.u32 4294901760, %v1973_v39  ;;  %v275_v26 = vadd.f32 %v274_v59, %v9241_v58  ;;  %2502 = vmatpush1.msra.mxu1 %v2501_v28  ;;  %2039 = vmatprep.subr.mxu0 %v9284_v47 }
 0x12d   :  { %1744 = vmatmul.mubr.f32.gmra.mxu1 %v8713_v42  ;;  %v2531_v52 = vand.u32 4294901760, %v9359_v60  ;;  %v9387_v25 = vpop.f32.mrf.mxu0  ;;  %v9394_v42 = vsub.f32 %v9332_v27, %v15514_v35  ;;  %v9398_v61 = vsub.f32 %v1910_v48, %v9378_v22  ;;  %v9400_v56 = vand.u32 4294901760, %v1972_v34  ;;  %v1968_v60 = vld [vmem:[#allocation8 + $0x1d0] sm:$0xff]  ;;  %2508 = vmatprep.subr.mxu1 %v2507_v21 }
 0x12e   :  { %15512 = vst [vmem:[#allocation81_spill] sm:$0xff] %v9384_v0  ;;  %v2537_v59 = vand.u32 4294901760, %v9370_v24  ;;  %v9406_v51 = vsub.f32 %v9350_v6, %v15517_v54  ;;  %v9410_v35 = vsub.f32 %v1973_v39, %v9384_v0  ;;  %v9412_v27 = vand.u32 4294901760, %v1971_v31  ;;  %2514 = vmatpush1.msra.mxu1 %v2513_v29  ;;  %2041 = vmatpush1.msra.mxu0 %v9297_v11 }
 0x12f   :  { %15515 = vst [vmem:[#allocation82_spill] sm:$0xff] %v9398_v61  ;;  %15516 = vst [vmem:[#allocation83_spill] sm:$0xff] %v9400_v56  ;;  %v15520_v48 = vand.u32 4294901760, %v9363_v15  ;;  %v9422_v24 = vsub.f32 %v1972_v34, %v9400_v56  ;;  %v9424_v54 = vand.u32 4294901760, %v1970_v46  ;;  %v15526_v34 = vand.u32 4294901760, %v9398_v61  ;;  %2520 = vmatprep.subr.mxu1 %v2519_v57  ;;  %2043 = vmatprep.subr.mxu0 %v9310_v37 }
 0x130   :  { %15518 = vst [vmem:[#allocation84_spill] sm:$0xff] %v9410_v35  ;;  %15519 = vst [vmem:[#allocation85_spill] sm:$0xff] %v9412_v27  ;;  %v9429_v28 = vsub.f32 %v1971_v31, %v9412_v27  ;;  %v2543_v3 = vand.u32 4294901760, %v9394_v42  ;;  %2526 = vmatpush1.msra.mxu1 %v2525_v19  ;;  %2045 = vmatpush1.msra.mxu0 %v9322_v63 }
 0x131   :  { %v9417_v38 = vsub.f32 %v9363_v15, %v15520_v48  ;;  %15521 = vst [vmem:[#allocation86_spill] sm:$0xff] %v9422_v24  ;;  %15522 = vst [vmem:[#allocation87_spill] sm:$0xff] %v9424_v54  ;;  %v660_v6 = vpop.f32.mrf.mxu1  ;;  %v9431_v48 = vand.u32 4294901760, %v1969_v16  ;;  %v9433_v15 = vand.u32 4294901760, %v1968_v60  ;;  %v2560_v55 = vsub.f32 %v9398_v61, %v15526_v34  ;;  %2532 = vmatprep.subr.mxu1 %v2531_v52 }
 0x132   :  { %15523 = vst [vmem:[#allocation88_spill] sm:$0xff] %v9429_v28  ;;  %v285_v9 = vpop.f32.mrf.mxu0  ;;  %v9435_v8 = vadd.f32 %v660_v6, %v264_v18  ;;  %v9443_v39 = vsub.f32 %v1970_v46, %v9424_v54  ;;  %v15528_v18 = vand.u32 4294901760, %v9410_v35  ;;  %v2549_v46 = vand.u32 4294901760, %v9406_v51  ;;  %2538 = vmatpush1.msra.mxu1 %v2537_v59  ;;  %2047 = vmatprep.subr.mxu0 %v9334_v4 }
 0x133   :  { %15524 = vst [vmem:[#allocation89_spill] sm:$0xff] %v9431_v48  ;;  %15525 = vst [vmem:[#allocation90_spill] sm:$0xff] %v9433_v15  ;;  %v9445_v31 = vpop.f32.mrf.mxu1  ;;  %v9454_v34 = vsub.f32 %v1969_v16, %v9431_v48  ;;  %v15530_v57 = vand.u32 4294901760, %v9422_v24  ;;  %v286_v29 = vadd.f32 %v285_v9, %v9241_v58  ;;  %v2555_v16 = vand.u32 4294901760, %v9417_v38  ;;  %2544 = vmatprep.subr.mxu1 %v2543_v3  ;;  %v1963_v3 = vld [vmem:[#allocation8 + $0x1a8] sm:$0xff] }
 0x134   :  { %15527 = vst [vmem:[#allocation91_spill] sm:$0xff] %v9443_v39  ;;  %v2566_v6 = vsub.f32 %v9410_v35, %v15528_v18  ;;  %v9456_v21 = vpop.f32.mrf.mxu0  ;;  %v1967_v18 = vld [vmem:[#allocation8 + $0x1c8] sm:$0xff]  ;;  %v15531_v11 = vand.u32 4294901760, %v9429_v28  ;;  %v2561_v37 = vand.u32 4294901760, %v2560_v55  ;;  %v15532_v9 = vand.u32 4294901760, %v9443_v39  ;;  %2049 = vmatpush1.msra.mxu0 %v9378_v22  ;;  %v1964_v55 = vld [vmem:[#allocation8 + $0x1b0] sm:$0xff]  ;;  %2550 = vmatpush1.msra.mxu1 %v2549_v46 }
 0x135   :  { %15529 = vst [vmem:[#allocation92_spill] sm:$0xff] %v9454_v34  ;;  %v2572_v42 = vsub.f32 %v9422_v24, %v15530_v57  ;;  %v667_v35 = vpop.f32.mrf.mxu1  ;;  %v1966_v57 = vld [vmem:[#allocation8 + $0x1c0] sm:$0xff]  ;;  %v9477_v38 = vsub.f32 %v1968_v60, %v9433_v15  ;;  %v15534_v63 = vand.u32 4294901760, %v9454_v34  ;;  %v9485_v59 = vand.u32 4294901760, %v1967_v18  ;;  %2051 = vmatprep.subr.mxu0 %v9384_v0  ;;  %2556 = vmatprep.subr.mxu1 %v2555_v16 }
 0x136   :  { %v2578_v19 = vsub.f32 %v9429_v28, %v15531_v11  ;;  %v296_v24 = vpop.f32.mrf.mxu0  ;;  %v9471_v61 = vadd.f32 %v667_v35, %v275_v26  ;;  %v2584_v52 = vsub.f32 %v9443_v39, %v15532_v9  ;;  %v1965_v11 = vld [vmem:[#allocation8 + $0x1b8] sm:$0xff]  ;;  %v2567_v51 = vand.u32 4294901760, %v2566_v6  ;;  %2053 = vmatpush2.msra.mxu0 %v9400_v56  ;;  %2562 = vmatpush1.msra.mxu1 %v2561_v37 }
 0x137   :  { %15533 = vst [vmem:[#allocation93_spill] sm:$0xff] %v9477_v38  ;;  %v9480_v28 = vpop.f32.mrf.mxu1  ;;  %v2590_v26 = vsub.f32 %v9454_v34, %v15534_v63  ;;  %15535 = vst [vmem:[#allocation94_spill] sm:$0xff] %v9485_v59  ;;  %v297_v35 = vadd.f32 %v296_v24, %v9241_v58  ;;  %v2573_v9 = vand.u32 4294901760, %v2572_v42  ;;  %v14568_v39 = vand.u32 4294901760, %v9477_v38  ;;  %2055 = vmatprep.subr.mxu0 %v9412_v27 }
 0x138   :  { %v9489_v60 = vpop.f32.mrf.mxu0  ;;  %v9492_v4 = vand.u32 4294901760, %v1966_v57  ;;  %v2579_v63 = vand.u32 4294901760, %v2578_v19  ;;  %v2585_v34 = vand.u32 4294901760, %v2584_v52  ;;  %v9496_v22 = vsub.f32 %v1967_v18, %v9485_v59  ;;  %2568 = vmatprep.subr.mxu1 %v2567_v51  ;;  %2057 = vmatpush2.msra.mxu0 %v9424_v54 }
 0x139   :  { %v674_v6 = vpop.f32.mrf.mxu1  ;;  %v9498_v47 = vand.u32 4294901760, %v1965_v11  ;;  %v2596_v42 = vsub.f32 %v9477_v38, %v14568_v39  ;;  %v9509_v16 = vand.u32 4294901760, %v1964_v55  ;;  %v2591_v19 = vand.u32 4294901760, %v2590_v26  ;;  %2574 = vmatpush2.msra.mxu1 %v2573_v9  ;;  %2059 = vmatprep.subr.mxu0 %v9431_v48 }
 0x13a   :  { %15536 = vst [vmem:[#allocation95_spill] sm:$0xff] %v9492_v4  ;;  %15537 = vst [vmem:[#allocation96_spill] sm:$0xff] %v9496_v22  ;;  %v307_v24 = vpop.f32.mrf.mxu0  ;;  %v9501_v46 = vadd.f32 %v674_v6, %v286_v29  ;;  %v9507_v0 = vsub.f32 %v1966_v57, %v9492_v4  ;;  %v14577_v52 = vand.u32 4294901760, %v9496_v22  ;;  %v9518_v37 = vand.u32 4294901760, %v1963_v3  ;;  %v1962_v6 = vld [vmem:[#allocation8 + $0x1a0] sm:$0xff]  ;;  %2580 = vmatprep.subr.mxu1 %v2579_v63 }
 0x13b   :  { %15538 = vst [vmem:[#allocation97_spill] sm:$0xff] %v9498_v47  ;;  %15540 = vst [vmem:[#allocation99_spill] sm:$0xff] %v9509_v16  ;;  %v9512_v18 = vpop.f32.mrf.mxu1  ;;  %v9516_v29 = vsub.f32 %v1965_v11, %v9498_v47  ;;  %v2597_v39 = vand.u32 4294901760, %v2596_v42  ;;  %v9525_v27 = vsub.f32 %v1964_v55, %v9509_v16  ;;  %v308_v51 = vadd.f32 %v307_v24, %v9241_v58 }
 0x13c   :  { %15539 = vst [vmem:[#allocation98_spill] sm:$0xff] %v9507_v0  ;;  %15542 = vst [vmem:[#allocation101_spill] sm:$0xff] %v9518_v37  ;;  %v9521_v57 = vpop.f32.mrf.mxu0  ;;  %v14580_v38 = vand.u32 4294901760, %v9507_v0  ;;  %v2602_v26 = vsub.f32 %v9496_v22, %v14577_v52  ;;  %v9534_v9 = vsub.f32 %v1963_v3, %v9518_v37  ;;  %2061 = vmatpush2.msra.mxu0 %v9433_v15  ;;  %2586 = vmatpush2.msra.mxu1 %v2585_v34  ;;  %v1961_v52 = vld [vmem:[#allocation8 + $0x198] sm:$0xff]  ;;  %v1958_v15 = vld [vmem:[#allocation8 + $0x180] sm:$0xff] }
 0x13d   :  { %15541 = vst [vmem:[#allocation100_spill] sm:$0xff] %v9516_v29  ;;  %15543 = vst [vmem:[#allocation102_spill] sm:$0xff] %v9525_v27  ;;  %v681_v11 = vpop.f32.mrf.mxu1  ;;  %v9543_v48 = vand.u32 4294901760, %v1962_v6  ;;  %2063 = vmatprep.subr.mxu0 %v9485_v59  ;;  %2592 = vmatprep.subr.mxu1 %v2591_v19  ;;  %v15546_v22 = vand.u32 4294901760, %v9516_v29 }
 0x13e   :  { %15544 = vst [vmem:[#allocation103_spill] sm:$0xff] %v9534_v9  ;;  %v318_v42 = vpop.f32.mrf.mxu0  ;;  %v9537_v55 = vadd.f32 %v681_v11, %v297_v35  ;;  %v2608_v24 = vsub.f32 %v9507_v0, %v14580_v38  ;;  %v2603_v3 = vand.u32 4294901760, %v2602_v26  ;;  %v1960_v11 = vld [vmem:[#allocation8 + $0x190] sm:$0xff]  ;;  %2065 = vmatpush2.msra.mxu0 %v9492_v4  ;;  %2598 = vmatpush2.msra.mxu1 %v2597_v39  ;;  %v15547_v0 = vand.u32 4294901760, %v9525_v27  ;;  %v1959_v26 = vld [vmem:[#allocation8 + $0x188] sm:$0xff] }
 0x13f   :  { %15545 = vst [vmem:[#allocation104_spill] sm:$0xff] %v9543_v48  ;;  %v9546_v54 = vpop.f32.mrf.mxu1  ;;  %v2614_v35 = vsub.f32 %v9516_v29, %v15546_v22  ;;  %v9559_v19 = vsub.f32 %v1962_v6, %v9543_v48  ;;  %2067 = vmatprep.subr.mxu0 %v9498_v47  ;;  %v319_v22 = vadd.f32 %v318_v42, %v9241_v58  ;;  %v15549_v4 = vand.u32 4294901760, %v9534_v9 }
 0x140   :  { %v9553_v38 = vpop.f32.mrf.mxu0  ;;  %v2609_v63 = vand.u32 4294901760, %v2608_v24  ;;  %v2620_v59 = vsub.f32 %v9525_v27, %v15547_v0  ;;  %2604 = vmatprep.subr.mxu1 %v2603_v3  ;;  %v9566_v24 = vand.u32 4294901760, %v1961_v52  ;;  %2069 = vmatpush2.msra.mxu0 %v9509_v16  ;;  %v9572_v42 = vand.u32 4294901760, %v1960_v11  ;;  %v1957_v3 = vld [vmem:[#allocation8 + $0x178] sm:$0xff] }
 0x141   :  { %15548 = vst [vmem:[#allocation105_spill] sm:$0xff] %v9559_v19  ;;  %v688_v34 = vpop.f32.mrf.mxu1  ;;  %v2615_v29 = vand.u32 4294901760, %v2614_v35  ;;  %v2626_v39 = vsub.f32 %v9534_v9, %v15549_v4  ;;  %v14603_v47 = vand.u32 4294901760, %v9559_v19  ;;  %2071 = vmatprep.subr.mxu0 %v9518_v37  ;;  %v9580_v16 = vand.u32 4294901760, %v1959_v26  ;;  %v1956_v37 = vld [vmem:[#allocation8 + $0x170] sm:$0xff] }
 0x142   :  { %15550 = vst [vmem:[#allocation106_spill] sm:$0xff] %v9566_v24  ;;  %v329_v0 = vpop.f32.mrf.mxu0  ;;  %v9569_v6 = vadd.f32 %v688_v34, %v308_v51  ;;  %2610 = vmatpush2.msra.mxu1 %v2609_v63  ;;  %v2621_v27 = vand.u32 4294901760, %v2620_v59  ;;  %15551 = vst [vmem:[#allocation107_spill] sm:$0xff] %v9572_v42  ;;  %v9578_v9 = vsub.f32 %v1961_v52, %v9566_v24  ;;  %2073 = vmatpush2.msra.mxu0 %v9543_v48 }
 0x143   :  { %v9575_v35 = vpop.f32.mrf.mxu1  ;;  %2616 = vmatprep.subr.mxu1 %v2615_v29  ;;  %v2627_v4 = vand.u32 4294901760, %v2626_v39  ;;  %15553 = vst [vmem:[#allocation109_spill] sm:$0xff] %v9580_v16  ;;  %v2632_v59 = vsub.f32 %v9559_v19, %v14603_v47  ;;  %v9589_v63 = vsub.f32 %v1960_v11, %v9572_v42  ;;  %v9591_v34 = vand.u32 4294901760, %v1958_v15  ;;  %2075 = vmatprep.subr.mxu0 %v9566_v24 }
 0x144   :  { %15552 = vst [vmem:[#allocation108_spill] sm:$0xff] %v9578_v9  ;;  %v9583_v51 = vpop.f32.mrf.mxu0  ;;  %2622 = vmatpush2.msra.mxu1 %v2621_v27  ;;  %v330_v52 = vadd.f32 %v329_v0, %v9241_v58  ;;  %v14614_v39 = vand.u32 4294901760, %v9578_v9  ;;  %v9597_v48 = vsub.f32 %v1959_v26, %v9580_v16  ;;  %v9599_v27 = vand.u32 4294901760, %v1957_v3  ;;  %2077 = vmatpush2.msra.mxu0 %v9572_v42 }
 0x145   :  { %15554 = vst [vmem:[#allocation110_spill] sm:$0xff] %v9589_v63  ;;  %15555 = vst [vmem:[#allocation111_spill] sm:$0xff] %v9591_v34  ;;  %v695_v29 = vpop.f32.mrf.mxu1  ;;  %2628 = vmatprep.subr.mxu1 %v2627_v4  ;;  %v2633_v19 = vand.u32 4294901760, %v2632_v59  ;;  %v14623_v24 = vand.u32 4294901760, %v9589_v63  ;;  %v9606_v0 = vsub.f32 %v1958_v15, %v9591_v34  ;;  %2079 = vmatprep.subr.mxu0 %v9580_v16  ;;  %v1955_v16 = vld [vmem:[#allocation8 + $0x168] sm:$0xff] }
 0x146   :  { %15556 = vst [vmem:[#allocation112_spill] sm:$0xff] %v9597_v48  ;;  %15557 = vst [vmem:[#allocation113_spill] sm:$0xff] %v9599_v27  ;;  %v340_v11 = vpop.f32.mrf.mxu0  ;;  %v9602_v47 = vadd.f32 %v695_v29, %v319_v22  ;;  %v2638_v26 = vsub.f32 %v9578_v9, %v14614_v39  ;;  %v9616_v42 = vsub.f32 %v1957_v3, %v9599_v27  ;;  %2081 = vmatpush2.msra.mxu0 %v9591_v34 }
 0x147   :  { %15558 = vst [vmem:[#allocation114_spill] sm:$0xff] %v9606_v0  ;;  %v9609_v4 = vpop.f32.mrf.mxu1  ;;  %2634 = vmatpush2.msra.mxu1 %v2633_v19  ;;  %v2644_v15 = vsub.f32 %v9589_v63, %v14623_v24  ;;  %v9625_v29 = vand.u32 4294901760, %v1956_v37  ;;  %2083 = vmatprep.subr.mxu0 %v9599_v27  ;;  %v341_v39 = vadd.f32 %v340_v11, %v9241_v58  ;;  %v15561_v9 = vand.u32 4294901760, %v9597_v48  ;;  %v1953_v11 = vld [vmem:[#allocation8 + $0x158] sm:$0xff] }
 0x148   :  { %15559 = vst [vmem:[#allocation115_spill] sm:$0xff] %v9616_v42  ;;  %v9619_v22 = vpop.f32.mrf.mxu0  ;;  %v2639_v56 = vand.u32 4294901760, %v2638_v26  ;;  %v14640_v19 = vand.u32 4294901760, %v9616_v42  ;;  %v15562_v63 = vand.u32 4294901760, %v9606_v0 }
 0x149   :  { %15560 = vst [vmem:[#allocation116_spill] sm:$0xff] %v9625_v29  ;;  %v702_v3 = vpop.f32.mrf.mxu1  ;;  %v2650_v34 = vsub.f32 %v9597_v48, %v15561_v9  ;;  %v2645_v59 = vand.u32 4294901760, %v2644_v15  ;;  %v9639_v27 = vsub.f32 %v1956_v37, %v9625_v29  ;;  %2085 = vmatpush2.msra.mxu0 %v9625_v29  ;;  %v1952_v15 = vld [vmem:[#allocation8 + $0x150] sm:$0xff]  ;;  %v1951_v29 = vld [vmem:[#allocation8 + $0x148] sm:$0xff] }
 0x14a   :  { %v351_v14 = vpop.f32.mrf.mxu0  ;;  %v9633_v24 = vadd.f32 %v702_v3, %v330_v52  ;;  %v2656_v33 = vsub.f32 %v9606_v0, %v15562_v63  ;;  %2640 = vmatprep.subr.mxu1 %v2639_v56  ;;  %v2662_v52 = vsub.f32 %v9616_v42, %v14640_v19  ;;  %v9647_v3 = vand.u32 4294901760, %v1955_v16 }
 0x14b   :  { %15563 = vst [vmem:[#allocation117_spill] sm:$0xff] %v9639_v27  ;;  %v9642_v26 = vpop.f32.mrf.mxu1  ;;  %v2651_v9 = vand.u32 4294901760, %v2650_v34  ;;  %2646 = vmatpush2.msra.mxu1 %v2645_v59  ;;  %v14643_v37 = vand.u32 4294901760, %v9639_v27  ;;  %v9652_v0 = vand.u32 4294901760, %v1954_v20  ;;  %v352_v62 = vadd.f32 %v351_v14, %v9241_v58 }
 0x14c   :  { %15564 = vst [vmem:[#allocation118_spill] sm:$0xff] %v9647_v3  ;;  %v9649_v48 = vpop.f32.mrf.mxu0  ;;  %v2657_v63 = vand.u32 4294901760, %v2656_v33  ;;  %v2663_v34 = vand.u32 4294901760, %v2662_v52  ;;  %v9656_v43 = vsub.f32 %v1955_v16, %v9647_v3  ;;  %v9658_v19 = vand.u32 4294901760, %v1953_v11  ;;  %2087 = vmatprep.subr.mxu0 %v9647_v3 }
 0x14d   :  { %15565 = vst [vmem:[#allocation119_spill] sm:$0xff] %v9652_v0  ;;  %v709_v56 = vpop.f32.mrf.mxu1  ;;  %2652 = vmatprep.subr.mxu1 %v2651_v9  ;;  %v2668_v33 = vsub.f32 %v9639_v27, %v14643_v37  ;;  %v9667_v14 = vsub.f32 %v1954_v20, %v9652_v0  ;;  %v9669_v9 = vand.u32 4294901760, %v1952_v15  ;;  %2089 = vmatpush2.msra.mxu0 %v9652_v0 }
 0x14e   :  { %15566 = vst [vmem:[#allocation120_spill] sm:$0xff] %v9656_v43  ;;  %15567 = vst [vmem:[#allocation121_spill] sm:$0xff] %v9658_v19  ;;  %v362_v42 = vpop.f32.mrf.mxu0  ;;  %v9661_v59 = vadd.f32 %v709_v56, %v341_v39  ;;  %2658 = vmatpush2.msra.mxu1 %v2657_v63  ;;  %v9676_v39 = vsub.f32 %v1953_v11, %v9658_v19  ;;  %v9678_v63 = vand.u32 4294901760, %v1951_v29  ;;  %v1950_v56 = vld [vmem:[#allocation8 + $0x140] sm:$0xff]  ;;  %2091 = vmatprep.subr.mxu0 %v9658_v19 }
 0x14f   :  { %15568 = vst [vmem:[#allocation122_spill] sm:$0xff] %v9667_v14  ;;  %15569 = vst [vmem:[#allocation123_spill] sm:$0xff] %v9669_v9  ;;  %v9672_v16 = vpop.f32.mrf.mxu1  ;;  %2664 = vmatprep.subr.mxu1 %v2663_v34  ;;  %v2669_v20 = vand.u32 4294901760, %v2668_v33  ;;  %v9685_v0 = vsub.f32 %v1952_v15, %v9669_v9  ;;  %2093 = vmatpush2.msra.mxu0 %v9669_v9  ;;  %v363_v34 = vadd.f32 %v362_v42, %v9241_v58 }
 0x150   :  { %15570 = vst [vmem:[#allocation124_spill] sm:$0xff] %v9676_v39  ;;  %15571 = vst [vmem:[#allocation125_spill] sm:$0xff] %v9678_v63  ;;  %v9681_v37 = vpop.f32.mrf.mxu0  ;;  %v15573_v11 = vand.u32 4294901760, %v9656_v43  ;;  %v9694_v19 = vsub.f32 %v1951_v29, %v9678_v63  ;;  %2095 = vmatprep.subr.mxu0 %v9678_v63  ;;  %v15575_v15 = vand.u32 4294901760, %v9667_v14  ;;  %v9703_v32 = vand.u32 4294901760, %v1950_v56 }
 0x151   :  { %15572 = vst [vmem:[#allocation126_spill] sm:$0xff] %v9685_v0  ;;  %v716_v52 = vpop.f32.mrf.mxu1  ;;  %2670 = vmatpush2.msra.mxu1 %v2669_v20  ;;  %v14676_v9 = vand.u32 4294901760, %v9685_v0  ;;  %v15577_v29 = vand.u32 4294901760, %v9676_v39 }
 0x152   :  { %v2674_v3 = vsub.f32 %v9656_v43, %v15573_v11  ;;  %15574 = vst [vmem:[#allocation127_spill] sm:$0xff] %v9694_v19  ;;  %v373_v33 = vpop.f32.mrf.mxu0  ;;  %v9697_v27 = vadd.f32 %v716_v52, %v352_v62  ;;  %v2680_v42 = vsub.f32 %v9667_v14, %v15575_v15  ;;  %15576 = vst [vmem:[#allocation128_spill] sm:$0xff] %v9703_v32  ;;  %v1949_v11 = vld [vmem:[#allocation8 + $0x138] sm:$0xff]  ;;  %v14683_v62 = vand.u32 4294901760, %v9694_v19  ;;  %v1948_v52 = vld [vmem:[#allocation8 + $0x130] sm:$0xff] }
 0x153   :  { %v9705_v43 = vpop.f32.mrf.mxu1  ;;  %v2686_v63 = vsub.f32 %v9676_v39, %v15577_v29  ;;  %v2692_v15 = vsub.f32 %v9685_v0, %v14676_v9  ;;  %v9717_v14 = vsub.f32 %v1950_v56, %v9703_v32  ;;  %2097 = vmatpush2.msra.mxu0 %v9703_v32  ;;  %v9729_v32 = vand.u32 4294901760, %v1948_v52 }
 0x154   :  { %v2675_v13 = vand.u32 4294901760, %v2674_v3  ;;  %v9711_v20 = vpop.f32.mrf.mxu0  ;;  %v2681_v1 = vand.u32 4294901760, %v2680_v42  ;;  %v374_v3 = vadd.f32 %v373_v33, %v9241_v58  ;;  %v2698_v39 = vsub.f32 %v9694_v19, %v14683_v62  ;;  %v1945_v33 = vld [vmem:[#allocation8 + $0x118] sm:$0xff] }
 0x155   :  { %15578 = vst [vmem:[#allocation129_spill] sm:$0xff] %v9717_v14  ;;  %v723_v10 = vpop.f32.mrf.mxu1  ;;  %v2687_v29 = vand.u32 4294901760, %v2686_v63  ;;  %v9724_v42 = vand.u32 4294901760, %v1949_v11  ;;  %v2693_v56 = vand.u32 4294901760, %v2692_v15  ;;  %v14686_v0 = vand.u32 4294901760, %v9717_v14  ;;  %15580 = vst [vmem:[#allocation131_spill] sm:$0xff] %v9729_v32 }
 0x156   :  { %2676 = vmatprep.subr.mxu1 %v2675_v13  ;;  %v384_v5 = vpop.f32.mrf.mxu0  ;;  %v9726_v9 = vadd.f32 %v723_v10, %v363_v34  ;;  %v2699_v7 = vand.u32 4294901760, %v2698_v39  ;;  %v9737_v19 = vand.u32 4294901760, %v1947_v23  ;;  %v9748_v34 = vand.u32 4294901760, %v1946_v36 }
 0x157   :  { %15579 = vst [vmem:[#allocation130_spill] sm:$0xff] %v9724_v42  ;;  %2682 = vmatpush2.msra.mxu1 %v2681_v1  ;;  %v385_v13 = vadd.f32 %v384_v5, %v9241_v58  ;;  %v9732_v63 = vpop.f32.mrf.mxu1  ;;  %v9735_v62 = vsub.f32 %v1949_v11, %v9724_v42  ;;  %2099 = vmatprep.subr.mxu0 %v9724_v42 }
 0x158   :  { %2688 = vmatprep.subr.mxu1 %v2687_v29  ;;  %15582 = vst [vmem:[#allocation133_spill] sm:$0xff] %v9737_v19  ;;  %v9740_v10 = vpop.f32.mrf.mxu0  ;;  %v2704_v1 = vsub.f32 %v9717_v14, %v14686_v0  ;;  %v9746_v5 = vsub.f32 %v1948_v52, %v9729_v32  ;;  %15584 = vst [vmem:[#allocation135_spill] sm:$0xff] %v9748_v34  ;;  %2101 = vmatpush2.msra.mxu0 %v9729_v32  ;;  %v9755_v29 = vand.u32 4294901760, %v1945_v33 }
 0x159   :  { %15581 = vst [vmem:[#allocation132_spill] sm:$0xff] %v9735_v62  ;;  %2694 = vmatpush2.msra.mxu1 %v2693_v56  ;;  %v730_v39 = vpop.f32.mrf.mxu1  ;;  %v14699_v11 = vand.u32 4294901760, %v9735_v62  ;;  %v9753_v15 = vsub.f32 %v1947_v23, %v9737_v19  ;;  %v1944_v56 = vld [vmem:[#allocation8 + $0x110] sm:$0xff]  ;;  %2103 = vmatprep.subr.mxu0 %v9737_v19  ;;  %v9762_v32 = vsub.f32 %v1946_v36, %v9748_v34 }
 0x15a   :  { %15583 = vst [vmem:[#allocation134_spill] sm:$0xff] %v9746_v5  ;;  %2700 = vmatprep.subr.mxu1 %v2699_v7  ;;  %15586 = vst [vmem:[#allocation137_spill] sm:$0xff] %v9755_v29  ;;  %v395_v0 = vpop.f32.mrf.mxu0  ;;  %v9758_v14 = vadd.f32 %v730_v39, %v374_v3  ;;  %v2705_v52 = vand.u32 4294901760, %v2704_v1  ;;  %v14710_v42 = vand.u32 4294901760, %v9746_v5  ;;  %2105 = vmatpush2.msra.mxu0 %v9748_v34  ;;  %v9782_v39 = vand.u32 4294901760, %v1944_v56  ;;  %v1943_v34 = vld [vmem:[#allocation8 + $0x108] sm:$0xff] }
 0x15b   :  { %15585 = vst [vmem:[#allocation136_spill] sm:$0xff] %v9753_v15  ;;  %15587 = vst [vmem:[#allocation138_spill] sm:$0xff] %v9762_v32  ;;  %v396_v7 = vadd.f32 %v395_v0, %v9241_v58  ;;  %v9766_v23 = vpop.f32.mrf.mxu1  ;;  %v2710_v40 = vsub.f32 %v9735_v62, %v14699_v11  ;;  %v14715_v19 = vand.u32 4294901760, %v9753_v15  ;;  %v9773_v3 = vsub.f32 %v1945_v33, %v9755_v29 }
 0x15c   :  { %2107 = vmatprep.subr.mxu0 %v9755_v29  ;;  %v9776_v1 = vpop.f32.mrf.mxu0  ;;  %2706 = vmatpush2.msra.mxu1 %v2705_v52  ;;  %v2716_v36 = vsub.f32 %v9746_v5, %v14710_v42  ;;  %v14716_v0 = vand.u32 4294901760, %v9762_v32  ;;  %15589 = vst [vmem:[#allocation140_spill] sm:$0xff] %v9782_v39  ;;  %v9794_v5 = vsub.f32 %v1944_v56, %v9782_v39 }
 0x15d   :  { %15588 = vst [vmem:[#allocation139_spill] sm:$0xff] %v9773_v3  ;;  %v737_v11 = vpop.f32.mrf.mxu1  ;;  %v2711_v62 = vand.u32 4294901760, %v2710_v40  ;;  %v2722_v33 = vsub.f32 %v9753_v15, %v14715_v19  ;;  %v14721_v29 = vand.u32 4294901760, %v9773_v3  ;;  %2109 = vmatpush2.msra.mxu0 %v9782_v39 }
 0x15e   :  { %v406_v45 = vpop.f32.mrf.mxu0  ;;  %v9788_v52 = vadd.f32 %v737_v11, %v385_v13  ;;  %v2717_v53 = vand.u32 4294901760, %v2716_v36  ;;  %v2728_v42 = vsub.f32 %v9762_v32, %v14716_v0  ;;  %15590 = vst [vmem:[#allocation141_spill] sm:$0xff] %v9794_v5  ;;  %v9803_v11 = vand.u32 4294901760, %v1943_v34 }
 0x15f   :  { %v407_v40 = vadd.f32 %v406_v45, %v9241_v58  ;;  %v9798_v44 = vpop.f32.mrf.mxu1  ;;  %2712 = vmatprep.subr.mxu1 %v2711_v62  ;;  %v2723_v19 = vand.u32 4294901760, %v2722_v33  ;;  %v2734_v13 = vsub.f32 %v9773_v3, %v14721_v29  ;;  %v14722_v56 = vand.u32 4294901760, %v9794_v5 }
 0x160   :  { %15591 = vst [vmem:[#allocation142_spill] sm:$0xff] %v9803_v11  ;;  %v9805_v36 = vpop.f32.mrf.mxu0  ;;  %2718 = vmatpush2.msra.mxu1 %v2717_v53  ;;  %v2729_v0 = vand.u32 4294901760, %v2728_v42  ;;  %v9808_v32 = vand.u32 4294901760, %v1942_v50  ;;  %v9811_v62 = vsub.f32 %v1943_v34, %v9803_v11  ;;  %2111 = vmatprep.subr.mxu0 %v9803_v11 }
 0x161   :  { %v744_v15 = vpop.f32.mrf.mxu1  ;;  %2724 = vmatprep.subr.mxu1 %v2723_v19  ;;  %v2735_v45 = vand.u32 4294901760, %v2734_v13  ;;  %v2740_v53 = vsub.f32 %v9794_v5, %v14722_v56 }
 0x162   :  { %15592 = vst [vmem:[#allocation143_spill] sm:$0xff] %v9808_v32  ;;  %15593 = vst [vmem:[#allocation144_spill] sm:$0xff] %v9811_v62  ;;  %v417_v33 = vpop.f32.mrf.mxu0  ;;  %v9814_v29 = vadd.f32 %v744_v15, %v396_v7  ;;  %2730 = vmatpush2.msra.mxu1 %v2729_v0  ;;  %v9820_v42 = vsub.f32 %v1942_v50, %v9808_v32  ;;  %2113 = vmatpush2.msra.mxu0 %v9808_v32  ;;  %v14736_v34 = vand.u32 4294901760, %v9811_v62 }
 0x163   :  { %v418_v19 = vadd.f32 %v417_v33, %v9241_v58  ;;  %v9824_v13 = vpop.f32.mrf.mxu1  ;;  %2736 = vmatprep.subr.mxu1 %v2735_v45  ;;  %2886 = vmatprep.subr.mxu0 %v8990_v2  ;;  %v2741_v7 = vand.u32 4294901760, %v2740_v53 }
 0x164   :  { %15594 = vst [vmem:[#allocation145_spill] sm:$0xff] %v9820_v42  ;;  %15595 = vst [vmem:[#allocation146_spill] sm:$0xff] %v9824_v13  ;;  %v9828_v15 = vpop.f32.mrf.mxu0  ;;  %v14737_v0 = vand.u32 4294901760, %v9820_v42  ;;  %v2746_v50 = vsub.f32 %v9811_v62, %v14736_v34 }
 0x165   :  { %15596 = vst [vmem:[#allocation147_spill] sm:$0xff] %v9828_v15  ;;  %v751_v56 = vpop.f32.mrf.mxu1  ;;  %2742 = vmatpush2.msra.mxu1 %v2741_v7 }
 0x166   :  { %v428_v5 = vpop.f32.mrf.mxu0  ;;  %v9834_v3 = vadd.f32 %v751_v56, %v407_v40  ;;  %v2752_v45 = vsub.f32 %v9820_v42, %v14737_v0  ;;  %v2747_v53 = vand.u32 4294901760, %v2746_v50 }
 0x167   :  { %v429_v33 = vadd.f32 %v428_v5, %v9241_v58  ;;  %v9840_v2 = vpop.f32.mrf.mxu1 }
 0x168   :  { %15597 = vst [vmem:[#allocation148_spill] sm:$0xff] %v9840_v2  ;;  %v9842_v32 = vpop.f32.mrf.mxu0  ;;  %v2753_v11 = vand.u32 4294901760, %v2752_v45  ;;  %2748 = vmatprep.subr.mxu1 %v2747_v53 }
 0x169   :  { %15598 = vst [vmem:[#allocation149_spill] sm:$0xff] %v9842_v32  ;;  %v758_v39 = vpop.f32.mrf.mxu1 }
 0x16a   :  { %v9844_v17 = vadd.f32 %v758_v39, %v418_v19  ;;  %v902_v34 = vpop.f32.mrf.mxu0  ;;  %2754 = vmatpush2.msra.mxu1 %v2753_v11 }
 0x16b   :  { %v903_v40 = vadd.f32 %v902_v34, %v9435_v8  ;;  %v9847_v56 = vpop.f32.mrf.mxu1  ;;  %3238 = vmatprep.subr.mxu1 %v8982_v41 }
 0x16c   :  { %15599 = vst [vmem:[#allocation150_spill] sm:$0xff] %v9847_v56  ;;  %v9850_v7 = vpop.f32.mrf.mxu0 }
 0x16d   :  { %v765_v58 = vpop.f32.mrf.mxu1 }
 0x16e   :  { %v9852_v5 = vadd.f32 %v765_v58, %v429_v33  ;;  %v910_v50 = vpop.f32.mrf.mxu0 }
 0x16f   :  { %v911_v45 = vadd.f32 %v910_v50, %v9471_v61  ;;  %v9855_v0 = vpop.f32.mrf.mxu1 }
 0x170   :  { %15600 = vst [vmem:[#allocation151_spill] sm:$0xff] %v9855_v0  ;;  %v9857_v39 = vpop.f32.mrf.mxu0 }
 0x171   :  { %v1128_v19 = vpop.f32.mrf.mxu1 }
 0x172   :  { %v918_v11 = vpop.f32.mrf.mxu0  ;;  %v9859_v53 = vadd.f32 %v1128_v19, %v903_v40 }
 0x173   :  { %v919_v8 = vadd.f32 %v918_v11, %v9501_v46  ;;  %v9862_v34 = vpop.f32.mrf.mxu1 }
 0x174   :  { %v9864_v42 = vpop.f32.mrf.mxu0 }
 0x175   :  { %v1137_v62 = vpop.f32.mrf.mxu1 }
 0x176   :  { %v926_v33 = vpop.f32.mrf.mxu0  ;;  %v9866_v58 = vadd.f32 %v1137_v62, %v911_v45 }
 0x177   :  { %v927_v61 = vadd.f32 %v926_v33, %v9537_v55  ;;  %v9869_v50 = vpop.f32.mrf.mxu1 }
 0x178   :  { %v9871_v41 = vpop.f32.mrf.mxu0 }
 0x179   :  { %v1146_v12 = vpop.f32.mrf.mxu1 }
 0x17a   :  { %v934_v0 = vpop.f32.mrf.mxu0  ;;  %v9873_v40 = vadd.f32 %v1146_v12, %v919_v8 }
 0x17b   :  { %v935_v46 = vadd.f32 %v934_v0, %v9569_v6  ;;  %v9876_v19 = vpop.f32.mrf.mxu1 }
 0x17c   :  { %v9878_v11 = vpop.f32.mrf.mxu0 }
 0x17d   :  { %15601 = vst [vmem:[#allocation152_spill] sm:$0xff] %v9878_v11  ;;  %v1155_v56 = vpop.f32.mrf.mxu1 }
 0x17e   :  { %v942_v2 = vpop.f32.mrf.mxu0  ;;  %v9880_v62 = vadd.f32 %v1155_v56, %v927_v61 }
 0x17f   :  { %v943_v55 = vadd.f32 %v942_v2, %v9602_v47  ;;  %v9883_v45 = vpop.f32.mrf.mxu1 }
 0x180   :  { %15602 = vst [vmem:[#allocation153_spill] sm:$0xff] %v9880_v62  ;;  %v9885_v33 = vpop.f32.mrf.mxu0 }
 0x181   :  { %15603 = vst [vmem:[#allocation154_spill] sm:$0xff] %v9885_v33  ;;  %v1164_v13 = vpop.f32.mrf.mxu1 }
 0x182   :  { %v950_v32 = vpop.f32.mrf.mxu0  ;;  %v9887_v12 = vadd.f32 %v1164_v13, %v935_v46 }
 0x183   :  { %v951_v6 = vadd.f32 %v950_v32, %v9633_v24  ;;  %v9890_v0 = vpop.f32.mrf.mxu1 }
 0x184   :  { %15604 = vst [vmem:[#allocation155_spill] sm:$0xff] %v9887_v12  ;;  %15605 = vst [vmem:[#allocation156_spill] sm:$0xff] %v9890_v0  ;;  %v9892_v8 = vpop.f32.mrf.mxu0 }
 0x185   :  { %v1173_v11 = vpop.f32.mrf.mxu1 }
 0x186   :  { %v958_v15 = vpop.f32.mrf.mxu0  ;;  %v9894_v56 = vadd.f32 %v1173_v11, %v943_v55 }
 0x187   :  { %v959_v2 = vadd.f32 %v958_v15, %v9661_v59  ;;  %v9897_v47 = vpop.f32.mrf.mxu1 }
 0x188   :  { %15606 = vst [vmem:[#allocation157_spill] sm:$0xff] %v9894_v56  ;;  %15607 = vst [vmem:[#allocation158_spill] sm:$0xff] %v9897_v47  ;;  %v9899_v61 = vpop.f32.mrf.mxu0 }
 0x189   :  { %v1182_v33 = vpop.f32.mrf.mxu1 }
 0x18a   :  { %v966_v62 = vpop.f32.mrf.mxu0  ;;  %v9901_v13 = vadd.f32 %v1182_v33, %v951_v6 }
 0x18b   :  { %v967_v32 = vadd.f32 %v966_v62, %v9697_v27  ;;  %v9904_v24 = vpop.f32.mrf.mxu1 }
 0x18c   :  { %15608 = vst [vmem:[#allocation159_spill] sm:$0xff] %v9901_v13  ;;  %15609 = vst [vmem:[#allocation160_spill] sm:$0xff] %v9904_v24  ;;  %v9906_v46 = vpop.f32.mrf.mxu0 }
 0x18d   :  { %v1191_v0 = vpop.f32.mrf.mxu1 }
 0x18e   :  { %v974_v12 = vpop.f32.mrf.mxu0  ;;  %v9908_v11 = vadd.f32 %v1191_v0, %v959_v2 }
 0x18f   :  { %v975_v59 = vadd.f32 %v974_v12, %v9726_v9  ;;  %v9911_v15 = vpop.f32.mrf.mxu1 }
 0x190   :  { %15610 = vst [vmem:[#allocation161_spill] sm:$0xff] %v9908_v11  ;;  %15611 = vst [vmem:[#allocation162_spill] sm:$0xff] %v9911_v15  ;;  %v9913_v55 = vpop.f32.mrf.mxu0 }
 0x191   :  { %v1200_v56 = vpop.f32.mrf.mxu1 }
 0x192   :  { %v982_v47 = vpop.f32.mrf.mxu0  ;;  %v9915_v33 = vadd.f32 %v1200_v56, %v967_v32 }
 0x193   :  { %v983_v27 = vadd.f32 %v982_v47, %v9758_v14  ;;  %v9918_v62 = vpop.f32.mrf.mxu1 }
 0x194   :  { %15612 = vst [vmem:[#allocation163_spill] sm:$0xff] %v9915_v33  ;;  %15613 = vst [vmem:[#allocation164_spill] sm:$0xff] %v9918_v62  ;;  %v9920_v6 = vpop.f32.mrf.mxu0 }
 0x195   :  { %v1209_v13 = vpop.f32.mrf.mxu1 }
 0x196   :  { %v990_v24 = vpop.f32.mrf.mxu0  ;;  %v9922_v0 = vadd.f32 %v1209_v13, %v975_v59 }
 0x197   :  { %v991_v9 = vadd.f32 %v990_v24, %v9788_v52  ;;  %v9925_v12 = vpop.f32.mrf.mxu1 }
 0x198   :  { %15614 = vst [vmem:[#allocation165_spill] sm:$0xff] %v9922_v0  ;;  %v9927_v2 = vpop.f32.mrf.mxu0 }
 0x199   :  { %v1218_v11 = vpop.f32.mrf.mxu1 }
 0x19a   :  { %v998_v15 = vpop.f32.mrf.mxu0  ;;  %v9929_v56 = vadd.f32 %v1218_v11, %v983_v27  ;;  %v9944_v11 = vsub.s32 1, %v9080_v30 }
 0x19b   :  { %v999_v14 = vadd.f32 %v998_v15, %v9814_v29  ;;  %v9932_v47 = vpop.f32.mrf.mxu1 }
 0x19c   :  { %15615 = vst [vmem:[#allocation166_spill] sm:$0xff] %v9929_v56  ;;  %v9934_v32 = vpop.f32.mrf.mxu0  ;;  %15618 = vst [vmem:[#allocation169_spill] sm:$0xff] %v9944_v11 }
 0x19d   :  { %15616 = vst [vmem:[#allocation167_spill] sm:$0xff] %v9934_v32  ;;  %v1227_v33 = vpop.f32.mrf.mxu1 }
 0x19e   :  { %v1006_v62 = vpop.f32.mrf.mxu0  ;;  %v9936_v13 = vadd.f32 %v1227_v33, %v991_v9 }
 0x19f   :  { %v1007_v52 = vadd.f32 %v1006_v62, %v9834_v3  ;;  %v9939_v24 = vpop.f32.mrf.mxu1  ;;  %v7897_v3 = vld [vmem:[%s14297_s2] sm:$0x3] }
 0x1a0   :  { %15617 = vst [vmem:[#allocation168_spill] sm:$0xff] %v9936_v13  ;;  %v9941_v59 = vpop.f32.mrf.mxu0  ;;  %v9957_v62 = vrot.slane %v7897_v3, %v9944_v11 }
 0x1a1   :  { %v1236_v0 = vpop.f32.mrf.mxu1 }
 0x1a2   :  { %v1014_v27 = vpop.f32.mrf.mxu0  ;;  %v9946_v29 = vadd.f32 %v1236_v0, %v999_v14 }
 0x1a3   :  { %v1015_v15 = vadd.f32 %v1014_v27, %v9844_v17  ;;  %v9949_v56 = vpop.f32.mrf.mxu1 }
 0x1a4   :  { %15619 = vst [vmem:[#allocation170_spill] sm:$0xff] %v9946_v29  ;;  %15620 = vst [vmem:[#allocation171_spill] sm:$0xff] %v9949_v56  ;;  %v9951_v32 = vpop.f32.mrf.mxu0  ;;  %v266_v29 = vadd.f32 %v9352_v49, %v9957_v62  ;;  %v288_v49 = vadd.f32 %v9456_v21, %v9957_v62  ;;  %v321_v21 = vadd.f32 %v9553_v38, %v9957_v62 }
 0x1a5   :  { %15621 = vst [vmem:[#allocation172_spill] sm:$0xff] %v9951_v32  ;;  %v1245_v33 = vpop.f32.mrf.mxu1 }
 0x1a6   :  { %v1022_v9 = vpop.f32.mrf.mxu0  ;;  %v9959_v30 = vadd.f32 %v1245_v33, %v1007_v52  ;;  %v663_v3 = vadd.f32 %v9445_v31, %v266_v29  ;;  %v310_v29 = vadd.f32 %v9521_v57, %v9957_v62 }
 0x1a7   :  { %v1023_v0 = vadd.f32 %v1022_v9, %v9852_v5  ;;  %v9962_v14 = vpop.f32.mrf.mxu1  ;;  %v277_v5 = vadd.f32 %v9387_v25, %v9957_v62 }
 0x1a8   :  { %15622 = vst [vmem:[#allocation173_spill] sm:$0xff] %v9959_v30  ;;  %v9964_v17 = vpop.f32.mrf.mxu0  ;;  %v905_v33 = vadd.f32 %v9850_v7, %v663_v3  ;;  %v677_v3 = vadd.f32 %v9512_v18, %v288_v49  ;;  %v343_v18 = vadd.f32 %v9619_v22, %v9957_v62  ;;  %v365_v22 = vadd.f32 %v9681_v37, %v9957_v62 }
 0x1a9   :  { %v1254_v27 = vpop.f32.mrf.mxu1  ;;  %v670_v31 = vadd.f32 %v9480_v28, %v277_v5  ;;  %v691_v28 = vadd.f32 %v9575_v35, %v310_v29  ;;  %v387_v37 = vadd.f32 %v9740_v10, %v9957_v62 }
 0x1aa   :  { %v9968_v13 = vadd.f32 %v1254_v27, %v1015_v15  ;;  %v1431_v56 = vpop.f32.mrf.mxu0  ;;  %v299_v15 = vadd.f32 %v9489_v60, %v9957_v62  ;;  %v1131_v25 = vadd.f32 %v9862_v34, %v905_v33  ;;  %v332_v60 = vadd.f32 %v9583_v51, %v9957_v62 }
 0x1ab   :  { %v9970_v32 = vpop.f32.mrf.mxu1  ;;  %v1432_v7 = vadd.f32 %v1431_v56, %v9859_v53  ;;  %v913_v57 = vadd.f32 %v9857_v39, %v670_v31  ;;  %v698_v53 = vadd.f32 %v9609_v4, %v321_v21  ;;  %v712_v4 = vadd.f32 %v9672_v16, %v343_v18 }
 0x1ac   :  { %v1433_v11 = vpop.f32.mrf.mxu0  ;;  %v705_v38 = vadd.f32 %v9642_v26, %v332_v60  ;;  %v376_v31 = vadd.f32 %v9711_v20, %v9957_v62  ;;  %v726_v16 = vadd.f32 %v9732_v63, %v365_v22  ;;  %v740_v10 = vadd.f32 %v9798_v44, %v387_v37 }
 0x1ad   :  { %v1263_v52 = vpop.f32.mrf.mxu1  ;;  %v1434_v5 = vadd.f32 %v1433_v11, %v1131_v25  ;;  %v1140_v56 = vadd.f32 %v9869_v50, %v913_v57 }
 0x1ae   :  { %v9976_v9 = vadd.f32 %v1263_v52, %v1023_v0  ;;  %v1438_v30 = vpop.f32.mrf.mxu0  ;;  %v684_v52 = vadd.f32 %v9546_v54, %v299_v15  ;;  %v354_v54 = vadd.f32 %v9649_v48, %v9957_v62  ;;  %v921_v48 = vadd.f32 %v9864_v42, %v677_v3 }
 0x1af   :  { %v9982_v27 = vpop.f32.mrf.mxu1  ;;  %v1439_v35 = vadd.f32 %v1438_v30, %v9866_v58  ;;  %v398_v3 = vadd.f32 %v9776_v1, %v9957_v62  ;;  %v733_v20 = vadd.f32 %v9766_v23, %v376_v31  ;;  %v15625_v1 = vld [vmem:[#allocation149_spill] sm:$0xff] }
 0x1b0   :  { %15623 = vst [vmem:[#allocation174_spill] sm:$0xff] %v9976_v9  ;;  %v1440_v0 = vpop.f32.mrf.mxu0  ;;  %v719_v49 = vadd.f32 %v9705_v43, %v354_v54  ;;  %v1149_v43 = vadd.f32 %v9876_v19, %v921_v48  ;;  %v929_v63 = vadd.f32 %v9871_v41, %v684_v52  ;;  %v409_v19 = vadd.f32 %v9805_v36, %v9957_v62  ;;  %v15626_v52 = vld [vmem:[#allocation153_spill] sm:$0xff]  ;;  %v15629_v48 = vld [vmem:[#allocation150_spill] sm:$0xff] }
 0x1b1   :  { %v1640_v9 = vpop.f32.mrf.mxu1  ;;  %v1441_v15 = vadd.f32 %v1440_v0, %v1140_v56  ;;  %v431_v23 = vadd.f32 %v15625_v1, %v9957_v62  ;;  %v15635_v1 = vld [vmem:[#allocation158_spill] sm:$0xff] }
 0x1b2   :  { %v1445_v34 = vpop.f32.mrf.mxu0  ;;  %v9997_v33 = vadd.f32 %v1640_v9, %v1432_v7  ;;  %v1158_v44 = vadd.f32 %v9883_v45, %v929_v63  ;;  %v15631_v45 = vld [vmem:[#allocation152_spill] sm:$0xff]  ;;  %v953_v63 = vadd.f32 %v9892_v8, %v705_v38  ;;  %v977_v38 = vadd.f32 %v9913_v55, %v726_v16 }
 0x1b3   :  { %v1642_v51 = vpop.f32.mrf.mxu1  ;;  %v1446_v42 = vadd.f32 %v1445_v34, %v9873_v40  ;;  %v15624_v34 = vld [vmem:[#allocation147_spill] sm:$0xff]  ;;  %v937_v31 = vadd.f32 %v15631_v45, %v691_v28 }
 0x1b4   :  { %v1782_v39 = vmul.f32 0.70710677, %v9997_v33  ;;  %v1447_v11 = vpop.f32.mrf.mxu0  ;;  %v10008_v9 = vadd.f32 %v1642_v51, %v1434_v5  ;;  %v420_v18 = vadd.f32 %v15624_v34, %v9957_v62  ;;  %v15634_v34 = vld [vmem:[#allocation156_spill] sm:$0xff]  ;;  %v1750_v55 = vmul.f32 0.5, %v9997_v33 }
 0x1b5   :  { %v1647_v26 = vpop.f32.mrf.mxu1  ;;  %v1448_v40 = vadd.f32 %v1447_v11, %v1149_v43  ;;  %v15628_v11 = vld [vmem:[#allocation148_spill] sm:$0xff] }
 0x1b6   :  { %7705 = verf.f32 %v1782_v39  ;;  %v1783_v50 = vmul.f32 0.70710677, %v10008_v9  ;;  %v1452_v58 = vpop.f32.mrf.mxu0  ;;  %v10016_v30 = vadd.f32 %v1647_v26, %v1439_v35  ;;  %v15627_v35 = vld [vmem:[#allocation146_spill] sm:$0xff]  ;;  %v754_v22 = vadd.f32 %v15628_v11, %v409_v19  ;;  %v15633_v19 = vld [vmem:[#allocation155_spill] sm:$0xff]  ;;  %v15638_v11 = vld [vmem:[#allocation164_spill] sm:$0xff] }
 0x1b7   :  { %v1649_v29 = vpop.f32.mrf.mxu1  ;;  %v1453_v54 = vadd.f32 %v1452_v58, %v15626_v52  ;;  %v747_v39 = vadd.f32 %v15627_v35, %v398_v3  ;;  %v761_v26 = vadd.f32 %v15629_v48, %v420_v18  ;;  %v961_v3 = vadd.f32 %v9899_v61, %v712_v4  ;;  %v15637_v4 = vld [vmem:[#allocation162_spill] sm:$0xff] }
 0x1b8   :  { %7707 = verf.f32 %v1783_v50  ;;  %v1784_v25 = vmul.f32 0.70710677, %v10016_v30  ;;  %v1454_v7 = vpop.f32.mrf.mxu0  ;;  %v10026_v0 = vadd.f32 %v1649_v29, %v1441_v15  ;;  %v15630_v15 = vld [vmem:[#allocation151_spill] sm:$0xff]  ;;  %v1167_v18 = vadd.f32 %v15634_v34, %v937_v31 }
 0x1b9   :  { %v1654_v21 = vpop.f32.mrf.mxu1  ;;  %v768_v62 = vadd.f32 %v15630_v15, %v431_v23  ;;  %v1455_v37 = vadd.f32 %v1454_v7, %v1158_v44  ;;  %v15636_v44 = vld [vmem:[#allocation160_spill] sm:$0xff]  ;;  %v985_v35 = vadd.f32 %v9920_v6, %v733_v20  ;;  %v15639_v20 = vld [vmem:[#allocation157_spill] sm:$0xff] }
 0x1ba   :  { %v1785_v60 = vmul.f32 0.70710677, %v10026_v0  ;;  %v1459_v57 = vpop.f32.mrf.mxu0  ;;  %v10036_v5 = vadd.f32 %v1654_v21, %v1446_v42  ;;  %7709 = verf.f32 %v1784_v25  ;;  %v15632_v42 = vld [vmem:[#allocation154_spill] sm:$0xff]  ;;  %v10066_v8 = vadd.f32 %v15636_v44, %v953_v63 }
 0x1bb   :  { %v1656_v41 = vpop.f32.mrf.mxu1  ;;  %v945_v25 = vadd.f32 %v15632_v42, %v698_v53  ;;  %v969_v53 = vadd.f32 %v9906_v46, %v719_v49  ;;  %v993_v46 = vadd.f32 %v9927_v2, %v740_v10  ;;  %v10086_v6 = vadd.f32 %v9932_v47, %v985_v35  ;;  %v15640_v10 = vld [vmem:[#allocation167_spill] sm:$0xff] }
 0x1bc   :  { %7711 = verf.f32 %v1785_v60  ;;  %v1786_v36 = vmul.f32 0.70710677, %v10036_v5  ;;  %v1461_v51 = vpop.f32.mrf.mxu0  ;;  %v10045_v56 = vadd.f32 %v1656_v41, %v1448_v40  ;;  %v1460_v40 = vadd.f32 %v1459_v57, %v15633_v19 }
 0x1bd   :  { %v1661_v50 = vpop.f32.mrf.mxu1  ;;  %v1176_v23 = vadd.f32 %v15635_v1, %v945_v25  ;;  %v10070_v57 = vadd.f32 %v15637_v4, %v961_v3  ;;  %v10077_v48 = vadd.f32 %v15638_v11, %v969_v53  ;;  %v1462_v49 = vadd.f32 %v1461_v51, %v1167_v18  ;;  %v15642_v18 = vld [vmem:[#allocation159_spill] sm:$0xff] }
 0x1be   :  { %v1787_v58 = vmul.f32 0.70710677, %v10045_v56  ;;  %v1466_v43 = vpop.f32.mrf.mxu0  ;;  %v10053_v29 = vadd.f32 %v1661_v50, %v1453_v54  ;;  %7713 = verf.f32 %v1786_v36  ;;  %v1001_v51 = vadd.f32 %v15640_v10, %v747_v39 }
 0x1bf   :  { %v1663_v21 = vpop.f32.mrf.mxu1  ;;  %v10093_v33 = vadd.f32 %v9939_v24, %v993_v46  ;;  %v1025_v34 = vadd.f32 %v9964_v17, %v768_v62  ;;  %v1751_v44 = vmul.f32 0.5, %v10008_v9  ;;  %v1752_v11 = vmul.f32 0.5, %v10016_v30  ;;  %v15645_v30 = vld [vmem:[#allocation161_spill] sm:$0xff] }
 0x1c0   :  { %7715 = verf.f32 %v1787_v58  ;;  %v1788_v60 = vmul.f32 0.70710677, %v10053_v29  ;;  %v1468_v28 = vpop.f32.mrf.mxu0  ;;  %v10060_v7 = vadd.f32 %v1663_v21, %v1455_v37  ;;  %v10083_v37 = vadd.f32 %v9925_v12, %v977_v38  ;;  %v15644_v38 = vld [vmem:[#allocation171_spill] sm:$0xff] }
 0x1c1   :  { %v1668_v61 = vpop.f32.mrf.mxu1  ;;  %v1467_v58 = vadd.f32 %v1466_v43, %v15639_v20  ;;  %v1469_v21 = vadd.f32 %v1468_v28, %v1176_v23  ;;  %v15641_v43 = vld [vmem:[#allocation172_spill] sm:$0xff]  ;;  %v10119_v4 = vadd.f32 %v9982_v27, %v1025_v34  ;;  %v1754_v27 = vmul.f32 0.5, %v10036_v5 }
 0x1c2   :  { %v1789_v41 = vmul.f32 0.70710677, %v10060_v7  ;;  %v1473_v52 = vpop.f32.mrf.mxu0  ;;  %v10073_v54 = vadd.f32 %v1668_v61, %v1460_v40  ;;  %7717 = verf.f32 %v1788_v60  ;;  %v1009_v40 = vadd.f32 %v9941_v59, %v754_v22 }
 0x1c3   :  { %v7706_v36 = vpop.eup %7705  ;;  %v1670_v15 = vpop.f32.mrf.mxu1  ;;  %v1017_v60 = vadd.f32 %v15641_v43, %v761_v26  ;;  %v1474_v39 = vadd.f32 %v1473_v52, %v15642_v18  ;;  %v10108_v59 = vadd.f32 %v15644_v38, %v1001_v51 }
 0x1c4   :  { %v1846_v16 = vadd.f32 1.0, %v7706_v36  ;;  %v1790_v50 = vmul.f32 0.70710677, %v10073_v54  ;;  %v1475_v45 = vpop.f32.mrf.mxu0  ;;  %v10089_v42 = vadd.f32 %v1670_v15, %v1462_v49  ;;  %7719 = verf.f32 %v1789_v41 }
 0x1c5   :  { %v7708_v31 = vpop.eup %7707  ;;  %v1675_v2 = vpop.f32.mrf.mxu1  ;;  %v10111_v22 = vadd.f32 %v9962_v14, %v1009_v40  ;;  %v10114_v17 = vadd.f32 %v9970_v32, %v1017_v60  ;;  %v1753_v14 = vmul.f32 0.5, %v10026_v0  ;;  %v1476_v20 = vadd.f32 %v1475_v45, %v10066_v8 }
 0x1c6   :  { %v1878_v25 = vmul.f32 %v1846_v16, %v1750_v55  ;;  %v1480_v63 = vpop.f32.mrf.mxu0  ;;  %v1847_v3 = vadd.f32 1.0, %v7708_v31  ;;  %7721 = verf.f32 %v1790_v50  ;;  %v1676_v12 = vadd.f32 %v1675_v2, %v1467_v58 }
 0x1c7   :  { %v1677_v19 = vpop.f32.mrf.mxu1  ;;  %v7710_v47 = vpop.eup %7709  ;;  %v1791_v28 = vmul.f32 0.70710677, %v10089_v42  ;;  %v1755_v16 = vmul.f32 0.5, %v10045_v56  ;;  %v1481_v58 = vadd.f32 %v1480_v63, %v15645_v30  ;;  %v1756_v56 = vmul.f32 0.5, %v10053_v29  ;;  %v15657_v30 = vld [vmem:[#allocation35_spill] sm:$0xff] }
 0x1c8   :  { %v10099_v1 = vpop.f32.mrf.mxu0  ;;  %v10101_v53 = vand.u32 4294901760, %v1878_v25  ;;  %v10105_v23 = vadd.f32 %v1677_v19, %v1469_v21  ;;  %v10121_v9 = vmul.f32 %v1847_v3, %v1751_v44  ;;  %v1792_v52 = vmul.f32 0.70710677, %v1676_v12 }
 0x1c9   :  { %v7712_v24 = vpop.eup %7711  ;;  %v1682_v61 = vpop.f32.mrf.mxu1  ;;  %v1848_v46 = vadd.f32 1.0, %v7710_v47  ;;  %7723 = verf.f32 %v1791_v28  ;;  %v10142_v63 = vmul.f32 0.5, %v10060_v7  ;;  %v10145_v47 = vmul.f32 0.5, %v10073_v54  ;;  %v15648_v28 = vld [vmem:[#allocation24_spill] sm:$0xff] }
 0x1ca   :  { %15643 = vst [vmem:[#allocation147_spill] sm:$0xff] %v10101_v53  ;;  %v1487_v26 = vpop.f32.mrf.mxu0  ;;  %v10116_v62 = vadd.f32 %v1682_v61, %v1474_v39  ;;  %v1849_v41 = vadd.f32 1.0, %v7712_v24  ;;  %v1793_v32 = vmul.f32 0.70710677, %v10105_v23  ;;  %v10127_v55 = vsub.f32 %v1878_v25, %v10101_v53  ;;  %v15647_v39 = vld [vmem:[#allocation163_spill] sm:$0xff] }
 0x1cb   :  { %v1684_v36 = vpop.f32.mrf.mxu1  ;;  %v7714_v35 = vpop.eup %7713  ;;  %7725 = verf.f32 %v1792_v52  ;;  %v10137_v25 = vand.u32 4294901760, %v10121_v9  ;;  %v1880_v3 = vmul.f32 %v1848_v46, %v1752_v11  ;;  %v10153_v29 = vmul.f32 0.5, %v10089_v42 }
 0x1cc   :  { %v1489_v49 = vpop.f32.mrf.mxu0  ;;  %v1794_v0 = vmul.f32 0.70710677, %v10116_v62  ;;  %v10134_v10 = vmul.f32 %v1849_v41, %v1753_v14  ;;  %v1850_v51 = vadd.f32 1.0, %v7714_v35  ;;  %7727 = verf.f32 %v1793_v32  ;;  %v15651_v35 = vld [vmem:[#allocation26_spill] sm:$0xff]  ;;  %v15652_v32 = vld [vmem:[#allocation28_spill] sm:$0xff] }
 0x1cd   :  { %v7716_v15 = vpop.eup %7715  ;;  %v1689_v50 = vpop.f32.mrf.mxu1  ;;  %15646 = vst [vmem:[#allocation149_spill] sm:$0xff] %v10137_v25  ;;  %v1685_v21 = vadd.f32 %v1684_v36, %v1476_v20  ;;  %v14747_v45 = vand.u32 4294901760, %v10127_v55  ;;  %2756 = vmatprep.mubr.f32.mxu1 %v10137_v25  ;;  %v10155_v34 = vmul.f32 0.5, %v1676_v12  ;;  %v1488_v24 = vadd.f32 %v1487_v26, %v15647_v39 }
 0x1ce   :  { %v1851_v31 = vadd.f32 1.0, %v7716_v15  ;;  %v1494_v2 = vpop.f32.mrf.mxu0  ;;  %v10148_v40 = vadd.f32 %v1689_v50, %v1481_v58  ;;  %7729 = verf.f32 %v1794_v0  ;;  %2758 = vmatmul.mubr.f32.vlgmr.msra.gmra.mxu1 %v10101_v53  ;;  %v1882_v54 = vmul.f32 %v1850_v51, %v1754_v27  ;;  %v15654_v50 = vld [vmem:[#allocation31_spill] sm:$0xff] }
 0x1cf   :  { %v1691_v5 = vpop.f32.mrf.mxu1  ;;  %v7718_v8 = vpop.eup %7717  ;;  %3240 = vmatpush1.msra.mxu1 %v15648_v28  ;;  %v10164_v61 = vand.u32 4294901760, %v10134_v10  ;;  %v10166_v12 = vand.u32 4294901760, %v1880_v3  ;;  %v1483_v52 = vadd.f32 %v10099_v1, %v10070_v57  ;;  %v1795_v36 = vmul.f32 0.70710677, %v1685_v21  ;;  %v15653_v1 = vld [vmem:[#allocation165_spill] sm:$0xff]  ;;  %v15658_v51 = vld [vmem:[#allocation39_spill] sm:$0xff] }
 0x1d0   :  { %v1496_v19 = vpop.f32.mrf.mxu0  ;;  %v10150_v60 = vmul.f32 %v1851_v31, %v1755_v16  ;;  %v1796_v44 = vmul.f32 0.70710677, %v10148_v40  ;;  %v1852_v41 = vadd.f32 1.0, %v7718_v8  ;;  %3242 = vmatprep.subr.mxu1 %v15651_v35  ;;  %v10174_v26 = vsub.f32 %v10127_v55, %v14747_v45 }
 0x1d1   :  { %v1696_v43 = vpop.f32.mrf.mxu1  ;;  %v7720_v18 = vpop.eup %7719  ;;  %15649 = vst [vmem:[#allocation153_spill] sm:$0xff] %v10164_v61  ;;  %15650 = vst [vmem:[#allocation146_spill] sm:$0xff] %v10166_v12  ;;  %v10177_v46 = vmul.f32 0.5, %v10105_v23  ;;  %v1490_v14 = vadd.f32 %v1489_v49, %v10077_v48  ;;  %2764 = vmatprep.mubr.f32.mxu1 %v10164_v61  ;;  %3244 = vmatpush1.msra.mxu1 %v15652_v32  ;;  %v1495_v27 = vadd.f32 %v1494_v2, %v15653_v1 }
 0x1d2   :  { %v10158_v7 = vpop.f32.mrf.mxu0  ;;  %v10182_v15 = vadd.f32 %v1696_v43, %v1488_v24  ;;  %7731 = verf.f32 %v1796_v44  ;;  %v1692_v16 = vadd.f32 %v1691_v5, %v1483_v52  ;;  %2766 = vmatmul.mubr.f32.gmra.mxu1 %v10166_v12  ;;  %3246 = vmatprep.subr.mxu1 %v15654_v50  ;;  %v10188_v23 = vand.u32 4294901760, %v10150_v60 }
 0x1d3   :  { %v1698_v42 = vpop.f32.mrf.mxu1  ;;  %v7722_v38 = vpop.eup %7721  ;;  %v10190_v31 = vand.u32 4294901760, %v1882_v54  ;;  %v1853_v48 = vadd.f32 1.0, %v7720_v18  ;;  %3248 = vmatpush1.msra.mxu1 %v15657_v30  ;;  %v1884_v0 = vmul.f32 %v1852_v41, %v1756_v56  ;;  %v10195_v2 = vmul.f32 0.5, %v10116_v62  ;;  %v15659_v62 = vld [vmem:[#allocation45_spill] sm:$0xff] }
 0x1d4   :  { %v1503_v11 = vpop.f32.mrf.mxu0  ;;  %15655 = vst [vmem:[#allocation148_spill] sm:$0xff] %v10188_v23  ;;  %v1854_v49 = vadd.f32 1.0, %v7722_v38  ;;  %v1798_v20 = vmul.f32 0.70710677, %v10182_v15  ;;  %7733 = verf.f32 %v1795_v36  ;;  %3250 = vmatprep.subr.mxu1 %v15658_v51  ;;  %v10200_v5 = vsub.f32 %v10121_v9, %v10137_v25  ;;  %2772 = vmatprep.mubr.f32.mxu1 %v10188_v23  ;;  %v15660_v36 = vld [vmem:[#allocation47_spill] sm:$0xff] }
 0x1d5   :  { %v1703_v57 = vpop.f32.mrf.mxu1  ;;  %15656 = vst [vmem:[#allocation150_spill] sm:$0xff] %v10190_v31  ;;  %v2124_v43 = vand.u32 4294901760, %v10174_v26  ;;  %v10207_v18 = vsub.f32 %v1880_v3, %v10166_v12  ;;  %v10209_v56 = vadd.f32 %v1698_v42, %v1490_v14  ;;  %3252 = vmatpush1.msra.mxu1 %v15659_v62  ;;  %v10214_v38 = vmul.f32 0.5, %v1685_v21  ;;  %v15661_v21 = vld [vmem:[#allocation43_spill] sm:$0xff] }
 0x1d6   :  { %v10203_v8 = vpop.f32.mrf.mxu0  ;;  %v10212_v39 = vadd.f32 %v1703_v57, %v1495_v27  ;;  %v7724_v44 = vpop.eup %7723  ;;  %v1497_v9 = vadd.f32 %v1496_v19, %v10083_v37  ;;  %v1797_v41 = vmul.f32 0.70710677, %v1692_v16  ;;  %v14752_v52 = vand.u32 4294901760, %v10200_v5  ;;  %2774 = vmatmul.mubr.f32.gmra.mxu1 %v10190_v31  ;;  %3254 = vmatprep.subr.mxu1 %v15660_v36  ;;  %v15663_v27 = vld [vmem:[#allocation57_spill] sm:$0xff] }
 0x1d7   :  { %v1705_v58 = vpop.f32.mrf.mxu1  ;;  %v10221_v3 = vsub.f32 %v1882_v54, %v10190_v31  ;;  %v10224_v42 = vmul.f32 %v1853_v48, %v10142_v63  ;;  %v1886_v26 = vmul.f32 %v1854_v49, %v10145_v47  ;;  %7735 = verf.f32 %v1798_v20  ;;  %3256 = vmatpush1.msra.mxu1 %v15661_v21  ;;  %v15664_v20 = vld [vmem:[#allocation166_spill] sm:$0xff] }
 0x1d8   :  { %v7726_v37 = vpop.eup %7725  ;;  %v10228_v19 = vand.u32 4294901760, %v1884_v0  ;;  %v10231_v57 = vmul.f32 0.5, %v10148_v40  ;;  %v2117_v54 = vsub.f32 %v10200_v5, %v14752_v52  ;;  %v1800_v1 = vmul.f32 0.70710677, %v10212_v39  ;;  %v10237_v63 = vpop.f32.mrf.mxu0  ;;  %3258 = vmatprep.subr.mxu1 %v15663_v27  ;;  %v15665_v31 = vld [vmem:[#allocation30_spill] sm:$0xff] }
 0x1d9   :  { %v1710_v24 = vpop.f32.mrf.mxu1  ;;  %v7728_v47 = vpop.eup %7727  ;;  %v1855_v48 = vadd.f32 1.0, %v7724_v44  ;;  %v10240_v49 = vmul.f32 0.5, %v1692_v16  ;;  %v1502_v45 = vadd.f32 %v10158_v7, %v15664_v20  ;;  %v1799_v40 = vmul.f32 0.70710677, %v10209_v56  ;;  %3260 = vmatpush1.msra.mxu1 %v15665_v31  ;;  %v15666_v44 = vld [vmem:[#allocation61_spill] sm:$0xff]  ;;  %v15669_v21 = vld [vmem:[#allocation34_spill] sm:$0xff] }
 0x1da   :  { %15662 = vst [vmem:[#allocation151_spill] sm:$0xff] %v10228_v19  ;;  %7737 = verf.f32 %v1797_v41  ;;  %v1504_v52 = vadd.f32 %v1503_v11, %v10086_v6  ;;  %v2118_v53 = vand.u32 4294901760, %v2117_v54  ;;  %v10251_v25 = vsub.f32 %v10134_v10, %v10164_v61  ;;  %3262 = vmatprep.subr.mxu1 %v15666_v44  ;;  %v10265_v11 = vpop.f32.mrf.mxu0  ;;  %v15670_v61 = vld [vmem:[#allocation62_spill] sm:$0xff]  ;;  %v15677_v44 = vld [vmem:[#allocation68_spill] sm:$0xff] }
 0x1db   :  { %v1712_v14 = vpop.f32.mrf.mxu1  ;;  %v7730_v16 = vpop.eup %7729  ;;  %v10254_v27 = vand.u32 4294901760, %v1886_v26  ;;  %v1856_v7 = vadd.f32 1.0, %v7726_v37  ;;  %v10256_v20 = vadd.f32 %v1705_v58, %v1497_v9  ;;  %v10259_v31 = vand.u32 4294901760, %v10224_v42  ;;  %3264 = vmatpush1.msra.mxu1 %v15669_v21 }
 0x1dc   :  { %v1857_v6 = vadd.f32 1.0, %v7728_v47  ;;  %2119 = vmatprep.mubr.f32.mxu0 %v2118_v53  ;;  %7739 = verf.f32 %v1800_v1  ;;  %v14759_v10 = vand.u32 4294901760, %v10251_v25  ;;  %v14760_v54 = vand.u32 4294901760, %v10207_v18  ;;  %3266 = vmatprep.subr.mxu1 %v15670_v61  ;;  %v15671_v1 = vld [vmem:[#allocation27_spill] sm:$0xff]  ;;  %v15674_v61 = vld [vmem:[#allocation29_spill] sm:$0xff]  ;;  %v1517_v21 = vpop.f32.mrf.mxu0 }
 0x1dd   :  { %v10246_v12 = vpop.f32.mrf.mxu1  ;;  %15667 = vst [vmem:[#allocation152_spill] sm:$0xff] %v10254_v27  ;;  %15668 = vst [vmem:[#allocation154_spill] sm:$0xff] %v10259_v31  ;;  %v10270_v58 = vsub.f32 %v1884_v0, %v10228_v19  ;;  %v10273_v9 = vmul.f32 %v1855_v48, %v10153_v29  ;;  %7741 = verf.f32 %v1799_v40  ;;  %2125 = vmatmul.mubr.f32.vlgmr.msra.gmra.mxu0 %v2124_v43  ;;  %2780 = vmatprep.mubr.f32.mxu1 %v10259_v31  ;;  %v15673_v40 = vld [vmem:[#allocation168_spill] sm:$0xff] }
 0x1de   :  { %v10276_v53 = vadd.f32 %v1710_v24, %v1502_v45  ;;  %v1858_v37 = vadd.f32 1.0, %v7730_v16  ;;  %2889 = vmatpush1.msra.mxu0 %v15671_v1  ;;  %v2133_v47 = vsub.f32 %v10251_v25, %v14759_v10  ;;  %v2139_v0 = vsub.f32 %v10207_v18, %v14760_v54  ;;  %2782 = vmatmul.mubr.f32.gmra.mxu1 %v10228_v19  ;;  %v15675_v54 = vld [vmem:[#allocation38_spill] sm:$0xff]  ;;  %v15678_v1 = vld [vmem:[#allocation37_spill] sm:$0xff] }
 0x1df   :  { %v10262_v41 = vpop.f32.mrf.mxu1  ;;  %v10286_v29 = vadd.f32 %v1712_v14, %v1504_v52  ;;  %v7732_v48 = vpop.eup %7731  ;;  %v10291_v45 = vsub.f32 %v1886_v26, %v10254_v27  ;;  %v10294_v24 = vmul.f32 0.5, %v10182_v15  ;;  %v1509_v16 = vadd.f32 %v10203_v8, %v15673_v40  ;;  %2892 = vmatprep.subr.mxu0 %v15674_v61  ;;  %3268 = vmatpush1.msra.mxu1 %v15675_v54  ;;  %v15676_v15 = vld [vmem:[#allocation33_spill] sm:$0xff] }
 0x1e0   :  { %v1801_v10 = vmul.f32 0.70710677, %v10256_v20  ;;  %v1888_v52 = vmul.f32 %v1856_v7, %v10155_v34  ;;  %v10303_v14 = vmul.f32 %v1857_v6, %v10177_v46  ;;  %v10306_v26 = vmul.f32 0.5, %v10209_v56  ;;  %2895 = vmatpush1.msra.mxu0 %v15676_v15  ;;  %3270 = vmatprep.subr.mxu1 %v15677_v44  ;;  %v15680_v56 = vld [vmem:[#allocation48_spill] sm:$0xff] }
 0x1e1   :  { %v10288_v43 = vpop.f32.mrf.mxu1  ;;  %15672 = vst [vmem:[#allocation155_spill] sm:$0xff] %v10291_v45  ;;  %v2134_v19 = vand.u32 4294901760, %v2133_v47  ;;  %v7734_v8 = vpop.eup %7733  ;;  %v1802_v40 = vmul.f32 0.70710677, %v10276_v53  ;;  %v2140_v61 = vand.u32 4294901760, %v2139_v0  ;;  %2898 = vmatprep.subr.mxu0 %v15678_v1  ;;  %v10314_v34 = vsub.f32 %v10150_v60, %v10188_v23  ;;  %3272 = vmatpush1.msra.mxu1 %v15680_v56  ;;  %v15681_v47 = vld [vmem:[#allocation17_spill] sm:$0xff] }
 0x1e2   :  { %v10317_v46 = vand.u32 4294901760, %v10273_v9  ;;  %v1890_v7 = vmul.f32 %v1858_v37, %v10195_v2  ;;  %v1860_v6 = vadd.f32 1.0, %v7732_v48  ;;  %2901 = vmatpush1.msra.mxu0 %v15681_v47  ;;  %v1803_v44 = vmul.f32 0.70710677, %v10286_v29  ;;  %v15682_v23 = vld [vmem:[#allocation41_spill] sm:$0xff]  ;;  %v15692_v15 = vld [vmem:[#allocation32_spill] sm:$0xff] }
 0x1e3   :  { %2135 = vmatprep.mubr.f32.mxu0 %v2134_v19  ;;  %v10324_v54 = vpop.f32.mrf.mxu1  ;;  %v10327_v60 = vmul.f32 0.5, %v10212_v39  ;;  %7743 = verf.f32 %v1801_v10  ;;  %2904 = vmatprep.subr.mxu0 %v15682_v23  ;;  %v10332_v2 = vadd.f32 %v10246_v12, %v1509_v16  ;;  %v10334_v37 = vand.u32 4294901760, %v1888_v52  ;;  %v15684_v39 = vld [vmem:[#allocation18_spill] sm:$0xff]  ;;  %v10340_v10 = vpop.f32.mrf.mxu0 }
 0x1e4   :  { %15679 = vst [vmem:[#allocation156_spill] sm:$0xff] %v10317_v46  ;;  %2141 = vmatmul.mubr.f32.gmra.mxu0 %v2140_v61  ;;  %v7736_v19 = vpop.eup %7735  ;;  %v1859_v48 = vadd.f32 1.0, %v7734_v8  ;;  %v1511_v0 = vadd.f32 %v10237_v63, %v10093_v33  ;;  %2788 = vmatprep.mubr.f32.mxu1 %v10317_v46  ;;  %v15685_v61 = vand.u32 4294901760, %v10221_v3  ;;  %v10346_v12 = vmul.f32 0.5, %v10256_v20  ;;  %v15687_v33 = vld [vmem:[#allocation55_spill] sm:$0xff]  ;;  %v15690_v20 = vld [vmem:[#allocation58_spill] sm:$0xff] }
 0x1e5   :  { %15683 = vst [vmem:[#allocation158_spill] sm:$0xff] %v10334_v37  ;;  %2907 = vmatpush1.msra.mxu0 %v15684_v39  ;;  %7745 = verf.f32 %v1802_v40  ;;  %v15686_v16 = vand.u32 4294901760, %v10314_v34  ;;  %2790 = vmatmul.mubr.f32.gmra.mxu1 %v10254_v27  ;;  %v10354_v63 = vand.u32 4294901760, %v10303_v14  ;;  %v10356_v39 = vand.u32 4294901760, %v1890_v7 }
 0x1e6   :  { %v2155_v56 = vsub.f32 %v10221_v3, %v15685_v61  ;;  %2910 = vmatprep.subr.mxu0 %v15687_v33  ;;  %v10359_v23 = vmul.f32 %v1860_v6, %v10231_v57  ;;  %7747 = verf.f32 %v1803_v44  ;;  %v10363_v40 = vadd.f32 %v10262_v41, %v1511_v0  ;;  %v15691_v61 = vld [vmem:[#allocation49_spill] sm:$0xff]  ;;  %v1524_v0 = vpop.f32.mrf.mxu0 }
 0x1e7   :  { %v2149_v8 = vsub.f32 %v10314_v34, %v15686_v16  ;;  %15688 = vst [vmem:[#allocation160_spill] sm:$0xff] %v10354_v63  ;;  %15689 = vst [vmem:[#allocation162_spill] sm:$0xff] %v10356_v39  ;;  %2913 = vmatpush1.msra.mxu0 %v15690_v20  ;;  %3274 = vmatprep.subr.mxu1 %v15691_v61  ;;  %v10366_v16 = vpop.f32.mrf.mxu1  ;;  %v7738_v27 = vpop.eup %7737  ;;  %v1862_v33 = vadd.f32 1.0, %v7736_v19  ;;  %v1804_v1 = vmul.f32 0.70710677, %v10332_v2  ;;  %v15694_v61 = vld [vmem:[#allocation42_spill] sm:$0xff] }
 0x1e8   :  { %2916 = vmatprep.subr.mxu0 %v15692_v15  ;;  %v10372_v57 = vsub.f32 %v10224_v42, %v10259_v31  ;;  %2796 = vmatprep.mubr.f32.mxu1 %v10354_v63  ;;  %v10376_v44 = vsub.f32 %v1888_v52, %v10334_v37  ;;  %v10379_v41 = vmul.f32 %v1859_v48, %v10214_v38  ;;  %v2156_v6 = vand.u32 4294901760, %v2155_v56  ;;  %v15695_v20 = vld [vmem:[#allocation170_spill] sm:$0xff] }
 0x1e9   :  { %v2150_v47 = vand.u32 4294901760, %v2149_v8  ;;  %v1805_v19 = vmul.f32 0.70710677, %v10363_v40  ;;  %v15693_v8 = vld [vmem:[#allocation20_spill] sm:$0xff]  ;;  %3276 = vmatpush1.msra.mxu1 %v15694_v61  ;;  %v7740_v15 = vpop.eup %7739  ;;  %v1516_v42 = vadd.f32 %v10265_v11, %v15695_v20  ;;  %v10387_v31 = vmul.f32 0.5, %v10276_v53  ;;  %v1733_v53 = vpop.f32.mrf.mxu1 }
 0x1ea   :  { %2919 = vmatpush1.msra.mxu0 %v15693_v8  ;;  %v1518_v52 = vadd.f32 %v1517_v21, %v10108_v59  ;;  %v14771_v38 = vand.u32 4294901760, %v10372_v57  ;;  %2798 = vmatmul.mubr.f32.gmra.mxu1 %v10334_v37  ;;  %v7742_v56 = vpop.eup %7741  ;;  %v10393_v48 = vsub.f32 %v1890_v7, %v10356_v39  ;;  %v1861_v8 = vadd.f32 1.0, %v7738_v27  ;;  %v15696_v11 = vld [vmem:[#allocation36_spill] sm:$0xff]  ;;  %v15698_v7 = vld [vmem:[#allocation50_spill] sm:$0xff] }
 0x1eb   :  { %2151 = vmatprep.mubr.f32.mxu0 %v2150_v47  ;;  %7749 = verf.f32 %v1805_v19  ;;  %v14772_v61 = vand.u32 4294901760, %v10270_v58  ;;  %2922 = vmatprep.subr.mxu0 %v15696_v11  ;;  %v10398_v20 = vand.u32 4294901760, %v10359_v23  ;;  %v10401_v59 = vmul.f32 %v1862_v33, %v10294_v24  ;;  %v15699_v27 = vld [vmem:[#allocation22_spill] sm:$0xff]  ;;  %v15700_v37 = vld [vmem:[#allocation52_spill] sm:$0xff] }
 0x1ec   :  { %2157 = vmatmul.mubr.f32.gmra.mxu0 %v2156_v6  ;;  %7751 = verf.f32 %v1804_v1  ;;  %v2165_v21 = vsub.f32 %v10372_v57, %v14771_v38  ;;  %3278 = vmatprep.subr.mxu1 %v15698_v7  ;;  %v1864_v47 = vadd.f32 1.0, %v7740_v15  ;;  %v1529_v6 = vpop.f32.mrf.mxu0  ;;  %v10413_v24 = vadd.f32 %v10324_v54, %v1518_v52  ;;  %v15701_v1 = vld [vmem:[#allocation65_spill] sm:$0xff]  ;;  %v15703_v15 = vld [vmem:[#allocation54_spill] sm:$0xff] }
 0x1ed   :  { %15697 = vst [vmem:[#allocation164_spill] sm:$0xff] %v10398_v20  ;;  %2925 = vmatpush1.msra.mxu0 %v15699_v27  ;;  %v2171_v19 = vsub.f32 %v10270_v58, %v14772_v61  ;;  %3280 = vmatpush1.msra.mxu1 %v15700_v37  ;;  %v10417_v33 = vand.u32 4294901760, %v10379_v41  ;;  %v1863_v38 = vadd.f32 1.0, %v7742_v56  ;;  %v10420_v27 = vadd.f32 %v10288_v43, %v1516_v42  ;;  %v15704_v37 = vld [vmem:[#allocation67_spill] sm:$0xff]  ;;  %v15705_v52 = vld [vmem:[#allocation173_spill] sm:$0xff]  ;;  %v10436_v42 = vpop.f32.mrf.mxu1 }
 0x1ee   :  { %2928 = vmatprep.subr.mxu0 %v15701_v1  ;;  %v2166_v7 = vand.u32 4294901760, %v2165_v21  ;;  %3282 = vmatprep.subr.mxu1 %v15703_v15  ;;  %v10425_v61 = vsub.f32 %v10273_v9, %v10317_v46  ;;  %v10429_v54 = vmul.f32 0.5, %v10286_v29  ;;  %v1523_v1 = vadd.f32 %v10340_v10, %v15705_v52  ;;  %v15706_v43 = vld [vmem:[#allocation59_spill] sm:$0xff] }
 0x1ef   :  { %15702 = vst [vmem:[#allocation157_spill] sm:$0xff] %v10417_v33  ;;  %2931 = vmatpush1.msra.mxu0 %v15704_v37  ;;  %v2172_v11 = vand.u32 4294901760, %v2171_v19  ;;  %v1807_v56 = vmul.f32 0.70710677, %v10413_v24  ;;  %2804 = vmatprep.mubr.f32.mxu1 %v10417_v33  ;;  %v10439_v9 = vmul.f32 %v1861_v8, %v10240_v49  ;;  %v10442_v21 = vmul.f32 0.5, %v10332_v2  ;;  %v1531_v8 = vpop.f32.mrf.mxu0 }
 0x1f0   :  { %3284 = vmatpush1.msra.mxu1 %v15706_v43  ;;  %2167 = vmatprep.mubr.f32.mxu0 %v2166_v7  ;;  %v7744_v19 = vpop.eup %7743  ;;  %v10449_v52 = vsub.f32 %v10359_v23, %v10398_v20  ;;  %v10452_v46 = vand.u32 4294901760, %v10401_v59  ;;  %v1896_v49 = vmul.f32 %v1864_v47, %v10327_v60  ;;  %v1525_v2 = vadd.f32 %v1524_v0, %v10111_v22  ;;  %v15708_v7 = vld [vmem:[#allocation40_spill] sm:$0xff]  ;;  %v15714_v47 = vld [vmem:[#allocation46_spill] sm:$0xff] }
 0x1f1   :  { %2806 = vmatmul.mubr.f32.gmra.mxu1 %v10356_v39  ;;  %2173 = vmatmul.mubr.f32.gmra.mxu0 %v2172_v11  ;;  %v10458_v10 = vmul.f32 %v1863_v38, %v10306_v26  ;;  %v1806_v29 = vmul.f32 0.70710677, %v10420_v27  ;;  %v15709_v39 = vand.u32 4294901760, %v10425_v61  ;;  %v15710_v43 = vand.u32 4294901760, %v10291_v45  ;;  %v15711_v60 = vld [vmem:[#allocation64_spill] sm:$0xff]  ;;  %v15713_v26 = vld [vmem:[#allocation66_spill] sm:$0xff] }
 0x1f2   :  { %15707 = vst [vmem:[#allocation167_spill] sm:$0xff] %v10452_v46  ;;  %2934 = vmatprep.subr.mxu0 %v15708_v7  ;;  %3286 = vmatprep.subr.mxu1 %v15711_v60  ;;  %v15712_v22 = vld [vmem:[#allocation44_spill] sm:$0xff]  ;;  %v7746_v0 = vpop.eup %7745  ;;  %v10470_v11 = vmul.f32 0.5, %v10363_v40  ;;  %7753 = verf.f32 %v1807_v56  ;;  %v10473_v38 = vadd.f32 %v1733_v53, %v1525_v2  ;;  %v1865_v60 = vadd.f32 1.0, %v7744_v19  ;;  %v15717_v56 = vld [vmem:[#allocation51_spill] sm:$0xff]  ;;  %v1536_v2 = vpop.f32.mrf.mxu0 }
 0x1f3   :  { %v2181_v23 = vsub.f32 %v10425_v61, %v15709_v39  ;;  %v2187_v37 = vsub.f32 %v10291_v45, %v15710_v43  ;;  %2937 = vmatpush1.msra.mxu0 %v15712_v22  ;;  %3288 = vmatpush1.msra.mxu1 %v15713_v26  ;;  %v10478_v39 = vsub.f32 %v10303_v14, %v10354_v63  ;;  %v1740_v43 = vpop.f32.mrf.mxu1  ;;  %v7748_v7 = vpop.eup %7747  ;;  %v15715_v45 = vld [vmem:[#allocation69_spill] sm:$0xff]  ;;  %v10483_v40 = vand.u32 4294901760, %v10439_v9  ;;  %v15719_v19 = vld [vmem:[#allocation71_spill] sm:$0xff] }
 0x1f4   :  { %2940 = vmatprep.subr.mxu0 %v15714_v47  ;;  %v1532_v22 = vadd.f32 %v1531_v8, %v10114_v17  ;;  %3290 = vmatprep.subr.mxu1 %v15715_v45  ;;  %v10486_v53 = vand.u32 4294901760, %v1896_v49  ;;  %v10489_v47 = vadd.f32 %v10366_v16, %v1523_v1  ;;  %v1809_v63 = vmul.f32 0.70710677, %v10473_v38  ;;  %v15720_v17 = vld [vmem:[#allocation53_spill] sm:$0xff] }
 0x1f5   :  { %v2182_v15 = vand.u32 4294901760, %v2181_v23  ;;  %15716 = vst [vmem:[#allocation172_spill] sm:$0xff] %v10483_v40  ;;  %2943 = vmatpush1.msra.mxu0 %v15717_v56  ;;  %v2188_v14 = vand.u32 4294901760, %v2187_v37  ;;  %3292 = vmatpush1.msra.mxu1 %v15719_v19  ;;  %v1530_v8 = vadd.f32 %v1529_v6, %v9968_v13  ;;  %7755 = verf.f32 %v1806_v29  ;;  %v1745_v6 = vpop.f32.mrf.mxu1  ;;  %v15727_v26 = vld [vmem:[#allocation77_spill] sm:$0xff] }
 0x1f6   :  { %15718 = vst [vmem:[#allocation159_spill] sm:$0xff] %v10486_v53  ;;  %2946 = vmatprep.subr.mxu0 %v15720_v17  ;;  %v14785_v23 = vand.u32 4294901760, %v10478_v39  ;;  %2812 = vmatprep.mubr.f32.mxu1 %v10483_v40  ;;  %v14786_v56 = vand.u32 4294901760, %v10376_v44  ;;  %v1866_v45 = vadd.f32 1.0, %v7746_v0  ;;  %v10499_v37 = vadd.f32 %v1740_v43, %v1532_v22  ;;  %v15723_v43 = vld [vmem:[#allocation56_spill] sm:$0xff] }
 0x1f7   :  { %2183 = vmatprep.mubr.f32.mxu0 %v2182_v15  ;;  %2814 = vmatmul.mubr.f32.gmra.mxu1 %v10398_v20  ;;  %v10503_v16 = vsub.f32 %v10379_v41, %v10417_v33  ;;  %v10506_v13 = vand.u32 4294901760, %v10458_v10  ;;  %v10510_v15 = vsub.f32 %v10401_v59, %v10452_v46  ;;  %v1867_v29 = vadd.f32 1.0, %v7748_v7  ;;  %v15722_v41 = vld [vmem:[#allocation73_spill] sm:$0xff]  ;;  %v1538_v33 = vpop.f32.mrf.mxu0  ;;  %v15725_v17 = vld [vmem:[#allocation60_spill] sm:$0xff] }
 0x1f8   :  { %2189 = vmatmul.mubr.f32.gmra.mxu0 %v2188_v14  ;;  %v7750_v1 = vpop.eup %7749  ;;  %v2197_v0 = vsub.f32 %v10478_v39, %v14785_v23  ;;  %v2203_v22 = vsub.f32 %v10376_v44, %v14786_v56  ;;  %3294 = vmatprep.subr.mxu1 %v15722_v41  ;;  %v10521_v20 = vsub.f32 %v1896_v49, %v10486_v53  ;;  %v1808_v7 = vmul.f32 0.70710677, %v10489_v47  ;;  %v15724_v23 = vld [vmem:[#allocation75_spill] sm:$0xff]  ;;  %v15726_v56 = vld [vmem:[#allocation174_spill] sm:$0xff] }
 0x1f9   :  { %15721 = vst [vmem:[#allocation171_spill] sm:$0xff] %v10506_v13  ;;  %2949 = vmatpush1.msra.mxu0 %v15723_v43  ;;  %v7752_v14 = vpop.eup %7751  ;;  %v10524_v59 = vmul.f32 %v1865_v60, %v10346_v12  ;;  %7757 = verf.f32 %v1809_v63  ;;  %3296 = vmatpush1.msra.mxu1 %v15724_v23  ;;  %v1537_v19 = vadd.f32 %v1536_v2, %v15726_v56  ;;  %v14787_v49 = vand.u32 4294901760, %v10503_v16  ;;  %v15729_v56 = vld [vmem:[#allocation80_spill] sm:$0xff]  ;;  %v1747_v2 = vpop.f32.mrf.mxu1 }
 0x1fa   :  { %2952 = vmatprep.subr.mxu0 %v15725_v17  ;;  %v2198_v41 = vand.u32 4294901760, %v2197_v0  ;;  %v10531_v43 = vadd.f32 %v10436_v42, %v1530_v8  ;;  %3298 = vmatprep.subr.mxu1 %v15727_v26  ;;  %v10537_v12 = vmul.f32 %v1866_v45, %v10387_v31  ;;  %v1869_v63 = vadd.f32 1.0, %v7750_v1  ;;  %v15728_v17 = vld [vmem:[#allocation63_spill] sm:$0xff] }
 0x1fb   :  { %2820 = vmatprep.mubr.f32.mxu1 %v10506_v13  ;;  %v2204_v60 = vand.u32 4294901760, %v2203_v22  ;;  %v1811_v23 = vmul.f32 0.70710677, %v10499_v37  ;;  %2955 = vmatpush1.msra.mxu0 %v15728_v17  ;;  %v1899_v42 = vmul.f32 %v1867_v29, %v10429_v54  ;;  %v1539_v8 = vadd.f32 %v1538_v33, %v10119_v4  ;;  %v15730_v1 = vld [vmem:[#allocation19_spill] sm:$0xff] }
 0x1fc   :  { %3300 = vmatpush1.msra.mxu1 %v15729_v56  ;;  %2199 = vmatprep.mubr.f32.mxu0 %v2198_v41  ;;  %v2213_v0 = vsub.f32 %v10503_v16, %v14787_v49  ;;  %v14792_v31 = vand.u32 4294901760, %v10393_v48  ;;  %v1868_v45 = vadd.f32 1.0, %v7752_v14  ;;  %7759 = verf.f32 %v1808_v7  ;;  %v15732_v41 = vld [vmem:[#allocation81_spill] sm:$0xff]  ;;  %v15733_v14 = vld [vmem:[#allocation70_spill] sm:$0xff]  ;;  %v15734_v49 = vld [vmem:[#allocation83_spill] sm:$0xff] }
 0x1fd   :  { %2822 = vmatmul.mubr.f32.gmra.mxu1 %v10452_v46  ;;  %2205 = vmatmul.mubr.f32.gmra.mxu0 %v2204_v60  ;;  %v10552_v22 = vsub.f32 %v10439_v9, %v10483_v40  ;;  %v10555_v4 = vand.u32 4294901760, %v10524_v59  ;;  %v1810_v33 = vmul.f32 0.70710677, %v10531_v43  ;;  %v10563_v7 = vadd.f32 %v1747_v2, %v1539_v8  ;;  %v15735_v46 = vld [vmem:[#allocation72_spill] sm:$0xff]  ;;  %v15740_v8 = vld [vmem:[#allocation87_spill] sm:$0xff] }
 0x1fe   :  { %2958 = vmatprep.subr.mxu0 %v15730_v1  ;;  %v2214_v54 = vand.u32 4294901760, %v2213_v0  ;;  %v2219_v29 = vsub.f32 %v10393_v48, %v14792_v31  ;;  %3302 = vmatprep.subr.mxu1 %v15732_v41  ;;  %v10566_v60 = vmul.f32 %v1869_v63, %v10470_v11  ;;  %v1775_v9 = vmul.f32 0.5, %v10413_v24 }
 0x1ff   :  { %15731 = vst [vmem:[#allocation161_spill] sm:$0xff] %v10555_v4  ;;  %2961 = vmatpush1.msra.mxu0 %v15733_v14  ;;  %7761 = verf.f32 %v1811_v23  ;;  %3304 = vmatpush2.msra.mxu1 %v15734_v49  ;;  %v14793_v0 = vand.u32 4294901760, %v10552_v22  ;;  %v7754_v40 = vpop.eup %7753  ;;  %v10572_v31 = vadd.f32 %v1745_v6, %v1537_v19  ;;  %v15736_v14 = vld [vmem:[#allocation85_spill] sm:$0xff]  ;;  %v14796_v2 = vand.u32 4294901760, %v10449_v52  ;;  %v15738_v6 = vld [vmem:[#allocation74_spill] sm:$0xff] }
 0x200   :  { %2964 = vmatprep.subr.mxu0 %v15735_v46  ;;  %2215 = vmatprep.mubr.f32.mxu0 %v2214_v54  ;;  %v2220_v41 = vand.u32 4294901760, %v2219_v29  ;;  %v10578_v11 = vsub.f32 %v10458_v10, %v10506_v13  ;;  %v10581_v24 = vand.u32 4294901760, %v10537_v12  ;;  %v10584_v23 = vmul.f32 %v1868_v45, %v10442_v21  ;;  %v15741_v13 = vld [vmem:[#allocation76_spill] sm:$0xff] }
 0x201   :  { %3306 = vmatprep.subr.mxu1 %v15736_v14  ;;  %v2229_v19 = vsub.f32 %v10552_v22, %v14793_v0  ;;  %2828 = vmatprep.mubr.f32.mxu1 %v10555_v4  ;;  %v10591_v63 = vand.u32 4294901760, %v1899_v42  ;;  %7763 = verf.f32 %v1810_v33  ;;  %v1813_v10 = vmul.f32 0.70710677, %v10563_v7  ;;  %v15742_v14 = vld [vmem:[#allocation89_spill] sm:$0xff]  ;;  %v15745_v33 = vld [vmem:[#allocation90_spill] sm:$0xff] }
 0x202   :  { %15737 = vst [vmem:[#allocation163_spill] sm:$0xff] %v10581_v24  ;;  %2967 = vmatpush1.msra.mxu0 %v15738_v6  ;;  %3308 = vmatpush2.msra.mxu1 %v15740_v8  ;;  %v2235_v21 = vsub.f32 %v10449_v52, %v14796_v2  ;;  %v14801_v45 = vand.u32 4294901760, %v10578_v11  ;;  %v7756_v54 = vpop.eup %7755  ;;  %v1871_v29 = vadd.f32 1.0, %v7754_v40  ;;  %v1812_v8 = vmul.f32 0.70710677, %v10572_v31  ;;  %v15743_v2 = vld [vmem:[#allocation78_spill] sm:$0xff] }
 0x203   :  { %15739 = vst [vmem:[#allocation24_spill] sm:$0xff] %v10591_v63  ;;  %2221 = vmatmul.mubr.f32.gmra.mxu0 %v2220_v41  ;;  %v2230_v0 = vand.u32 4294901760, %v2229_v19  ;;  %2830 = vmatmul.mubr.f32.gmra.mxu1 %v10486_v53  ;;  %v10604_v41 = vsub.f32 %v10524_v59, %v10555_v4  ;;  %v10613_v19 = vand.u32 4294901760, %v10566_v60  ;;  %v15746_v59 = vand.u32 4294901760, %v10510_v15 }
 0x204   :  { %2970 = vmatprep.subr.mxu0 %v15741_v13  ;;  %v2236_v6 = vand.u32 4294901760, %v2235_v21  ;;  %3310 = vmatprep.subr.mxu1 %v15742_v14  ;;  %v2245_v40 = vsub.f32 %v10578_v11, %v14801_v45  ;;  %v10626_v45 = vsub.f32 %v10537_v12, %v10581_v24  ;;  %7765 = verf.f32 %v1813_v10  ;;  %v15750_v10 = vld [vmem:[#allocation82_spill] sm:$0xff] }
 0x205   :  { %2973 = vmatpush1.msra.mxu0 %v15743_v2  ;;  %15744 = vst [vmem:[#allocation26_spill] sm:$0xff] %v10613_v19  ;;  %2231 = vmatprep.mubr.f32.mxu0 %v2230_v0  ;;  %v2251_v53 = vsub.f32 %v10510_v15, %v15746_v59  ;;  %v14804_v21 = vand.u32 4294901760, %v10604_v41  ;;  %v10622_v2 = vsub.f32 %v1899_v42, %v10591_v63  ;;  %v15747_v0 = vld [vmem:[#allocation79_spill] sm:$0xff]  ;;  %v1870_v13 = vadd.f32 1.0, %v7756_v54  ;;  %v15748_v59 = vld [vmem:[#allocation94_spill] sm:$0xff] }
 0x206   :  { %3312 = vmatpush2.msra.mxu1 %v15745_v33  ;;  %v7758_v14 = vpop.eup %7757  ;;  %2976 = vmatprep.subr.mxu0 %v15747_v0  ;;  %v2246_v33 = vand.u32 4294901760, %v2245_v40  ;;  %v1903_v46 = vmul.f32 %v1871_v29, %v1775_v9  ;;  %v10636_v12 = vand.u32 4294901760, %v10584_v23  ;;  %7767 = verf.f32 %v1812_v8  ;;  %v15751_v29 = vld [vmem:[#allocation95_spill] sm:$0xff]  ;;  %v15752_v40 = vld [vmem:[#allocation84_spill] sm:$0xff] }
 0x207   :  { %2237 = vmatmul.mubr.f32.gmra.mxu0 %v2236_v6  ;;  %3314 = vmatprep.subr.mxu1 %v15748_v59  ;;  %v2261_v42 = vsub.f32 %v10604_v41, %v14804_v21  ;;  %v1774_v6 = vmul.f32 0.5, %v10420_v27  ;;  %v2252_v9 = vand.u32 4294901760, %v2251_v53  ;;  %v1873_v54 = vadd.f32 1.0, %v7758_v14  ;;  %v15754_v14 = vld [vmem:[#allocation97_spill] sm:$0xff] }
 0x208   :  { %2836 = vmatprep.mubr.f32.mxu1 %v10591_v63  ;;  %15749 = vst [vmem:[#allocation28_spill] sm:$0xff] %v10636_v12  ;;  %2247 = vmatprep.mubr.f32.mxu0 %v2246_v33  ;;  %v15753_v21 = vand.u32 4294901760, %v10521_v20  ;;  %v10647_v59 = vsub.f32 %v10566_v60, %v10613_v19  ;;  %v1777_v8 = vmul.f32 0.5, %v10473_v38  ;;  %v15755_v33 = vld [vmem:[#allocation86_spill] sm:$0xff]  ;;  %v10661_v38 = vsub.f32 %v10584_v23, %v10636_v12  ;;  %v15761_v60 = vld [vmem:[#allocation91_spill] sm:$0xff] }
 0x209   :  { %2979 = vmatpush1.msra.mxu0 %v15750_v10  ;;  %3316 = vmatpush2.msra.mxu1 %v15751_v29  ;;  %v2262_v63 = vand.u32 4294901760, %v2261_v42  ;;  %v7760_v27 = vpop.eup %7759  ;;  %v1902_v53 = vmul.f32 %v1870_v13, %v1774_v6  ;;  %v15756_v42 = vand.u32 4294901760, %v10622_v2  ;;  %v15759_v13 = vld [vmem:[#allocation88_spill] sm:$0xff]  ;;  %v1776_v10 = vmul.f32 0.5, %v10489_v47 }
 0x20a   :  { %2982 = vmatprep.subr.mxu0 %v15752_v40  ;;  %v2267_v4 = vsub.f32 %v10521_v20, %v15753_v21  ;;  %2838 = vmatmul.mubr.f32.gmra.mxu1 %v10581_v24  ;;  %v10656_v21 = vand.u32 4294901760, %v1903_v46  ;;  %v1872_v6 = vadd.f32 1.0, %v7760_v27  ;;  %v1905_v24 = vmul.f32 %v1873_v54, %v1777_v8  ;;  %v15765_v47 = vld [vmem:[#allocation92_spill] sm:$0xff] }
 0x20b   :  { %2253 = vmatmul.mubr.f32.gmra.mxu0 %v2252_v9  ;;  %3318 = vmatprep.subr.mxu1 %v15754_v14  ;;  %v2277_v40 = vsub.f32 %v10622_v2, %v15756_v42  ;;  %v15758_v9 = vld [vmem:[#allocation99_spill] sm:$0xff]  ;;  %v10670_v0 = vand.u32 4294901760, %v1902_v53  ;;  %v15764_v54 = vand.u32 4294901760, %v10626_v45 }
 0x20c   :  { %2985 = vmatpush2.msra.mxu0 %v15755_v33  ;;  %15757 = vst [vmem:[#allocation165_spill] sm:$0xff] %v10656_v21  ;;  %v7762_v29 = vpop.eup %7761  ;;  %3320 = vmatpush2.msra.mxu1 %v15758_v9  ;;  %v15760_v33 = vld [vmem:[#allocation101_spill] sm:$0xff]  ;;  %v2268_v14 = vand.u32 4294901760, %v2267_v4  ;;  %v15763_v9 = vld [vmem:[#allocation104_spill] sm:$0xff]  ;;  %v10677_v4 = vsub.f32 %v1903_v46, %v10656_v21  ;;  %v1904_v42 = vmul.f32 %v1872_v6, %v1776_v10  ;;  %v1779_v46 = vmul.f32 0.5, %v10499_v37  ;;  %v15773_v37 = vld [vmem:[#allocation98_spill] sm:$0xff] }
 0x20d   :  { %2988 = vmatprep.subr.mxu0 %v15759_v13  ;;  %3322 = vmatprep.subr.mxu1 %v15760_v33  ;;  %15762 = vst [vmem:[#allocation31_spill] sm:$0xff] %v10670_v0  ;;  %v2278_v27 = vand.u32 4294901760, %v2277_v40  ;;  %v1875_v8 = vadd.f32 1.0, %v7762_v29  ;;  %v15770_v29 = vld [vmem:[#allocation107_spill] sm:$0xff]  ;;  %v10693_v10 = vsub.f32 %v1902_v53, %v10670_v0  ;;  %v1778_v33 = vmul.f32 0.5, %v10531_v43 }
 0x20e   :  { %2263 = vmatprep.mubr.f32.mxu0 %v2262_v63  ;;  %2844 = vmatprep.mubr.f32.mxu1 %v10613_v19  ;;  %v7764_v23 = vpop.eup %7763  ;;  %v2283_v63 = vsub.f32 %v10626_v45, %v15764_v54  ;;  %v15766_v19 = vld [vmem:[#allocation106_spill] sm:$0xff]  ;;  %v15775_v13 = vld [vmem:[#allocation111_spill] sm:$0xff] }
 0x20f   :  { %2991 = vmatpush2.msra.mxu0 %v15761_v60  ;;  %3324 = vmatpush2.msra.mxu1 %v15763_v9  ;;  %v15767_v60 = vld [vmem:[#allocation93_spill] sm:$0xff]  ;;  %v10686_v9 = vand.u32 4294901760, %v1905_v24  ;;  %v1874_v6 = vadd.f32 1.0, %v7764_v23  ;;  %v1907_v54 = vmul.f32 %v1875_v8, %v1779_v46  ;;  %v15776_v23 = vand.u32 4294901760, %v10661_v38  ;;  %v15777_v8 = vld [vmem:[#allocation100_spill] sm:$0xff] }
 0x210   :  { %2269 = vmatmul.mubr.f32.gmra.mxu0 %v2268_v14  ;;  %2846 = vmatmul.mubr.f32.gmra.mxu1 %v10636_v12  ;;  %v15768_v14 = vand.u32 4294901760, %v10647_v59  ;;  %v15771_v12 = vld [vmem:[#allocation96_spill] sm:$0xff] }
 0x211   :  { %2994 = vmatprep.subr.mxu0 %v15765_v47  ;;  %3326 = vmatprep.subr.mxu1 %v15766_v19  ;;  %15769 = vst [vmem:[#allocation35_spill] sm:$0xff] %v10686_v9  ;;  %v7766_v47 = vpop.eup %7765  ;;  %v2284_v19 = vand.u32 4294901760, %v2283_v63  ;;  %v10707_v63 = vsub.f32 %v1905_v24, %v10686_v9  ;;  %v1906_v46 = vmul.f32 %v1874_v6, %v1778_v33  ;;  %v15781_v24 = vld [vmem:[#allocation116_spill] sm:$0xff] }
 0x212   :  { %2997 = vmatpush2.msra.mxu0 %v15767_v60  ;;  %v2293_v40 = vsub.f32 %v10647_v59, %v15768_v14  ;;  %3328 = vmatpush2.msra.mxu1 %v15770_v29  ;;  %v15772_v60 = vld [vmem:[#allocation109_spill] sm:$0xff]  ;;  %v1877_v43 = vadd.f32 1.0, %v7766_v47  ;;  %v15782_v47 = vld [vmem:[#allocation103_spill] sm:$0xff] }
 0x213   :  { %3000 = vmatprep.subr.mxu0 %v15771_v12  ;;  %3330 = vmatprep.subr.mxu1 %v15772_v60  ;;  %v7768_v29 = vpop.eup %7767  ;;  %v10700_v12 = vand.u32 4294901760, %v1904_v42  ;;  %v15778_v14 = vld [vmem:[#allocation113_spill] sm:$0xff] }
 0x214   :  { %2279 = vmatprep.mubr.f32.mxu0 %v2278_v27  ;;  %2852 = vmatprep.mubr.f32.mxu1 %v10656_v21  ;;  %v2294_v53 = vand.u32 4294901760, %v2293_v40  ;;  %v2299_v27 = vsub.f32 %v10661_v38, %v15776_v23  ;;  %v15779_v21 = vld [vmem:[#allocation102_spill] sm:$0xff]  ;;  %v1781_v23 = vmul.f32 0.5, %v10563_v7  ;;  %v1876_v6 = vadd.f32 1.0, %v7768_v29  ;;  %v15785_v7 = vld [vmem:[#allocation105_spill] sm:$0xff] }
 0x215   :  { %3003 = vmatpush2.msra.mxu0 %v15773_v37  ;;  %15774 = vst [vmem:[#allocation39_spill] sm:$0xff] %v10700_v12  ;;  %3332 = vmatpush2.msra.mxu1 %v15775_v13  ;;  %v10723_v33 = vsub.f32 %v1904_v42, %v10700_v12  ;;  %v10729_v13 = vand.u32 4294901760, %v1906_v46  ;;  %v15788_v29 = vand.u32 4294901760, %v10693_v10 }
 0x216   :  { %2285 = vmatmul.mubr.f32.gmra.mxu0 %v2284_v19  ;;  %2854 = vmatmul.mubr.f32.gmra.mxu1 %v10670_v0  ;;  %v15780_v19 = vand.u32 4294901760, %v10677_v4  ;;  %v10720_v0 = vand.u32 4294901760, %v1907_v54 }
 0x217   :  { %3006 = vmatprep.subr.mxu0 %v15777_v8  ;;  %3334 = vmatprep.subr.mxu1 %v15778_v14  ;;  %v15784_v14 = vld [vmem:[#allocation118_spill] sm:$0xff]  ;;  %v1909_v8 = vmul.f32 %v1877_v43, %v1781_v23  ;;  %15786 = vst [vmem:[#allocation47_spill] sm:$0xff] %v10729_v13 }
 0x218   :  { %3009 = vmatpush2.msra.mxu0 %v15779_v21  ;;  %v2309_v40 = vsub.f32 %v10677_v4, %v15780_v19  ;;  %3336 = vmatpush2.msra.mxu1 %v15781_v24  ;;  %15783 = vst [vmem:[#allocation45_spill] sm:$0xff] %v10720_v0  ;;  %v2300_v21 = vand.u32 4294901760, %v2299_v27  ;;  %v15787_v24 = vld [vmem:[#allocation119_spill] sm:$0xff]  ;;  %v15789_v27 = vld [vmem:[#allocation108_spill] sm:$0xff]  ;;  %v10739_v43 = vsub.f32 %v1907_v54, %v10720_v0  ;;  %v15790_v19 = vld [vmem:[#allocation121_spill] sm:$0xff] }
 0x219   :  { %3012 = vmatprep.subr.mxu0 %v15782_v47  ;;  %3338 = vmatprep.subr.mxu1 %v15784_v14  ;;  %v1780_v47 = vmul.f32 0.5, %v10572_v31  ;;  %v15792_v31 = vand.u32 4294901760, %v10707_v63  ;;  %v10752_v54 = vsub.f32 %v1906_v46, %v10729_v13 }
 0x21a   :  { %2295 = vmatprep.mubr.f32.mxu0 %v2294_v53  ;;  %2860 = vmatprep.mubr.f32.mxu1 %v10686_v9  ;;  %v2310_v42 = vand.u32 4294901760, %v2309_v40  ;;  %v2315_v53 = vsub.f32 %v10693_v10, %v15788_v29  ;;  %v15791_v9 = vld [vmem:[#allocation110_spill] sm:$0xff]  ;;  %v15794_v29 = vld [vmem:[#allocation112_spill] sm:$0xff] }
 0x21b   :  { %3015 = vmatpush2.msra.mxu0 %v15785_v7  ;;  %3340 = vmatpush2.msra.mxu1 %v15787_v24  ;;  %v1908_v23 = vmul.f32 %v1876_v6, %v1780_v47  ;;  %v15793_v24 = vld [vmem:[#allocation123_spill] sm:$0xff]  ;;  %v15796_v47 = vld [vmem:[#allocation125_spill] sm:$0xff] }
 0x21c   :  { %2301 = vmatmul.mubr.f32.gmra.mxu0 %v2300_v21  ;;  %2862 = vmatmul.mubr.f32.gmra.mxu1 %v10700_v12  ;;  %v2325_v21 = vsub.f32 %v10707_v63, %v15792_v31  ;;  %v10749_v12 = vand.u32 4294901760, %v1909_v8  ;;  %v2316_v6 = vand.u32 4294901760, %v2315_v53  ;;  %v15803_v31 = vld [vmem:[#allocation117_spill] sm:$0xff] }
 0x21d   :  { %3018 = vmatprep.subr.mxu0 %v15789_v27  ;;  %3342 = vmatprep.subr.mxu1 %v15790_v19  ;;  %v10758_v40 = vand.u32 4294901760, %v1908_v23  ;;  %v15800_v19 = vand.u32 4294901760, %v10723_v33 }
 0x21e   :  { %3021 = vmatpush2.msra.mxu0 %v15791_v9  ;;  %3344 = vmatpush2.msra.mxu1 %v15793_v24  ;;  %15795 = vst [vmem:[#allocation166_spill] sm:$0xff] %v10749_v12  ;;  %v15797_v9 = vld [vmem:[#allocation114_spill] sm:$0xff]  ;;  %v15799_v24 = vld [vmem:[#allocation128_spill] sm:$0xff]  ;;  %v10767_v53 = vsub.f32 %v1909_v8, %v10749_v12 }
 0x21f   :  { %3024 = vmatprep.subr.mxu0 %v15794_v29  ;;  %3346 = vmatprep.subr.mxu1 %v15796_v47  ;;  %15798 = vst [vmem:[#allocation168_spill] sm:$0xff] %v10758_v40  ;;  %v2326_v29 = vand.u32 4294901760, %v2325_v21  ;;  %v2331_v46 = vsub.f32 %v10723_v33, %v15800_v19  ;;  %v15805_v21 = vld [vmem:[#allocation120_spill] sm:$0xff] }
 0x220   :  { %2311 = vmatprep.mubr.f32.mxu0 %v2310_v42  ;;  %2868 = vmatprep.mubr.f32.mxu1 %v10720_v0  ;;  %v15801_v42 = vld [vmem:[#allocation115_spill] sm:$0xff]  ;;  %v15802_v0 = vld [vmem:[#allocation130_spill] sm:$0xff] }
 0x221   :  { %3027 = vmatpush2.msra.mxu0 %v15797_v9  ;;  %3348 = vmatpush2.msra.mxu1 %v15799_v24  ;;  %v15804_v24 = vld [vmem:[#allocation131_spill] sm:$0xff]  ;;  %v2332_v8 = vand.u32 4294901760, %v2331_v46  ;;  %v15813_v46 = vld [vmem:[#allocation126_spill] sm:$0xff]  ;;  %v15815_v9 = vand.u32 4294901760, %v10200_v5 }
 0x222   :  { %2317 = vmatmul.mubr.f32.gmra.mxu0 %v2316_v6  ;;  %2870 = vmatmul.mubr.f32.gmra.mxu1 %v10729_v13  ;;  %v15806_v6 = vand.u32 4294901760, %v10739_v43  ;;  %v10778_v13 = vsub.f32 %v1908_v23, %v10758_v40  ;;  %v15811_v23 = vld [vmem:[#allocation124_spill] sm:$0xff] }
 0x223   :  { %3030 = vmatprep.subr.mxu0 %v15801_v42  ;;  %3350 = vmatprep.subr.mxu1 %v15802_v0  ;;  %v15807_v42 = vld [vmem:[#allocation133_spill] sm:$0xff] }
 0x224   :  { %3033 = vmatpush2.msra.mxu0 %v15803_v31  ;;  %3352 = vmatpush2.msra.mxu1 %v15804_v24  ;;  %v2341_v19 = vsub.f32 %v10739_v43, %v15806_v6  ;;  %v15808_v31 = vld [vmem:[#allocation122_spill] sm:$0xff]  ;;  %v15809_v24 = vld [vmem:[#allocation135_spill] sm:$0xff] }
 0x225   :  { %3036 = vmatprep.subr.mxu0 %v15805_v21  ;;  %3354 = vmatprep.subr.mxu1 %v15807_v42  ;;  %v15810_v21 = vand.u32 4294901760, %v10752_v54 }
 0x226   :  { %2327 = vmatprep.mubr.f32.mxu0 %v2326_v29  ;;  %2876 = vmatprep.mubr.f32.mxu1 %v10749_v12  ;;  %v2342_v42 = vand.u32 4294901760, %v2341_v19  ;;  %v15812_v29 = vld [vmem:[#allocation137_spill] sm:$0xff]  ;;  %v14827_v12 = vand.u32 4294901760, %v10778_v13 }
 0x227   :  { %3039 = vmatpush2.msra.mxu0 %v15808_v31  ;;  %3356 = vmatpush2.msra.mxu1 %v15809_v24  ;;  %v2347_v6 = vsub.f32 %v10752_v54, %v15810_v21  ;;  %v15814_v31 = vld [vmem:[#allocation140_spill] sm:$0xff]  ;;  %v15817_v24 = vld [vmem:[#allocation127_spill] sm:$0xff] }
 0x228   :  { %2333 = vmatmul.mubr.f32.gmra.mxu0 %v2332_v8  ;;  %2878 = vmatmul.mubr.f32.gmra.mxu1 %v10758_v40  ;;  %v15816_v8 = vand.u32 4294901760, %v10767_v53  ;;  %v15818_v40 = vld [vmem:[#allocation142_spill] sm:$0xff] }
 0x229   :  { %3042 = vmatprep.subr.mxu0 %v15811_v23  ;;  %3358 = vmatprep.subr.mxu1 %v15812_v29  ;;  %v2348_v19 = vand.u32 4294901760, %v2347_v6  ;;  %v15819_v29 = vld [vmem:[#allocation129_spill] sm:$0xff]  ;;  %v15822_v23 = vand.u32 4294901760, %v10127_v55  ;;  %v15826_v6 = vld [vmem:[#allocation136_spill] sm:$0xff] }
 0x22a   :  { %3045 = vmatpush2.msra.mxu0 %v15813_v46  ;;  %3360 = vmatpush2.msra.mxu1 %v15814_v31  ;;  %v2357_v21 = vsub.f32 %v10767_v53, %v15816_v8  ;;  %v15820_v46 = vld [vmem:[#allocation143_spill] sm:$0xff]  ;;  %v2363_v31 = vsub.f32 %v10778_v13, %v14827_v12  ;;  %v15827_v12 = vld [vmem:[#allocation138_spill] sm:$0xff] }
 0x22b   :  { %3368 = vmatprep.mubr.f32.mxu1 %v15815_v9  ;;  %3048 = vmatprep.subr.mxu0 %v15817_v24  ;;  %v15821_v9 = vld [vmem:[#allocation132_spill] sm:$0xff]  ;;  %v15823_v24 = vld [vmem:[#allocation23_spill] sm:$0xff] }
 0x22c   :  { %3362 = vmatprep.subr.mxu1 %v15818_v40  ;;  %2343 = vmatprep.mubr.f32.mxu0 %v2342_v42  ;;  %v2358_v8 = vand.u32 4294901760, %v2357_v21  ;;  %v15824_v40 = vld [vmem:[#allocation134_spill] sm:$0xff]  ;;  %v15825_v42 = vand.u32 4294901760, %v10251_v25  ;;  %v15830_v21 = vld [vmem:[#allocation141_spill] sm:$0xff] }
 0x22d   :  { %3051 = vmatpush2.msra.mxu0 %v15819_v29  ;;  %3364 = vmatpush2.msra.mxu1 %v15820_v46 }
 0x22e   :  { %2349 = vmatmul.mubr.f32.gmra.mxu0 %v2348_v19  ;;  %3054 = vmatprep.subr.mxu0 %v15821_v9  ;;  %v2364_v19 = vand.u32 4294901760, %v2363_v31  ;;  %v15835_v31 = vld [vmem:[#allocation25_spill] sm:$0xff] }
 0x22f   :  { %3372 = vmatmul.mubr.f32.vlgmr.msra.gmra.mxu1 %v15822_v23  ;;  %3944 = vmatprep.subr.mxu1 %v15823_v24  ;;  %v15828_v23 = vld [vmem:[#allocation139_spill] sm:$0xff]  ;;  %v15829_v24 = vand.u32 4294901760, %v10207_v18 }
 0x230   :  { %3057 = vmatpush2.msra.mxu0 %v15824_v40  ;;  %3380 = vmatprep.mubr.f32.mxu1 %v15825_v42  ;;  %v15840_v42 = vld [vmem:[#allocation43_spill] sm:$0xff] }
 0x231   :  { %3946 = vmatpush1.msra.mxu1 %v15648_v28  ;;  %3060 = vmatprep.subr.mxu0 %v15826_v6  ;;  %v15831_v28 = vand.u32 4294901760, %v10314_v34 }
 0x232   :  { %3948 = vmatprep.subr.mxu1 %v15651_v35  ;;  %2359 = vmatprep.mubr.f32.mxu0 %v2358_v8  ;;  %v15832_v35 = vld [vmem:[#allocation144_spill] sm:$0xff] }
 0x233   :  { %3063 = vmatpush2.msra.mxu0 %v15827_v12  ;;  %3950 = vmatpush1.msra.mxu1 %v15652_v32  ;;  %v15833_v32 = vld [vmem:[#allocation145_spill] sm:$0xff] }
 0x234   :  { %2365 = vmatmul.mubr.f32.gmra.mxu0 %v2364_v19  ;;  %3066 = vmatprep.subr.mxu0 %v15828_v23  ;;  %v15843_v19 = vld [vmem:[#allocation57_spill] sm:$0xff] }
 0x235   :  { %3384 = vmatmul.mubr.f32.gmra.mxu1 %v15829_v24  ;;  %3952 = vmatprep.subr.mxu1 %v15654_v50  ;;  %v15834_v50 = vand.u32 4294901760, %v10221_v3  ;;  %v15844_v24 = vld [vmem:[#allocation33_spill] sm:$0xff] }
 0x236   :  { %3069 = vmatpush2.msra.mxu0 %v15830_v21  ;;  %3078 = vmatprep.mubr.f32.mxu0 %v10200_v5  ;;  %v15836_v5 = vand.u32 4294901760, %v15835_v31 }
 0x237   :  { %3392 = vmatprep.mubr.f32.mxu1 %v15831_v28  ;;  %3954 = vmatpush1.msra.mxu1 %v15657_v30  ;;  %v15837_v30 = vand.u32 4294901760, %v10372_v57  ;;  %v15845_v28 = vand.u32 4294901760, %v15844_v24 }
 0x238   :  { %3072 = vmatprep.subr.mxu0 %v15832_v35  ;;  %3956 = vmatprep.subr.mxu1 %v15658_v51  ;;  %v15838_v51 = vld [vmem:[#allocation27_spill] sm:$0xff] }
 0x239   :  { %3075 = vmatpush2.msra.mxu0 %v15833_v32  ;;  %3958 = vmatpush1.msra.mxu1 %v15659_v62  ;;  %v15839_v8 = vand.u32 4294901760, %v15838_v51  ;;  %v15841_v62 = vld [vmem:[#allocation29_spill] sm:$0xff] }
 0x23a   :  { %3081 = vmatmul.mubr.f32.vlgmr.msra.gmra.mxu0 %v10127_v55  ;;  %3396 = vmatmul.mubr.f32.gmra.mxu1 %v15834_v50  ;;  %v15842_v55 = vand.u32 4294901760, %v15841_v62  ;;  %v15846_v50 = vld [vmem:[#allocation30_spill] sm:$0xff]  ;;  %v15852_v51 = vld [vmem:[#allocation17_spill] sm:$0xff] }
 0x23b   :  { %3561 = vmatprep.subr.mxu0 %v15836_v5  ;;  %3960 = vmatprep.subr.mxu1 %v15660_v36  ;;  %v15848_v36 = vld [vmem:[#allocation37_spill] sm:$0xff] }
 0x23c   :  { %3088 = vmatprep.mubr.f32.mxu0 %v10251_v25  ;;  %3404 = vmatprep.mubr.f32.mxu1 %v15837_v30  ;;  %v15847_v25 = vand.u32 4294901760, %v10270_v58  ;;  %v15849_v31 = vand.u32 4294901760, %v15848_v36  ;;  %v15850_v5 = vld [vmem:[#allocation61_spill] sm:$0xff]  ;;  %v15851_v30 = vand.u32 4294901760, %v10425_v61 }
 0x23d   :  { %3565 = vmatpush1.msra.mxu0 %v15839_v8  ;;  %3962 = vmatpush1.msra.mxu1 %v15840_v42  ;;  %v15853_v8 = vand.u32 4294901760, %v15852_v51  ;;  %v15854_v42 = vld [vmem:[#allocation34_spill] sm:$0xff]  ;;  %v15855_v62 = vld [vmem:[#allocation41_spill] sm:$0xff] }
 0x23e   :  { %3569 = vmatprep.subr.mxu0 %v15842_v55  ;;  %3964 = vmatprep.subr.mxu1 %v15843_v19  ;;  %v15857_v55 = vld [vmem:[#allocation62_spill] sm:$0xff] }
 0x23f   :  { %3573 = vmatpush1.msra.mxu0 %v15845_v28  ;;  %3966 = vmatpush1.msra.mxu1 %v15846_v50  ;;  %v15858_v19 = vld [vmem:[#allocation18_spill] sm:$0xff] }
 0x240   :  { %3091 = vmatmul.mubr.f32.gmra.mxu0 %v10207_v18  ;;  %3408 = vmatmul.mubr.f32.gmra.mxu1 %v15847_v25  ;;  %v15856_v18 = vand.u32 4294901760, %v15855_v62  ;;  %v15859_v24 = vand.u32 4294901760, %v15858_v19  ;;  %v15860_v28 = vld [vmem:[#allocation38_spill] sm:$0xff]  ;;  %v15863_v25 = vld [vmem:[#allocation55_spill] sm:$0xff]  ;;  %v15872_v62 = vld [vmem:[#allocation49_spill] sm:$0xff] }
 0x241   :  { %3577 = vmatprep.subr.mxu0 %v15849_v31  ;;  %3968 = vmatprep.subr.mxu1 %v15850_v5  ;;  %v15864_v36 = vand.u32 4294901760, %v15863_v25  ;;  %v15865_v31 = vld [vmem:[#allocation68_spill] sm:$0xff]  ;;  %v15866_v5 = vand.u32 4294901760, %v10478_v39  ;;  %v15875_v19 = vld [vmem:[#allocation42_spill] sm:$0xff]  ;;  %v15880_v25 = vand.u32 4294901760, %v10503_v16 }
 0x242   :  { %3098 = vmatprep.mubr.f32.mxu0 %v10314_v34  ;;  %3416 = vmatprep.mubr.f32.mxu1 %v15851_v30  ;;  %v15861_v34 = vld [vmem:[#allocation155_spill] sm:$0xff]  ;;  %v15867_v30 = vld [vmem:[#allocation58_spill] sm:$0xff] }
 0x243   :  { %3581 = vmatpush1.msra.mxu0 %v15853_v8  ;;  %3970 = vmatpush1.msra.mxu1 %v15854_v42  ;;  %v15862_v50 = vand.u32 4294901760, %v15861_v34  ;;  %v15868_v51 = vand.u32 4294901760, %v15867_v30  ;;  %v15869_v8 = vld [vmem:[#allocation48_spill] sm:$0xff]  ;;  %v15884_v30 = vld [vmem:[#allocation65_spill] sm:$0xff] }
 0x244   :  { %3585 = vmatprep.subr.mxu0 %v15856_v18  ;;  %3972 = vmatprep.subr.mxu1 %v15857_v55  ;;  %v15870_v42 = vld [vmem:[#allocation32_spill] sm:$0xff] }
 0x245   :  { %3589 = vmatpush1.msra.mxu0 %v15859_v24  ;;  %3974 = vmatpush1.msra.mxu1 %v15860_v28  ;;  %v15873_v18 = vld [vmem:[#allocation20_spill] sm:$0xff] }
 0x246   :  { %3101 = vmatmul.mubr.f32.gmra.mxu0 %v10221_v3  ;;  %3420 = vmatmul.mubr.f32.gmra.mxu1 %v15862_v50  ;;  %v15871_v3 = vand.u32 4294901760, %v15870_v42  ;;  %v15874_v55 = vand.u32 4294901760, %v15873_v18  ;;  %v15877_v24 = vld [vmem:[#allocation36_spill] sm:$0xff]  ;;  %v15879_v50 = vld [vmem:[#allocation50_spill] sm:$0xff] }
 0x247   :  { %3593 = vmatprep.subr.mxu0 %v15864_v36  ;;  %3976 = vmatprep.subr.mxu1 %v15865_v31  ;;  %v15878_v28 = vand.u32 4294901760, %v15877_v24  ;;  %v15881_v36 = vld [vmem:[#allocation22_spill] sm:$0xff] }
 0x248   :  { %3108 = vmatprep.mubr.f32.mxu0 %v10372_v57  ;;  %3428 = vmatprep.mubr.f32.mxu1 %v15866_v5  ;;  %v15876_v57 = vand.u32 4294901760, %v10376_v44  ;;  %v15882_v31 = vand.u32 4294901760, %v15881_v36  ;;  %v15883_v5 = vld [vmem:[#allocation52_spill] sm:$0xff]  ;;  %v15901_v36 = vld [vmem:[#allocation51_spill] sm:$0xff] }
 0x249   :  { %3597 = vmatpush1.msra.mxu0 %v15868_v51  ;;  %3978 = vmatpush1.msra.mxu1 %v15869_v8  ;;  %v15886_v51 = vld [vmem:[#allocation54_spill] sm:$0xff]  ;;  %v15887_v8 = vld [vmem:[#allocation67_spill] sm:$0xff] }
 0x24a   :  { %3601 = vmatprep.subr.mxu0 %v15871_v3  ;;  %3980 = vmatprep.subr.mxu1 %v15872_v62  ;;  %v15888_v42 = vand.u32 4294901760, %v15887_v8  ;;  %v15889_v3 = vld [vmem:[#allocation59_spill] sm:$0xff]  ;;  %v15891_v62 = vld [vmem:[#allocation40_spill] sm:$0xff]  ;;  %v15908_v8 = vand.u32 4294901760, %v10578_v11 }
 0x24b   :  { %3605 = vmatpush1.msra.mxu0 %v15874_v55  ;;  %3982 = vmatpush1.msra.mxu1 %v15875_v19  ;;  %v15892_v18 = vand.u32 4294901760, %v15891_v62  ;;  %v15893_v55 = vld [vmem:[#allocation64_spill] sm:$0xff]  ;;  %v15894_v19 = vand.u32 4294901760, %v10552_v22 }
 0x24c   :  { %3111 = vmatmul.mubr.f32.gmra.mxu0 %v10270_v58  ;;  %3432 = vmatmul.mubr.f32.gmra.mxu1 %v15876_v57  ;;  %v15885_v58 = vand.u32 4294901760, %v15884_v30  ;;  %v15895_v57 = vld [vmem:[#allocation44_spill] sm:$0xff]  ;;  %v15905_v30 = vld [vmem:[#allocation53_spill] sm:$0xff] }
 0x24d   :  { %3609 = vmatprep.subr.mxu0 %v15878_v28  ;;  %3984 = vmatprep.subr.mxu1 %v15879_v50  ;;  %v15896_v24 = vand.u32 4294901760, %v15895_v57  ;;  %v15897_v28 = vld [vmem:[#allocation66_spill] sm:$0xff]  ;;  %v15912_v62 = vld [vmem:[#allocation60_spill] sm:$0xff]  ;;  %v15918_v57 = vand.u32 4294901760, %v10604_v41 }
 0x24e   :  { %3118 = vmatprep.mubr.f32.mxu0 %v10425_v61  ;;  %3440 = vmatprep.mubr.f32.mxu1 %v15880_v25  ;;  %v15890_v61 = vand.u32 4294901760, %v10393_v48  ;;  %v15898_v50 = vld [vmem:[#allocation46_spill] sm:$0xff]  ;;  %v15900_v25 = vld [vmem:[#allocation69_spill] sm:$0xff] }
 0x24f   :  { %3613 = vmatpush1.msra.mxu0 %v15882_v31  ;;  %3986 = vmatpush1.msra.mxu1 %v15883_v5  ;;  %v15902_v31 = vand.u32 4294901760, %v15901_v36  ;;  %v15903_v5 = vld [vmem:[#allocation71_spill] sm:$0xff]  ;;  %v15930_v36 = vld [vmem:[#allocation89_spill] sm:$0xff] }
 0x250   :  { %3617 = vmatprep.subr.mxu0 %v15885_v58  ;;  %3988 = vmatprep.subr.mxu1 %v15886_v51  ;;  %v15906_v58 = vand.u32 4294901760, %v15905_v30  ;;  %v15907_v51 = vld [vmem:[#allocation73_spill] sm:$0xff]  ;;  %v15935_v30 = vld [vmem:[#allocation79_spill] sm:$0xff] }
 0x251   :  { %3621 = vmatpush1.msra.mxu0 %v15888_v42  ;;  %3990 = vmatpush1.msra.mxu1 %v15889_v3  ;;  %v15909_v42 = vld [vmem:[#allocation56_spill] sm:$0xff] }
 0x252   :  { %3121 = vmatmul.mubr.f32.gmra.mxu0 %v15861_v34  ;;  %3444 = vmatmul.mubr.f32.gmra.mxu1 %v15890_v61  ;;  %v15899_v34 = vand.u32 4294901760, %v15898_v50  ;;  %v15910_v3 = vand.u32 4294901760, %v15909_v42  ;;  %v15911_v61 = vld [vmem:[#allocation75_spill] sm:$0xff] }
 0x253   :  { %3625 = vmatprep.subr.mxu0 %v15892_v18  ;;  %3992 = vmatprep.subr.mxu1 %v15893_v55  ;;  %v15914_v18 = vand.u32 4294901760, %v15728_v17  ;;  %v15916_v55 = vand.u32 4294901760, %v15730_v1  ;;  %v15926_v50 = vld [vmem:[#allocation87_spill] sm:$0xff] }
 0x254   :  { %3128 = vmatprep.mubr.f32.mxu0 %v10478_v39  ;;  %3452 = vmatprep.mubr.f32.mxu1 %v15894_v19  ;;  %v15904_v39 = vand.u32 4294901760, %v10449_v52  ;;  %v15917_v19 = vld [vmem:[#allocation81_spill] sm:$0xff]  ;;  %v15940_v42 = vld [vmem:[#allocation95_spill] sm:$0xff] }
 0x255   :  { %3629 = vmatpush1.msra.mxu0 %v15896_v24  ;;  %3994 = vmatpush1.msra.mxu1 %v15897_v28  ;;  %v15923_v24 = vld [vmem:[#allocation85_spill] sm:$0xff]  ;;  %v15924_v28 = vld [vmem:[#allocation74_spill] sm:$0xff] }
 0x256   :  { %3633 = vmatprep.subr.mxu0 %v15899_v34  ;;  %3996 = vmatprep.subr.mxu1 %v15900_v25  ;;  %v15925_v1 = vand.u32 4294901760, %v15924_v28  ;;  %v15928_v34 = vld [vmem:[#allocation76_spill] sm:$0xff]  ;;  %v15958_v28 = vld [vmem:[#allocation106_spill] sm:$0xff] }
 0x257   :  { %3637 = vmatpush1.msra.mxu0 %v15902_v31  ;;  %3998 = vmatpush1.msra.mxu1 %v15903_v5  ;;  %v15929_v25 = vand.u32 4294901760, %v15928_v34  ;;  %v15932_v31 = vld [vmem:[#allocation78_spill] sm:$0xff]  ;;  %v15962_v34 = vld [vmem:[#allocation107_spill] sm:$0xff] }
 0x258   :  { %3131 = vmatmul.mubr.f32.gmra.mxu0 %v10376_v44  ;;  %3456 = vmatmul.mubr.f32.gmra.mxu1 %v15904_v39  ;;  %v15913_v44 = vand.u32 4294901760, %v15912_v62  ;;  %v15933_v5 = vand.u32 4294901760, %v15932_v31  ;;  %v15934_v39 = vld [vmem:[#allocation90_spill] sm:$0xff]  ;;  %v15944_v62 = vld [vmem:[#allocation97_spill] sm:$0xff]  ;;  %v15968_v31 = vld [vmem:[#allocation100_spill] sm:$0xff] }
 0x259   :  { %3641 = vmatprep.subr.mxu0 %v15906_v58  ;;  %4000 = vmatprep.subr.mxu1 %v15907_v51  ;;  %v15937_v58 = vld [vmem:[#allocation94_spill] sm:$0xff] }
 0x25a   :  { %3138 = vmatprep.mubr.f32.mxu0 %v10503_v16  ;;  %3464 = vmatprep.mubr.f32.mxu1 %v15908_v8  ;;  %v15915_v16 = vand.u32 4294901760, %v10510_v15  ;;  %v15938_v51 = vld [vmem:[#allocation82_spill] sm:$0xff] }
 0x25b   :  { %3645 = vmatpush1.msra.mxu0 %v15910_v3  ;;  %4002 = vmatpush1.msra.mxu1 %v15911_v61  ;;  %v15939_v8 = vand.u32 4294901760, %v15938_v51  ;;  %v15942_v3 = vld [vmem:[#allocation84_spill] sm:$0xff]  ;;  %v15977_v51 = vand.u32 4294901760, %v15785_v7 }
 0x25c   :  { %3649 = vmatprep.subr.mxu0 %v15913_v44  ;;  %4004 = vmatprep.subr.mxu1 %v15727_v26  ;;  %v15919_v26 = vld [vmem:[#allocation70_spill] sm:$0xff]  ;;  %v15943_v61 = vand.u32 4294901760, %v15942_v3  ;;  %v15945_v44 = vand.u32 4294901760, %v10647_v59  ;;  %v15982_v3 = vand.u32 4294901760, %v10739_v43 }
 0x25d   :  { %3653 = vmatpush1.msra.mxu0 %v15914_v18  ;;  %4006 = vmatpush1.msra.mxu1 %v15729_v56  ;;  %v15920_v17 = vand.u32 4294901760, %v15919_v26  ;;  %v15921_v56 = vld [vmem:[#allocation72_spill] sm:$0xff]  ;;  %v15946_v18 = vld [vmem:[#allocation86_spill] sm:$0xff]  ;;  %v15952_v26 = vld [vmem:[#allocation91_spill] sm:$0xff] }
 0x25e   :  { %3141 = vmatmul.mubr.f32.gmra.mxu0 %v10393_v48  ;;  %3468 = vmatmul.mubr.f32.gmra.mxu1 %v15915_v16  ;;  %v15922_v48 = vand.u32 4294901760, %v15921_v56  ;;  %v15947_v16 = vand.u32 4294901760, %v15946_v18  ;;  %v15954_v56 = vld [vmem:[#allocation104_spill] sm:$0xff] }
 0x25f   :  { %3657 = vmatprep.subr.mxu0 %v15916_v55  ;;  %4008 = vmatprep.subr.mxu1 %v15917_v19  ;;  %v15948_v55 = vld [vmem:[#allocation99_spill] sm:$0xff]  ;;  %v15949_v19 = vld [vmem:[#allocation88_spill] sm:$0xff] }
 0x260   :  { %3148 = vmatprep.mubr.f32.mxu0 %v10552_v22  ;;  %3476 = vmatprep.mubr.f32.mxu1 %v15918_v57  ;;  %v15927_v22 = vand.u32 4294901760, %v10521_v20  ;;  %v15951_v57 = vld [vmem:[#allocation101_spill] sm:$0xff]  ;;  %v15990_v18 = vld [vmem:[#allocation128_spill] sm:$0xff] }
 0x261   :  { %3661 = vmatpush1.msra.mxu0 %v15920_v17  ;;  %4010 = vmatpush2.msra.mxu1 %v15734_v49  ;;  %v15931_v49 = vand.u32 4294901760, %v10622_v2  ;;  %v15953_v17 = vand.u32 4294901760, %v15952_v26  ;;  %v15998_v26 = vld [vmem:[#allocation120_spill] sm:$0xff] }
 0x262   :  { %3665 = vmatprep.subr.mxu0 %v15922_v48  ;;  %4012 = vmatprep.subr.mxu1 %v15923_v24  ;;  %v15956_v48 = vld [vmem:[#allocation92_spill] sm:$0xff] }
 0x263   :  { %3669 = vmatpush1.msra.mxu0 %v15925_v1  ;;  %4014 = vmatpush2.msra.mxu1 %v15926_v50  ;;  %v15957_v24 = vand.u32 4294901760, %v15956_v48  ;;  %v15959_v1 = vand.u32 4294901760, %v10677_v4  ;;  %v15960_v50 = vld [vmem:[#allocation93_spill] sm:$0xff]  ;;  %v16003_v48 = vld [vmem:[#allocation135_spill] sm:$0xff] }
 0x264   :  { %3151 = vmatmul.mubr.f32.gmra.mxu0 %v10449_v52  ;;  %3480 = vmatmul.mubr.f32.gmra.mxu1 %v15927_v22  ;;  %v15936_v52 = vand.u32 4294901760, %v15935_v30  ;;  %v15961_v22 = vand.u32 4294901760, %v15960_v50  ;;  %v15971_v30 = vand.u32 4294901760, %v10707_v63 }
 0x265   :  { %3673 = vmatprep.subr.mxu0 %v15929_v25  ;;  %4016 = vmatprep.subr.mxu1 %v15930_v36  ;;  %v15963_v25 = vld [vmem:[#allocation96_spill] sm:$0xff]  ;;  %v15965_v36 = vand.u32 4294901760, %v15773_v37 }
 0x266   :  { %3158 = vmatprep.mubr.f32.mxu0 %v10578_v11  ;;  %3488 = vmatprep.mubr.f32.mxu1 %v15931_v49  ;;  %v15941_v11 = vand.u32 4294901760, %v10626_v45  ;;  %v15966_v49 = vld [vmem:[#allocation111_spill] sm:$0xff] }
 0x267   :  { %3677 = vmatpush1.msra.mxu0 %v15933_v5  ;;  %4018 = vmatpush2.msra.mxu1 %v15934_v39  ;;  %v15969_v5 = vand.u32 4294901760, %v15968_v31  ;;  %v15970_v39 = vld [vmem:[#allocation113_spill] sm:$0xff] }
 0x268   :  { %3681 = vmatprep.subr.mxu0 %v15936_v52  ;;  %4020 = vmatprep.subr.mxu1 %v15937_v58  ;;  %v15974_v52 = vld [vmem:[#allocation116_spill] sm:$0xff]  ;;  %v15975_v58 = vld [vmem:[#allocation103_spill] sm:$0xff] }
 0x269   :  { %3685 = vmatpush1.msra.mxu0 %v15939_v8  ;;  %4022 = vmatpush2.msra.mxu1 %v15940_v42  ;;  %v15978_v8 = vld [vmem:[#allocation119_spill] sm:$0xff]  ;;  %v15980_v42 = vand.u32 4294901760, %v15789_v27 }
 0x26a   :  { %3161 = vmatmul.mubr.f32.gmra.mxu0 %v10510_v15  ;;  %3492 = vmatmul.mubr.f32.gmra.mxu1 %v15941_v11  ;;  %v15950_v15 = vand.u32 4294901760, %v15949_v19  ;;  %v15981_v11 = vld [vmem:[#allocation121_spill] sm:$0xff]  ;;  %v15994_v19 = vand.u32 4294901760, %v10767_v53 }
 0x26b   :  { %3689 = vmatprep.subr.mxu0 %v15943_v61  ;;  %4024 = vmatprep.subr.mxu1 %v15944_v62  ;;  %v15985_v61 = vld [vmem:[#allocation123_spill] sm:$0xff]  ;;  %v15986_v62 = vld [vmem:[#allocation112_spill] sm:$0xff] }
 0x26c   :  { %3168 = vmatprep.mubr.f32.mxu0 %v10604_v41  ;;  %3500 = vmatprep.mubr.f32.mxu1 %v15945_v44  ;;  %v15955_v41 = vand.u32 4294901760, %v10661_v38  ;;  %v15988_v44 = vld [vmem:[#allocation114_spill] sm:$0xff] }
 0x26d   :  { %3693 = vmatpush2.msra.mxu0 %v15947_v16  ;;  %4026 = vmatpush2.msra.mxu1 %v15948_v55  ;;  %v15989_v27 = vand.u32 4294901760, %v15988_v44  ;;  %v15992_v16 = vld [vmem:[#allocation115_spill] sm:$0xff] }
 0x26e   :  { %3697 = vmatprep.subr.mxu0 %v15950_v15  ;;  %4028 = vmatprep.subr.mxu1 %v15951_v57  ;;  %v15993_v55 = vand.u32 4294901760, %v15992_v16  ;;  %v15997_v57 = vld [vmem:[#allocation131_spill] sm:$0xff]  ;;  %v16037_v16 = vld [vmem:[#allocation162_spill] sm:$0xff] }
 0x26f   :  { %3701 = vmatpush2.msra.mxu0 %v15953_v17  ;;  %4030 = vmatpush2.msra.mxu1 %v15954_v56  ;;  %v16000_v17 = vld [vmem:[#allocation133_spill] sm:$0xff]  ;;  %v16001_v56 = vld [vmem:[#allocation122_spill] sm:$0xff] }
 0x270   :  { %3171 = vmatmul.mubr.f32.gmra.mxu0 %v10521_v20  ;;  %3504 = vmatmul.mubr.f32.gmra.mxu1 %v15955_v41  ;;  %v15964_v20 = vand.u32 4294901760, %v15963_v25  ;;  %v16002_v41 = vand.u32 4294901760, %v16001_v56  ;;  %v16012_v25 = vld [vmem:[#allocation127_spill] sm:$0xff] }
 0x271   :  { %3705 = vmatprep.subr.mxu0 %v15957_v24  ;;  %4032 = vmatprep.subr.mxu1 %v15958_v28  ;;  %v16007_v28 = vld [vmem:[#allocation137_spill] sm:$0xff] }
 0x272   :  { %3178 = vmatprep.mubr.f32.mxu0 %v10622_v2  ;;  %3512 = vmatprep.mubr.f32.mxu1 %v15959_v1  ;;  %v15967_v2 = vand.u32 4294901760, %v10693_v10  ;;  %v16008_v1 = vld [vmem:[#allocation126_spill] sm:$0xff] }
 0x273   :  { %3709 = vmatpush2.msra.mxu0 %v15961_v22  ;;  %4034 = vmatpush2.msra.mxu1 %v15962_v34  ;;  %v16009_v50 = vand.u32 4294901760, %v16008_v1  ;;  %v16010_v22 = vld [vmem:[#allocation140_spill] sm:$0xff]  ;;  %v16011_v34 = vld [vmem:[#allocation149_spill] sm:$0xff] }
 0x274   :  { %3713 = vmatprep.subr.mxu0 %v15964_v20  ;;  %4036 = vmatprep.subr.mxu1 %v15772_v60  ;;  %v15972_v60 = vld [vmem:[#allocation102_spill] sm:$0xff]  ;;  %v16013_v20 = vand.u32 4294901760, %v16012_v25 }
 0x275   :  { %3717 = vmatpush2.msra.mxu0 %v15965_v36  ;;  %4038 = vmatpush2.msra.mxu1 %v15966_v49  ;;  %v15973_v37 = vand.u32 4294901760, %v15972_v60  ;;  %v16015_v36 = vand.u32 4294901760, %v15819_v29  ;;  %v16017_v49 = vld [vmem:[#allocation147_spill] sm:$0xff]  ;;  %v16020_v29 = vand.u32 4294901760, %v15826_v6  ;;  %v16025_v6 = vld [vmem:[#allocation148_spill] sm:$0xff] }
 0x276   :  { %3181 = vmatmul.mubr.f32.gmra.mxu0 %v10626_v45  ;;  %3516 = vmatmul.mubr.f32.gmra.mxu1 %v15967_v2  ;;  %v15976_v45 = vand.u32 4294901760, %v15975_v58  ;;  %v16018_v2 = vand.u32 4294901760, %v15824_v40  ;;  %v16024_v40 = vand.u32 4294901760, %v15830_v21  ;;  %v16029_v21 = vld [vmem:[#allocation154_spill] sm:$0xff] }
 0x277   :  { %3721 = vmatprep.subr.mxu0 %v15969_v5  ;;  %4040 = vmatprep.subr.mxu1 %v15970_v39  ;;  %v16019_v5 = vld [vmem:[#allocation153_spill] sm:$0xff] }
 0x278   :  { %3188 = vmatprep.mubr.f32.mxu0 %v10647_v59  ;;  %3524 = vmatprep.mubr.f32.mxu1 %v15971_v30  ;;  %v15979_v59 = vand.u32 4294901760, %v10723_v33 }
 0x279   :  { %3725 = vmatpush2.msra.mxu0 %v15973_v37  ;;  %4042 = vmatpush2.msra.mxu1 %v15974_v52  ;;  %v16030_v37 = vld [vmem:[#allocation151_spill] sm:$0xff] }
 0x27a   :  { %3729 = vmatprep.subr.mxu0 %v15976_v45  ;;  %4044 = vmatprep.subr.mxu1 %v15784_v14  ;;  %v15983_v14 = vld [vmem:[#allocation110_spill] sm:$0xff]  ;;  %v16032_v45 = vld [vmem:[#allocation156_spill] sm:$0xff] }
 0x27b   :  { %3733 = vmatpush2.msra.mxu0 %v15977_v51  ;;  %4046 = vmatpush2.msra.mxu1 %v15978_v8  ;;  %v15984_v7 = vand.u32 4294901760, %v15983_v14  ;;  %v16033_v8 = vld [vmem:[#allocation152_spill] sm:$0xff] }
 0x27c   :  { %3191 = vmatmul.mubr.f32.gmra.mxu0 %v10661_v38  ;;  %3528 = vmatmul.mubr.f32.gmra.mxu1 %v15979_v59  ;;  %v15987_v38 = vand.u32 4294901760, %v15986_v62  ;;  %v16036_v62 = vld [vmem:[#allocation157_spill] sm:$0xff] }
 0x27d   :  { %3737 = vmatprep.subr.mxu0 %v15980_v42  ;;  %4048 = vmatprep.subr.mxu1 %v15981_v11  ;;  %v16034_v11 = vld [vmem:[#allocation160_spill] sm:$0xff] }
 0x27e   :  { %3198 = vmatprep.mubr.f32.mxu0 %v10677_v4  ;;  %3536 = vmatprep.mubr.f32.mxu1 %v15982_v3  ;;  %v15991_v4 = vand.u32 4294901760, %v10752_v54 }
 0x27f   :  { %3741 = vmatpush2.msra.mxu0 %v15984_v7  ;;  %4050 = vmatpush2.msra.mxu1 %v15985_v61  ;;  %v16035_v61 = vld [vmem:[#allocation158_spill] sm:$0xff] }
 0x280   :  { %3745 = vmatprep.subr.mxu0 %v15987_v38  ;;  %4052 = vmatprep.subr.mxu1 %v15796_v47  ;;  %v15995_v47 = vld [vmem:[#allocation117_spill] sm:$0xff] }
 0x281   :  { %3749 = vmatpush2.msra.mxu0 %v15989_v27  ;;  %4054 = vmatpush2.msra.mxu1 %v15990_v18  ;;  %v15996_v15 = vand.u32 4294901760, %v15995_v47  ;;  %v4391_v18 = vld [vmem:[#allocation9 + $0xf8] sm:$0xff] }
 0x282   :  { %3201 = vmatmul.mubr.f32.gmra.mxu0 %v10693_v10  ;;  %3540 = vmatmul.mubr.f32.gmra.mxu1 %v15991_v4  ;;  %v15999_v10 = vand.u32 4294901760, %v15998_v26  ;;  %v4390_v4 = vld [vmem:[#allocation9 + $0xf0] sm:$0xff]  ;;  %v11154_v47 = vand.u32 4294901760, %v4391_v18 }
 0x283   :  { %3753 = vmatprep.subr.mxu0 %v15993_v55  ;;  %4056 = vmatprep.subr.mxu1 %v15802_v0  ;;  %v16004_v0 = vand.u32 4294901760, %v10778_v13 }
 0x284   :  { %3208 = vmatprep.mubr.f32.mxu0 %v10707_v63  ;;  %3548 = vmatprep.mubr.f32.mxu1 %v15994_v19  ;;  %v16005_v63 = vld [vmem:[#allocation124_spill] sm:$0xff]  ;;  %16038 = vst [vmem:[#allocation170_spill] sm:$0xff] %v11154_v47 }
 0x285   :  { %3757 = vmatpush2.msra.mxu0 %v15996_v15  ;;  %4058 = vmatpush2.msra.mxu1 %v15997_v57  ;;  %v16006_v24 = vand.u32 4294901760, %v16005_v63  ;;  %v11156_v15 = vand.u32 4294901760, %v4390_v4  ;;  %v16040_v57 = vld [vmem:[#allocation172_spill] sm:$0xff] }
 0x286   :  { %3761 = vmatprep.subr.mxu0 %v15999_v10  ;;  %4060 = vmatprep.subr.mxu1 %v16000_v17  ;;  %v11163_v10 = vsub.f32 %v4391_v18, %v11154_v47  ;;  %v16057_v18 = vld [vmem:[#allocation159_spill] sm:$0xff] }
 0x287   :  { %3765 = vmatpush2.msra.mxu0 %v16002_v41  ;;  %4062 = vmatpush2.msra.mxu1 %v16003_v48  ;;  %16039 = vst [vmem:[#allocation173_spill] sm:$0xff] %v11156_v15  ;;  %v11166_v17 = vsub.f32 %v4390_v4, %v11156_v15  ;;  %v4389_v41 = vld [vmem:[#allocation9 + $0xe8] sm:$0xff]  ;;  %v4388_v48 = vld [vmem:[#allocation9 + $0xe0] sm:$0xff] }
 0x288   :  { %3211 = vmatmul.mubr.f32.gmra.mxu0 %v10723_v33  ;;  %3552 = vmatmul.mubr.f32.gmra.mxu1 %v16004_v0  ;;  %v16014_v33 = vld [vmem:[#allocation142_spill] sm:$0xff]  ;;  %16041 = vst [vmem:[#allocation174_spill] sm:$0xff] %v11163_v10  ;;  %v16043_v0 = vld [vmem:[#allocation164_spill] sm:$0xff]  ;;  %v11176_v1 = vand.u32 4294901760, %v4389_v41 }
 0x289   :  { %3769 = vmatprep.subr.mxu0 %v16006_v24  ;;  %4064 = vmatprep.subr.mxu1 %v16007_v28  ;;  %16042 = vst [vmem:[#allocation77_spill] sm:$0xff] %v11166_v17  ;;  %v14835_v24 = vand.u32 4294901760, %v11163_v10  ;;  %v14833_v28 = vand.u32 4294901760, %v11166_v17 }
 0x28a   :  { %3218 = vmatprep.mubr.f32.mxu0 %v10739_v43  ;;  %3773 = vmatpush2.msra.mxu0 %v16009_v50  ;;  %v16016_v43 = vand.u32 4294901760, %v15821_v9  ;;  %v16022_v9 = vand.u32 4294901760, %v15828_v23  ;;  %v16028_v23 = vld [vmem:[#allocation150_spill] sm:$0xff]  ;;  %16044 = vst [vmem:[#allocation63_spill] sm:$0xff] %v11176_v1  ;;  %v11178_v50 = vand.u32 4294901760, %v4388_v48 }
 0x28b   :  { %4066 = vmatpush2.msra.mxu1 %v16010_v22  ;;  %4072 = vmatprep.mubr.f32.mxu1 %v16011_v34  ;;  %v16046_v22 = vld [vmem:[#allocation171_spill] sm:$0xff] }
 0x28c   :  { %3777 = vmatprep.subr.mxu0 %v16013_v20  ;;  %4068 = vmatprep.subr.mxu1 %v16014_v33  ;;  %16045 = vst [vmem:[#allocation80_spill] sm:$0xff] %v11178_v50  ;;  %v4387_v20 = vld [vmem:[#allocation9 + $0xd8] sm:$0xff]  ;;  %v4386_v33 = vld [vmem:[#allocation9 + $0xd0] sm:$0xff] }
 0x28d   :  { %3781 = vmatpush2.msra.mxu0 %v16015_v36  ;;  %4070 = vmatpush2.msra.mxu1 %v15820_v46  ;;  %v16021_v46 = vand.u32 4294901760, %v15827_v12  ;;  %v16026_v12 = vand.u32 4294901760, %v15832_v35  ;;  %v1974_v35 = vld [vmem:[%s14299_s4] sm:$0x3] }
 0x28e   :  { %3221 = vmatmul.mubr.f32.gmra.mxu0 %v10752_v54  ;;  %3785 = vmatprep.subr.mxu0 %v16016_v43  ;;  %v2759_v31 = vpop.f32.mrf.mxu1  ;;  %v4824_v43 = vsub.f32 %v11163_v10, %v14835_v24 }
 0x28f   :  { %4074 = vmatmul.mubr.f32.vlgmr.msra.gmra.mxu1 %v16017_v49  ;;  %3228 = vmatprep.mubr.f32.mxu0 %v10767_v53  ;;  %v16023_v53 = vld [vmem:[#allocation146_spill] sm:$0xff] }
 0x290   :  { %3789 = vmatpush2.msra.mxu0 %v16018_v2  ;;  %4080 = vmatprep.mubr.f32.mxu1 %v16019_v5  ;;  %v11094_v54 = vpop.f32.mrf.mxu1  ;;  %v11194_v2 = vsub.f32 %v4389_v41, %v11176_v1 }
 0x291   :  { %3793 = vmatprep.subr.mxu0 %v16020_v29  ;;  %v11203_v29 = vand.u32 4294901760, %v4387_v20 }
 0x292   :  { %3797 = vmatpush2.msra.mxu0 %v16021_v46  ;;  %v2767_v39 = vpop.f32.mrf.mxu1  ;;  %16047 = vst [vmem:[#allocation19_spill] sm:$0xff] %v11194_v2  ;;  %v11205_v46 = vand.u32 4294901760, %v4386_v33 }
 0x293   :  { %3231 = vmatmul.mubr.f32.gmra.mxu0 %v10778_v13  ;;  %3801 = vmatprep.subr.mxu0 %v16022_v9  ;;  %v16027_v13 = vand.u32 4294901760, %v15833_v32  ;;  %v16031_v32 = vld [vmem:[#allocation21_spill] sm:$0xff]  ;;  %16049 = vst [vmem:[#allocation109_spill] sm:$0xff] %v11203_v29  ;;  %v16051_v9 = vld [vmem:[#allocation167_spill] sm:$0xff] }
 0x294   :  { %4082 = vmatmul.mubr.f32.gmra.mxu1 %v16023_v53  ;;  %3805 = vmatpush2.msra.mxu0 %v16024_v40  ;;  %v11106_v30 = vpop.f32.mrf.mxu1  ;;  %v11122_v52 = vrot.slane %v1974_v35, %v16031_v32  ;;  %16050 = vst [vmem:[#allocation98_spill] sm:$0xff] %v11205_v46  ;;  %v4384_v35 = vld [vmem:[#allocation9 + $0xc0] sm:$0xff]  ;;  %v4377_v32 = vld [vmem:[#allocation9 + $0x88] sm:$0xff] }
 0x295   :  { %3815 = vmatprep.mubr.f32.mxu0 %v16011_v34  ;;  %4088 = vmatprep.mubr.f32.mxu1 %v16025_v6 }
 0x296   :  { %3809 = vmatprep.subr.mxu0 %v16026_v12  ;;  %v11112_v60 = vpop.f32.mrf.mxu1  ;;  %v16052_v12 = vld [vmem:[#allocation161_spill] sm:$0xff] }
 0x297   :  { %3813 = vmatpush2.msra.mxu0 %v16027_v13 }
 0x298   :  { %3817 = vmatmul.mubr.f32.vlgmr.msra.gmra.mxu0 %v16017_v49  ;;  %4090 = vmatmul.mubr.f32.gmra.mxu1 %v16028_v23  ;;  %v11124_v58 = vpop.f32.mrf.mxu1  ;;  %v4830_v49 = vsub.f32 %v11166_v17, %v14833_v28 }
 0x299   :  { %3823 = vmatprep.mubr.f32.mxu0 %v16019_v5  ;;  %4096 = vmatprep.mubr.f32.mxu1 %v16029_v21 }
 0x29a   :  { %4437 = vmatprep.subr.mxu0 %v11154_v47  ;;  %v4831_v40 = vand.u32 4294901760, %v4830_v49 }
 0x29b   :  { %4439 = vmatpush1.msra.mxu0 %v11156_v15 }
 0x29c   :  { %3825 = vmatmul.mubr.f32.gmra.mxu0 %v16023_v53  ;;  %4098 = vmatmul.mubr.f32.gmra.mxu1 %v16030_v37  ;;  %v4825_v53 = vand.u32 4294901760, %v4824_v43  ;;  %v4381_v43 = vld [vmem:[#allocation9 + $0xa8] sm:$0xff] }
 0x29d   :  { %3831 = vmatprep.mubr.f32.mxu0 %v16025_v6  ;;  %4104 = vmatprep.mubr.f32.mxu1 %v16032_v45  ;;  %v2126_v51 = vpop.f32.mrf.mxu0 }
 0x29e   :  { %v2127_v59 = vadd.f32 %v2126_v51, %v11122_v52  ;;  %v11131_v42 = vpop.f32.mrf.mxu1  ;;  %4441 = vmatprep.subr.mxu0 %v11176_v1  ;;  %4826 = vmatprep.subr.mxu1 %v4825_v53 }
 0x29f   :  { %v11135_v3 = vpop.f32.mrf.mxu0  ;;  %4443 = vmatpush1.msra.mxu0 %v11178_v50  ;;  %4832 = vmatpush1.msra.mxu1 %v4831_v40 }
 0x2a0   :  { %3833 = vmatmul.mubr.f32.gmra.mxu0 %v16028_v23  ;;  %4106 = vmatmul.mubr.f32.gmra.mxu1 %v16033_v8  ;;  %v11137_v14 = vadd.f32 %v2759_v31, %v2127_v59  ;;  %v11139_v7 = vpop.f32.mrf.mxu1  ;;  %v11197_v31 = vsub.f32 %v4388_v48, %v11178_v50  ;;  %v11217_v23 = vsub.f32 %v4387_v20, %v11203_v29  ;;  %v11230_v59 = vand.u32 4294901760, %v4384_v35 }
 0x2a1   :  { %3839 = vmatprep.mubr.f32.mxu0 %v16029_v21  ;;  %4112 = vmatprep.mubr.f32.mxu1 %v16034_v11  ;;  %v4385_v21 = vld [vmem:[#allocation9 + $0xc8] sm:$0xff] }
 0x2a2   :  { %16048 = vst [vmem:[#allocation83_spill] sm:$0xff] %v11197_v31  ;;  %v14830_v6 = vand.u32 4294901760, %v11197_v31  ;;  %16053 = vst [vmem:[#allocation118_spill] sm:$0xff] %v11217_v23  ;;  %4445 = vmatprep.subr.mxu0 %v11203_v29 }
 0x2a3   :  { %16056 = vst [vmem:[#allocation125_spill] sm:$0xff] %v11230_v59  ;;  %4447 = vmatpush1.msra.mxu0 %v11205_v46 }
 0x2a4   :  { %3841 = vmatmul.mubr.f32.gmra.mxu0 %v16030_v37  ;;  %4114 = vmatmul.mubr.f32.gmra.mxu1 %v16035_v61  ;;  %v2142_v38 = vpop.f32.mrf.mxu0  ;;  %v4842_v51 = vsub.f32 %v11197_v31, %v14830_v6 }
 0x2a5   :  { %3847 = vmatprep.mubr.f32.mxu0 %v16032_v45  ;;  %4120 = vmatprep.mubr.f32.mxu1 %v16036_v62  ;;  %v2143_v44 = vadd.f32 %v2142_v38, %v11122_v52  ;;  %v11146_v27 = vpop.f32.mrf.mxu1  ;;  %v4383_v38 = vld [vmem:[#allocation9 + $0xb8] sm:$0xff] }
 0x2a6   :  { %v11150_v55 = vpop.f32.mrf.mxu0  ;;  %v4843_v41 = vand.u32 4294901760, %v4842_v51  ;;  %v16065_v51 = vld [vmem:[#allocation163_spill] sm:$0xff] }
 0x2a7   :  { %v11152_v19 = vadd.f32 %v2767_v39, %v2143_v44  ;;  %v11160_v26 = vpop.f32.mrf.mxu1  ;;  %v14831_v39 = vand.u32 4294901760, %v11194_v2  ;;  %v4382_v44 = vld [vmem:[#allocation9 + $0xb0] sm:$0xff] }
 0x2a8   :  { %3849 = vmatmul.mubr.f32.gmra.mxu0 %v16033_v8  ;;  %4122 = vmatmul.mubr.f32.gmra.mxu1 %v16037_v16  ;;  %v11228_v8 = vand.u32 4294901760, %v4385_v21  ;;  %v11264_v40 = vand.u32 4294901760, %v4382_v44 }
 0x2a9   :  { %3855 = vmatprep.mubr.f32.mxu0 %v16034_v11  ;;  %4128 = vmatprep.mubr.f32.mxu1 %v16040_v57  ;;  %v4836_v45 = vsub.f32 %v11194_v2, %v14831_v39 }
 0x2aa   :  { %v11169_v56 = vpop.f32.mrf.mxu1  ;;  %16055 = vst [vmem:[#allocation108_spill] sm:$0xff] %v11228_v8  ;;  %v11244_v48 = vsub.f32 %v4385_v21, %v11228_v8  ;;  %16062 = vst [vmem:[#allocation132_spill] sm:$0xff] %v11264_v40  ;;  %4449 = vmatprep.subr.mxu0 %v11228_v8  ;;  %v4370_v8 = vld [vmem:[#allocation9 + $0x50] sm:$0xff] }
 0x2ab   :  { %4451 = vmatpush1.msra.mxu0 %v11230_v59  ;;  %v11437_v50 = vand.u32 4294901760, %v4370_v8 }
 0x2ac   :  { %3857 = vmatmul.mubr.f32.gmra.mxu0 %v16035_v61  ;;  %4130 = vmatmul.mubr.f32.gmra.mxu1 %v16043_v0  ;;  %v2158_v63 = vpop.f32.mrf.mxu0  ;;  %v11183_v25 = vpop.f32.mrf.mxu1  ;;  %v14829_v61 = vand.u32 4294901760, %v11217_v23  ;;  %16058 = vst [vmem:[#allocation130_spill] sm:$0xff] %v11244_v48  ;;  %v14832_v53 = vand.u32 4294901760, %v11244_v48 }
 0x2ad   :  { %3863 = vmatprep.mubr.f32.mxu0 %v16036_v62  ;;  %4136 = vmatprep.mubr.f32.mxu1 %v16046_v22  ;;  %v2159_v34 = vadd.f32 %v2158_v63, %v11122_v52  ;;  %v11247_v63 = vsub.f32 %v4384_v35, %v11230_v59  ;;  %16106 = vst [vmem:[#allocation48_spill] sm:$0xff] %v11437_v50 }
 0x2ae   :  { %v11185_v36 = vpop.f32.mrf.mxu0  ;;  %v4848_v20 = vsub.f32 %v11217_v23, %v14829_v61 }
 0x2af   :  { %v11201_v5 = vadd.f32 %v11112_v60, %v2159_v34  ;;  %v11220_v60 = vsub.f32 %v4386_v33, %v11205_v46  ;;  %16059 = vst [vmem:[#allocation129_spill] sm:$0xff] %v11247_v63  ;;  %v16060_v34 = vld [vmem:[#allocation24_spill] sm:$0xff]  ;;  %v11257_v33 = vand.u32 4294901760, %v4383_v38 }
 0x2b0   :  { %3865 = vmatmul.mubr.f32.gmra.mxu0 %v16037_v16  ;;  %4138 = vmatmul.mubr.f32.gmra.mxu1 %v16051_v9  ;;  %v4849_v21 = vand.u32 4294901760, %v4848_v20  ;;  %v11284_v20 = vsub.f32 %v4382_v44, %v11264_v40 }
 0x2b1   :  { %3871 = vmatprep.mubr.f32.mxu0 %v16040_v57  ;;  %4144 = vmatprep.mubr.f32.mxu1 %v16052_v12  ;;  %v11214_v13 = vpop.f32.mrf.mxu1  ;;  %16054 = vst [vmem:[#allocation105_spill] sm:$0xff] %v11220_v60  ;;  %v2174_v37 = vpop.f32.mrf.mxu0  ;;  %v14828_v62 = vand.u32 4294901760, %v11220_v60  ;;  %v4837_v57 = vand.u32 4294901760, %v4836_v45  ;;  %16061 = vst [vmem:[#allocation143_spill] sm:$0xff] %v11257_v33  ;;  %v11268_v35 = vsub.f32 %v4383_v38, %v11257_v33  ;;  %v4379_v45 = vld [vmem:[#allocation9 + $0x98] sm:$0xff] }
 0x2b2   :  { %v2175_v11 = vadd.f32 %v2174_v37, %v11122_v52  ;;  %v11270_v37 = vand.u32 4294901760, %v4381_v43  ;;  %16066 = vst [vmem:[#allocation136_spill] sm:$0xff] %v11284_v20  ;;  %v11300_v24 = vand.u32 4294901760, %v4379_v45  ;;  %4453 = vmatprep.subr.mxu0 %v11257_v33 }
 0x2b3   :  { %v11239_v4 = vpop.f32.mrf.mxu0  ;;  %v11241_v16 = vpop.f32.mrf.mxu1  ;;  %4838 = vmatprep.subr.mxu1 %v4837_v57  ;;  %v4854_v49 = vsub.f32 %v11220_v60, %v14828_v62  ;;  %16063 = vst [vmem:[#allocation23_spill] sm:$0xff] %v11268_v35  ;;  %v14840_v6 = vand.u32 4294901760, %v11268_v35  ;;  %4455 = vmatpush1.msra.mxu0 %v11264_v40  ;;  %v4375_v60 = vld [vmem:[#allocation9 + $0x78] sm:$0xff] }
 0x2b4   :  { %3873 = vmatmul.mubr.f32.gmra.mxu0 %v16043_v0  ;;  %4146 = vmatmul.mubr.f32.gmra.mxu1 %v16057_v18  ;;  %v11252_v0 = vadd.f32 %v11131_v42, %v2175_v11  ;;  %v4380_v42 = vld [vmem:[#allocation9 + $0xa0] sm:$0xff]  ;;  %16064 = vst [vmem:[#allocation134_spill] sm:$0xff] %v11270_v37  ;;  %16071 = vst [vmem:[#allocation144_spill] sm:$0xff] %v11300_v24 }
 0x2b5   :  { %3879 = vmatprep.mubr.f32.mxu0 %v16046_v22  ;;  %4152 = vmatprep.mubr.f32.mxu1 %v16060_v34  ;;  %v14834_v22 = vand.u32 4294901760, %v11247_v63  ;;  %v4855_v62 = vand.u32 4294901760, %v4854_v49  ;;  %v11291_v49 = vsub.f32 %v4381_v43, %v11270_v37  ;;  %v11293_v39 = vand.u32 4294901760, %v4380_v42 }
 0x2b6   :  { %4844 = vmatpush1.msra.mxu1 %v4843_v41  ;;  %v4860_v41 = vsub.f32 %v11244_v48, %v14832_v53  ;;  %v4378_v53 = vld [vmem:[#allocation9 + $0x90] sm:$0xff]  ;;  %4457 = vmatprep.subr.mxu0 %v11270_v37  ;;  %v4371_v37 = vld [vmem:[#allocation9 + $0x58] sm:$0xff] }
 0x2b7   :  { %v11275_v57 = vpop.f32.mrf.mxu1  ;;  %v4866_v38 = vsub.f32 %v11247_v63, %v14834_v22  ;;  %16068 = vst [vmem:[#allocation138_spill] sm:$0xff] %v11291_v49  ;;  %16069 = vst [vmem:[#allocation139_spill] sm:$0xff] %v11293_v39  ;;  %4850 = vmatprep.subr.mxu1 %v4849_v21  ;;  %v4872_v63 = vsub.f32 %v11268_v35, %v14840_v6  ;;  %v16072_v21 = vld [vmem:[#allocation28_spill] sm:$0xff]  ;;  %v16076_v6 = vld [vmem:[#allocation165_spill] sm:$0xff]  ;;  %v11328_v35 = vand.u32 4294901760, %v4377_v32  ;;  %4459 = vmatpush1.msra.mxu0 %v11293_v39 }
 0x2b8   :  { %3881 = vmatmul.mubr.f32.gmra.mxu0 %v16051_v9  ;;  %4154 = vmatmul.mubr.f32.gmra.mxu1 %v16065_v51  ;;  %v2190_v11 = vpop.f32.mrf.mxu0  ;;  %v16067_v9 = vld [vmem:[#allocation26_spill] sm:$0xff]  ;;  %v4861_v44 = vand.u32 4294901760, %v4860_v41 }
 0x2b9   :  { %3887 = vmatprep.mubr.f32.mxu0 %v16052_v12  ;;  %4160 = vmatprep.mubr.f32.mxu1 %v16067_v9  ;;  %v2191_v61 = vadd.f32 %v2190_v11, %v11122_v52  ;;  %v11297_v22 = vpop.f32.mrf.mxu1  ;;  %v14845_v12 = vand.u32 4294901760, %v11284_v20  ;;  %v4867_v43 = vand.u32 4294901760, %v4866_v38  ;;  %v4376_v38 = vld [vmem:[#allocation9 + $0x80] sm:$0xff]  ;;  %v4873_v48 = vand.u32 4294901760, %v4872_v63  ;;  %16077 = vst [vmem:[#allocation43_spill] sm:$0xff] %v11328_v35 }
 0x2ba   :  { %v11295_v28 = vpop.f32.mrf.mxu0  ;;  %16070 = vst [vmem:[#allocation141_spill] sm:$0xff] %v11297_v22  ;;  %4856 = vmatpush1.msra.mxu1 %v4855_v62  ;;  %v11322_v62 = vand.u32 4294901760, %v4378_v53  ;;  %v11341_v2 = vsub.f32 %v4377_v32, %v11328_v35  ;;  %v11356_v32 = vand.u32 4294901760, %v4375_v60  ;;  %4461 = vmatprep.subr.mxu0 %v11300_v24 }
 0x2bb   :  { %v11304_v11 = vadd.f32 %v11146_v27, %v2191_v61  ;;  %v4878_v41 = vsub.f32 %v11284_v20, %v14845_v12  ;;  %v11317_v27 = vsub.f32 %v4380_v42, %v11293_v39  ;;  %v11320_v61 = vsub.f32 %v4379_v45, %v11300_v24  ;;  %4862 = vmatprep.subr.mxu1 %v4861_v44 }
 0x2bc   :  { %3889 = vmatmul.mubr.f32.gmra.mxu0 %v16057_v18  ;;  %4162 = vmatmul.mubr.f32.gmra.mxu1 %v16072_v21  ;;  %16075 = vst [vmem:[#allocation27_spill] sm:$0xff] %v11322_v62  ;;  %v16078_v42 = vand.u32 4294901760, %v11291_v49  ;;  %16080 = vst [vmem:[#allocation57_spill] sm:$0xff] %v11341_v2  ;;  %v11343_v44 = vand.u32 4294901760, %v4376_v38  ;;  %v11374_v33 = vsub.f32 %v4375_v60, %v11356_v32 }
 0x2bd   :  { %16073 = vst [vmem:[#allocation145_spill] sm:$0xff] %v11317_v27  ;;  %16074 = vst [vmem:[#allocation25_spill] sm:$0xff] %v11320_v61  ;;  %3895 = vmatprep.mubr.f32.mxu0 %v16060_v34  ;;  %4168 = vmatprep.mubr.f32.mxu1 %v16076_v6  ;;  %v11326_v18 = vpop.f32.mrf.mxu1  ;;  %v2206_v12 = vpop.f32.mrf.mxu0  ;;  %v14862_v20 = vand.u32 4294901760, %v11317_v27  ;;  %v11336_v34 = vsub.f32 %v4378_v53, %v11322_v62  ;;  %v4879_v31 = vand.u32 4294901760, %v4878_v41  ;;  %v4374_v41 = vld [vmem:[#allocation9 + $0x70] sm:$0xff]  ;;  %v16086_v17 = vand.u32 4294901760, %v11320_v61 }
 0x2be   :  { %v4884_v45 = vsub.f32 %v11291_v49, %v16078_v42  ;;  %v2207_v63 = vadd.f32 %v2206_v12, %v11122_v52  ;;  %4868 = vmatpush1.msra.mxu1 %v4867_v43  ;;  %16081 = vst [vmem:[#allocation33_spill] sm:$0xff] %v11343_v44  ;;  %v16082_v42 = vld [vmem:[#allocation31_spill] sm:$0xff]  ;;  %16084 = vst [vmem:[#allocation37_spill] sm:$0xff] %v11356_v32  ;;  %4463 = vmatpush1.msra.mxu0 %v11322_v62 }
 0x2bf   :  { %16079 = vst [vmem:[#allocation29_spill] sm:$0xff] %v11336_v34  ;;  %v11348_v23 = vpop.f32.mrf.mxu0  ;;  %v11350_v53 = vpop.f32.mrf.mxu1  ;;  %v4890_v12 = vsub.f32 %v11317_v27, %v14862_v20  ;;  %v16085_v49 = vld [vmem:[#allocation35_spill] sm:$0xff]  ;;  %v4896_v39 = vsub.f32 %v11320_v61, %v16086_v17  ;;  %v11368_v20 = vsub.f32 %v4376_v38, %v11343_v44  ;;  %4874 = vmatprep.subr.mxu1 %v4873_v48  ;;  %v16088_v40 = vand.u32 4294901760, %v11336_v34  ;;  %v16094_v61 = vld [vmem:[#allocation45_spill] sm:$0xff] }
 0x2c0   :  { %3897 = vmatmul.mubr.f32.gmra.mxu0 %v16065_v51  ;;  %4170 = vmatmul.mubr.f32.gmra.mxu1 %v16082_v42  ;;  %16083 = vst [vmem:[#allocation30_spill] sm:$0xff] %v11350_v53  ;;  %v11361_v51 = vadd.f32 %v11169_v56, %v2207_v63  ;;  %v4373_v43 = vld [vmem:[#allocation9 + $0x68] sm:$0xff]  ;;  %v4885_v27 = vand.u32 4294901760, %v4884_v45  ;;  %16089 = vst [vmem:[#allocation17_spill] sm:$0xff] %v11374_v33  ;;  %v4372_v56 = vld [vmem:[#allocation9 + $0x60] sm:$0xff]  ;;  %v11378_v38 = vand.u32 4294901760, %v4374_v41 }
 0x2c1   :  { %3903 = vmatprep.mubr.f32.mxu0 %v16067_v9  ;;  %4176 = vmatprep.mubr.f32.mxu1 %v16085_v49  ;;  %16087 = vst [vmem:[#allocation61_spill] sm:$0xff] %v11368_v20  ;;  %v4902_v9 = vsub.f32 %v11336_v34, %v16088_v40  ;;  %v4891_v17 = vand.u32 4294901760, %v4890_v12  ;;  %v16091_v48 = vld [vmem:[#allocation39_spill] sm:$0xff]  ;;  %v16092_v45 = vand.u32 4294901760, %v11341_v2  ;;  %v11390_v12 = vand.u32 4294901760, %v4373_v43 }
 0x2c2   :  { %4880 = vmatpush1.msra.mxu1 %v4879_v31  ;;  %16090 = vst [vmem:[#allocation34_spill] sm:$0xff] %v11378_v38  ;;  %v4897_v62 = vand.u32 4294901760, %v4896_v39  ;;  %v11399_v24 = vand.u32 4294901760, %v4372_v56  ;;  %v16097_v31 = vand.u32 4294901760, %v11368_v20  ;;  %4465 = vmatprep.subr.mxu0 %v11328_v35 }
 0x2c3   :  { %v2222_v63 = vpop.f32.mrf.mxu0  ;;  %v11384_v60 = vpop.f32.mrf.mxu1  ;;  %v4908_v34 = vsub.f32 %v11341_v2, %v16092_v45  ;;  %16093 = vst [vmem:[#allocation41_spill] sm:$0xff] %v11390_v12  ;;  %4886 = vmatprep.subr.mxu1 %v4885_v27  ;;  %v4903_v45 = vand.u32 4294901760, %v4902_v9  ;;  %v11419_v9 = vand.u32 4294901760, %v4371_v37  ;;  %4467 = vmatpush1.msra.mxu0 %v11343_v44  ;;  %v4366_v44 = vld [vmem:[#allocation9 + $0x30] sm:$0xff] }
 0x2c4   :  { %3905 = vmatmul.mubr.f32.gmra.mxu0 %v16072_v21  ;;  %4178 = vmatmul.mubr.f32.gmra.mxu1 %v16091_v48  ;;  %v2223_v40 = vadd.f32 %v2222_v63, %v11122_v52  ;;  %v11397_v63 = vsub.f32 %v4374_v41, %v11378_v38  ;;  %16096 = vst [vmem:[#allocation18_spill] sm:$0xff] %v11399_v24  ;;  %v16100_v41 = vand.u32 4294901760, %v11374_v33 }
 0x2c5   :  { %3911 = vmatprep.mubr.f32.mxu0 %v16076_v6  ;;  %4184 = vmatprep.mubr.f32.mxu1 %v16094_v61  ;;  %v11394_v21 = vpop.f32.mrf.mxu0  ;;  %v4914_v2 = vsub.f32 %v11368_v20, %v16097_v31  ;;  %v11408_v6 = vsub.f32 %v4373_v43, %v11390_v12  ;;  %v11410_v39 = vpop.f32.mrf.mxu1  ;;  %v11417_v27 = vsub.f32 %v4372_v56, %v11399_v24  ;;  %v4369_v43 = vld [vmem:[#allocation9 + $0x48] sm:$0xff]  ;;  %v4909_v31 = vand.u32 4294901760, %v4908_v34 }
 0x2c6   :  { %16095 = vst [vmem:[#allocation62_spill] sm:$0xff] %v11397_v63  ;;  %v11402_v59 = vadd.f32 %v11214_v13, %v2223_v40  ;;  %16099 = vst [vmem:[#allocation155_spill] sm:$0xff] %v11410_v39  ;;  %4892 = vmatpush1.msra.mxu1 %v4891_v17  ;;  %v4920_v29 = vsub.f32 %v11374_v33, %v16100_v41  ;;  %v14897_v13 = vand.u32 4294901760, %v11397_v63  ;;  %v16103_v40 = vld [vmem:[#allocation47_spill] sm:$0xff]  ;;  %v16104_v41 = vld [vmem:[#allocation166_spill] sm:$0xff]  ;;  %v11445_v1 = vand.u32 4294901760, %v4369_v43 }
 0x2c7   :  { %16098 = vst [vmem:[#allocation38_spill] sm:$0xff] %v11408_v6  ;;  %v2238_v46 = vpop.f32.mrf.mxu0  ;;  %16101 = vst [vmem:[#allocation55_spill] sm:$0xff] %v11417_v27  ;;  %v14902_v20 = vand.u32 4294901760, %v11408_v6  ;;  %4898 = vmatprep.subr.mxu1 %v4897_v62  ;;  %v16108_v15 = vand.u32 4294901760, %v11417_v27  ;;  %v11455_v62 = vsub.f32 %v4370_v8, %v11437_v50  ;;  %4469 = vmatprep.subr.mxu0 %v11356_v32 }
 0x2c8   :  { %16102 = vst [vmem:[#allocation68_spill] sm:$0xff] %v11419_v9  ;;  %3913 = vmatmul.mubr.f32.gmra.mxu0 %v16082_v42  ;;  %4186 = vmatmul.mubr.f32.gmra.mxu1 %v16103_v40  ;;  %v2239_v17 = vadd.f32 %v2238_v46, %v11122_v52  ;;  %v4926_v33 = vsub.f32 %v11397_v63, %v14897_v13  ;;  %16107 = vst [vmem:[#allocation32_spill] sm:$0xff] %v11445_v1  ;;  %v4368_v13 = vld [vmem:[#allocation9 + $0x40] sm:$0xff] }
 0x2c9   :  { %3919 = vmatprep.mubr.f32.mxu0 %v16085_v49  ;;  %4192 = vmatprep.mubr.f32.mxu1 %v16104_v41  ;;  %v11428_v56 = vpop.f32.mrf.mxu0  ;;  %v11435_v42 = vsub.f32 %v4371_v37, %v11419_v9  ;;  %v4915_v49 = vand.u32 4294901760, %v4914_v2  ;;  %v4932_v34 = vsub.f32 %v11408_v6, %v14902_v20  ;;  %v4921_v37 = vand.u32 4294901760, %v4920_v29  ;;  %16109 = vst [vmem:[#allocation49_spill] sm:$0xff] %v11455_v62  ;;  %v16110_v20 = vld [vmem:[#allocation168_spill] sm:$0xff] }
 0x2ca   :  { %v11440_v46 = vadd.f32 %v11275_v57, %v2239_v17  ;;  %v11448_v63 = vpop.f32.mrf.mxu1  ;;  %4904 = vmatpush1.msra.mxu1 %v4903_v45  ;;  %v4938_v57 = vsub.f32 %v11417_v27, %v16108_v15  ;;  %v4367_v17 = vld [vmem:[#allocation9 + $0x38] sm:$0xff]  ;;  %v4927_v45 = vand.u32 4294901760, %v4926_v33  ;;  %v11462_v29 = vsub.f32 %v4369_v43, %v11445_v1  ;;  %v4365_v33 = vld [vmem:[#allocation9 + $0x28] sm:$0xff]  ;;  %4471 = vmatpush1.msra.mxu0 %v11378_v38 }
 0x2cb   :  { %16105 = vst [vmem:[#allocation58_spill] sm:$0xff] %v11435_v42  ;;  %v2254_v35 = vpop.f32.mrf.mxu0  ;;  %4910 = vmatprep.subr.mxu1 %v4909_v31  ;;  %v4933_v2 = vand.u32 4294901760, %v4932_v34  ;;  %v16113_v27 = vand.u32 4294901760, %v11435_v42  ;;  %v14913_v32 = vand.u32 4294901760, %v11455_v62  ;;  %v11479_v53 = vand.u32 4294901760, %v4367_v17  ;;  %4473 = vmatprep.subr.mxu0 %v11390_v12 }
 0x2cc   :  { %3921 = vmatmul.mubr.f32.gmra.mxu0 %v16091_v48  ;;  %4194 = vmatmul.mubr.f32.gmra.mxu1 %v16110_v20  ;;  %v2255_v6 = vadd.f32 %v2254_v35, %v11122_v52  ;;  %16111 = vst [vmem:[#allocation20_spill] sm:$0xff] %v11462_v29  ;;  %v11467_v8 = vpop.f32.mrf.mxu1  ;;  %v11473_v35 = vand.u32 4294901760, %v4368_v13  ;;  %v14916_v39 = vand.u32 4294901760, %v11462_v29 }
 0x2cd   :  { %3927 = vmatprep.mubr.f32.mxu0 %v16094_v61  ;;  %v11465_v15 = vpop.f32.mrf.mxu0  ;;  %16112 = vst [vmem:[#allocation42_spill] sm:$0xff] %v11467_v8  ;;  %v4944_v48 = vsub.f32 %v11435_v42, %v16113_v27  ;;  %4916 = vmatpush1.msra.mxu1 %v4915_v49  ;;  %v4939_v61 = vand.u32 4294901760, %v4938_v57  ;;  %16115 = vst [vmem:[#allocation50_spill] sm:$0xff] %v11479_v53  ;;  %v4950_v27 = vsub.f32 %v11455_v62, %v14913_v32  ;;  %v4363_v62 = vld [vmem:[#allocation9 + $0x18] sm:$0xff] }
 0x2ce   :  { %16114 = vst [vmem:[#allocation36_spill] sm:$0xff] %v11473_v35  ;;  %v11476_v43 = vadd.f32 %v11326_v18, %v2255_v6  ;;  %4922 = vmatprep.subr.mxu1 %v4921_v37  ;;  %v11486_v34 = vsub.f32 %v4368_v13, %v11473_v35  ;;  %v11488_v42 = vand.u32 4294901760, %v4366_v44  ;;  %v4364_v18 = vld [vmem:[#allocation9 + $0x20] sm:$0xff]  ;;  %v4956_v49 = vsub.f32 %v11462_v29, %v14916_v39  ;;  %v4403_v8 = vld [vmem:[#allocation9 + $0x158] sm:$0xff] }
 0x2cf   :  { %v4945_v31 = vand.u32 4294901760, %v4944_v48  ;;  %4928 = vmatpush1.msra.mxu1 %v4927_v45  ;;  %v11496_v37 = vsub.f32 %v4367_v17, %v11479_v53  ;;  %v11498_v57 = vand.u32 4294901760, %v4365_v33  ;;  %v4951_v32 = vand.u32 4294901760, %v4950_v27  ;;  %4475 = vmatpush1.msra.mxu0 %v11399_v24 }
 0x2d0   :  { %16116 = vst [vmem:[#allocation22_spill] sm:$0xff] %v11486_v34  ;;  %16117 = vst [vmem:[#allocation52_spill] sm:$0xff] %v11488_v42  ;;  %3929 = vmatmul.mubr.f32.gmra.mxu0 %v16103_v40  ;;  %v2270_v6 = vpop.f32.mrf.mxu0  ;;  %v11502_v48 = vpop.f32.mrf.mxu1  ;;  %4934 = vmatprep.subr.mxu1 %v4933_v2  ;;  %v14921_v40 = vand.u32 4294901760, %v11486_v34  ;;  %v11506_v45 = vsub.f32 %v4366_v44, %v11488_v42  ;;  %v4957_v17 = vand.u32 4294901760, %v4956_v49  ;;  %v4362_v2 = vld [vmem:[#allocation9 + $0x10] sm:$0xff] }
 0x2d1   :  { %16118 = vst [vmem:[#allocation65_spill] sm:$0xff] %v11496_v37  ;;  %16119 = vst [vmem:[#allocation54_spill] sm:$0xff] %v11498_v57  ;;  %3935 = vmatprep.mubr.f32.mxu0 %v16104_v41  ;;  %v2271_v13 = vadd.f32 %v2270_v6, %v11122_v52  ;;  %4940 = vmatpush1.msra.mxu1 %v4939_v61  ;;  %v14924_v29 = vand.u32 4294901760, %v11496_v37  ;;  %v11512_v41 = vsub.f32 %v4365_v33, %v11498_v57 }
 0x2d2   :  { %16120 = vst [vmem:[#allocation67_spill] sm:$0xff] %v11506_v45  ;;  %v11508_v39 = vpop.f32.mrf.mxu0  ;;  %v11515_v6 = vand.u32 4294901760, %v4364_v18  ;;  %v11517_v27 = vpop.f32.mrf.mxu1  ;;  %4946 = vmatprep.subr.mxu1 %v4945_v31  ;;  %v4962_v61 = vsub.f32 %v11486_v34, %v14921_v40  ;;  %v14929_v49 = vand.u32 4294901760, %v11506_v45  ;;  %4477 = vmatprep.subr.mxu0 %v11419_v9  ;;  %v11535_v31 = vand.u32 4294901760, %v4363_v62 }
 0x2d3   :  { %16121 = vst [vmem:[#allocation59_spill] sm:$0xff] %v11512_v41  ;;  %16123 = vst [vmem:[#allocation64_spill] sm:$0xff] %v11517_v27  ;;  %v11520_v44 = vadd.f32 %v11384_v60, %v2271_v13  ;;  %4952 = vmatpush1.msra.mxu1 %v4951_v32  ;;  %v4968_v33 = vsub.f32 %v11496_v37, %v14924_v29  ;;  %v14934_v24 = vand.u32 4294901760, %v11512_v41  ;;  %v4361_v13 = vld [vmem:[#allocation9 + $0x8] sm:$0xff]  ;;  %4479 = vmatpush1.msra.mxu0 %v11437_v50  ;;  %v4360_v32 = vld [vmem:[#allocation9] sm:$0xff] }
 0x2d4   :  { %16122 = vst [vmem:[#allocation40_spill] sm:$0xff] %v11515_v6  ;;  %3937 = vmatmul.mubr.f32.gmra.mxu0 %v16110_v20  ;;  %v11533_v60 = vsub.f32 %v4364_v18, %v11515_v6  ;;  %16125 = vst [vmem:[#allocation66_spill] sm:$0xff] %v11535_v31  ;;  %4958 = vmatprep.subr.mxu1 %v4957_v17  ;;  %v4963_v40 = vand.u32 4294901760, %v4962_v61  ;;  %v4974_v34 = vsub.f32 %v11506_v45, %v14929_v49 }
 0x2d5   :  { %v11541_v20 = vand.u32 4294901760, %v4362_v2  ;;  %v4969_v37 = vand.u32 4294901760, %v4968_v33  ;;  %v4980_v18 = vsub.f32 %v11512_v41, %v14934_v24  ;;  %v11548_v17 = vsub.f32 %v4363_v62, %v11535_v31  ;;  %4481 = vmatprep.subr.mxu0 %v11445_v1  ;;  %v4423_v24 = vld [vmem:[#allocation9 + $0x1f8] sm:$0xff] }
 0x2d6   :  { %16124 = vst [vmem:[#allocation44_spill] sm:$0xff] %v11533_v60  ;;  %v2286_v29 = vpop.f32.mrf.mxu0  ;;  %v11552_v49 = vpop.f32.mrf.mxu1  ;;  %4964 = vmatpush1.msra.mxu1 %v4963_v40  ;;  %v4975_v45 = vand.u32 4294901760, %v4974_v34  ;;  %v11557_v33 = vand.u32 4294901760, %v4361_v13  ;;  %4483 = vmatpush1.msra.mxu0 %v11473_v35  ;;  %v16130_v41 = vand.u32 4294901760, %v11533_v60  ;;  %v11566_v40 = vand.u32 4294901760, %v4360_v32  ;;  %v4422_v34 = vld [vmem:[#allocation9 + $0x1f0] sm:$0xff] }
 0x2d7   :  { %16126 = vst [vmem:[#allocation46_spill] sm:$0xff] %v11541_v20  ;;  %16127 = vst [vmem:[#allocation69_spill] sm:$0xff] %v11548_v17  ;;  %v2287_v61 = vadd.f32 %v2286_v29, %v11122_v52  ;;  %v11555_v50 = vsub.f32 %v4362_v2, %v11541_v20  ;;  %4970 = vmatprep.subr.mxu1 %v4969_v37  ;;  %v4981_v62 = vand.u32 4294901760, %v4980_v18  ;;  %4485 = vmatprep.subr.mxu0 %v11479_v53 }
 0x2d8   :  { %16129 = vst [vmem:[#allocation71_spill] sm:$0xff] %v11557_v33  ;;  %v11560_v9 = vpop.f32.mrf.mxu0  ;;  %v4986_v29 = vsub.f32 %v11533_v60, %v16130_v41  ;;  %16131 = vst [vmem:[#allocation53_spill] sm:$0xff] %v11566_v40  ;;  %v11569_v2 = vpop.f32.mrf.mxu1  ;;  %4976 = vmatpush1.msra.mxu1 %v4975_v45  ;;  %v11576_v18 = vsub.f32 %v4361_v13, %v11557_v33  ;;  %4487 = vmatpush1.msra.mxu0 %v11488_v42  ;;  %v4421_v41 = vld [vmem:[#allocation9 + $0x1e8] sm:$0xff]  ;;  %v16134_v60 = vand.u32 4294901760, %v11548_v17 }
 0x2d9   :  { %16128 = vst [vmem:[#allocation51_spill] sm:$0xff] %v11555_v50  ;;  %16132 = vst [vmem:[#allocation73_spill] sm:$0xff] %v11569_v2  ;;  %v11572_v35 = vadd.f32 %v11448_v63, %v2287_v61  ;;  %v14951_v37 = vand.u32 4294901760, %v11555_v50  ;;  %4982 = vmatprep.subr.mxu1 %v4981_v62  ;;  %v11583_v12 = vsub.f32 %v4360_v32, %v11566_v40  ;;  %v11585_v63 = vand.u32 4294901760, %v4423_v24  ;;  %v4420_v62 = vld [vmem:[#allocation9 + $0x1e0] sm:$0xff] }
 0x2da   :  { %16133 = vst [vmem:[#allocation56_spill] sm:$0xff] %v11576_v18  ;;  %v4987_v1 = vand.u32 4294901760, %v4986_v29  ;;  %v4992_v53 = vsub.f32 %v11548_v17, %v16134_v60  ;;  %4489 = vmatprep.subr.mxu0 %v11498_v57  ;;  %v11592_v61 = vand.u32 4294901760, %v4422_v34  ;;  %v11599_v57 = vand.u32 4294901760, %v4421_v41 }
 0x2db   :  { %16135 = vst [vmem:[#allocation75_spill] sm:$0xff] %v11583_v12  ;;  %16136 = vst [vmem:[#allocation60_spill] sm:$0xff] %v11585_v63  ;;  %v4998_v45 = vsub.f32 %v11555_v50, %v14951_v37  ;;  %4491 = vmatpush1.msra.mxu0 %v11515_v6  ;;  %v14964_v32 = vand.u32 4294901760, %v11583_v12  ;;  %v11597_v17 = vsub.f32 %v4423_v24, %v11585_v63  ;;  %v16140_v6 = vand.u32 4294901760, %v11576_v18 }
 0x2dc   :  { %16137 = vst [vmem:[#allocation81_spill] sm:$0xff] %v11592_v61  ;;  %v2302_v29 = vpop.f32.mrf.mxu0  ;;  %4988 = vmatpush1.msra.mxu1 %v4987_v1  ;;  %v4993_v60 = vand.u32 4294901760, %v4992_v53  ;;  %16139 = vst [vmem:[#allocation72_spill] sm:$0xff] %v11599_v57  ;;  %4493 = vmatprep.subr.mxu0 %v11535_v31  ;;  %v11603_v13 = vpop.f32.mrf.mxu1  ;;  %v11609_v1 = vsub.f32 %v4422_v34, %v11592_v61  ;;  %v11621_v31 = vand.u32 4294901760, %v4420_v62 }
 0x2dd   :  { %16138 = vst [vmem:[#allocation70_spill] sm:$0xff] %v11597_v17  ;;  %v2303_v37 = vadd.f32 %v2302_v29, %v11122_v52  ;;  %v4999_v50 = vand.u32 4294901760, %v4998_v45  ;;  %v5004_v42 = vsub.f32 %v11576_v18, %v16140_v6  ;;  %4495 = vmatpush1.msra.mxu0 %v11541_v20  ;;  %v5010_v53 = vsub.f32 %v11583_v12, %v14964_v32  ;;  %v4419_v6 = vld [vmem:[#allocation9 + $0x1d8] sm:$0xff]  ;;  %v4418_v18 = vld [vmem:[#allocation9 + $0x1d0] sm:$0xff]  ;;  %v4417_v12 = vld [vmem:[#allocation9 + $0x1c8] sm:$0xff] }
 0x2de   :  { %16141 = vst [vmem:[#allocation85_spill] sm:$0xff] %v11609_v1  ;;  %v11612_v24 = vpop.f32.mrf.mxu0  ;;  %4994 = vmatprep.subr.mxu1 %v4993_v60  ;;  %v14971_v29 = vand.u32 4294901760, %v11597_v17  ;;  %v11619_v45 = vsub.f32 %v4421_v41, %v11599_v57  ;;  %16144 = vst [vmem:[#allocation76_spill] sm:$0xff] %v11621_v31  ;;  %4497 = vmatprep.subr.mxu0 %v11557_v33  ;;  %v11624_v34 = vpop.f32.mrf.mxu1  ;;  %v14974_v32 = vand.u32 4294901760, %v11609_v1 }
 0x2df   :  { %16142 = vst [vmem:[#allocation74_spill] sm:$0xff] %v11612_v24  ;;  %16145 = vst [vmem:[#allocation89_spill] sm:$0xff] %v11624_v34  ;;  %v11627_v20 = vadd.f32 %v11502_v48, %v2303_v37  ;;  %5000 = vmatpush1.msra.mxu1 %v4999_v50  ;;  %v5005_v60 = vand.u32 4294901760, %v5004_v42  ;;  %4499 = vmatpush1.msra.mxu0 %v11566_v40  ;;  %v5011_v41 = vand.u32 4294901760, %v5010_v53  ;;  %v11642_v42 = vand.u32 4294901760, %v4419_v6  ;;  %v4416_v37 = vld [vmem:[#allocation9 + $0x1c0] sm:$0xff] }
 0x2e0   :  { %16143 = vst [vmem:[#allocation87_spill] sm:$0xff] %v11619_v45  ;;  %v5016_v38 = vsub.f32 %v11597_v17, %v14971_v29  ;;  %v14981_v2 = vand.u32 4294901760, %v11619_v45  ;;  %v11636_v33 = vsub.f32 %v4420_v62, %v11621_v31  ;;  %4501 = vmatprep.subr.mxu0 %v11585_v63  ;;  %v5022_v50 = vsub.f32 %v11609_v1, %v14974_v32  ;;  %v4413_v40 = vld [vmem:[#allocation9 + $0x1a8] sm:$0xff] }
 0x2e1   :  { %5006 = vmatprep.subr.mxu1 %v5005_v60  ;;  %16147 = vst [vmem:[#allocation90_spill] sm:$0xff] %v11642_v42  ;;  %v11644_v48 = vand.u32 4294901760, %v4418_v18  ;;  %4503 = vmatpush2.msra.mxu0 %v11592_v61  ;;  %v11651_v17 = vand.u32 4294901760, %v4417_v12  ;;  %v11658_v61 = vsub.f32 %v4419_v6, %v11642_v42  ;;  %v4414_v6 = vld [vmem:[#allocation9 + $0x1b0] sm:$0xff]  ;;  %v4409_v34 = vld [vmem:[#allocation9 + $0x188] sm:$0xff] }
 0x2e2   :  { %16146 = vst [vmem:[#allocation78_spill] sm:$0xff] %v11636_v33  ;;  %v2318_v53 = vpop.f32.mrf.mxu0  ;;  %5012 = vmatpush1.msra.mxu1 %v5011_v41  ;;  %v5017_v29 = vand.u32 4294901760, %v5016_v38  ;;  %v5028_v62 = vsub.f32 %v11619_v45, %v14981_v2  ;;  %4505 = vmatprep.subr.mxu0 %v11599_v57  ;;  %v11655_v1 = vpop.f32.mrf.mxu1  ;;  %v5023_v63 = vand.u32 4294901760, %v5022_v50  ;;  %v4415_v41 = vld [vmem:[#allocation9 + $0x1b8] sm:$0xff]  ;;  %v16153_v45 = vand.u32 4294901760, %v11636_v33 }
 0x2e3   :  { %16148 = vst [vmem:[#allocation79_spill] sm:$0xff] %v11644_v48  ;;  %16149 = vst [vmem:[#allocation94_spill] sm:$0xff] %v11651_v17  ;;  %v2319_v32 = vadd.f32 %v2318_v53, %v11122_v52  ;;  %v11661_v38 = vsub.f32 %v4418_v18, %v11644_v48  ;;  %4507 = vmatpush2.msra.mxu0 %v11621_v31  ;;  %v11670_v57 = vsub.f32 %v4417_v12, %v11651_v17 }
 0x2e4   :  { %16150 = vst [vmem:[#allocation82_spill] sm:$0xff] %v11658_v61  ;;  %v11664_v2 = vpop.f32.mrf.mxu0  ;;  %5018 = vmatprep.subr.mxu1 %v5017_v29  ;;  %v5029_v60 = vand.u32 4294901760, %v5028_v62  ;;  %v5034_v53 = vsub.f32 %v11636_v33, %v16153_v45  ;;  %v11672_v50 = vand.u32 4294901760, %v4416_v37  ;;  %4509 = vmatprep.subr.mxu0 %v11642_v42  ;;  %v11675_v18 = vpop.f32.mrf.mxu1  ;;  %v14996_v29 = vand.u32 4294901760, %v11658_v61 }
 0x2e5   :  { %16151 = vst [vmem:[#allocation95_spill] sm:$0xff] %v11661_v38  ;;  %16152 = vst [vmem:[#allocation84_spill] sm:$0xff] %v11664_v2  ;;  %v11678_v31 = vadd.f32 %v11552_v49, %v2319_v32  ;;  %5024 = vmatpush2.msra.mxu1 %v5023_v63  ;;  %v14999_v62 = vand.u32 4294901760, %v11661_v38  ;;  %4511 = vmatpush2.msra.mxu0 %v11644_v48  ;;  %v15006_v45 = vand.u32 4294901760, %v11670_v57  ;;  %v11687_v42 = vand.u32 4294901760, %v4415_v41 }
 0x2e6   :  { %16154 = vst [vmem:[#allocation97_spill] sm:$0xff] %v11670_v57  ;;  %16155 = vst [vmem:[#allocation86_spill] sm:$0xff] %v11672_v50  ;;  %5030 = vmatprep.subr.mxu1 %v5029_v60  ;;  %v5035_v12 = vand.u32 4294901760, %v5034_v53  ;;  %v11685_v33 = vsub.f32 %v4416_v37, %v11672_v50  ;;  %4513 = vmatprep.subr.mxu0 %v11651_v17  ;;  %v5040_v49 = vsub.f32 %v11658_v61, %v14996_v29  ;;  %v4412_v61 = vld [vmem:[#allocation9 + $0x1a0] sm:$0xff] }
 0x2e7   :  { %16156 = vst [vmem:[#allocation99_spill] sm:$0xff] %v11675_v18  ;;  %16158 = vst [vmem:[#allocation101_spill] sm:$0xff] %v11687_v42  ;;  %v5046_v63 = vsub.f32 %v11661_v38, %v14999_v62  ;;  %v11696_v32 = vand.u32 4294901760, %v4414_v6  ;;  %4515 = vmatpush2.msra.mxu0 %v11672_v50  ;;  %v5052_v37 = vsub.f32 %v11670_v57, %v15006_v45  ;;  %v11706_v29 = vand.u32 4294901760, %v4413_v40  ;;  %v4411_v45 = vld [vmem:[#allocation9 + $0x198] sm:$0xff] }
 0x2e8   :  { %16157 = vst [vmem:[#allocation88_spill] sm:$0xff] %v11685_v33  ;;  %v2334_v60 = vpop.f32.mrf.mxu0  ;;  %5036 = vmatpush2.msra.mxu1 %v5035_v12  ;;  %v11704_v17 = vsub.f32 %v4415_v41, %v11687_v42  ;;  %4517 = vmatprep.subr.mxu0 %v11687_v42  ;;  %v11710_v38 = vpop.f32.mrf.mxu1  ;;  %v5041_v50 = vand.u32 4294901760, %v5040_v49  ;;  %v16164_v57 = vand.u32 4294901760, %v11685_v33  ;;  %v4410_v49 = vld [vmem:[#allocation9 + $0x190] sm:$0xff] }
 0x2e9   :  { %16159 = vst [vmem:[#allocation91_spill] sm:$0xff] %v11696_v32  ;;  %16161 = vst [vmem:[#allocation92_spill] sm:$0xff] %v11706_v29  ;;  %v2335_v62 = vadd.f32 %v2334_v60, %v11122_v52  ;;  %v5047_v12 = vand.u32 4294901760, %v5046_v63  ;;  %v11713_v48 = vsub.f32 %v4414_v6, %v11696_v32  ;;  %4519 = vmatpush2.msra.mxu0 %v11696_v32  ;;  %v5053_v41 = vand.u32 4294901760, %v5052_v37 }
 0x2ea   :  { %16160 = vst [vmem:[#allocation104_spill] sm:$0xff] %v11704_v17  ;;  %v11716_v53 = vpop.f32.mrf.mxu0  ;;  %v5058_v18 = vsub.f32 %v11685_v33, %v16164_v57  ;;  %v15017_v42 = vand.u32 4294901760, %v11704_v17  ;;  %v11723_v60 = vsub.f32 %v4413_v40, %v11706_v29  ;;  %4521 = vmatprep.subr.mxu0 %v11706_v29  ;;  %v11726_v6 = vpop.f32.mrf.mxu1  ;;  %5042 = vmatprep.subr.mxu1 %v5041_v50  ;;  %v11732_v32 = vand.u32 4294901760, %v4412_v61 }
 0x2eb   :  { %16162 = vst [vmem:[#allocation106_spill] sm:$0xff] %v11713_v48  ;;  %16163 = vst [vmem:[#allocation93_spill] sm:$0xff] %v11716_v53  ;;  %v11729_v63 = vadd.f32 %v11603_v13, %v2335_v62  ;;  %v15020_v37 = vand.u32 4294901760, %v11713_v48  ;;  %5048 = vmatpush2.msra.mxu1 %v5047_v12  ;;  %v11738_v29 = vand.u32 4294901760, %v4411_v45  ;;  %v11746_v62 = vand.u32 4294901760, %v4410_v49  ;;  %v4408_v12 = vld [vmem:[#allocation9 + $0x180] sm:$0xff] }
 0x2ec   :  { %16165 = vst [vmem:[#allocation107_spill] sm:$0xff] %v11723_v60  ;;  %16166 = vst [vmem:[#allocation96_spill] sm:$0xff] %v11726_v6  ;;  %v5059_v57 = vand.u32 4294901760, %v5058_v18  ;;  %v5064_v40 = vsub.f32 %v11704_v17, %v15017_v42  ;;  %v15025_v33 = vand.u32 4294901760, %v11723_v60  ;;  %5054 = vmatprep.subr.mxu1 %v5053_v41  ;;  %v11744_v50 = vsub.f32 %v4412_v61, %v11732_v32 }
 0x2ed   :  { %16167 = vst [vmem:[#allocation111_spill] sm:$0xff] %v11732_v32  ;;  %16168 = vst [vmem:[#allocation100_spill] sm:$0xff] %v11738_v29  ;;  %v5070_v13 = vsub.f32 %v11713_v48, %v15020_v37  ;;  %4523 = vmatpush2.msra.mxu0 %v11732_v32  ;;  %v11753_v41 = vsub.f32 %v4411_v45, %v11738_v29  ;;  %v11755_v6 = vand.u32 4294901760, %v4409_v34 }
 0x2ee   :  { %16169 = vst [vmem:[#allocation113_spill] sm:$0xff] %v11744_v50  ;;  %16170 = vst [vmem:[#allocation102_spill] sm:$0xff] %v11746_v62  ;;  %v2350_v18 = vpop.f32.mrf.mxu0  ;;  %5060 = vmatpush2.msra.mxu1 %v5059_v57  ;;  %v5065_v42 = vand.u32 4294901760, %v5064_v40  ;;  %v5076_v17 = vsub.f32 %v11723_v60, %v15025_v33  ;;  %4525 = vmatprep.subr.mxu0 %v11738_v29  ;;  %v11763_v57 = vsub.f32 %v4410_v49, %v11746_v62  ;;  %v4407_v40 = vld [vmem:[#allocation9 + $0x178] sm:$0xff] }
 0x2ef   :  { %16171 = vst [vmem:[#allocation116_spill] sm:$0xff] %v11753_v41  ;;  %16172 = vst [vmem:[#allocation103_spill] sm:$0xff] %v11755_v6  ;;  %v2351_v61 = vadd.f32 %v2350_v18, %v11122_v52  ;;  %v11759_v37 = vpop.f32.mrf.mxu1  ;;  %v5071_v48 = vand.u32 4294901760, %v5070_v13  ;;  %4527 = vmatpush2.msra.mxu0 %v11746_v62  ;;  %v15036_v60 = vand.u32 4294901760, %v11753_v41  ;;  %v11770_v29 = vsub.f32 %v4409_v34, %v11755_v6  ;;  %v4406_v13 = vld [vmem:[#allocation9 + $0x170] sm:$0xff] }
 0x2f0   :  { %16173 = vst [vmem:[#allocation119_spill] sm:$0xff] %v11763_v57  ;;  %v11766_v33 = vpop.f32.mrf.mxu0  ;;  %5066 = vmatprep.subr.mxu1 %v5065_v42  ;;  %v5077_v45 = vand.u32 4294901760, %v5076_v17  ;;  %v11772_v18 = vand.u32 4294901760, %v4408_v12  ;;  %4529 = vmatprep.subr.mxu0 %v11755_v6  ;;  %v16177_v62 = vand.u32 4294901760, %v11744_v50  ;;  %v15041_v42 = vand.u32 4294901760, %v11763_v57 }
 0x2f1   :  { %16174 = vst [vmem:[#allocation121_spill] sm:$0xff] %v11766_v33  ;;  %16175 = vst [vmem:[#allocation110_spill] sm:$0xff] %v11770_v29  ;;  %v11775_v32 = vpop.f32.mrf.mxu1  ;;  %v11778_v49 = vadd.f32 %v11655_v1, %v2351_v61  ;;  %5072 = vmatpush2.msra.mxu1 %v5071_v48  ;;  %v5088_v34 = vsub.f32 %v11753_v41, %v15036_v60  ;;  %v15044_v27 = vand.u32 4294901760, %v11770_v29  ;;  %v11791_v33 = vand.u32 4294901760, %v4407_v40  ;;  %v4405_v1 = vld [vmem:[#allocation9 + $0x168] sm:$0xff] }
 0x2f2   :  { %16176 = vst [vmem:[#allocation123_spill] sm:$0xff] %v11772_v18  ;;  %v5082_v17 = vsub.f32 %v11744_v50, %v16177_v62  ;;  %5078 = vmatprep.subr.mxu1 %v5077_v45  ;;  %v11789_v6 = vsub.f32 %v4408_v12, %v11772_v18  ;;  %4531 = vmatpush2.msra.mxu0 %v11772_v18  ;;  %v11797_v61 = vand.u32 4294901760, %v4406_v13  ;;  %v4404_v45 = vld [vmem:[#allocation9 + $0x160] sm:$0xff] }
 0x2f3   :  { %16179 = vst [vmem:[#allocation114_spill] sm:$0xff] %v11791_v33  ;;  %v5094_v62 = vsub.f32 %v11763_v57, %v15041_v42  ;;  %v5089_v60 = vand.u32 4294901760, %v5088_v34  ;;  %v5100_v12 = vsub.f32 %v11770_v29, %v15044_v27  ;;  %v11804_v53 = vsub.f32 %v4407_v40, %v11791_v33  ;;  %4533 = vmatprep.subr.mxu0 %v11791_v33 }
 0x2f4   :  { %16178 = vst [vmem:[#allocation112_spill] sm:$0xff] %v11789_v6  ;;  %v5083_v48 = vand.u32 4294901760, %v5082_v17  ;;  %16180 = vst [vmem:[#allocation128_spill] sm:$0xff] %v11797_v61  ;;  %v2366_v50 = vpop.f32.mrf.mxu0  ;;  %v15049_v41 = vand.u32 4294901760, %v11789_v6  ;;  %v11811_v57 = vsub.f32 %v4406_v13, %v11797_v61  ;;  %v11813_v34 = vand.u32 4294901760, %v4405_v1  ;;  %4535 = vmatpush2.msra.mxu0 %v11797_v61 }
 0x2f5   :  { %16181 = vst [vmem:[#allocation115_spill] sm:$0xff] %v11804_v53  ;;  %v2367_v17 = vadd.f32 %v2366_v50, %v11122_v52  ;;  %v11808_v18 = vpop.f32.mrf.mxu1  ;;  %v5095_v42 = vand.u32 4294901760, %v5094_v62  ;;  %v5101_v40 = vand.u32 4294901760, %v5100_v12  ;;  %v15056_v50 = vand.u32 4294901760, %v11804_v53  ;;  %v4402_v62 = vld [vmem:[#allocation9 + $0x150] sm:$0xff]  ;;  %v4401_v12 = vld [vmem:[#allocation9 + $0x148] sm:$0xff] }
 0x2f6   :  { %5084 = vmatpush2.msra.mxu1 %v5083_v48  ;;  %16182 = vst [vmem:[#allocation117_spill] sm:$0xff] %v11811_v57  ;;  %16183 = vst [vmem:[#allocation131_spill] sm:$0xff] %v11813_v34  ;;  %v11816_v27 = vpop.f32.mrf.mxu0  ;;  %v5106_v52 = vsub.f32 %v11789_v6, %v15049_v41  ;;  %v11822_v48 = vand.u32 4294901760, %v4404_v45  ;;  %v15061_v61 = vand.u32 4294901760, %v11811_v57  ;;  %4537 = vmatprep.subr.mxu0 %v11813_v34 }
 0x2f7   :  { %16184 = vst [vmem:[#allocation120_spill] sm:$0xff] %v11816_v27  ;;  %5090 = vmatprep.subr.mxu1 %v5089_v60  ;;  %v11824_v13 = vpop.f32.mrf.mxu1  ;;  %v11827_v29 = vadd.f32 %v11710_v38, %v2367_v17  ;;  %v11831_v60 = vsub.f32 %v4405_v1, %v11813_v34  ;;  %v5112_v6 = vsub.f32 %v11804_v53, %v15056_v50  ;;  %v11840_v38 = vand.u32 4294901760, %v4403_v8 }
 0x2f8   :  { %16185 = vst [vmem:[#allocation133_spill] sm:$0xff] %v11822_v48  ;;  %5096 = vmatpush2.msra.mxu1 %v5095_v42  ;;  %v5107_v41 = vand.u32 4294901760, %v5106_v52  ;;  %v11838_v33 = vsub.f32 %v4404_v45, %v11822_v48  ;;  %4539 = vmatpush2.msra.mxu0 %v11822_v48  ;;  %v5118_v42 = vsub.f32 %v11811_v57, %v15061_v61  ;;  %v11847_v17 = vand.u32 4294901760, %v4402_v62 }
 0x2f9   :  { %16186 = vst [vmem:[#allocation122_spill] sm:$0xff] %v11831_v60  ;;  %5102 = vmatprep.subr.mxu1 %v5101_v40  ;;  %16188 = vst [vmem:[#allocation124_spill] sm:$0xff] %v11840_v38  ;;  %v4400_v40 = vld [vmem:[#allocation9 + $0x140] sm:$0xff]  ;;  %v5113_v34 = vand.u32 4294901760, %v5112_v6  ;;  %v11851_v45 = vsub.f32 %v4403_v8, %v11840_v38  ;;  %v11853_v53 = vand.u32 4294901760, %v4401_v12  ;;  %4541 = vmatprep.subr.mxu0 %v11840_v38  ;;  %v16192_v57 = vand.u32 4294901760, %v11831_v60 }
 0x2fa   :  { %16187 = vst [vmem:[#allocation135_spill] sm:$0xff] %v11838_v33  ;;  %16189 = vst [vmem:[#allocation137_spill] sm:$0xff] %v11847_v17  ;;  %v3082_v52 = vpop.f32.mrf.mxu0  ;;  %5108 = vmatpush2.msra.mxu1 %v5107_v41  ;;  %v15068_v50 = vand.u32 4294901760, %v11838_v33  ;;  %v11857_v61 = vpop.f32.mrf.mxu1  ;;  %v5119_v1 = vand.u32 4294901760, %v5118_v42  ;;  %v11863_v6 = vsub.f32 %v4402_v62, %v11847_v17  ;;  %4543 = vmatpush2.msra.mxu0 %v11847_v17 }
 0x2fb   :  { %16190 = vst [vmem:[#allocation126_spill] sm:$0xff] %v11851_v45  ;;  %16191 = vst [vmem:[#allocation140_spill] sm:$0xff] %v11853_v53  ;;  %v3083_v48 = vadd.f32 %v3082_v52, %v11137_v14  ;;  %v5124_v27 = vsub.f32 %v11831_v60, %v16192_v57  ;;  %5114 = vmatprep.subr.mxu1 %v5113_v34  ;;  %v11873_v42 = vsub.f32 %v4401_v12, %v11853_v53  ;;  %v4399_v57 = vld [vmem:[#allocation9 + $0x138] sm:$0xff]  ;;  %v4398_v60 = vld [vmem:[#allocation9 + $0x130] sm:$0xff] }
 0x2fc   :  { %16193 = vst [vmem:[#allocation149_spill] sm:$0xff] %v11863_v6  ;;  %v11866_v8 = vpop.f32.mrf.mxu0  ;;  %v5130_v41 = vsub.f32 %v11838_v33, %v15068_v50  ;;  %v11875_v52 = vand.u32 4294901760, %v4400_v40  ;;  %4545 = vmatprep.subr.mxu0 %v11853_v53  ;;  %v11878_v62 = vpop.f32.mrf.mxu1  ;;  %5120 = vmatpush2.msra.mxu1 %v5119_v1  ;;  %v15079_v50 = vand.u32 4294901760, %v11863_v6  ;;  %v4397_v33 = vld [vmem:[#allocation9 + $0x128] sm:$0xff]  ;;  %v16197_v12 = vand.u32 4294901760, %v11851_v45  ;;  %v4396_v1 = vld [vmem:[#allocation9 + $0x120] sm:$0xff] }
 0x2fd   :  { %16194 = vst [vmem:[#allocation127_spill] sm:$0xff] %v11873_v42  ;;  %16196 = vst [vmem:[#allocation147_spill] sm:$0xff] %v11878_v62  ;;  %v11881_v17 = vadd.f32 %v11759_v37, %v3083_v48  ;;  %v5125_v34 = vand.u32 4294901760, %v5124_v27  ;;  %v15082_v2 = vand.u32 4294901760, %v11873_v42  ;;  %v11895_v37 = vand.u32 4294901760, %v4399_v57 }
 0x2fe   :  { %16195 = vst [vmem:[#allocation142_spill] sm:$0xff] %v11875_v52  ;;  %v5131_v14 = vand.u32 4294901760, %v5130_v41  ;;  %v5136_v38 = vsub.f32 %v11851_v45, %v16197_v12  ;;  %v11889_v24 = vsub.f32 %v4400_v40, %v11875_v52  ;;  %4547 = vmatpush2.msra.mxu0 %v11875_v52  ;;  %v5142_v27 = vsub.f32 %v11863_v6, %v15079_v50 }
 0x2ff   :  { %5126 = vmatprep.subr.mxu1 %v5125_v34  ;;  %16199 = vst [vmem:[#allocation146_spill] sm:$0xff] %v11895_v37  ;;  %v11897_v48 = vand.u32 4294901760, %v4398_v60  ;;  %v5148_v40 = vsub.f32 %v11873_v42, %v15082_v2  ;;  %v11903_v52 = vand.u32 4294901760, %v4397_v33  ;;  %v11909_v6 = vsub.f32 %v4399_v57, %v11895_v37  ;;  %4549 = vmatprep.subr.mxu0 %v11895_v37  ;;  %v4394_v57 = vld [vmem:[#allocation9 + $0x110] sm:$0xff]  ;;  %v4393_v37 = vld [vmem:[#allocation9 + $0x108] sm:$0xff] }
 0x300   :  { %16198 = vst [vmem:[#allocation153_spill] sm:$0xff] %v11889_v24  ;;  %v3092_v41 = vpop.f32.mrf.mxu0  ;;  %5132 = vmatpush2.msra.mxu1 %v5131_v14  ;;  %v5137_v12 = vand.u32 4294901760, %v5136_v38  ;;  %v15087_v45 = vand.u32 4294901760, %v11889_v24  ;;  %v11906_v53 = vpop.f32.mrf.mxu1  ;;  %v5143_v50 = vand.u32 4294901760, %v5142_v27  ;;  %v4395_v38 = vld [vmem:[#allocation9 + $0x118] sm:$0xff]  ;;  %v11923_v27 = vand.u32 4294901760, %v4396_v1 }
 0x301   :  { %16200 = vst [vmem:[#allocation148_spill] sm:$0xff] %v11897_v48  ;;  %16201 = vst [vmem:[#allocation150_spill] sm:$0xff] %v11903_v52  ;;  %v3093_v34 = vadd.f32 %v3092_v41, %v11152_v19  ;;  %v11912_v62 = vsub.f32 %v4398_v60, %v11897_v48  ;;  %v5149_v2 = vand.u32 4294901760, %v5148_v40  ;;  %v11921_v41 = vsub.f32 %v4397_v33, %v11903_v52 }
 0x302   :  { %16202 = vst [vmem:[#allocation154_spill] sm:$0xff] %v11909_v6  ;;  %v11915_v14 = vpop.f32.mrf.mxu0  ;;  %5138 = vmatprep.subr.mxu1 %v5137_v12  ;;  %v5154_v19 = vsub.f32 %v11889_v24, %v15087_v45  ;;  %16205 = vst [vmem:[#allocation152_spill] sm:$0xff] %v11923_v27  ;;  %4551 = vmatpush2.msra.mxu0 %v11897_v48  ;;  %v11926_v60 = vpop.f32.mrf.mxu1  ;;  %v15096_v12 = vand.u32 4294901760, %v11909_v6  ;;  %v11936_v24 = vsub.f32 %v4396_v1, %v11923_v27 }
 0x303   :  { %16203 = vst [vmem:[#allocation151_spill] sm:$0xff] %v11912_v62  ;;  %16204 = vst [vmem:[#allocation156_spill] sm:$0xff] %v11921_v41  ;;  %v11929_v42 = vadd.f32 %v11808_v18, %v3093_v34  ;;  %5144 = vmatpush2.msra.mxu1 %v5143_v50  ;;  %v15097_v40 = vand.u32 4294901760, %v11912_v62  ;;  %4553 = vmatprep.subr.mxu0 %v11903_v52  ;;  %v15102_v45 = vand.u32 4294901760, %v11921_v41  ;;  %v11938_v48 = vand.u32 4294901760, %v4395_v38 }
 0x304   :  { %16206 = vst [vmem:[#allocation160_spill] sm:$0xff] %v11926_v60  ;;  %5150 = vmatprep.subr.mxu1 %v5149_v2  ;;  %v5155_v33 = vand.u32 4294901760, %v5154_v19  ;;  %16207 = vst [vmem:[#allocation158_spill] sm:$0xff] %v11936_v24  ;;  %4555 = vmatpush2.msra.mxu0 %v11923_v27  ;;  %v5160_v18 = vsub.f32 %v11909_v6, %v15096_v12  ;;  %v11947_v34 = vand.u32 4294901760, %v4394_v57  ;;  %v11956_v52 = vand.u32 4294901760, %v4393_v37  ;;  %v4392_v12 = vld [vmem:[#allocation9 + $0x100] sm:$0xff] }
 0x305   :  { %16208 = vst [vmem:[#allocation157_spill] sm:$0xff] %v11938_v48  ;;  %v5166_v50 = vsub.f32 %v11912_v62, %v15097_v40  ;;  %v5172_v1 = vsub.f32 %v11921_v41, %v15102_v45  ;;  %v11954_v27 = vsub.f32 %v4395_v38, %v11938_v48  ;;  %4557 = vmatprep.subr.mxu0 %v11938_v48  ;;  %v16213_v38 = vand.u32 4294901760, %v11936_v24 }
 0x306   :  { %16209 = vst [vmem:[#allocation162_spill] sm:$0xff] %v11947_v34  ;;  %v3102_v2 = vpop.f32.mrf.mxu0  ;;  %5156 = vmatpush2.msra.mxu1 %v5155_v33  ;;  %16211 = vst [vmem:[#allocation164_spill] sm:$0xff] %v11956_v52  ;;  %v3421_v62 = vpop.f32.mrf.mxu1  ;;  %v5161_v6 = vand.u32 4294901760, %v5160_v18  ;;  %v11961_v33 = vsub.f32 %v4394_v57, %v11947_v34  ;;  %4559 = vmatpush2.msra.mxu0 %v11947_v34  ;;  %v11971_v48 = vsub.f32 %v4393_v37, %v11956_v52 }
 0x307   :  { %16210 = vst [vmem:[#allocation172_spill] sm:$0xff] %v11954_v27  ;;  %v3103_v40 = vadd.f32 %v3102_v2, %v11201_v5  ;;  %v5167_v60 = vand.u32 4294901760, %v5166_v50  ;;  %v5173_v19 = vand.u32 4294901760, %v5172_v1  ;;  %v5178_v41 = vsub.f32 %v11936_v24, %v16213_v38  ;;  %4561 = vmatprep.subr.mxu0 %v11956_v52 }
 0x308   :  { %16212 = vst [vmem:[#allocation171_spill] sm:$0xff] %v11961_v33  ;;  %v11964_v45 = vpop.f32.mrf.mxu0  ;;  %v15107_v22 = vand.u32 4294901760, %v11954_v27  ;;  %16214 = vst [vmem:[#allocation167_spill] sm:$0xff] %v11971_v48  ;;  %v11974_v5 = vpop.f32.mrf.mxu1  ;;  %5162 = vmatprep.subr.mxu1 %v5161_v6  ;;  %v15108_v18 = vand.u32 4294901760, %v11961_v33  ;;  %v11980_v50 = vand.u32 4294901760, %v4392_v12  ;;  %v15113_v37 = vand.u32 4294901760, %v11971_v48 }
 0x309   :  { %v11977_v57 = vadd.f32 %v11857_v61, %v3103_v40  ;;  %5168 = vmatpush2.msra.mxu1 %v5167_v60  ;;  %v5179_v2 = vand.u32 4294901760, %v5178_v41 }
 0x30a   :  { %16215 = vst [vmem:[#allocation161_spill] sm:$0xff] %v11980_v50  ;;  %v5184_v1 = vsub.f32 %v11954_v27, %v15107_v22  ;;  %5174 = vmatprep.subr.mxu1 %v5173_v19  ;;  %v5190_v38 = vsub.f32 %v11961_v33, %v15108_v18  ;;  %v11990_v61 = vsub.f32 %v4392_v12, %v11980_v50 }
 0x30b   :  { %4563 = vmatpush2.msra.mxu0 %v11980_v50  ;;  %5180 = vmatpush2.msra.mxu1 %v5179_v2  ;;  %v5196_v41 = vsub.f32 %v11971_v48, %v15113_v37 }
 0x30c   :  { %16216 = vst [vmem:[#allocation159_spill] sm:$0xff] %v11990_v61  ;;  %v3112_v6 = vpop.f32.mrf.mxu0  ;;  %v5185_v60 = vand.u32 4294901760, %v5184_v1  ;;  %5336 = vmatprep.subr.mxu0 %v11163_v10  ;;  %v3433_v19 = vpop.f32.mrf.mxu1  ;;  %v5191_v22 = vand.u32 4294901760, %v5190_v38  ;;  %v15115_v18 = vand.u32 4294901760, %v11990_v61 }
 0x30d   :  { %v3113_v40 = vadd.f32 %v3112_v6, %v11252_v0  ;;  %v5197_v12 = vand.u32 4294901760, %v5196_v41 }
 0x30e   :  { %v11999_v33 = vpop.f32.mrf.mxu0  ;;  %5186 = vmatprep.subr.mxu1 %v5185_v60  ;;  %v12001_v27 = vpop.f32.mrf.mxu1  ;;  %v5202_v1 = vsub.f32 %v11990_v61, %v15115_v18 }
 0x30f   :  { %v12004_v2 = vadd.f32 %v11906_v53, %v3113_v40  ;;  %5192 = vmatpush2.msra.mxu1 %v5191_v22 }
 0x310   :  { %5198 = vmatprep.subr.mxu1 %v5197_v12  ;;  %v5203_v0 = vand.u32 4294901760, %v5202_v1 }
 0x312   :  { %v3122_v6 = vpop.f32.mrf.mxu0  ;;  %v3445_v37 = vpop.f32.mrf.mxu1  ;;  %5204 = vmatpush2.msra.mxu1 %v5203_v0 }
 0x313   :  { %v3123_v38 = vadd.f32 %v3122_v6, %v11304_v11  ;;  %5688 = vmatprep.subr.mxu1 %v11154_v47 }
 0x314   :  { %v12010_v10 = vpop.f32.mrf.mxu0  ;;  %v12013_v60 = vpop.f32.mrf.mxu1 }
 0x315   :  { %v12015_v53 = vadd.f32 %v3421_v62, %v3123_v38 }
 0x318   :  { %v3132_v22 = vpop.f32.mrf.mxu0  ;;  %v3457_v40 = vpop.f32.mrf.mxu1 }
 0x319   :  { %v3133_v41 = vadd.f32 %v3132_v22, %v11361_v51 }
 0x31a   :  { %v12018_v18 = vpop.f32.mrf.mxu0  ;;  %v12020_v12 = vpop.f32.mrf.mxu1 }
 0x31b   :  { %v12022_v1 = vadd.f32 %v3433_v19, %v3133_v41 }
 0x31e   :  { %v3142_v11 = vpop.f32.mrf.mxu0  ;;  %v3469_v6 = vpop.f32.mrf.mxu1 }
 0x31f   :  { %v3143_v0 = vadd.f32 %v3142_v11, %v11402_v59 }
 0x320   :  { %v12025_v61 = vpop.f32.mrf.mxu0  ;;  %v12027_v48 = vpop.f32.mrf.mxu1 }
 0x321   :  { %v12029_v62 = vadd.f32 %v3445_v37, %v3143_v0 }
 0x323   :  { %16217 = vst [vmem:[#allocation24_spill] sm:$0xff] %v12029_v62 }
 0x324   :  { %v3152_v38 = vpop.f32.mrf.mxu0  ;;  %v3481_v22 = vpop.f32.mrf.mxu1 }
 0x325   :  { %v3153_v51 = vadd.f32 %v3152_v38, %v11440_v46 }
 0x326   :  { %v12032_v24 = vpop.f32.mrf.mxu0  ;;  %v12034_v47 = vpop.f32.mrf.mxu1 }
 0x327   :  { %16218 = vst [vmem:[#allocation163_spill] sm:$0xff] %v12034_v47  ;;  %v12036_v19 = vadd.f32 %v3457_v40, %v3153_v51 }
 0x329   :  { %16219 = vst [vmem:[#allocation26_spill] sm:$0xff] %v12036_v19 }
 0x32a   :  { %v3162_v41 = vpop.f32.mrf.mxu0  ;;  %v3493_v11 = vpop.f32.mrf.mxu1 }
 0x32b   :  { %v3163_v59 = vadd.f32 %v3162_v41, %v11476_v43 }
 0x32c   :  { %v12039_v50 = vpop.f32.mrf.mxu0  ;;  %v12041_v52 = vpop.f32.mrf.mxu1 }
 0x32d   :  { %16220 = vst [vmem:[#allocation28_spill] sm:$0xff] %v12041_v52  ;;  %v12043_v37 = vadd.f32 %v3469_v6, %v3163_v59 }
 0x32f   :  { %16221 = vst [vmem:[#allocation165_spill] sm:$0xff] %v12043_v37 }
 0x330   :  { %v3172_v0 = vpop.f32.mrf.mxu0  ;;  %v3505_v38 = vpop.f32.mrf.mxu1 }
 0x331   :  { %v3173_v46 = vadd.f32 %v3172_v0, %v11520_v44 }
 0x332   :  { %v12046_v34 = vpop.f32.mrf.mxu0  ;;  %v12048_v62 = vpop.f32.mrf.mxu1 }
 0x333   :  { %16222 = vst [vmem:[#allocation31_spill] sm:$0xff] %v12048_v62  ;;  %v12050_v40 = vadd.f32 %v3481_v22, %v3173_v46 }
 0x335   :  { %16223 = vst [vmem:[#allocation35_spill] sm:$0xff] %v12050_v40 }
 0x336   :  { %v3182_v51 = vpop.f32.mrf.mxu0  ;;  %v3517_v41 = vpop.f32.mrf.mxu1 }
 0x337   :  { %v3183_v43 = vadd.f32 %v3182_v51, %v11572_v35 }
 0x338   :  { %v12053_v19 = vpop.f32.mrf.mxu0  ;;  %v12055_v47 = vpop.f32.mrf.mxu1 }
 0x339   :  { %16224 = vst [vmem:[#allocation39_spill] sm:$0xff] %v12055_v47  ;;  %v12057_v6 = vadd.f32 %v3493_v11, %v3183_v43 }
 0x33b   :  { %16225 = vst [vmem:[#allocation45_spill] sm:$0xff] %v12057_v6 }
 0x33c   :  { %v3192_v59 = vpop.f32.mrf.mxu0  ;;  %v3529_v0 = vpop.f32.mrf.mxu1 }
 0x33d   :  { %v3193_v44 = vadd.f32 %v3192_v59, %v11627_v20 }
 0x33e   :  { %v12060_v37 = vpop.f32.mrf.mxu0  ;;  %v12062_v52 = vpop.f32.mrf.mxu1 }
 0x33f   :  { %16226 = vst [vmem:[#allocation47_spill] sm:$0xff] %v12062_v52  ;;  %v12064_v22 = vadd.f32 %v3505_v38, %v3193_v44  ;;  %v7898_v38 = vld [vmem:[%s14299_s4] sm:$0x3]  ;;  %v16230_v44 = vld [vmem:[#allocation169_spill] sm:$0xff] }
 0x341   :  { %16227 = vst [vmem:[#allocation166_spill] sm:$0xff] %v12064_v22  ;;  %v12080_v22 = vrot.slane %v7898_v38, %v16230_v44 }
 0x342   :  { %v3202_v46 = vpop.f32.mrf.mxu0  ;;  %v3541_v51 = vpop.f32.mrf.mxu1 }
 0x343   :  { %v3203_v35 = vadd.f32 %v3202_v46, %v11678_v31  ;;  %v2145_v44 = vadd.f32 %v11150_v55, %v12080_v22 }
 0x344   :  { %v12067_v40 = vpop.f32.mrf.mxu0  ;;  %v12069_v62 = vpop.f32.mrf.mxu1 }
 0x345   :  { %16228 = vst [vmem:[#allocation168_spill] sm:$0xff] %v12069_v62  ;;  %v12071_v11 = vadd.f32 %v3517_v41, %v3203_v35  ;;  %v2129_v41 = vadd.f32 %v11135_v3, %v12080_v22  ;;  %v2770_v55 = vadd.f32 %v11106_v30, %v2145_v44 }
 0x347   :  { %16229 = vst [vmem:[#allocation175_spill] sm:$0xff] %v12071_v11  ;;  %v2762_v47 = vadd.f32 %v11094_v54, %v2129_v41  ;;  %v2177_v54 = vadd.f32 %v11239_v4, %v12080_v22  ;;  %v2193_v41 = vadd.f32 %v11295_v28, %v12080_v22  ;;  %v2241_v28 = vadd.f32 %v11428_v56, %v12080_v22 }
 0x348   :  { %v3212_v43 = vpop.f32.mrf.mxu0  ;;  %v3553_v59 = vpop.f32.mrf.mxu1 }
 0x349   :  { %v3213_v20 = vadd.f32 %v3212_v43, %v11729_v63 }
 0x34a   :  { %v12074_v6 = vpop.f32.mrf.mxu0  ;;  %v12082_v31 = vpop.f32.mrf.mxu1 }
 0x34b   :  { %v12084_v46 = vadd.f32 %v3529_v0, %v3213_v20 }
 0x34d   :  { %16231 = vst [vmem:[#allocation176_spill] sm:$0xff] %v12084_v46  ;;  %v3085_v46 = vadd.f32 %v11866_v8, %v2762_v47 }
 0x34e   :  { %v3222_v62 = vpop.f32.mrf.mxu0 }
 0x34f   :  { %v3223_v63 = vadd.f32 %v3222_v62, %v11778_v49  ;;  %v4075_v35 = vpop.f32.mrf.mxu1  ;;  %v3376_v8 = vadd.f32 %v11775_v32, %v3085_v46  ;;  %v2257_v32 = vadd.f32 %v11465_v15, %v12080_v22  ;;  %v2289_v15 = vadd.f32 %v11560_v9, %v12080_v22 }
 0x350   :  { %v12089_v43 = vpop.f32.mrf.mxu0 }
 0x351   :  { %v4077_v11 = vpop.f32.mrf.mxu1  ;;  %v12091_v52 = vadd.f32 %v3541_v51, %v3223_v63  ;;  %v2161_v51 = vadd.f32 %v11185_v36, %v12080_v22  ;;  %v2225_v36 = vadd.f32 %v11394_v21, %v12080_v22  ;;  %v2786_v21 = vadd.f32 %v11139_v7, %v2177_v54 }
 0x353   :  { %v3232_v38 = vpop.f32.mrf.mxu0  ;;  %v2778_v30 = vadd.f32 %v11124_v58, %v2161_v51 }
 0x354   :  { %v3233_v0 = vadd.f32 %v3232_v38, %v11827_v29  ;;  %v4083_v20 = vpop.f32.mrf.mxu1  ;;  %v3095_v38 = vadd.f32 %v11915_v14, %v2770_v55  ;;  %v2794_v14 = vadd.f32 %v11160_v26, %v2193_v41  ;;  %v16232_v41 = vld [vmem:[#allocation141_spill] sm:$0xff] }
 0x355   :  { %v12098_v3 = vpop.f32.mrf.mxu0 }
 0x356   :  { %v4085_v49 = vpop.f32.mrf.mxu1  ;;  %v12100_v62 = vadd.f32 %v3553_v59, %v3233_v0  ;;  %v2209_v59 = vadd.f32 %v11348_v23, %v12080_v22  ;;  %v2273_v23 = vadd.f32 %v11508_v39, %v12080_v22  ;;  %v2810_v39 = vadd.f32 %v11241_v16, %v2225_v36 }
 0x357   :  { %v3388_v7 = vadd.f32 %v11824_v13, %v3095_v38 }
 0x358   :  { %v3818_v29 = vpop.f32.mrf.mxu0  ;;  %v4091_v63 = vpop.f32.mrf.mxu1  ;;  %v2802_v51 = vadd.f32 %v11183_v25, %v2209_v59 }
 0x359   :  { %v3819_v47 = vadd.f32 %v3818_v29, %v11881_v17  ;;  %v3105_v29 = vadd.f32 %v11964_v45, %v2778_v30  ;;  %v16235_v30 = vld [vmem:[#allocation155_spill] sm:$0xff] }
 0x35a   :  { %v3820_v4 = vpop.f32.mrf.mxu0  ;;  %v4093_v0 = vpop.f32.mrf.mxu1  ;;  %v2834_v25 = vadd.f32 %v16235_v30, %v2273_v23  ;;  %v16241_v30 = vld [vmem:[#allocation120_spill] sm:$0xff] }
 0x35b   :  { %v12119_v44 = vadd.f32 %v4075_v35, %v3819_v47  ;;  %v3821_v17 = vadd.f32 %v3820_v4, %v3376_v8  ;;  %v2818_v47 = vadd.f32 %v16232_v41, %v2241_v28  ;;  %v16234_v4 = vld [vmem:[#allocation30_spill] sm:$0xff]  ;;  %v16236_v28 = vld [vmem:[#allocation147_spill] sm:$0xff] }
 0x35c   :  { %v3826_v46 = vpop.f32.mrf.mxu0  ;;  %v4099_v55 = vpop.f32.mrf.mxu1  ;;  %v2826_v9 = vadd.f32 %v16234_v4, %v2257_v32 }
 0x35d   :  { %v4232_v56 = vmul.f32 0.70710677, %v12119_v44  ;;  %v12129_v58 = vadd.f32 %v4077_v11, %v3821_v17  ;;  %v3827_v35 = vadd.f32 %v3826_v46, %v11929_v42  ;;  %v16233_v42 = vld [vmem:[#allocation74_spill] sm:$0xff]  ;;  %v3400_v17 = vadd.f32 %v16236_v28, %v3105_v29  ;;  %v16242_v28 = vld [vmem:[#allocation64_spill] sm:$0xff] }
 0x35e   :  { %v3828_v26 = vpop.f32.mrf.mxu0  ;;  %v4101_v54 = vpop.f32.mrf.mxu1  ;;  %v2305_v8 = vadd.f32 %v16233_v42, %v12080_v22  ;;  %v16240_v42 = vld [vmem:[#allocation121_spill] sm:$0xff] }
 0x35f   :  { %7769 = verf.f32 %v4232_v56  ;;  %v4233_v45 = vmul.f32 0.70710677, %v12129_v58  ;;  %v12139_v11 = vadd.f32 %v4083_v20, %v3827_v35  ;;  %v3829_v59 = vadd.f32 %v3828_v26, %v3388_v7  ;;  %v16237_v20 = vld [vmem:[#allocation84_spill] sm:$0xff]  ;;  %v16238_v35 = vld [vmem:[#allocation42_spill] sm:$0xff]  ;;  %v16239_v26 = vld [vmem:[#allocation93_spill] sm:$0xff] }
 0x360   :  { %v3834_v16 = vpop.f32.mrf.mxu0  ;;  %v12145_v36 = vpop.f32.mrf.mxu1  ;;  %v2321_v46 = vadd.f32 %v16237_v20, %v12080_v22  ;;  %v3115_v56 = vadd.f32 %v11999_v33, %v2786_v21  ;;  %v2842_v32 = vadd.f32 %v16238_v35, %v2289_v15  ;;  %v2353_v4 = vadd.f32 %v16240_v42, %v12080_v22  ;;  %v16245_v42 = vld [vmem:[#allocation89_spill] sm:$0xff] }
 0x361   :  { %7771 = verf.f32 %v4233_v45  ;;  %v4234_v13 = vmul.f32 0.70710677, %v12139_v11  ;;  %v3835_v38 = vadd.f32 %v3834_v16, %v11977_v57  ;;  %v12154_v41 = vadd.f32 %v4085_v49, %v3829_v59 }
 0x362   :  { %v3836_v23 = vpop.f32.mrf.mxu0  ;;  %v4109_v7 = vpop.f32.mrf.mxu1  ;;  %v2337_v45 = vadd.f32 %v16239_v26, %v12080_v22  ;;  %v2369_v16 = vadd.f32 %v16241_v30, %v12080_v22  ;;  %v3125_v33 = vadd.f32 %v12010_v10, %v2794_v14  ;;  %v3135_v59 = vadd.f32 %v12018_v18, %v2802_v51  ;;  %v16243_v10 = vld [vmem:[#allocation160_spill] sm:$0xff]  ;;  %v16246_v18 = vld [vmem:[#allocation99_spill] sm:$0xff] }
 0x363   :  { %v12160_v57 = vadd.f32 %v4091_v63, %v3835_v38  ;;  %v3837_v29 = vadd.f32 %v3836_v23, %v3400_v17  ;;  %7773 = verf.f32 %v4234_v13  ;;  %v4235_v49 = vmul.f32 0.70710677, %v12154_v41  ;;  %v16244_v23 = vld [vmem:[#allocation73_spill] sm:$0xff] }
 0x364   :  { %v3842_v21 = vpop.f32.mrf.mxu0  ;;  %v12166_v15 = vpop.f32.mrf.mxu1  ;;  %v2850_v20 = vadd.f32 %v16242_v28, %v2305_v8  ;;  %v3145_v38 = vadd.f32 %v12025_v61, %v2810_v39  ;;  %v3412_v14 = vadd.f32 %v16243_v10, %v3115_v56  ;;  %v2858_v26 = vadd.f32 %v16244_v23, %v2321_v46 }
 0x365   :  { %v12170_v35 = vadd.f32 %v4093_v0, %v3837_v29  ;;  %v3843_v63 = vadd.f32 %v3842_v21, %v12004_v2  ;;  %7775 = verf.f32 %v4235_v49  ;;  %v4236_v22 = vmul.f32 0.70710677, %v12160_v57  ;;  %v16247_v2 = vld [vmem:[#allocation96_spill] sm:$0xff] }
 0x366   :  { %v3844_v13 = vpop.f32.mrf.mxu0  ;;  %v4117_v17 = vpop.f32.mrf.mxu1  ;;  %v2866_v30 = vadd.f32 %v16245_v42, %v2337_v45  ;;  %v2874_v51 = vadd.f32 %v16246_v18, %v2353_v4  ;;  %v3155_v8 = vadd.f32 %v12032_v24, %v2818_v47  ;;  %v2882_v29 = vadd.f32 %v16247_v2, %v2369_v16  ;;  %v16251_v18 = vld [vmem:[#allocation39_spill] sm:$0xff] }
 0x367   :  { %v4237_v0 = vmul.f32 0.70710677, %v12170_v35  ;;  %v3845_v61 = vadd.f32 %v3844_v13, %v3412_v14  ;;  %v3424_v21 = vadd.f32 %v11974_v5, %v3125_v33  ;;  %v12183_v56 = vadd.f32 %v4099_v55, %v3843_v63 }
 0x368   :  { %v3850_v39 = vpop.f32.mrf.mxu0  ;;  %v4123_v49 = vpop.f32.mrf.mxu1  ;;  %v3436_v45 = vadd.f32 %v12001_v27, %v3135_v59  ;;  %v3165_v4 = vadd.f32 %v12039_v50, %v2826_v9  ;;  %v3448_v16 = vadd.f32 %v12013_v60, %v3145_v38  ;;  %v3175_v10 = vadd.f32 %v12046_v34, %v2834_v25 }
 0x369   :  { %7777 = verf.f32 %v4237_v0  ;;  %v3851_v46 = vadd.f32 %v3850_v39, %v12015_v53  ;;  %v12188_v28 = vadd.f32 %v4101_v54, %v3845_v61  ;;  %v3185_v5 = vadd.f32 %v12053_v19, %v2842_v32  ;;  %v16252_v61 = vld [vmem:[#allocation24_spill] sm:$0xff] }
 0x36a   :  { %7779 = verf.f32 %v4236_v22  ;;  %v3852_v24 = vpop.f32.mrf.mxu0  ;;  %v12190_v47 = vpop.f32.mrf.mxu1  ;;  %v3195_v55 = vadd.f32 %v12060_v37, %v2850_v20  ;;  %v3205_v27 = vadd.f32 %v12067_v40, %v2858_v26  ;;  %v4200_v50 = vmul.f32 0.5, %v12119_v44  ;;  %v16248_v22 = vld [vmem:[#allocation163_spill] sm:$0xff] }
 0x36b   :  { %v3853_v33 = vadd.f32 %v3852_v24, %v3424_v21  ;;  %v4239_v54 = vmul.f32 0.70710677, %v12188_v28  ;;  %v12202_v63 = vadd.f32 %v12020_v12, %v3155_v8  ;;  %v4238_v34 = vmul.f32 0.70710677, %v12183_v56 }
 0x36c   :  { %v7770_v53 = vpop.eup %7769  ;;  %v3858_v9 = vpop.f32.mrf.mxu0  ;;  %v12206_v19 = vadd.f32 %v12145_v36, %v3851_v46  ;;  %v3215_v40 = vadd.f32 %v12074_v6, %v2866_v30  ;;  %v12215_v12 = vadd.f32 %v12027_v48, %v3165_v4  ;;  %v12218_v14 = vadd.f32 %v16248_v22, %v3175_v10  ;;  %v16249_v36 = vld [vmem:[#allocation28_spill] sm:$0xff]  ;;  %v16254_v10 = vld [vmem:[#allocation47_spill] sm:$0xff] }
 0x36d   :  { %v12199_v59 = vpop.f32.mrf.mxu1  ;;  %v4296_v60 = vadd.f32 1.0, %v7770_v53  ;;  %v12208_v37 = vadd.f32 %v4109_v7, %v3853_v33  ;;  %7781 = verf.f32 %v4239_v54  ;;  %v3859_v44 = vadd.f32 %v3858_v9, %v12022_v1  ;;  %v16250_v7 = vld [vmem:[#allocation31_spill] sm:$0xff] }
 0x36e   :  { %v7772_v25 = vpop.eup %7771  ;;  %v3860_v32 = vpop.f32.mrf.mxu0  ;;  %v12221_v13 = vadd.f32 %v16249_v36, %v3185_v5  ;;  %v12224_v23 = vadd.f32 %v16250_v7, %v3195_v55  ;;  %v12230_v48 = vadd.f32 %v16251_v18, %v3205_v27  ;;  %7783 = verf.f32 %v4238_v34 }
 0x36f   :  { %v12212_v20 = vpop.f32.mrf.mxu1  ;;  %v4328_v38 = vmul.f32 %v4296_v60, %v4200_v50  ;;  %v4297_v6 = vadd.f32 1.0, %v7772_v25  ;;  %v4241_v26 = vmul.f32 0.70710677, %v12208_v37  ;;  %v3861_v1 = vadd.f32 %v3860_v32, %v3436_v45  ;;  %v16256_v32 = vld [vmem:[#allocation168_spill] sm:$0xff] }
 0x370   :  { %v3866_v42 = vpop.f32.mrf.mxu0  ;;  %v7774_v0 = vpop.eup %7773  ;;  %v4240_v8 = vmul.f32 0.70710677, %v12206_v19  ;;  %v12234_v2 = vadd.f32 %v12166_v15, %v3859_v44  ;;  %v4201_v46 = vmul.f32 0.5, %v12129_v58  ;;  %v12245_v5 = vadd.f32 %v16254_v10, %v3215_v40 }
 0x371   :  { %v12227_v30 = vpop.f32.mrf.mxu1  ;;  %v3867_v39 = vadd.f32 %v3866_v42, %v16252_v61  ;;  %v12237_v21 = vand.u32 4294901760, %v4328_v38  ;;  %v12240_v45 = vadd.f32 %v4117_v17, %v3861_v1  ;;  %v3225_v33 = vadd.f32 %v12089_v43, %v2874_v51 }
 0x372   :  { %v3868_v4 = vpop.f32.mrf.mxu0  ;;  %v7776_v55 = vpop.eup %7775  ;;  %v3235_v15 = vadd.f32 %v12098_v3, %v2882_v29  ;;  %v12251_v50 = vmul.f32 %v4297_v6, %v4201_v46  ;;  %v4298_v54 = vadd.f32 1.0, %v7774_v0  ;;  %7785 = verf.f32 %v4241_v26 }
 0x373   :  { %16253 = vst [vmem:[#allocation141_spill] sm:$0xff] %v12237_v21  ;;  %v12242_v24 = vpop.f32.mrf.mxu1  ;;  %v12249_v53 = vadd.f32 %v4123_v49, %v3867_v39  ;;  %v3869_v27 = vadd.f32 %v3868_v4, %v3448_v16  ;;  %v4299_v58 = vadd.f32 1.0, %v7776_v55  ;;  %v4202_v9 = vmul.f32 0.5, %v12139_v11  ;;  %v16255_v49 = vld [vmem:[#allocation26_spill] sm:$0xff]  ;;  %v16259_v55 = vld [vmem:[#allocation173_spill] sm:$0xff] }
 0x374   :  { %v3874_v17 = vpop.f32.mrf.mxu0  ;;  %v4203_v60 = vmul.f32 0.5, %v12154_v41  ;;  %7787 = verf.f32 %v4240_v8  ;;  %v4242_v34 = vmul.f32 0.70710677, %v12234_v2  ;;  %v12259_v3 = vsub.f32 %v4328_v38, %v12237_v21 }
 0x375   :  { %v12256_v25 = vpop.f32.mrf.mxu1  ;;  %v4243_v51 = vmul.f32 0.70710677, %v12240_v45  ;;  %v12263_v29 = vadd.f32 %v12190_v47, %v3869_v27  ;;  %v3875_v16 = vadd.f32 %v3874_v17, %v16255_v49  ;;  %v4244_v41 = vmul.f32 0.70710677, %v12249_v53 }
 0x376   :  { %v7778_v43 = vpop.eup %7777  ;;  %v3876_v40 = vpop.f32.mrf.mxu0  ;;  %v12266_v44 = vmul.f32 %v4299_v58, %v4203_v60  ;;  %v12270_v22 = vadd.f32 %v16256_v32, %v3225_v33  ;;  %v12273_v36 = vadd.f32 %v12082_v31, %v3235_v15  ;;  %v12275_v38 = vmul.f32 %v4298_v54, %v4202_v9  ;;  %v16260_v33 = vld [vmem:[#allocation165_spill] sm:$0xff]  ;;  %v16261_v54 = vld [vmem:[#allocation63_spill] sm:$0xff] }
 0x377   :  { %v7780_v11 = vpop.eup %7779  ;;  %v4204_v7 = vmul.f32 0.5, %v12160_v57  ;;  %v4205_v47 = vmul.f32 0.5, %v12170_v35  ;;  %v12280_v6 = vand.u32 4294901760, %v12251_v50  ;;  %v4301_v1 = vadd.f32 1.0, %v7778_v43  ;;  %v12284_v0 = vpop.f32.mrf.mxu1  ;;  %v16263_v43 = vld [vmem:[#allocation80_spill] sm:$0xff] }
 0x378   :  { %v3882_v26 = vpop.f32.mrf.mxu0  ;;  %7789 = verf.f32 %v4242_v34  ;;  %v4245_v42 = vmul.f32 0.70710677, %v12263_v29  ;;  %v3877_v18 = vadd.f32 %v3876_v40, %v12202_v63  ;;  %v15129_v31 = vand.u32 4294901760, %v12259_v3  ;;  %v16264_v40 = vld [vmem:[#allocation109_spill] sm:$0xff] }
 0x379   :  { %16257 = vst [vmem:[#allocation74_spill] sm:$0xff] %v12280_v6  ;;  %v4300_v8 = vadd.f32 1.0, %v7780_v11  ;;  %7791 = verf.f32 %v4243_v51  ;;  %v4132_v57 = vadd.f32 %v12199_v59, %v3875_v16  ;;  %5206 = vmatprep.mubr.f32.mxu1 %v12280_v6  ;;  %v12290_v39 = vmul.f32 0.5, %v12183_v56  ;;  %v16265_v11 = vld [vmem:[#allocation35_spill] sm:$0xff] }
 0x37a   :  { %v3884_v35 = vpop.f32.mrf.mxu0  ;;  %v7782_v61 = vpop.eup %7781  ;;  %7793 = verf.f32 %v4244_v41  ;;  %v12293_v46 = vadd.f32 %v12212_v20, %v3877_v18  ;;  %5208 = vmatmul.mubr.f32.vlgmr.msra.gmra.mxu1 %v12237_v21  ;;  %v12297_v63 = vand.u32 4294901760, %v12266_v44  ;;  %v4207_v4 = vmul.f32 0.5, %v12188_v28 }
 0x37b   :  { %v4303_v10 = vadd.f32 1.0, %v7782_v61  ;;  %v12301_v59 = vmul.f32 0.5, %v12206_v19  ;;  %5690 = vmatpush1.msra.mxu1 %v16259_v55  ;;  %v3883_v56 = vadd.f32 %v3882_v26, %v16260_v33  ;;  %v12305_v27 = vmul.f32 %v4301_v1, %v4205_v47  ;;  %v12307_v20 = vpop.f32.mrf.mxu1  ;;  %v7784_v19 = vpop.eup %7783 }
 0x37c   :  { %16258 = vst [vmem:[#allocation30_spill] sm:$0xff] %v12297_v63  ;;  %v3890_v15 = vpop.f32.mrf.mxu0  ;;  %7795 = verf.f32 %v4245_v42  ;;  %5692 = vmatprep.subr.mxu1 %v16261_v54  ;;  %5214 = vmatprep.mubr.f32.mxu1 %v12297_v63  ;;  %v3885_v28 = vadd.f32 %v3884_v35, %v12215_v12  ;;  %v12313_v58 = vand.u32 4294901760, %v12275_v38  ;;  %v12318_v17 = vsub.f32 %v12259_v3, %v15129_v31 }
 0x37d   :  { %v12320_v9 = vmul.f32 %v4300_v8, %v4204_v7  ;;  %v12323_v60 = vmul.f32 0.5, %v12208_v37  ;;  %v4246_v34 = vmul.f32 0.70710677, %v4132_v57  ;;  %5694 = vmatpush1.msra.mxu1 %v16263_v43  ;;  %v12327_v12 = vmul.f32 0.5, %v12234_v2  ;;  %v16266_v2 = vld [vmem:[#allocation98_spill] sm:$0xff]  ;;  %v4157_v18 = vpop.f32.mrf.mxu1  ;;  %v16267_v8 = vld [vmem:[#allocation108_spill] sm:$0xff] }
 0x37e   :  { %16262 = vst [vmem:[#allocation155_spill] sm:$0xff] %v12313_v58  ;;  %v3892_v51 = vpop.f32.mrf.mxu0  ;;  %v12330_v49 = vmul.f32 0.5, %v12240_v45  ;;  %v4247_v16 = vmul.f32 0.70710677, %v12293_v46  ;;  %5216 = vmatmul.mubr.f32.gmra.mxu1 %v12313_v58  ;;  %5696 = vmatprep.subr.mxu1 %v16264_v40  ;;  %v3891_v41 = vadd.f32 %v3890_v15, %v16265_v11  ;;  %v12336_v37 = vmul.f32 %v4303_v10, %v4207_v4  ;;  %v16269_v4 = vld [vmem:[#allocation125_spill] sm:$0xff]  ;;  %v16273_v11 = vld [vmem:[#allocation132_spill] sm:$0xff] }
 0x37f   :  { %v12339_v32 = vmul.f32 0.5, %v12249_v53  ;;  %v4140_v7 = vadd.f32 %v12227_v30, %v3883_v56  ;;  %5698 = vmatpush1.msra.mxu1 %v16266_v2  ;;  %v12345_v45 = vsub.f32 %v12251_v50, %v12280_v6  ;;  %v7786_v26 = vpop.eup %7785  ;;  %v4302_v1 = vadd.f32 1.0, %v7784_v19 }
 0x380   :  { %v3898_v47 = vpop.f32.mrf.mxu0  ;;  %v12348_v42 = vadd.f32 %v12242_v24, %v3885_v28  ;;  %5700 = vmatprep.subr.mxu1 %v16267_v8  ;;  %v12352_v53 = vand.u32 4294901760, %v12305_v27  ;;  %v3893_v30 = vadd.f32 %v3892_v51, %v12218_v14  ;;  %v4574_v61 = vand.u32 4294901760, %v12318_v17  ;;  %v16271_v14 = vld [vmem:[#allocation143_spill] sm:$0xff] }
 0x381   :  { %v7788_v35 = vpop.eup %7787  ;;  %v12357_v50 = vmul.f32 0.5, %v12263_v29  ;;  %7797 = verf.f32 %v4246_v34  ;;  %5702 = vmatpush1.msra.mxu1 %v16269_v4  ;;  %v12361_v24 = vand.u32 4294901760, %v12320_v9  ;;  %v12364_v33 = vadd.f32 %v12256_v25, %v3891_v41 }
 0x382   :  { %16268 = vst [vmem:[#allocation147_spill] sm:$0xff] %v12352_v53  ;;  %v3900_v10 = vpop.f32.mrf.mxu0  ;;  %7799 = verf.f32 %v4247_v16  ;;  %v15134_v56 = vand.u32 4294901760, %v12345_v45  ;;  %5222 = vmatprep.mubr.f32.mxu1 %v12352_v53  ;;  %5704 = vmatprep.subr.mxu1 %v16271_v14  ;;  %v12371_v29 = vsub.f32 %v12266_v44, %v12297_v63  ;;  %v4305_v15 = vadd.f32 1.0, %v7786_v26  ;;  %v12383_v16 = vpop.f32.mrf.mxu1  ;;  %v16278_v14 = vld [vmem:[#allocation144_spill] sm:$0xff] }
 0x383   :  { %16270 = vst [vmem:[#allocation84_spill] sm:$0xff] %v12361_v24  ;;  %v12373_v28 = vmul.f32 0.5, %v4132_v57  ;;  %v4248_v19 = vmul.f32 0.70710677, %v4140_v7  ;;  %5224 = vmatmul.mubr.f32.gmra.mxu1 %v12361_v24  ;;  %v12377_v17 = vand.u32 4294901760, %v12336_v37  ;;  %v12380_v34 = vmul.f32 %v4302_v1, %v12290_v39  ;;  %v16274_v39 = vld [vmem:[#allocation134_spill] sm:$0xff] }
 0x384   :  { %v3906_v25 = vpop.f32.mrf.mxu0  ;;  %v4249_v51 = vmul.f32 0.70710677, %v12348_v42  ;;  %v4567_v44 = vsub.f32 %v12345_v45, %v15134_v56  ;;  %v12389_v57 = vadd.f32 %v12284_v0, %v3893_v30  ;;  %5706 = vmatpush1.msra.mxu1 %v16273_v11  ;;  %v4304_v26 = vadd.f32 1.0, %v7788_v35  ;;  %v16275_v11 = vld [vmem:[#allocation139_spill] sm:$0xff] }
 0x385   :  { %16272 = vst [vmem:[#allocation42_spill] sm:$0xff] %v12377_v17  ;;  %v7790_v41 = vpop.eup %7789  ;;  %v12393_v31 = vmul.f32 0.5, %v12293_v46  ;;  %5708 = vmatprep.subr.mxu1 %v16274_v39  ;;  %5230 = vmatprep.mubr.f32.mxu1 %v12377_v17  ;;  %v3901_v63 = vadd.f32 %v3900_v10, %v12221_v13  ;;  %v12399_v6 = vmul.f32 0.5, %v4140_v7  ;;  %v4250_v0 = vmul.f32 0.70710677, %v12364_v33  ;;  %v16276_v39 = vld [vmem:[#allocation45_spill] sm:$0xff] }
 0x386   :  { %v3908_v21 = vpop.f32.mrf.mxu0  ;;  %v7792_v56 = vpop.eup %7791  ;;  %v4568_v30 = vand.u32 4294901760, %v4567_v44  ;;  %5710 = vmatpush1.msra.mxu1 %v16275_v11  ;;  %v12405_v46 = vsub.f32 %v12275_v38, %v12313_v58  ;;  %v12408_v1 = vmul.f32 %v4305_v15, %v12323_v60  ;;  %7801 = verf.f32 %v4248_v19  ;;  %v16280_v15 = vld [vmem:[#allocation27_spill] sm:$0xff]  ;;  %v16282_v11 = vld [vmem:[#allocation77_spill] sm:$0xff] }
 0x387   :  { %v7794_v35 = vpop.eup %7793  ;;  %v3899_v13 = vadd.f32 %v3898_v47, %v16276_v39  ;;  %v16277_v10 = vand.u32 4294901760, %v12371_v29  ;;  %5712 = vmatprep.subr.mxu1 %v16278_v14  ;;  %7803 = verf.f32 %v4249_v51  ;;  %v4251_v38 = vmul.f32 0.70710677, %v12389_v57  ;;  %v4165_v58 = vpop.f32.mrf.mxu1  ;;  %v16281_v51 = vld [vmem:[#allocation43_spill] sm:$0xff] }
 0x388   :  { %v12415_v44 = vpop.f32.mrf.mxu0  ;;  %4569 = vmatprep.mubr.f32.mxu0 %v4568_v30  ;;  %v12420_v60 = vand.u32 4294901760, %v12380_v34  ;;  %5714 = vmatpush1.msra.mxu1 %v16280_v15  ;;  %v12424_v19 = vmul.f32 %v4304_v26, %v12301_v59  ;;  %v4307_v39 = vadd.f32 1.0, %v7792_v56  ;;  %v12426_v14 = vadd.f32 %v4157_v18, %v3901_v63 }
 0x389   :  { %v4583_v7 = vsub.f32 %v12371_v29, %v16277_v10  ;;  %v7796_v47 = vpop.eup %7795  ;;  %4575 = vmatmul.mubr.f32.vlgmr.msra.gmra.mxu0 %v4574_v61  ;;  %5716 = vmatprep.subr.mxu1 %v16281_v51  ;;  %v4306_v30 = vadd.f32 1.0, %v7790_v41  ;;  %v4308_v4 = vadd.f32 1.0, %v7794_v35  ;;  %7805 = verf.f32 %v4250_v0  ;;  %v16284_v61 = vld [vmem:[#allocation19_spill] sm:$0xff] }
 0x38a   :  { %16279 = vst [vmem:[#allocation93_spill] sm:$0xff] %v12420_v60  ;;  %5339 = vmatpush1.msra.mxu0 %v16282_v11  ;;  %v16283_v8 = vand.u32 4294901760, %v12405_v46  ;;  %5232 = vmatmul.mubr.f32.gmra.mxu1 %v12420_v60  ;;  %v3916_v59 = vpop.f32.mrf.mxu0  ;;  %v4156_v56 = vadd.f32 %v12307_v20, %v3899_v13  ;;  %v12438_v63 = vsub.f32 %v12305_v27, %v12352_v53  ;;  %v12441_v18 = vand.u32 4294901760, %v12408_v1  ;;  %v16286_v0 = vld [vmem:[#allocation83_spill] sm:$0xff]  ;;  %v16287_v20 = vld [vmem:[#allocation166_spill] sm:$0xff] }
 0x38b   :  { %v4584_v10 = vand.u32 4294901760, %v4583_v7  ;;  %5342 = vmatprep.subr.mxu0 %v16284_v61  ;;  %v3909_v41 = vadd.f32 %v3908_v21, %v12224_v23  ;;  %v4309_v26 = vadd.f32 1.0, %v7796_v47  ;;  %7807 = verf.f32 %v4251_v38  ;;  %v16288_v7 = vld [vmem:[#allocation33_spill] sm:$0xff]  ;;  %v16289_v23 = vld [vmem:[#allocation118_spill] sm:$0xff] }
 0x38c   :  { %v4589_v15 = vsub.f32 %v12405_v46, %v16283_v8  ;;  %16285 = vst [vmem:[#allocation121_spill] sm:$0xff] %v12441_v18  ;;  %v12444_v8 = vpop.f32.mrf.mxu1  ;;  %5345 = vmatpush1.msra.mxu0 %v16286_v0  ;;  %v3907_v13 = vadd.f32 %v3906_v25, %v16287_v20  ;;  %5718 = vmatpush1.msra.mxu1 %v16288_v7  ;;  %v12453_v27 = vmul.f32 0.5, %v12348_v42  ;;  %v4253_v53 = vmul.f32 0.70710677, %v12426_v14  ;;  %v16291_v47 = vld [vmem:[#allocation37_spill] sm:$0xff] }
 0x38d   :  { %4585 = vmatprep.mubr.f32.mxu0 %v4584_v10  ;;  %v12450_v10 = vmul.f32 %v4307_v39, %v12330_v49  ;;  %5348 = vmatprep.subr.mxu0 %v16289_v23  ;;  %v12463_v25 = vmul.f32 0.5, %v12364_v33  ;;  %v12467_v49 = vsub.f32 %v12320_v9, %v12361_v24  ;;  %v12470_v42 = vand.u32 4294901760, %v12424_v19  ;;  %v12473_v39 = vpop.f32.mrf.mxu0  ;;  %v16292_v33 = vld [vmem:[#allocation105_spill] sm:$0xff]  ;;  %v16294_v24 = vld [vmem:[#allocation34_spill] sm:$0xff] }
 0x38e   :  { %v4590_v35 = vand.u32 4294901760, %v4589_v15  ;;  %5238 = vmatprep.mubr.f32.mxu1 %v12441_v18  ;;  %v7798_v38 = vpop.eup %7797  ;;  %v12460_v15 = vmul.f32 %v4306_v30, %v12327_v12  ;;  %5720 = vmatprep.subr.mxu1 %v16291_v47  ;;  %v12476_v21 = vmul.f32 %v4308_v4, %v12339_v32  ;;  %v12479_v12 = vmul.f32 0.5, %v12389_v57  ;;  %v4173_v51 = vpop.f32.mrf.mxu1  ;;  %v16295_v4 = vld [vmem:[#allocation130_spill] sm:$0xff]  ;;  %v16307_v23 = vld [vmem:[#allocation25_spill] sm:$0xff] }
 0x38f   :  { %16290 = vst [vmem:[#allocation120_spill] sm:$0xff] %v12470_v42  ;;  %v7800_v20 = vpop.eup %7799  ;;  %5351 = vmatpush1.msra.mxu0 %v16292_v33  ;;  %v16293_v30 = vand.u32 4294901760, %v12438_v63  ;;  %5722 = vmatpush1.msra.mxu1 %v16294_v24  ;;  %v12489_v47 = vmul.f32 %v4309_v26, %v12357_v50  ;;  %v4252_v7 = vmul.f32 0.70710677, %v4156_v56  ;;  %v12492_v32 = vadd.f32 %v12383_v16, %v3907_v13  ;;  %v16313_v61 = vld [vmem:[#allocation57_spill] sm:$0xff] }
 0x390   :  { %4591 = vmatmul.mubr.f32.gmra.mxu0 %v4590_v35  ;;  %v12485_v35 = vadd.f32 %v4165_v58, %v3909_v41  ;;  %5354 = vmatprep.subr.mxu0 %v16295_v4  ;;  %v15145_v57 = vand.u32 4294901760, %v12467_v49  ;;  %7809 = verf.f32 %v4253_v53  ;;  %v16296_v58 = vld [vmem:[#allocation129_spill] sm:$0xff]  ;;  %v12501_v50 = vsub.f32 %v12336_v37, %v12377_v17  ;;  %v16299_v4 = vld [vmem:[#allocation23_spill] sm:$0xff]  ;;  %v16300_v53 = vld [vmem:[#allocation18_spill] sm:$0xff] }
 0x391   :  { %v4599_v9 = vsub.f32 %v12438_v63, %v16293_v30  ;;  %5240 = vmatmul.mubr.f32.gmra.mxu1 %v12470_v42  ;;  %5357 = vmatpush1.msra.mxu0 %v16296_v58  ;;  %v16297_v41 = vld [vmem:[#allocation41_spill] sm:$0xff]  ;;  %v12504_v26 = vand.u32 4294901760, %v12450_v10  ;;  %v4310_v16 = vadd.f32 1.0, %v7798_v38  ;;  %v4311_v13 = vadd.f32 1.0, %v7800_v20  ;;  %v16301_v17 = vld [vmem:[#allocation136_spill] sm:$0xff] }
 0x392   :  { %5724 = vmatprep.subr.mxu1 %v16297_v41  ;;  %v4605_v24 = vsub.f32 %v12467_v49, %v15145_v57  ;;  %5360 = vmatprep.subr.mxu0 %v16299_v4  ;;  %v3924_v41 = vpop.f32.mrf.mxu0  ;;  %v4255_v37 = vmul.f32 0.70710677, %v12485_v35  ;;  %v12517_v38 = vsub.f32 %v12380_v34, %v12420_v60  ;;  %v12520_v20 = vand.u32 4294901760, %v12460_v15  ;;  %v16304_v60 = vld [vmem:[#allocation175_spill] sm:$0xff] }
 0x393   :  { %v4600_v30 = vand.u32 4294901760, %v4599_v9  ;;  %16298 = vst [vmem:[#allocation64_spill] sm:$0xff] %v12504_v26  ;;  %5726 = vmatpush1.msra.mxu1 %v16300_v53  ;;  %v3917_v9 = vadd.f32 %v3916_v59, %v12230_v48  ;;  %5363 = vmatpush1.msra.mxu0 %v16301_v17  ;;  %v7802_v57 = vpop.eup %7801  ;;  %v12522_v4 = vmul.f32 0.5, %v4156_v56  ;;  %7811 = verf.f32 %v4252_v7  ;;  %v4179_v59 = vpop.f32.mrf.mxu1  ;;  %v16303_v53 = vld [vmem:[#allocation138_spill] sm:$0xff]  ;;  %v16306_v7 = vld [vmem:[#allocation145_spill] sm:$0xff] }
 0x394   :  { %16302 = vst [vmem:[#allocation160_spill] sm:$0xff] %v12520_v20  ;;  %v12525_v48 = vmul.f32 0.5, %v12426_v14  ;;  %5366 = vmatprep.subr.mxu0 %v16303_v53  ;;  %5246 = vmatprep.mubr.f32.mxu1 %v12504_v26  ;;  %v7804_v58 = vpop.eup %7803  ;;  %v4254_v34 = vmul.f32 0.70710677, %v12492_v32  ;;  %v3915_v17 = vadd.f32 %v12415_v44, %v16304_v60  ;;  %v16305_v33 = vand.u32 4294901760, %v12501_v50 }
 0x395   :  { %4601 = vmatprep.mubr.f32.mxu0 %v4600_v30  ;;  %v4606_v30 = vand.u32 4294901760, %v4605_v24  ;;  %5369 = vmatpush1.msra.mxu0 %v16306_v7  ;;  %v12539_v24 = vmul.f32 %v4310_v16, %v12373_v28  ;;  %v12541_v53 = vadd.f32 %v4173_v51, %v3917_v9  ;;  %v12546_v44 = vsub.f32 %v12408_v1, %v12441_v18  ;;  %v16309_v16 = vld [vmem:[#allocation68_spill] sm:$0xff]  ;;  %v16310_v51 = vld [vmem:[#allocation29_spill] sm:$0xff] }
 0x396   :  { %v4615_v56 = vsub.f32 %v12501_v50, %v16305_v33  ;;  %5248 = vmatmul.mubr.f32.gmra.mxu1 %v12520_v20  ;;  %5372 = vmatprep.subr.mxu0 %v16307_v23  ;;  %v12549_v60 = vand.u32 4294901760, %v12489_v47  ;;  %v3930_v33 = vpop.f32.mrf.mxu0  ;;  %v7806_v7 = vpop.eup %7805  ;;  %v12552_v14 = vmul.f32 %v4311_v13, %v12393_v31  ;;  %v4312_v0 = vadd.f32 1.0, %v7802_v57  ;;  %v16312_v23 = vld [vmem:[#allocation48_spill] sm:$0xff] }
 0x397   :  { %4607 = vmatmul.mubr.f32.gmra.mxu0 %v4606_v30  ;;  %7813 = verf.f32 %v4255_v37  ;;  %5728 = vmatprep.subr.mxu1 %v16309_v16  ;;  %v4313_v9 = vadd.f32 1.0, %v7804_v58  ;;  %v4181_v30 = vpop.f32.mrf.mxu1  ;;  %v16311_v1 = vand.u32 4294901760, %v12517_v38  ;;  %v15152_v31 = vand.u32 4294901760, %v12546_v44  ;;  %v16314_v58 = vld [vmem:[#allocation176_spill] sm:$0xff] }
 0x398   :  { %16308 = vst [vmem:[#allocation73_spill] sm:$0xff] %v12549_v60  ;;  %v4616_v28 = vand.u32 4294901760, %v4615_v56  ;;  %5375 = vmatpush1.msra.mxu0 %v16310_v51  ;;  %5730 = vmatpush1.msra.mxu1 %v16312_v23  ;;  %v3925_v57 = vadd.f32 %v3924_v41, %v12245_v5  ;;  %v7808_v13 = vpop.eup %7807  ;;  %7815 = verf.f32 %v4254_v34  ;;  %v12564_v37 = vadd.f32 %v12444_v8, %v3915_v17  ;;  %v16315_v51 = vld [vmem:[#allocation32_spill] sm:$0xff]  ;;  %v16316_v17 = vld [vmem:[#allocation61_spill] sm:$0xff] }
 0x399   :  { %v4621_v18 = vsub.f32 %v12517_v38, %v16311_v1  ;;  %5378 = vmatprep.subr.mxu0 %v16313_v61  ;;  %v3923_v56 = vadd.f32 %v12473_v39, %v16314_v58  ;;  %5732 = vmatprep.subr.mxu1 %v16315_v51  ;;  %v12571_v1 = vsub.f32 %v12424_v19, %v12470_v42  ;;  %v12574_v61 = vmul.f32 0.5, %v12492_v32  ;;  %v3932_v39 = vpop.f32.mrf.mxu0  ;;  %v16318_v32 = vld [vmem:[#allocation36_spill] sm:$0xff]  ;;  %v16319_v58 = vld [vmem:[#allocation17_spill] sm:$0xff]  ;;  %v4187_v51 = vpop.f32.mrf.mxu1 }
 0x39a   :  { %4617 = vmatprep.mubr.f32.mxu0 %v4616_v28  ;;  %v4257_v5 = vmul.f32 0.70710677, %v12541_v53  ;;  %5254 = vmatprep.mubr.f32.mxu1 %v12549_v60  ;;  %v12580_v8 = vand.u32 4294901760, %v12476_v21  ;;  %v12583_v34 = vmul.f32 %v4312_v0, %v12399_v6  ;;  %v4631_v19 = vsub.f32 %v12546_v44, %v15152_v31 }
 0x39b   :  { %v4622_v41 = vand.u32 4294901760, %v4621_v18  ;;  %5381 = vmatpush1.msra.mxu0 %v16316_v17  ;;  %5734 = vmatpush1.msra.mxu1 %v16318_v32  ;;  %v12589_v28 = vadd.f32 %v4181_v30, %v3925_v57  ;;  %v4314_v42 = vadd.f32 1.0, %v7806_v7  ;;  %v4315_v17 = vadd.f32 1.0, %v7808_v13  ;;  %v16321_v13 = vld [vmem:[#allocation50_spill] sm:$0xff] }
 0x39c   :  { %16317 = vst [vmem:[#allocation89_spill] sm:$0xff] %v12580_v8  ;;  %5384 = vmatprep.subr.mxu0 %v16319_v58  ;;  %5256 = vmatmul.mubr.f32.gmra.mxu1 %v12580_v8  ;;  %v12596_v6 = vsub.f32 %v12450_v10, %v12504_v26  ;;  %v12599_v0 = vand.u32 4294901760, %v12552_v14  ;;  %v12602_v30 = vmul.f32 %v4313_v9, %v12453_v27  ;;  %v4256_v57 = vmul.f32 0.70710677, %v12564_v37  ;;  %v16324_v58 = vld [vmem:[#allocation52_spill] sm:$0xff]  ;;  %v16325_v9 = vld [vmem:[#allocation38_spill] sm:$0xff] }
 0x39d   :  { %4623 = vmatmul.mubr.f32.gmra.mxu0 %v4622_v41  ;;  %v12605_v31 = vadd.f32 %v4179_v59, %v3923_v56  ;;  %v4632_v7 = vand.u32 4294901760, %v4631_v19  ;;  %5736 = vmatprep.subr.mxu1 %v16321_v13  ;;  %v16322_v41 = vld [vmem:[#allocation62_spill] sm:$0xff]  ;;  %v7810_v18 = vpop.eup %7809  ;;  %7817 = verf.f32 %v4257_v5  ;;  %v16323_v10 = vand.u32 4294901760, %v12571_v1  ;;  %v3938_v56 = vpop.f32.mrf.mxu0 }
 0x39e   :  { %16320 = vst [vmem:[#allocation99_spill] sm:$0xff] %v12599_v0  ;;  %5387 = vmatpush1.msra.mxu0 %v16322_v41  ;;  %5738 = vmatpush1.msra.mxu1 %v16324_v58  ;;  %v3931_v27 = vadd.f32 %v3930_v33, %v12091_v52  ;;  %v12617_v19 = vmul.f32 0.5, %v12485_v35  ;;  %v4259_v41 = vmul.f32 0.70710677, %v12589_v28  ;;  %v16326_v5 = vld [vmem:[#allocation54_spill] sm:$0xff]  ;;  %v3933_v13 = vadd.f32 %v3932_v39, %v12270_v22  ;;  %v4189_v59 = vpop.f32.mrf.mxu1 }
 0x39f   :  { %v4637_v26 = vsub.f32 %v12571_v1, %v16323_v10  ;;  %5390 = vmatprep.subr.mxu0 %v16325_v9  ;;  %4633 = vmatprep.mubr.f32.mxu0 %v4632_v7  ;;  %v12624_v10 = vsub.f32 %v12460_v15, %v12520_v20  ;;  %v12627_v52 = vmul.f32 %v4314_v42, %v12463_v25  ;;  %v16327_v7 = vld [vmem:[#allocation55_spill] sm:$0xff]  ;;  %v4317_v39 = vadd.f32 1.0, %v7810_v18  ;;  %v16330_v42 = vld [vmem:[#allocation40_spill] sm:$0xff]  ;;  %v16336_v58 = vld [vmem:[#allocation46_spill] sm:$0xff] }
 0x3a0   :  { %5740 = vmatprep.subr.mxu1 %v16326_v5  ;;  %v12630_v33 = vmul.f32 %v4315_v17, %v12479_v12  ;;  %5262 = vmatprep.mubr.f32.mxu1 %v12599_v0  ;;  %v12635_v5 = vand.u32 4294901760, %v12539_v24  ;;  %v7812_v22 = vpop.eup %7811  ;;  %7819 = verf.f32 %v4256_v57  ;;  %v16329_v15 = vand.u32 4294901760, %v12596_v6  ;;  %v16331_v17 = vld [vmem:[#allocation58_spill] sm:$0xff] }
 0x3a1   :  { %v4638_v35 = vand.u32 4294901760, %v4637_v26  ;;  %5393 = vmatpush1.msra.mxu0 %v16327_v7  ;;  %5742 = vmatpush1.msra.mxu1 %v16330_v42  ;;  %v4258_v26 = vmul.f32 0.70710677, %v12605_v31  ;;  %v12644_v20 = vadd.f32 %v4187_v51, %v3931_v27  ;;  %v12649_v18 = vsub.f32 %v12489_v47, %v12549_v60  ;;  %v16334_v51 = vld [vmem:[#allocation66_spill] sm:$0xff]  ;;  %v16335_v27 = vld [vmem:[#allocation49_spill] sm:$0xff]  ;;  %v4195_v60 = vpop.f32.mrf.mxu1 }
 0x3a2   :  { %16328 = vst [vmem:[#allocation96_spill] sm:$0xff] %v12635_v5  ;;  %v4647_v25 = vsub.f32 %v12596_v6, %v16329_v15  ;;  %5396 = vmatprep.subr.mxu0 %v16331_v17  ;;  %5264 = vmatmul.mubr.f32.gmra.mxu1 %v12635_v5  ;;  %v12652_v57 = vand.u32 4294901760, %v12602_v30  ;;  %v3940_v15 = vpop.f32.mrf.mxu0  ;;  %7821 = verf.f32 %v4259_v41  ;;  %v12654_v12 = vadd.f32 %v4189_v59, %v3933_v13  ;;  %v16337_v13 = vld [vmem:[#allocation20_spill] sm:$0xff] }
 0x3a3   :  { %4639 = vmatmul.mubr.f32.gmra.mxu0 %v4638_v35  ;;  %v16333_v17 = vand.u32 4294901760, %v12624_v10  ;;  %5744 = vmatprep.subr.mxu1 %v16334_v51  ;;  %v4316_v9 = vadd.f32 1.0, %v7812_v22  ;;  %v12662_v47 = vmul.f32 0.5, %v12541_v53  ;;  %v3939_v41 = vadd.f32 %v3938_v56, %v12100_v62 }
 0x3a4   :  { %16332 = vst [vmem:[#allocation163_spill] sm:$0xff] %v12652_v57  ;;  %v4648_v42 = vand.u32 4294901760, %v4647_v25  ;;  %5399 = vmatpush1.msra.mxu0 %v16335_v27  ;;  %v7814_v7 = vpop.eup %7813  ;;  %5746 = vmatpush1.msra.mxu1 %v16336_v58  ;;  %v15159_v59 = vand.u32 4294901760, %v12649_v18  ;;  %v12669_v25 = vmul.f32 %v4317_v39, %v12525_v48  ;;  %v16338_v27 = vld [vmem:[#allocation71_spill] sm:$0xff]  ;;  %v3941_v22 = vadd.f32 %v3940_v15, %v12273_v36  ;;  %v16339_v48 = vld [vmem:[#allocation22_spill] sm:$0xff] }
 0x3a5   :  { %v4653_v35 = vsub.f32 %v12624_v10, %v16333_v17  ;;  %5402 = vmatprep.subr.mxu0 %v16337_v13  ;;  %5748 = vmatprep.subr.mxu1 %v16338_v27  ;;  %v12675_v53 = vsub.f32 %v12476_v21, %v12580_v8  ;;  %v7816_v58 = vpop.eup %7815  ;;  %7823 = verf.f32 %v4258_v26  ;;  %v4260_v62 = vmul.f32 0.70710677, %v12644_v20  ;;  %v16341_v21 = vld [vmem:[#allocation53_spill] sm:$0xff]  ;;  %v16360_v27 = vld [vmem:[#allocation79_spill] sm:$0xff] }
 0x3a6   :  { %4649 = vmatprep.mubr.f32.mxu0 %v4648_v42  ;;  %v4663_v56 = vsub.f32 %v12649_v18, %v15159_v59  ;;  %5270 = vmatprep.mubr.f32.mxu1 %v12652_v57  ;;  %v12684_v39 = vand.u32 4294901760, %v12583_v34  ;;  %v4319_v36 = vadd.f32 1.0, %v7814_v7  ;;  %v4261_v42 = vmul.f32 0.70710677, %v12654_v12 }
 0x3a7   :  { %v4654_v17 = vand.u32 4294901760, %v4653_v35  ;;  %5405 = vmatpush1.msra.mxu0 %v16339_v48  ;;  %5750 = vmatpush1.msra.mxu1 %v16341_v21  ;;  %v12691_v15 = vsub.f32 %v12552_v14, %v12599_v0  ;;  %v4197_v35 = vpop.f32.mrf.mxu1  ;;  %v12693_v59 = vadd.f32 %v4195_v60, %v3939_v41  ;;  %v16342_v48 = vld [vmem:[#allocation65_spill] sm:$0xff]  ;;  %v12698_v7 = vand.u32 4294901760, %v12630_v33  ;;  %v16346_v0 = vld [vmem:[#allocation67_spill] sm:$0xff] }
 0x3a8   :  { %16340 = vst [vmem:[#allocation28_spill] sm:$0xff] %v12684_v39  ;;  %v4664_v8 = vand.u32 4294901760, %v4663_v56  ;;  %5272 = vmatmul.mubr.f32.gmra.mxu1 %v12684_v39  ;;  %5408 = vmatprep.subr.mxu0 %v16342_v48  ;;  %v4348_v26 = vmul.f32 %v4316_v9, %v12522_v4  ;;  %v4318_v21 = vadd.f32 1.0, %v7816_v58  ;;  %v12705_v14 = vadd.f32 %v4197_v35, %v3941_v22  ;;  %v16345_v56 = vld [vmem:[#allocation60_spill] sm:$0xff]  ;;  %v16347_v48 = vld [vmem:[#allocation81_spill] sm:$0xff]  ;;  %v16349_v35 = vld [vmem:[#allocation59_spill] sm:$0xff] }
 0x3a9   :  { %4655 = vmatmul.mubr.f32.gmra.mxu0 %v4654_v17  ;;  %16343 = vst [vmem:[#allocation31_spill] sm:$0xff] %v12698_v7  ;;  %v12702_v17 = vsub.f32 %v12539_v24, %v12635_v5  ;;  %v16344_v60 = vand.u32 4294901760, %v12675_v53  ;;  %5752 = vmatprep.subr.mxu1 %v16345_v56  ;;  %7825 = verf.f32 %v4260_v62  ;;  %v15168_v24 = vand.u32 4294901760, %v12691_v15 }
 0x3aa   :  { %5411 = vmatpush1.msra.mxu0 %v16346_v0  ;;  %4665 = vmatprep.mubr.f32.mxu0 %v4664_v8  ;;  %v12716_v4 = vand.u32 4294901760, %v12627_v52  ;;  %v7818_v58 = vpop.eup %7817  ;;  %v4351_v9 = vmul.f32 %v4319_v36, %v12617_v19  ;;  %7827 = verf.f32 %v4261_v42  ;;  %v12723_v8 = vsub.f32 %v12602_v30, %v12652_v57  ;;  %v16355_v0 = vld [vmem:[#allocation69_spill] sm:$0xff] }
 0x3ab   :  { %v4669_v41 = vsub.f32 %v12675_v53, %v16344_v60  ;;  %5754 = vmatpush2.msra.mxu1 %v16347_v48  ;;  %5414 = vmatprep.subr.mxu0 %v16349_v35  ;;  %v16350_v60 = vld [vmem:[#allocation72_spill] sm:$0xff]  ;;  %v4262_v62 = vmul.f32 0.70710677, %v12693_v59  ;;  %v4679_v5 = vsub.f32 %v12691_v15, %v15168_v24  ;;  %v16352_v19 = vand.u32 4294901760, %v12702_v17 }
 0x3ac   :  { %16348 = vst [vmem:[#allocation39_spill] sm:$0xff] %v12716_v4  ;;  %5756 = vmatprep.subr.mxu1 %v16350_v60  ;;  %5278 = vmatprep.mubr.f32.mxu1 %v12698_v7  ;;  %v16351_v48 = vld [vmem:[#allocation44_spill] sm:$0xff]  ;;  %v12735_v42 = vand.u32 4294901760, %v12669_v25  ;;  %v4263_v30 = vmul.f32 0.70710677, %v12705_v14  ;;  %v12742_v24 = vsub.f32 %v12583_v34, %v12684_v39  ;;  %v12754_v57 = vsub.f32 %v12627_v52, %v12716_v4  ;;  %v16357_v34 = vld [vmem:[#allocation90_spill] sm:$0xff] }
 0x3ad   :  { %v4670_v22 = vand.u32 4294901760, %v4669_v41  ;;  %5417 = vmatpush1.msra.mxu0 %v16351_v48  ;;  %v4685_v36 = vsub.f32 %v12702_v17, %v16352_v19  ;;  %v16354_v41 = vld [vmem:[#allocation76_spill] sm:$0xff]  ;;  %v12746_v48 = vsub.f32 %v12630_v33, %v12698_v7  ;;  %v7820_v60 = vpop.eup %7819  ;;  %v4321_v19 = vadd.f32 1.0, %v7818_v58  ;;  %5280 = vmatmul.mubr.f32.gmra.mxu1 %v12716_v4  ;;  %v16358_v39 = vld [vmem:[#allocation51_spill] sm:$0xff] }
 0x3ae   :  { %16353 = vst [vmem:[#allocation24_spill] sm:$0xff] %v12735_v42  ;;  %5758 = vmatpush2.msra.mxu1 %v16354_v41  ;;  %v4680_v35 = vand.u32 4294901760, %v4679_v5  ;;  %5420 = vmatprep.subr.mxu0 %v16355_v0  ;;  %v16359_v33 = vand.u32 4294901760, %v12723_v8  ;;  %v4350_v56 = vmul.f32 %v4318_v21, %v12574_v61  ;;  %v12765_v52 = vand.u32 4294901760, %v4351_v9 }
 0x3af   :  { %4671 = vmatmul.mubr.f32.gmra.mxu0 %v4670_v22  ;;  %v12750_v22 = vand.u32 4294901760, %v4348_v26  ;;  %v4686_v41 = vand.u32 4294901760, %v4685_v36  ;;  %5760 = vmatprep.subr.mxu1 %v16357_v34  ;;  %v7822_v0 = vpop.eup %7821  ;;  %v12770_v4 = vsub.f32 %v12669_v25, %v12735_v42  ;;  %7829 = verf.f32 %v4263_v30 }
 0x3b0   :  { %5423 = vmatpush1.msra.mxu0 %v16358_v39  ;;  %v4695_v58 = vsub.f32 %v12723_v8, %v16359_v33  ;;  %4681 = vmatprep.mubr.f32.mxu0 %v4680_v35  ;;  %16361 = vst [vmem:[#allocation26_spill] sm:$0xff] %v12765_v52  ;;  %v16362_v33 = vld [vmem:[#allocation56_spill] sm:$0xff]  ;;  %v16363_v7 = vand.u32 4294901760, %v12742_v24  ;;  %v16364_v21 = vand.u32 4294901760, %v12746_v48  ;;  %v4353_v36 = vmul.f32 %v4321_v19, %v12662_v47  ;;  %v16365_v39 = vld [vmem:[#allocation94_spill] sm:$0xff] }
 0x3b1   :  { %16356 = vst [vmem:[#allocation47_spill] sm:$0xff] %v12750_v22  ;;  %5762 = vmatpush2.msra.mxu1 %v16360_v27  ;;  %5426 = vmatprep.subr.mxu0 %v16362_v33  ;;  %v4320_v27 = vadd.f32 1.0, %v7820_v60  ;;  %v12784_v30 = vsub.f32 %v4348_v26, %v12750_v22  ;;  %7831 = verf.f32 %v4262_v62  ;;  %v16366_v33 = vld [vmem:[#allocation75_spill] sm:$0xff]  ;;  %v16368_v47 = vld [vmem:[#allocation70_spill] sm:$0xff]  ;;  %v12793_v26 = vand.u32 4294901760, %v4350_v56  ;;  %v16371_v62 = vld [vmem:[#allocation101_spill] sm:$0xff] }
 0x3b2   :  { %v4696_v5 = vand.u32 4294901760, %v4695_v58  ;;  %v4701_v61 = vsub.f32 %v12742_v24, %v16363_v7  ;;  %v4711_v35 = vsub.f32 %v12746_v48, %v16364_v21  ;;  %5764 = vmatprep.subr.mxu1 %v16365_v39  ;;  %5286 = vmatprep.mubr.f32.mxu1 %v12735_v42  ;;  %v4224_v58 = vmul.f32 0.5, %v12564_v37  ;;  %v16367_v21 = vld [vmem:[#allocation86_spill] sm:$0xff] }
 0x3b3   :  { %4687 = vmatmul.mubr.f32.gmra.mxu0 %v4686_v41  ;;  %v7824_v41 = vpop.eup %7823  ;;  %v4323_v7 = vadd.f32 1.0, %v7822_v0  ;;  %5766 = vmatpush2.msra.mxu1 %v16367_v21  ;;  %v16369_v42 = vand.u32 4294901760, %v12754_v57  ;;  %16370 = vst [vmem:[#allocation168_spill] sm:$0xff] %v12793_v26  ;;  %v12796_v39 = vsub.f32 %v4351_v9, %v12765_v52  ;;  %v4227_v37 = vmul.f32 0.5, %v12589_v28  ;;  %v16376_v28 = vld [vmem:[#allocation87_spill] sm:$0xff] }
 0x3b4   :  { %4697 = vmatprep.mubr.f32.mxu0 %v4696_v5  ;;  %5429 = vmatpush1.msra.mxu0 %v16366_v33  ;;  %v4702_v60 = vand.u32 4294901760, %v4701_v61  ;;  %v4712_v19 = vand.u32 4294901760, %v4711_v35  ;;  %v4352_v0 = vmul.f32 %v4320_v27, %v4224_v58  ;;  %v16372_v5 = vld [vmem:[#allocation85_spill] sm:$0xff]  ;;  %v16373_v61 = vand.u32 4294901760, %v12770_v4  ;;  %v16375_v33 = vld [vmem:[#allocation91_spill] sm:$0xff]  ;;  %v16377_v58 = vld [vmem:[#allocation92_spill] sm:$0xff] }
 0x3b5   :  { %5432 = vmatprep.subr.mxu0 %v16368_v47  ;;  %v4717_v25 = vsub.f32 %v12754_v57, %v16369_v42  ;;  %5288 = vmatmul.mubr.f32.gmra.mxu1 %v12750_v22  ;;  %v12805_v42 = vand.u32 4294901760, %v4353_v36  ;;  %v4322_v21 = vadd.f32 1.0, %v7824_v41  ;;  %v4355_v27 = vmul.f32 %v4323_v7, %v4227_v37  ;;  %v16378_v41 = vld [vmem:[#allocation78_spill] sm:$0xff]  ;;  %v16379_v47 = vld [vmem:[#allocation111_spill] sm:$0xff] }
 0x3b6   :  { %5768 = vmatprep.subr.mxu1 %v16371_v62  ;;  %5435 = vmatpush2.msra.mxu0 %v16372_v5  ;;  %v4727_v35 = vsub.f32 %v12770_v4, %v16373_v61  ;;  %v7826_v9 = vpop.eup %7825  ;;  %v12813_v61 = vsub.f32 %v4350_v56, %v12793_v26  ;;  %v4226_v62 = vmul.f32 0.5, %v12605_v31  ;;  %v16380_v7 = vand.u32 4294901760, %v12784_v30  ;;  %v16382_v31 = vld [vmem:[#allocation82_spill] sm:$0xff] }
 0x3b7   :  { %4703 = vmatmul.mubr.f32.gmra.mxu0 %v4702_v60  ;;  %16374 = vst [vmem:[#allocation173_spill] sm:$0xff] %v12805_v42  ;;  %5770 = vmatpush2.msra.mxu1 %v16375_v33  ;;  %v7828_v60 = vpop.eup %7827  ;;  %v4718_v22 = vand.u32 4294901760, %v4717_v25  ;;  %v12822_v25 = vand.u32 4294901760, %v4352_v0  ;;  %v12825_v37 = vsub.f32 %v4353_v36, %v12805_v42  ;;  %v4229_v36 = vmul.f32 0.5, %v12654_v12  ;;  %v16390_v12 = vld [vmem:[#allocation88_spill] sm:$0xff] }
 0x3b8   :  { %5438 = vmatprep.subr.mxu0 %v16376_v28  ;;  %5772 = vmatprep.subr.mxu1 %v16377_v58  ;;  %v4728_v28 = vand.u32 4294901760, %v4727_v35  ;;  %v4325_v56 = vadd.f32 1.0, %v7828_v60  ;;  %v4354_v5 = vmul.f32 %v4322_v21, %v4226_v62  ;;  %v16387_v60 = vld [vmem:[#allocation102_spill] sm:$0xff]  ;;  %v4324_v21 = vadd.f32 1.0, %v7826_v9  ;;  %v16389_v62 = vld [vmem:[#allocation103_spill] sm:$0xff] }
 0x3b9   :  { %4713 = vmatprep.mubr.f32.mxu0 %v4712_v19  ;;  %5294 = vmatprep.mubr.f32.mxu1 %v12765_v52  ;;  %v4733_v19 = vsub.f32 %v12784_v30, %v16380_v7  ;;  %16381 = vst [vmem:[#allocation165_spill] sm:$0xff] %v12822_v25  ;;  %v16383_v52 = vld [vmem:[#allocation100_spill] sm:$0xff]  ;;  %v12834_v7 = vand.u32 4294901760, %v4355_v27  ;;  %v4228_v58 = vmul.f32 0.5, %v12644_v20 }
 0x3ba   :  { %5441 = vmatpush2.msra.mxu0 %v16378_v41  ;;  %5774 = vmatpush2.msra.mxu1 %v16379_v47  ;;  %v16384_v47 = vld [vmem:[#allocation95_spill] sm:$0xff]  ;;  %v4357_v41 = vmul.f32 %v4325_v56, %v4229_v36  ;;  %v16394_v56 = vld [vmem:[#allocation104_spill] sm:$0xff] }
 0x3bb   :  { %4719 = vmatmul.mubr.f32.gmra.mxu0 %v4718_v22  ;;  %5296 = vmatmul.mubr.f32.gmra.mxu1 %v12793_v26  ;;  %v16385_v22 = vand.u32 4294901760, %v12796_v39  ;;  %16386 = vst [vmem:[#allocation63_spill] sm:$0xff] %v12834_v7  ;;  %v16388_v26 = vld [vmem:[#allocation97_spill] sm:$0xff]  ;;  %v4356_v36 = vmul.f32 %v4324_v21, %v4228_v58  ;;  %v16401_v58 = vld [vmem:[#allocation131_spill] sm:$0xff] }
 0x3bc   :  { %5444 = vmatprep.subr.mxu0 %v16382_v31  ;;  %5776 = vmatprep.subr.mxu1 %v16383_v52  ;;  %v7830_v31 = vpop.eup %7829  ;;  %v12852_v52 = vand.u32 4294901760, %v4354_v5 }
 0x3bd   :  { %5447 = vmatpush2.msra.mxu0 %v16384_v47  ;;  %v4743_v35 = vsub.f32 %v12796_v39, %v16385_v22  ;;  %5778 = vmatpush2.msra.mxu1 %v16387_v60  ;;  %v4734_v47 = vand.u32 4294901760, %v4733_v19  ;;  %v12843_v22 = vsub.f32 %v4352_v0, %v12822_v25  ;;  %v12855_v0 = vsub.f32 %v4355_v27, %v12834_v7  ;;  %v16398_v27 = vld [vmem:[#allocation128_spill] sm:$0xff] }
 0x3be   :  { %5450 = vmatprep.subr.mxu0 %v16388_v26  ;;  %5780 = vmatprep.subr.mxu1 %v16389_v62  ;;  %v7832_v60 = vpop.eup %7831  ;;  %v16391_v26 = vld [vmem:[#allocation123_spill] sm:$0xff]  ;;  %16393 = vst [vmem:[#allocation80_spill] sm:$0xff] %v12852_v52  ;;  %v4327_v20 = vadd.f32 1.0, %v7830_v31 }
 0x3bf   :  { %4729 = vmatprep.mubr.f32.mxu0 %v4728_v28  ;;  %5302 = vmatprep.mubr.f32.mxu1 %v12805_v42  ;;  %v4744_v9 = vand.u32 4294901760, %v4743_v35  ;;  %v16392_v28 = vand.u32 4294901760, %v12813_v61  ;;  %v16395_v42 = vld [vmem:[#allocation114_spill] sm:$0xff]  ;;  %v16399_v31 = vld [vmem:[#allocation107_spill] sm:$0xff] }
 0x3c0   :  { %5453 = vmatpush2.msra.mxu0 %v16390_v12  ;;  %5782 = vmatpush2.msra.mxu1 %v16391_v26  ;;  %v16396_v26 = vld [vmem:[#allocation106_spill] sm:$0xff]  ;;  %v4231_v12 = vmul.f32 0.5, %v12705_v14  ;;  %v16402_v14 = vld [vmem:[#allocation113_spill] sm:$0xff] }
 0x3c1   :  { %4735 = vmatmul.mubr.f32.gmra.mxu0 %v4734_v47  ;;  %v4749_v19 = vsub.f32 %v12813_v61, %v16392_v28  ;;  %5304 = vmatmul.mubr.f32.gmra.mxu1 %v12822_v25  ;;  %v16397_v47 = vand.u32 4294901760, %v12825_v37  ;;  %v12868_v25 = vand.u32 4294901760, %v4357_v41  ;;  %v4230_v28 = vmul.f32 0.5, %v12693_v59  ;;  %v16408_v59 = vld [vmem:[#allocation119_spill] sm:$0xff] }
 0x3c2   :  { %5456 = vmatprep.subr.mxu0 %v16394_v56  ;;  %5784 = vmatprep.subr.mxu1 %v16395_v42  ;;  %v4326_v56 = vadd.f32 1.0, %v7832_v60  ;;  %v12873_v42 = vsub.f32 %v4354_v5, %v12852_v52  ;;  %v16406_v5 = vld [vmem:[#allocation116_spill] sm:$0xff] }
 0x3c3   :  { %5459 = vmatpush2.msra.mxu0 %v16396_v26  ;;  %v4759_v35 = vsub.f32 %v12825_v37, %v16397_v47  ;;  %5786 = vmatpush2.msra.mxu1 %v16398_v27  ;;  %16400 = vst [vmem:[#allocation109_spill] sm:$0xff] %v12868_v25  ;;  %v4750_v21 = vand.u32 4294901760, %v4749_v19  ;;  %v4359_v47 = vmul.f32 %v4327_v20, %v4231_v12  ;;  %v12882_v19 = vand.u32 4294901760, %v4356_v36  ;;  %v16407_v26 = vld [vmem:[#allocation124_spill] sm:$0xff] }
 0x3c4   :  { %5462 = vmatprep.subr.mxu0 %v16399_v31  ;;  %5788 = vmatprep.subr.mxu1 %v16401_v58  ;;  %v16403_v31 = vld [vmem:[#allocation133_spill] sm:$0xff]  ;;  %v16404_v58 = vand.u32 4294901760, %v12843_v22  ;;  %v12887_v12 = vsub.f32 %v4357_v41, %v12868_v25  ;;  %v4358_v20 = vmul.f32 %v4326_v56, %v4230_v28  ;;  %v16414_v28 = vld [vmem:[#allocation112_spill] sm:$0xff] }
 0x3c5   :  { %4745 = vmatprep.mubr.f32.mxu0 %v4744_v9  ;;  %5310 = vmatprep.mubr.f32.mxu1 %v12834_v7  ;;  %v4760_v60 = vand.u32 4294901760, %v4759_v35  ;;  %16405 = vst [vmem:[#allocation35_spill] sm:$0xff] %v12882_v19  ;;  %v16409_v35 = vand.u32 4294901760, %v12855_v0  ;;  %v16410_v7 = vld [vmem:[#allocation137_spill] sm:$0xff]  ;;  %v12901_v56 = vsub.f32 %v4356_v36, %v12882_v19  ;;  %v16418_v36 = vld [vmem:[#allocation115_spill] sm:$0xff] }
 0x3c6   :  { %5465 = vmatpush2.msra.mxu0 %v16402_v14  ;;  %5790 = vmatpush2.msra.mxu1 %v16403_v31  ;;  %v4765_v9 = vsub.f32 %v12843_v22, %v16404_v58  ;;  %v16411_v31 = vld [vmem:[#allocation110_spill] sm:$0xff] }
 0x3c7   :  { %4751 = vmatmul.mubr.f32.gmra.mxu0 %v4750_v21  ;;  %5312 = vmatmul.mubr.f32.gmra.mxu1 %v12852_v52  ;;  %v4775_v21 = vsub.f32 %v12855_v0, %v16409_v35  ;;  %v12897_v52 = vand.u32 4294901760, %v4359_v47  ;;  %v16415_v58 = vld [vmem:[#allocation142_spill] sm:$0xff]  ;;  %v16420_v35 = vld [vmem:[#allocation117_spill] sm:$0xff] }
 0x3c8   :  { %5468 = vmatprep.subr.mxu0 %v16406_v5  ;;  %5792 = vmatprep.subr.mxu1 %v16407_v26  ;;  %v16413_v5 = vld [vmem:[#allocation140_spill] sm:$0xff]  ;;  %v4766_v41 = vand.u32 4294901760, %v4765_v9  ;;  %v16419_v9 = vld [vmem:[#allocation146_spill] sm:$0xff] }
 0x3c9   :  { %5471 = vmatpush2.msra.mxu0 %v16408_v59  ;;  %5794 = vmatpush2.msra.mxu1 %v16410_v7  ;;  %16412 = vst [vmem:[#allocation98_spill] sm:$0xff] %v12897_v52  ;;  %v4776_v7 = vand.u32 4294901760, %v4775_v21  ;;  %v16421_v21 = vld [vmem:[#allocation148_spill] sm:$0xff] }
 0x3ca   :  { %5474 = vmatprep.subr.mxu0 %v16411_v31  ;;  %5796 = vmatprep.subr.mxu1 %v16413_v5  ;;  %v16416_v31 = vand.u32 4294901760, %v12873_v42  ;;  %v12910_v5 = vand.u32 4294901760, %v4358_v20 }
 0x3cb   :  { %4761 = vmatprep.mubr.f32.mxu0 %v4760_v60  ;;  %5318 = vmatprep.mubr.f32.mxu1 %v12868_v25  ;;  %v12915_v60 = vsub.f32 %v4359_v47, %v12897_v52  ;;  %v16422_v25 = vld [vmem:[#allocation122_spill] sm:$0xff] }
 0x3cc   :  { %5477 = vmatpush2.msra.mxu0 %v16414_v28  ;;  %5798 = vmatpush2.msra.mxu1 %v16415_v58  ;;  %v4781_v59 = vsub.f32 %v12873_v42, %v16416_v31  ;;  %16417 = vst [vmem:[#allocation45_spill] sm:$0xff] %v12910_v5  ;;  %v16423_v31 = vand.u32 4294901760, %v12887_v12  ;;  %v12927_v47 = vsub.f32 %v4358_v20, %v12910_v5  ;;  %v16429_v20 = vld [vmem:[#allocation157_spill] sm:$0xff] }
 0x3cd   :  { %4767 = vmatmul.mubr.f32.gmra.mxu0 %v4766_v41  ;;  %5320 = vmatmul.mubr.f32.gmra.mxu1 %v12882_v19  ;;  %v16424_v19 = vld [vmem:[#allocation150_spill] sm:$0xff]  ;;  %v16432_v41 = vand.u32 4294901760, %v12345_v45 }
 0x3ce   :  { %5480 = vmatprep.subr.mxu0 %v16418_v36  ;;  %5800 = vmatprep.subr.mxu1 %v16419_v9  ;;  %v4791_v58 = vsub.f32 %v12887_v12, %v16423_v31  ;;  %v4782_v36 = vand.u32 4294901760, %v4781_v59 }
 0x3cf   :  { %5483 = vmatpush2.msra.mxu0 %v16420_v35  ;;  %5802 = vmatpush2.msra.mxu1 %v16421_v21  ;;  %v16425_v35 = vld [vmem:[#allocation135_spill] sm:$0xff]  ;;  %v16426_v21 = vld [vmem:[#allocation152_spill] sm:$0xff] }
 0x3d0   :  { %5486 = vmatprep.subr.mxu0 %v16422_v25  ;;  %5804 = vmatprep.subr.mxu1 %v16424_v19  ;;  %v16427_v25 = vand.u32 4294901760, %v12901_v56  ;;  %v4792_v59 = vand.u32 4294901760, %v4791_v58  ;;  %v16430_v19 = vld [vmem:[#allocation149_spill] sm:$0xff] }
 0x3d1   :  { %4777 = vmatprep.mubr.f32.mxu0 %v4776_v7  ;;  %5326 = vmatprep.mubr.f32.mxu1 %v12897_v52  ;;  %v16428_v7 = vld [vmem:[#allocation126_spill] sm:$0xff]  ;;  %v15199_v52 = vand.u32 4294901760, %v12927_v47 }
 0x3d2   :  { %5489 = vmatpush2.msra.mxu0 %v16425_v35  ;;  %5806 = vmatpush2.msra.mxu1 %v16426_v21  ;;  %v4797_v31 = vsub.f32 %v12901_v56, %v16427_v25  ;;  %v16431_v35 = vld [vmem:[#allocation162_spill] sm:$0xff]  ;;  %v16434_v21 = vld [vmem:[#allocation127_spill] sm:$0xff] }
 0x3d3   :  { %4783 = vmatmul.mubr.f32.gmra.mxu0 %v4782_v36  ;;  %5328 = vmatmul.mubr.f32.gmra.mxu1 %v12910_v5  ;;  %v16433_v36 = vand.u32 4294901760, %v12915_v60  ;;  %v16435_v5 = vld [vmem:[#allocation164_spill] sm:$0xff] }
 0x3d4   :  { %5492 = vmatprep.subr.mxu0 %v16428_v7  ;;  %5808 = vmatprep.subr.mxu1 %v16429_v20  ;;  %v4798_v58 = vand.u32 4294901760, %v4797_v31  ;;  %v16436_v20 = vld [vmem:[#allocation153_spill] sm:$0xff]  ;;  %v16439_v7 = vand.u32 4294901760, %v12259_v3  ;;  %v16442_v31 = vand.u32 4294901760, %v12371_v29 }
 0x3d5   :  { %5495 = vmatpush2.msra.mxu0 %v16430_v19  ;;  %5810 = vmatpush2.msra.mxu1 %v16431_v35  ;;  %v4807_v25 = vsub.f32 %v12915_v60, %v16433_v36  ;;  %v16437_v19 = vld [vmem:[#allocation161_spill] sm:$0xff]  ;;  %v4813_v35 = vsub.f32 %v12927_v47, %v15199_v52  ;;  %v16444_v52 = vld [vmem:[#allocation158_spill] sm:$0xff] }
 0x3d6   :  { %5818 = vmatprep.mubr.f32.mxu1 %v16432_v41  ;;  %5498 = vmatprep.subr.mxu0 %v16434_v21  ;;  %v16438_v41 = vld [vmem:[#allocation154_spill] sm:$0xff] }
 0x3d7   :  { %5812 = vmatprep.subr.mxu1 %v16435_v5  ;;  %4793 = vmatprep.mubr.f32.mxu0 %v4792_v59  ;;  %v4808_v36 = vand.u32 4294901760, %v4807_v25  ;;  %v16440_v21 = vld [vmem:[#allocation170_spill] sm:$0xff]  ;;  %v16441_v5 = vld [vmem:[#allocation151_spill] sm:$0xff]  ;;  %v16443_v59 = vld [vmem:[#allocation156_spill] sm:$0xff] }
 0x3d8   :  { %5501 = vmatpush2.msra.mxu0 %v16436_v20  ;;  %5814 = vmatpush2.msra.mxu1 %v16437_v19  ;;  %v16447_v25 = vld [vmem:[#allocation171_spill] sm:$0xff] }
 0x3d9   :  { %4799 = vmatmul.mubr.f32.gmra.mxu0 %v4798_v58  ;;  %5504 = vmatprep.subr.mxu0 %v16438_v41  ;;  %v4814_v58 = vand.u32 4294901760, %v4813_v35  ;;  %v16451_v35 = vld [vmem:[#allocation159_spill] sm:$0xff] }
 0x3da   :  { %5822 = vmatmul.mubr.f32.vlgmr.msra.gmra.mxu1 %v16439_v7  ;;  %6394 = vmatprep.subr.mxu1 %v16440_v21  ;;  %v16445_v7 = vld [vmem:[#allocation172_spill] sm:$0xff]  ;;  %v16446_v21 = vand.u32 4294901760, %v12405_v46 }
 0x3db   :  { %5507 = vmatpush2.msra.mxu0 %v16441_v5  ;;  %5830 = vmatprep.mubr.f32.mxu1 %v16442_v31  ;;  %v16454_v31 = vld [vmem:[#allocation174_spill] sm:$0xff] }
 0x3dc   :  { %6396 = vmatpush1.msra.mxu1 %v16259_v55  ;;  %5510 = vmatprep.subr.mxu0 %v16443_v59  ;;  %v16448_v55 = vand.u32 4294901760, %v12438_v63 }
 0x3dd   :  { %6398 = vmatprep.subr.mxu1 %v16261_v54  ;;  %4809 = vmatprep.mubr.f32.mxu0 %v4808_v36  ;;  %v16449_v54 = vld [vmem:[#allocation167_spill] sm:$0xff]  ;;  %v16452_v36 = vld [vmem:[#allocation125_spill] sm:$0xff] }
 0x3de   :  { %5513 = vmatpush2.msra.mxu0 %v16444_v52  ;;  %6400 = vmatpush1.msra.mxu1 %v16263_v43  ;;  %v16450_v43 = vld [vmem:[#allocation108_spill] sm:$0xff] }
 0x3df   :  { %4815 = vmatmul.mubr.f32.gmra.mxu0 %v4814_v58  ;;  %5516 = vmatprep.subr.mxu0 %v16445_v7  ;;  %v16456_v58 = vld [vmem:[#allocation143_spill] sm:$0xff] }
 0x3e0   :  { %5834 = vmatmul.mubr.f32.gmra.mxu1 %v16446_v21  ;;  %6402 = vmatprep.subr.mxu1 %v16264_v40  ;;  %v16453_v40 = vand.u32 4294901760, %v12467_v49  ;;  %v16458_v21 = vand.u32 4294901760, %v16282_v11 }
 0x3e1   :  { %5519 = vmatpush2.msra.mxu0 %v16447_v25  ;;  %5528 = vmatprep.mubr.f32.mxu0 %v12345_v45  ;;  %v16455_v45 = vand.u32 4294901760, %v16454_v31 }
 0x3e2   :  { %5842 = vmatprep.mubr.f32.mxu1 %v16448_v55  ;;  %6404 = vmatpush1.msra.mxu1 %v16266_v2  ;;  %v16457_v2 = vand.u32 4294901760, %v12501_v50  ;;  %v16459_v55 = vld [vmem:[#allocation132_spill] sm:$0xff] }
 0x3e3   :  { %5522 = vmatprep.subr.mxu0 %v16449_v54  ;;  %6406 = vmatprep.subr.mxu1 %v16450_v43  ;;  %v16460_v43 = vld [vmem:[#allocation19_spill] sm:$0xff] }
 0x3e4   :  { %5525 = vmatpush2.msra.mxu0 %v16451_v35  ;;  %6408 = vmatpush1.msra.mxu1 %v16452_v36  ;;  %v16462_v36 = vld [vmem:[#allocation134_spill] sm:$0xff] }
 0x3e5   :  { %5531 = vmatmul.mubr.f32.vlgmr.msra.gmra.mxu0 %v12259_v3  ;;  %5846 = vmatmul.mubr.f32.gmra.mxu1 %v16453_v40  ;;  %v16461_v3 = vand.u32 4294901760, %v16460_v43  ;;  %v16463_v40 = vld [vmem:[#allocation83_spill] sm:$0xff] }
 0x3e6   :  { %6011 = vmatprep.subr.mxu0 %v16455_v45  ;;  %6410 = vmatprep.subr.mxu1 %v16456_v58  ;;  %v16464_v31 = vand.u32 4294901760, %v16463_v40  ;;  %v16465_v45 = vld [vmem:[#allocation139_spill] sm:$0xff]  ;;  %v16467_v58 = vld [vmem:[#allocation118_spill] sm:$0xff] }
 0x3e7   :  { %5538 = vmatprep.mubr.f32.mxu0 %v12371_v29  ;;  %5854 = vmatprep.mubr.f32.mxu1 %v16457_v2  ;;  %v16466_v29 = vand.u32 4294901760, %v12517_v38  ;;  %v16468_v11 = vand.u32 4294901760, %v16467_v58  ;;  %v16469_v2 = vld [vmem:[#allocation144_spill] sm:$0xff]  ;;  %v16476_v40 = vld [vmem:[#allocation43_spill] sm:$0xff] }
 0x3e8   :  { %6015 = vmatpush1.msra.mxu0 %v16458_v21  ;;  %6412 = vmatpush1.msra.mxu1 %v16459_v55  ;;  %v16470_v21 = vand.u32 4294901760, %v12546_v44  ;;  %v16471_v55 = vld [vmem:[#allocation105_spill] sm:$0xff]  ;;  %v16481_v58 = vld [vmem:[#allocation23_spill] sm:$0xff] }
 0x3e9   :  { %6019 = vmatprep.subr.mxu0 %v16461_v3  ;;  %6414 = vmatprep.subr.mxu1 %v16462_v36  ;;  %v16472_v43 = vand.u32 4294901760, %v16471_v55  ;;  %v16473_v3 = vld [vmem:[#allocation27_spill] sm:$0xff]  ;;  %v16474_v36 = vld [vmem:[#allocation130_spill] sm:$0xff]  ;;  %v16485_v55 = vld [vmem:[#allocation136_spill] sm:$0xff] }
 0x3ea   :  { %6023 = vmatpush1.msra.mxu0 %v16464_v31  ;;  %6416 = vmatpush1.msra.mxu1 %v16465_v45  ;;  %v16477_v31 = vld [vmem:[#allocation129_spill] sm:$0xff] }
 0x3eb   :  { %5541 = vmatmul.mubr.f32.gmra.mxu0 %v12405_v46  ;;  %5858 = vmatmul.mubr.f32.gmra.mxu1 %v16466_v29  ;;  %v16475_v46 = vand.u32 4294901760, %v16474_v36  ;;  %v16478_v45 = vand.u32 4294901760, %v16477_v31  ;;  %v16479_v29 = vld [vmem:[#allocation33_spill] sm:$0xff]  ;;  %v16488_v36 = vld [vmem:[#allocation138_spill] sm:$0xff] }
 0x3ec   :  { %6027 = vmatprep.subr.mxu0 %v16468_v11  ;;  %6418 = vmatprep.subr.mxu1 %v16469_v2  ;;  %v16482_v11 = vand.u32 4294901760, %v16481_v58  ;;  %v16483_v2 = vld [vmem:[#allocation37_spill] sm:$0xff]  ;;  %v16497_v58 = vand.u32 4294901760, %v12649_v18 }
 0x3ed   :  { %5548 = vmatprep.mubr.f32.mxu0 %v12438_v63  ;;  %5866 = vmatprep.mubr.f32.mxu1 %v16470_v21  ;;  %v16480_v63 = vand.u32 4294901760, %v12571_v1  ;;  %v16484_v21 = vand.u32 4294901760, %v12596_v6 }
 0x3ee   :  { %6031 = vmatpush1.msra.mxu0 %v16472_v43  ;;  %6420 = vmatpush1.msra.mxu1 %v16473_v3  ;;  %v16486_v43 = vand.u32 4294901760, %v16485_v55  ;;  %v16487_v3 = vld [vmem:[#allocation34_spill] sm:$0xff]  ;;  %v16502_v55 = vld [vmem:[#allocation32_spill] sm:$0xff] }
 0x3ef   :  { %6035 = vmatprep.subr.mxu0 %v16475_v46  ;;  %6422 = vmatprep.subr.mxu1 %v16476_v40  ;;  %v16490_v46 = vld [vmem:[#allocation41_spill] sm:$0xff] }
 0x3f0   :  { %6039 = vmatpush1.msra.mxu0 %v16478_v45  ;;  %6424 = vmatpush1.msra.mxu1 %v16479_v29  ;;  %v16491_v40 = vld [vmem:[#allocation145_spill] sm:$0xff]  ;;  %v16493_v45 = vld [vmem:[#allocation18_spill] sm:$0xff] }
 0x3f1   :  { %5551 = vmatmul.mubr.f32.gmra.mxu0 %v12467_v49  ;;  %5870 = vmatmul.mubr.f32.gmra.mxu1 %v16480_v63  ;;  %v16489_v49 = vand.u32 4294901760, %v16488_v36  ;;  %v16492_v31 = vand.u32 4294901760, %v16491_v40  ;;  %v16495_v29 = vld [vmem:[#allocation25_spill] sm:$0xff] }
 0x3f2   :  { %6043 = vmatprep.subr.mxu0 %v16482_v11  ;;  %6426 = vmatprep.subr.mxu1 %v16483_v2  ;;  %v16496_v63 = vand.u32 4294901760, %v16495_v29  ;;  %v16498_v11 = vld [vmem:[#allocation29_spill] sm:$0xff] }
 0x3f3   :  { %5558 = vmatprep.mubr.f32.mxu0 %v12501_v50  ;;  %5878 = vmatprep.mubr.f32.mxu1 %v16484_v21  ;;  %v16494_v50 = vand.u32 4294901760, %v12624_v10  ;;  %v16499_v2 = vand.u32 4294901760, %v16498_v11  ;;  %v16500_v21 = vld [vmem:[#allocation57_spill] sm:$0xff] }
 0x3f4   :  { %6047 = vmatpush1.msra.mxu0 %v16486_v43  ;;  %6428 = vmatpush1.msra.mxu1 %v16487_v3  ;;  %v16503_v43 = vld [vmem:[#allocation61_spill] sm:$0xff] }
 0x3f5   :  { %6051 = vmatprep.subr.mxu0 %v16489_v49  ;;  %6430 = vmatprep.subr.mxu1 %v16490_v46  ;;  %v16504_v3 = vand.u32 4294901760, %v16503_v43  ;;  %v16508_v49 = vld [vmem:[#allocation50_spill] sm:$0xff]  ;;  %v16527_v43 = vld [vmem:[#allocation71_spill] sm:$0xff] }
 0x3f6   :  { %6055 = vmatpush1.msra.mxu0 %v16492_v31  ;;  %6432 = vmatpush1.msra.mxu1 %v16493_v45  ;;  %v16510_v46 = vld [vmem:[#allocation62_spill] sm:$0xff]  ;;  %v16512_v31 = vld [vmem:[#allocation52_spill] sm:$0xff] }
 0x3f7   :  { %5561 = vmatmul.mubr.f32.gmra.mxu0 %v12517_v38  ;;  %5882 = vmatmul.mubr.f32.gmra.mxu1 %v16494_v50  ;;  %v16501_v38 = vand.u32 4294901760, %v16500_v21  ;;  %v16511_v40 = vand.u32 4294901760, %v16510_v46  ;;  %v16515_v45 = vld [vmem:[#allocation54_spill] sm:$0xff]  ;;  %v16516_v50 = vld [vmem:[#allocation55_spill] sm:$0xff]  ;;  %v16523_v21 = vld [vmem:[#allocation49_spill] sm:$0xff] }
 0x3f8   :  { %6059 = vmatprep.subr.mxu0 %v16496_v63  ;;  %6434 = vmatprep.subr.mxu1 %v16309_v16  ;;  %v16506_v16 = vld [vmem:[#allocation17_spill] sm:$0xff]  ;;  %v16517_v29 = vand.u32 4294901760, %v16516_v50  ;;  %v16518_v63 = vld [vmem:[#allocation40_spill] sm:$0xff] }
 0x3f9   :  { %5568 = vmatprep.mubr.f32.mxu0 %v12546_v44  ;;  %5890 = vmatprep.mubr.f32.mxu1 %v16497_v58  ;;  %v16505_v44 = vand.u32 4294901760, %v12675_v53  ;;  %v16507_v36 = vand.u32 4294901760, %v16506_v16  ;;  %v16520_v58 = vld [vmem:[#allocation58_spill] sm:$0xff]  ;;  %v16530_v16 = vld [vmem:[#allocation53_spill] sm:$0xff]  ;;  %v16544_v50 = vld [vmem:[#allocation76_spill] sm:$0xff] }
 0x3fa   :  { %6063 = vmatpush1.msra.mxu0 %v16499_v2  ;;  %6436 = vmatpush1.msra.mxu1 %v16312_v23  ;;  %v16509_v23 = vand.u32 4294901760, %v12691_v15  ;;  %v16521_v11 = vand.u32 4294901760, %v16520_v58  ;;  %v16522_v2 = vand.u32 4294901760, %v12723_v8  ;;  %v16549_v58 = vld [vmem:[#allocation51_spill] sm:$0xff] }
 0x3fb   :  { %6067 = vmatprep.subr.mxu0 %v16501_v38  ;;  %6438 = vmatprep.subr.mxu1 %v16502_v55  ;;  %v16524_v38 = vand.u32 4294901760, %v16523_v21  ;;  %v16525_v55 = vld [vmem:[#allocation46_spill] sm:$0xff]  ;;  %v16552_v21 = vld [vmem:[#allocation56_spill] sm:$0xff] }
 0x3fc   :  { %6071 = vmatpush1.msra.mxu0 %v16504_v3  ;;  %6440 = vmatpush1.msra.mxu1 %v16318_v32  ;;  %v16513_v32 = vld [vmem:[#allocation38_spill] sm:$0xff] }
 0x3fd   :  { %5571 = vmatmul.mubr.f32.gmra.mxu0 %v12571_v1  ;;  %5894 = vmatmul.mubr.f32.gmra.mxu1 %v16505_v44  ;;  %v16514_v1 = vand.u32 4294901760, %v16513_v32  ;;  %v16528_v3 = vld [vmem:[#allocation22_spill] sm:$0xff]  ;;  %v16541_v32 = vld [vmem:[#allocation72_spill] sm:$0xff] }
 0x3fe   :  { %6075 = vmatprep.subr.mxu0 %v16507_v36  ;;  %6442 = vmatprep.subr.mxu1 %v16508_v49  ;;  %v16529_v44 = vand.u32 4294901760, %v16528_v3  ;;  %v16534_v49 = vld [vmem:[#allocation60_spill] sm:$0xff] }
 0x3ff   :  { %5578 = vmatprep.mubr.f32.mxu0 %v12596_v6  ;;  %5902 = vmatprep.mubr.f32.mxu1 %v16509_v23  ;;  %v16519_v6 = vand.u32 4294901760, %v12702_v17  ;;  %v16536_v23 = vld [vmem:[#allocation67_spill] sm:$0xff] }
 0x400   :  { %6079 = vmatpush1.msra.mxu0 %v16511_v40  ;;  %6444 = vmatpush1.msra.mxu1 %v16512_v31  ;;  %v16537_v46 = vand.u32 4294901760, %v16536_v23  ;;  %v16538_v40 = vld [vmem:[#allocation81_spill] sm:$0xff]  ;;  %v16539_v31 = vld [vmem:[#allocation59_spill] sm:$0xff] }
 0x401   :  { %6083 = vmatprep.subr.mxu0 %v16514_v1  ;;  %6446 = vmatprep.subr.mxu1 %v16515_v45  ;;  %v16542_v1 = vld [vmem:[#allocation44_spill] sm:$0xff] }
 0x402   :  { %6087 = vmatpush1.msra.mxu0 %v16517_v29  ;;  %6448 = vmatpush1.msra.mxu1 %v16518_v63  ;;  %v16543_v45 = vand.u32 4294901760, %v16542_v1  ;;  %v16546_v29 = vld [vmem:[#allocation69_spill] sm:$0xff] }
 0x403   :  { %5581 = vmatmul.mubr.f32.gmra.mxu0 %v12624_v10  ;;  %5906 = vmatmul.mubr.f32.gmra.mxu1 %v16519_v6  ;;  %v16526_v10 = vand.u32 4294901760, %v16337_v13  ;;  %v16535_v13 = vand.u32 4294901760, %v12746_v48  ;;  %v16547_v63 = vand.u32 4294901760, %v16546_v29  ;;  %v16548_v6 = vand.u32 4294901760, %v12770_v4 }
 0x404   :  { %6091 = vmatprep.subr.mxu0 %v16521_v11  ;;  %6450 = vmatprep.subr.mxu1 %v16334_v51  ;;  %v16532_v51 = vld [vmem:[#allocation65_spill] sm:$0xff]  ;;  %v16550_v11 = vand.u32 4294901760, %v16549_v58 }
 0x405   :  { %5588 = vmatprep.mubr.f32.mxu0 %v12649_v18  ;;  %5914 = vmatprep.mubr.f32.mxu1 %v16522_v2  ;;  %v16531_v18 = vand.u32 4294901760, %v12742_v24  ;;  %v16533_v36 = vand.u32 4294901760, %v16532_v51  ;;  %v16551_v2 = vld [vmem:[#allocation79_spill] sm:$0xff] }
 0x406   :  { %6095 = vmatpush1.msra.mxu0 %v16524_v38  ;;  %6452 = vmatpush1.msra.mxu1 %v16525_v55  ;;  %v16554_v38 = vld [vmem:[#allocation94_spill] sm:$0xff]  ;;  %v16555_v55 = vld [vmem:[#allocation75_spill] sm:$0xff] }
 0x407   :  { %6099 = vmatprep.subr.mxu0 %v16526_v10  ;;  %6454 = vmatprep.subr.mxu1 %v16527_v43  ;;  %v16556_v10 = vand.u32 4294901760, %v16555_v55  ;;  %v16557_v43 = vld [vmem:[#allocation86_spill] sm:$0xff]  ;;  %v16594_v55 = vand.u32 4294901760, %v16402_v14 }
 0x408   :  { %6103 = vmatpush1.msra.mxu0 %v16529_v44  ;;  %6456 = vmatpush1.msra.mxu1 %v16530_v16  ;;  %v16561_v44 = vld [vmem:[#allocation101_spill] sm:$0xff]  ;;  %v16562_v16 = vand.u32 4294901760, %v12796_v39 }
 0x409   :  { %5591 = vmatmul.mubr.f32.gmra.mxu0 %v12675_v53  ;;  %5918 = vmatmul.mubr.f32.gmra.mxu1 %v16531_v18  ;;  %v16540_v53 = vand.u32 4294901760, %v16539_v31  ;;  %v16563_v18 = vld [vmem:[#allocation85_spill] sm:$0xff] }
 0x40a   :  { %6107 = vmatprep.subr.mxu0 %v16533_v36  ;;  %6458 = vmatprep.subr.mxu1 %v16534_v49  ;;  %v16564_v51 = vand.u32 4294901760, %v16563_v18  ;;  %v16565_v36 = vld [vmem:[#allocation87_spill] sm:$0xff]  ;;  %v16567_v49 = vld [vmem:[#allocation92_spill] sm:$0xff]  ;;  %v16606_v18 = vand.u32 4294901760, %v16414_v28 }
 0x40b   :  { %5598 = vmatprep.mubr.f32.mxu0 %v12691_v15  ;;  %5926 = vmatprep.mubr.f32.mxu1 %v16535_v13  ;;  %v16545_v15 = vand.u32 4294901760, %v12754_v57  ;;  %v16568_v13 = vld [vmem:[#allocation78_spill] sm:$0xff] }
 0x40c   :  { %6111 = vmatpush1.msra.mxu0 %v16537_v46  ;;  %6460 = vmatpush2.msra.mxu1 %v16538_v40  ;;  %v16569_v23 = vand.u32 4294901760, %v16568_v13  ;;  %v16570_v46 = vld [vmem:[#allocation111_spill] sm:$0xff]  ;;  %v16572_v40 = vld [vmem:[#allocation82_spill] sm:$0xff]  ;;  %v16614_v13 = vld [vmem:[#allocation148_spill] sm:$0xff] }
 0x40d   :  { %6115 = vmatprep.subr.mxu0 %v16540_v53  ;;  %6462 = vmatprep.subr.mxu1 %v16541_v32  ;;  %v16573_v31 = vand.u32 4294901760, %v16572_v40  ;;  %v16574_v53 = vld [vmem:[#allocation100_spill] sm:$0xff]  ;;  %v16576_v32 = vld [vmem:[#allocation95_spill] sm:$0xff] }
 0x40e   :  { %6119 = vmatpush1.msra.mxu0 %v16543_v45  ;;  %6464 = vmatpush2.msra.mxu1 %v16544_v50  ;;  %v16577_v1 = vand.u32 4294901760, %v16576_v32  ;;  %v16578_v45 = vld [vmem:[#allocation102_spill] sm:$0xff]  ;;  %v16579_v50 = vld [vmem:[#allocation97_spill] sm:$0xff] }
 0x40f   :  { %5601 = vmatmul.mubr.f32.gmra.mxu0 %v12702_v17  ;;  %5930 = vmatmul.mubr.f32.gmra.mxu1 %v16545_v15  ;;  %v16553_v17 = vand.u32 4294901760, %v16552_v21  ;;  %v16581_v15 = vld [vmem:[#allocation88_spill] sm:$0xff]  ;;  %v16625_v32 = vld [vmem:[#allocation149_spill] sm:$0xff] }
 0x410   :  { %6123 = vmatprep.subr.mxu0 %v16547_v63  ;;  %6466 = vmatprep.subr.mxu1 %v16357_v34  ;;  %v16559_v34 = vld [vmem:[#allocation70_spill] sm:$0xff]  ;;  %v16582_v29 = vand.u32 4294901760, %v16581_v15  ;;  %v16583_v63 = vld [vmem:[#allocation123_spill] sm:$0xff] }
 0x411   :  { %5608 = vmatprep.mubr.f32.mxu0 %v12723_v8  ;;  %5938 = vmatprep.mubr.f32.mxu1 %v16548_v6  ;;  %v16558_v8 = vand.u32 4294901760, %v12784_v30  ;;  %v16560_v3 = vand.u32 4294901760, %v16559_v34  ;;  %v16585_v6 = vld [vmem:[#allocation104_spill] sm:$0xff]  ;;  %v16600_v34 = vld [vmem:[#allocation119_spill] sm:$0xff] }
 0x412   :  { %6127 = vmatpush1.msra.mxu0 %v16550_v11  ;;  %6468 = vmatpush2.msra.mxu1 %v16551_v2  ;;  %v16586_v58 = vand.u32 4294901760, %v16585_v6  ;;  %v16587_v11 = vld [vmem:[#allocation114_spill] sm:$0xff]  ;;  %v16588_v2 = vand.u32 4294901760, %v12855_v0  ;;  %v16601_v14 = vand.u32 4294901760, %v16600_v34  ;;  %v16652_v34 = vld [vmem:[#allocation64_spill] sm:$0xff] }
 0x413   :  { %6131 = vmatprep.subr.mxu0 %v16553_v17  ;;  %6470 = vmatprep.subr.mxu1 %v16554_v38  ;;  %v16591_v17 = vld [vmem:[#allocation107_spill] sm:$0xff] }
 0x414   :  { %6135 = vmatpush1.msra.mxu0 %v16556_v10  ;;  %6472 = vmatpush2.msra.mxu1 %v16557_v43  ;;  %v16593_v38 = vld [vmem:[#allocation131_spill] sm:$0xff]  ;;  %v16595_v10 = vld [vmem:[#allocation133_spill] sm:$0xff]  ;;  %v16597_v43 = vld [vmem:[#allocation116_spill] sm:$0xff] }
 0x415   :  { %5611 = vmatmul.mubr.f32.gmra.mxu0 %v12742_v24  ;;  %5942 = vmatmul.mubr.f32.gmra.mxu1 %v16558_v8  ;;  %v16566_v24 = vand.u32 4294901760, %v16565_v36  ;;  %v16598_v8 = vand.u32 4294901760, %v16597_v43  ;;  %v16651_v43 = vld [vmem:[#allocation120_spill] sm:$0xff] }
 0x416   :  { %6139 = vmatprep.subr.mxu0 %v16560_v3  ;;  %6474 = vmatprep.subr.mxu1 %v16561_v44  ;;  %v16602_v3 = vld [vmem:[#allocation137_spill] sm:$0xff]  ;;  %v16603_v44 = vld [vmem:[#allocation110_spill] sm:$0xff] }
 0x417   :  { %5618 = vmatprep.mubr.f32.mxu0 %v12746_v48  ;;  %5950 = vmatprep.mubr.f32.mxu1 %v16562_v16  ;;  %v16571_v48 = vand.u32 4294901760, %v12813_v61  ;;  %v16605_v16 = vld [vmem:[#allocation140_spill] sm:$0xff] }
 0x418   :  { %6143 = vmatpush2.msra.mxu0 %v16564_v51  ;;  %6476 = vmatpush2.msra.mxu1 %v16375_v33  ;;  %v16575_v33 = vand.u32 4294901760, %v12825_v37  ;;  %v16607_v51 = vld [vmem:[#allocation142_spill] sm:$0xff] }
 0x419   :  { %6147 = vmatprep.subr.mxu0 %v16566_v24  ;;  %6478 = vmatprep.subr.mxu1 %v16567_v49  ;;  %v16611_v24 = vand.u32 4294901760, %v12915_v60  ;;  %v16612_v49 = vld [vmem:[#allocation117_spill] sm:$0xff] }
 0x41a   :  { %6151 = vmatpush2.msra.mxu0 %v16569_v23  ;;  %6480 = vmatpush2.msra.mxu1 %v16570_v46  ;;  %v16613_v28 = vand.u32 4294901760, %v16612_v49  ;;  %v16615_v23 = vld [vmem:[#allocation122_spill] sm:$0xff] }
 0x41b   :  { %5621 = vmatmul.mubr.f32.gmra.mxu0 %v12754_v57  ;;  %5954 = vmatmul.mubr.f32.gmra.mxu1 %v16571_v48  ;;  %v16580_v57 = vand.u32 4294901760, %v16579_v50  ;;  %v16617_v46 = vld [vmem:[#allocation150_spill] sm:$0xff]  ;;  %v16618_v48 = vld [vmem:[#allocation135_spill] sm:$0xff] }
 0x41c   :  { %6155 = vmatprep.subr.mxu0 %v16573_v31  ;;  %6482 = vmatprep.subr.mxu1 %v16574_v53  ;;  %v16619_v40 = vand.u32 4294901760, %v16618_v48  ;;  %v16620_v31 = vld [vmem:[#allocation152_spill] sm:$0xff]  ;;  %v16628_v50 = vld [vmem:[#allocation74_spill] sm:$0xff] }
 0x41d   :  { %5628 = vmatprep.mubr.f32.mxu0 %v12770_v4  ;;  %5962 = vmatprep.mubr.f32.mxu1 %v16575_v33  ;;  %v16584_v4 = vand.u32 4294901760, %v12843_v22  ;;  %v16624_v33 = vld [vmem:[#allocation157_spill] sm:$0xff] }
 0x41e   :  { %6159 = vmatpush2.msra.mxu0 %v16577_v1  ;;  %6484 = vmatpush2.msra.mxu1 %v16578_v45  ;;  %v16626_v1 = vand.u32 4294901760, %v16625_v32  ;;  %v16627_v45 = vld [vmem:[#allocation162_spill] sm:$0xff] }
 0x41f   :  { %6163 = vmatprep.subr.mxu0 %v16580_v57  ;;  %6486 = vmatprep.subr.mxu1 %v16389_v62  ;;  %v16589_v62 = vld [vmem:[#allocation106_spill] sm:$0xff]  ;;  %v16629_v57 = vld [vmem:[#allocation127_spill] sm:$0xff] }
 0x420   :  { %6167 = vmatpush2.msra.mxu0 %v16582_v29  ;;  %6488 = vmatpush2.msra.mxu1 %v16583_v63  ;;  %v16590_v21 = vand.u32 4294901760, %v16589_v62  ;;  %v16630_v15 = vand.u32 4294901760, %v16629_v57  ;;  %v16632_v29 = vand.u32 4294901760, %v16436_v20  ;;  %v16634_v63 = vld [vmem:[#allocation141_spill] sm:$0xff]  ;;  %v16637_v20 = vand.u32 4294901760, %v16443_v59 }
 0x421   :  { %5631 = vmatmul.mubr.f32.gmra.mxu0 %v12784_v30  ;;  %5966 = vmatmul.mubr.f32.gmra.mxu1 %v16584_v4  ;;  %v16592_v30 = vand.u32 4294901760, %v16591_v17  ;;  %v16635_v4 = vand.u32 4294901760, %v16441_v5  ;;  %v16641_v5 = vand.u32 4294901760, %v16447_v25  ;;  %v16643_v59 = vand.u32 4294901760, %v16449_v54  ;;  %v4424_v25 = vld [vmem:[%s14301_s6] sm:$0x3] }
 0x422   :  { %6171 = vmatprep.subr.mxu0 %v16586_v58  ;;  %6490 = vmatprep.subr.mxu1 %v16587_v11  ;;  %v16636_v58 = vld [vmem:[#allocation30_spill] sm:$0xff]  ;;  %v16640_v11 = vld [vmem:[#allocation155_spill] sm:$0xff]  ;;  %v16644_v62 = vand.u32 4294901760, %v16451_v35  ;;  %v16647_v54 = vld [vmem:[#allocation93_spill] sm:$0xff] }
 0x423   :  { %5638 = vmatprep.mubr.f32.mxu0 %v12796_v39  ;;  %5974 = vmatprep.mubr.f32.mxu1 %v16588_v2  ;;  %v16596_v39 = vand.u32 4294901760, %v12873_v42  ;;  %v16642_v2 = vld [vmem:[#allocation147_spill] sm:$0xff]  ;;  %v16648_v17 = vld [vmem:[#allocation21_spill] sm:$0xff] }
 0x424   :  { %6175 = vmatpush2.msra.mxu0 %v16590_v21  ;;  %6492 = vmatpush2.msra.mxu1 %v16398_v27  ;;  %v16599_v27 = vand.u32 4294901760, %v12887_v12  ;;  %v13264_v35 = vrot.slane %v4424_v25, %v16648_v17 }
 0x425   :  { %6179 = vmatprep.subr.mxu0 %v16592_v30  ;;  %6494 = vmatprep.subr.mxu1 %v16593_v38  ;;  %v16649_v38 = vld [vmem:[#allocation121_spill] sm:$0xff] }
 0x426   :  { %6183 = vmatpush2.msra.mxu0 %v16594_v55  ;;  %6496 = vmatpush2.msra.mxu1 %v16595_v10  ;;  %v16650_v55 = vld [vmem:[#allocation169_spill] sm:$0xff] }
 0x427   :  { %5641 = vmatmul.mubr.f32.gmra.mxu0 %v12813_v61  ;;  %5978 = vmatmul.mubr.f32.gmra.mxu1 %v16596_v39  ;;  %v16604_v61 = vand.u32 4294901760, %v16603_v44  ;;  %v13269_v10 = vrot.slane %v4424_v25, %v16650_v55 }
 0x428   :  { %6187 = vmatprep.subr.mxu0 %v16598_v8  ;;  %6498 = vmatprep.subr.mxu1 %v16407_v26  ;;  %v16608_v26 = vand.u32 4294901760, %v12901_v56 }
 0x429   :  { %5648 = vmatprep.mubr.f32.mxu0 %v12825_v37  ;;  %5986 = vmatprep.mubr.f32.mxu1 %v16599_v27  ;;  %v16609_v37 = vld [vmem:[#allocation115_spill] sm:$0xff] }
 0x42a   :  { %6191 = vmatpush2.msra.mxu0 %v16601_v14  ;;  %6500 = vmatpush2.msra.mxu1 %v16602_v3  ;;  %v16610_v36 = vand.u32 4294901760, %v16609_v37 }
 0x42b   :  { %6195 = vmatprep.subr.mxu0 %v16604_v61  ;;  %6502 = vmatprep.subr.mxu1 %v16605_v16  ;;  %v16653_v16 = vld [vmem:[#allocation160_spill] sm:$0xff] }
 0x42c   :  { %6199 = vmatpush2.msra.mxu0 %v16606_v18  ;;  %6504 = vmatpush2.msra.mxu1 %v16607_v51 }
 0x42d   :  { %5651 = vmatmul.mubr.f32.gmra.mxu0 %v12843_v22  ;;  %5990 = vmatmul.mubr.f32.gmra.mxu1 %v16608_v26  ;;  %v16616_v22 = vand.u32 4294901760, %v16615_v23  ;;  %v16654_v26 = vld [vmem:[#allocation73_spill] sm:$0xff] }
 0x42e   :  { %6203 = vmatprep.subr.mxu0 %v16610_v36  ;;  %6506 = vmatprep.subr.mxu1 %v16419_v9  ;;  %v16622_v9 = vld [vmem:[#allocation126_spill] sm:$0xff] }
 0x42f   :  { %5658 = vmatprep.mubr.f32.mxu0 %v12855_v0  ;;  %5998 = vmatprep.mubr.f32.mxu1 %v16611_v24  ;;  %v16621_v0 = vand.u32 4294901760, %v12927_v47  ;;  %v16623_v53 = vand.u32 4294901760, %v16622_v9 }
 0x430   :  { %6207 = vmatpush2.msra.mxu0 %v16613_v28  ;;  %6508 = vmatpush2.msra.mxu1 %v16614_v13  ;;  %v16655_v13 = vld [vmem:[#allocation89_spill] sm:$0xff] }
 0x431   :  { %6211 = vmatprep.subr.mxu0 %v16616_v22  ;;  %6510 = vmatprep.subr.mxu1 %v16617_v46  ;;  %v16656_v22 = vld [vmem:[#allocation99_spill] sm:$0xff] }
 0x432   :  { %6215 = vmatpush2.msra.mxu0 %v16619_v40  ;;  %6512 = vmatpush2.msra.mxu1 %v16620_v31  ;;  %v16657_v40 = vld [vmem:[#allocation96_spill] sm:$0xff] }
 0x433   :  { %5661 = vmatmul.mubr.f32.gmra.mxu0 %v12873_v42  ;;  %6002 = vmatmul.mubr.f32.gmra.mxu1 %v16621_v0  ;;  %v16631_v42 = vld [vmem:[#allocation164_spill] sm:$0xff]  ;;  %v16658_v0 = vld [vmem:[#allocation163_spill] sm:$0xff] }
 0x434   :  { %6219 = vmatprep.subr.mxu0 %v16623_v53  ;;  %6514 = vmatprep.subr.mxu1 %v16624_v33 }
 0x435   :  { %5668 = vmatprep.mubr.f32.mxu0 %v12887_v12  ;;  %6223 = vmatpush2.msra.mxu0 %v16626_v1  ;;  %v16633_v12 = vand.u32 4294901760, %v16438_v41  ;;  %v16639_v41 = vand.u32 4294901760, %v16445_v7  ;;  %v16646_v7 = vld [vmem:[#allocation42_spill] sm:$0xff] }
 0x436   :  { %6516 = vmatpush2.msra.mxu1 %v16627_v45  ;;  %6522 = vmatprep.mubr.f32.mxu1 %v16628_v50  ;;  %v16659_v45 = vld [vmem:[#allocation28_spill] sm:$0xff] }
 0x437   :  { %6227 = vmatprep.subr.mxu0 %v16630_v15  ;;  %6518 = vmatprep.subr.mxu1 %v16631_v42 }
 0x438   :  { %6231 = vmatpush2.msra.mxu0 %v16632_v29  ;;  %6520 = vmatpush2.msra.mxu1 %v16437_v19  ;;  %v16638_v19 = vand.u32 4294901760, %v16444_v52 }
 0x439   :  { %5671 = vmatmul.mubr.f32.gmra.mxu0 %v12901_v56  ;;  %6235 = vmatprep.subr.mxu0 %v16633_v12  ;;  %v16661_v12 = vld [vmem:[#allocation39_spill] sm:$0xff] }
 0x43a   :  { %6524 = vmatmul.mubr.f32.vlgmr.msra.gmra.mxu1 %v16634_v63  ;;  %5678 = vmatprep.mubr.f32.mxu0 %v12915_v60  ;;  %v5209_v6 = vpop.f32.mrf.mxu1 }
 0x43b   :  { %6239 = vmatpush2.msra.mxu0 %v16635_v4  ;;  %6530 = vmatprep.mubr.f32.mxu1 %v16636_v58 }
 0x43c   :  { %6243 = vmatprep.subr.mxu0 %v16637_v20  ;;  %v5211_v56 = vpop.f32.mrf.mxu1 }
 0x43d   :  { %6247 = vmatpush2.msra.mxu0 %v16638_v19 }
 0x43e   :  { %5681 = vmatmul.mubr.f32.gmra.mxu0 %v12927_v47  ;;  %6251 = vmatprep.subr.mxu0 %v16639_v41  ;;  %v5217_v60 = vpop.f32.mrf.mxu1  ;;  %v16645_v47 = vld [vmem:[#allocation84_spill] sm:$0xff] }
 0x43f   :  { %6532 = vmatmul.mubr.f32.gmra.mxu1 %v16640_v11  ;;  %6255 = vmatpush2.msra.mxu0 %v16641_v5  ;;  %v16664_v5 = vld [vmem:[#allocation26_spill] sm:$0xff] }
 0x440   :  { %6265 = vmatprep.mubr.f32.mxu0 %v16628_v50  ;;  %6538 = vmatprep.mubr.f32.mxu1 %v16642_v2  ;;  %v5219_v52 = vpop.f32.mrf.mxu1  ;;  %v16660_v50 = vld [vmem:[#allocation31_spill] sm:$0xff] }
 0x441   :  { %6259 = vmatprep.subr.mxu0 %v16643_v59 }
 0x442   :  { %6263 = vmatpush2.msra.mxu0 %v16644_v62 }
 0x443   :  { %6267 = vmatmul.mubr.f32.vlgmr.msra.gmra.mxu0 %v16634_v63  ;;  %6540 = vmatmul.mubr.f32.gmra.mxu1 %v16645_v47  ;;  %v5225_v21 = vpop.f32.mrf.mxu1 }
 0x444   :  { %6273 = vmatprep.mubr.f32.mxu0 %v16636_v58  ;;  %6546 = vmatprep.mubr.f32.mxu1 %v16646_v7 }
 0x445   :  { %v5227_v30 = vpop.f32.mrf.mxu1 }
 0x447   :  { %6275 = vmatmul.mubr.f32.gmra.mxu0 %v16640_v11  ;;  %6548 = vmatmul.mubr.f32.gmra.mxu1 %v16647_v54 }
 0x448   :  { %6281 = vmatprep.mubr.f32.mxu0 %v16642_v2  ;;  %6554 = vmatprep.mubr.f32.mxu1 %v16649_v38 }
 0x449   :  { %v4576_v39 = vpop.f32.mrf.mxu0 }
 0x44a   :  { %v4577_v8 = vadd.f32 %v4576_v39, %v13264_v35  ;;  %v5233_v27 = vpop.f32.mrf.mxu1 }
 0x44b   :  { %6283 = vmatmul.mubr.f32.gmra.mxu0 %v16645_v47  ;;  %6556 = vmatmul.mubr.f32.gmra.mxu1 %v16651_v43  ;;  %v4578_v14 = vpop.f32.mrf.mxu0  ;;  %v16665_v47 = vld [vmem:[#allocation168_spill] sm:$0xff] }
 0x44c   :  { %6289 = vmatprep.mubr.f32.mxu0 %v16646_v7  ;;  %6562 = vmatprep.mubr.f32.mxu1 %v16652_v34  ;;  %v4579_v3 = vadd.f32 %v4578_v14, %v13269_v10  ;;  %v5235_v44 = vpop.f32.mrf.mxu1  ;;  %v13277_v61 = vadd.f32 %v5209_v6, %v4577_v8  ;;  %v16662_v6 = vld [vmem:[#allocation24_spill] sm:$0xff]  ;;  %v16666_v7 = vld [vmem:[#allocation173_spill] sm:$0xff]  ;;  %v16668_v8 = vld [vmem:[#allocation63_spill] sm:$0xff] }
 0x44d   :  { %v16669_v14 = vld [vmem:[#allocation80_spill] sm:$0xff] }
 0x44e   :  { %v13281_v51 = vadd.f32 %v5211_v56, %v4579_v3  ;;  %v16663_v56 = vld [vmem:[#allocation47_spill] sm:$0xff] }
 0x44f   :  { %6291 = vmatmul.mubr.f32.gmra.mxu0 %v16647_v54  ;;  %6564 = vmatmul.mubr.f32.gmra.mxu1 %v16653_v16 }
 0x450   :  { %v4592_v18 = vpop.f32.mrf.mxu0  ;;  %6297 = vmatprep.mubr.f32.mxu0 %v16649_v38  ;;  %6570 = vmatprep.mubr.f32.mxu1 %v16654_v26  ;;  %v16667_v38 = vld [vmem:[#allocation165_spill] sm:$0xff] }
 0x451   :  { %v4593_v37 = vadd.f32 %v4592_v18, %v13264_v35  ;;  %v5241_v24 = vpop.f32.mrf.mxu1 }
 0x452   :  { %v4594_v36 = vpop.f32.mrf.mxu0 }
 0x453   :  { %v4595_v49 = vadd.f32 %v4594_v36, %v13269_v10  ;;  %v13287_v28 = vadd.f32 %v5217_v60, %v4593_v37  ;;  %6299 = vmatmul.mubr.f32.gmra.mxu0 %v16651_v43  ;;  %6572 = vmatmul.mubr.f32.gmra.mxu1 %v16655_v13  ;;  %v5243_v23 = vpop.f32.mrf.mxu1 }
 0x454   :  { %6305 = vmatprep.mubr.f32.mxu0 %v16652_v34  ;;  %6578 = vmatprep.mubr.f32.mxu1 %v16656_v22 }
 0x455   :  { %v13293_v46 = vadd.f32 %v5219_v52, %v4595_v49  ;;  %v16671_v49 = vld [vmem:[#allocation35_spill] sm:$0xff] }
 0x456   :  { %v5249_v48 = vpop.f32.mrf.mxu1 }
 0x457   :  { %6307 = vmatmul.mubr.f32.gmra.mxu0 %v16653_v16  ;;  %6580 = vmatmul.mubr.f32.gmra.mxu1 %v16657_v40  ;;  %v4608_v31 = vpop.f32.mrf.mxu0  ;;  %v16670_v16 = vld [vmem:[#allocation109_spill] sm:$0xff] }
 0x458   :  { %6313 = vmatprep.mubr.f32.mxu0 %v16654_v26  ;;  %6586 = vmatprep.mubr.f32.mxu1 %v16658_v0  ;;  %v4609_v9 = vadd.f32 %v4608_v31, %v13264_v35  ;;  %v5251_v33 = vpop.f32.mrf.mxu1 }
 0x459   :  { %v4610_v53 = vpop.f32.mrf.mxu0 }
 0x45a   :  { %v4611_v32 = vadd.f32 %v4610_v53, %v13269_v10  ;;  %v13301_v1 = vadd.f32 %v5225_v21, %v4609_v9  ;;  %v16673_v53 = vld [vmem:[#allocation45_spill] sm:$0xff] }
 0x45b   :  { %6315 = vmatmul.mubr.f32.gmra.mxu0 %v16655_v13  ;;  %6588 = vmatmul.mubr.f32.gmra.mxu1 %v16659_v45 }
 0x45c   :  { %6321 = vmatprep.mubr.f32.mxu0 %v16656_v22  ;;  %6594 = vmatprep.mubr.f32.mxu1 %v16660_v50  ;;  %v13307_v57 = vadd.f32 %v5227_v30, %v4611_v32  ;;  %v5257_v42 = vpop.f32.mrf.mxu1  ;;  %v16672_v22 = vld [vmem:[#allocation98_spill] sm:$0xff] }
 0x45d   :  { %v4624_v15 = vpop.f32.mrf.mxu0 }
 0x45e   :  { %v4625_v29 = vadd.f32 %v4624_v15, %v13264_v35  ;;  %v5259_v4 = vpop.f32.mrf.mxu1 }
 0x45f   :  { %6323 = vmatmul.mubr.f32.gmra.mxu0 %v16657_v40  ;;  %6596 = vmatmul.mubr.f32.gmra.mxu1 %v16661_v12  ;;  %v4626_v63 = vpop.f32.mrf.mxu0 }
 0x460   :  { %6329 = vmatprep.mubr.f32.mxu0 %v16658_v0  ;;  %6602 = vmatprep.mubr.f32.mxu1 %v16662_v6  ;;  %v4627_v58 = vadd.f32 %v4626_v63, %v13269_v10  ;;  %v13315_v20 = vadd.f32 %v5233_v27, %v4625_v29 }
 0x462   :  { %v13317_v19 = vadd.f32 %v5235_v44, %v4627_v58  ;;  %v5265_v11 = vpop.f32.mrf.mxu1 }
 0x463   :  { %6331 = vmatmul.mubr.f32.gmra.mxu0 %v16659_v45  ;;  %6604 = vmatmul.mubr.f32.gmra.mxu1 %v16663_v56  ;;  %v4640_v41 = vpop.f32.mrf.mxu0 }
 0x464   :  { %6337 = vmatprep.mubr.f32.mxu0 %v16660_v50  ;;  %6610 = vmatprep.mubr.f32.mxu1 %v16664_v5  ;;  %v4641_v60 = vadd.f32 %v4640_v41, %v13264_v35  ;;  %v5267_v59 = vpop.f32.mrf.mxu1 }
 0x465   :  { %v4642_v2 = vpop.f32.mrf.mxu0 }
 0x466   :  { %v4643_v52 = vadd.f32 %v4642_v2, %v13269_v10  ;;  %v13325_v62 = vadd.f32 %v5241_v24, %v4641_v60 }
 0x467   :  { %6339 = vmatmul.mubr.f32.gmra.mxu0 %v16661_v12  ;;  %6612 = vmatmul.mubr.f32.gmra.mxu1 %v16665_v47 }
 0x468   :  { %6345 = vmatprep.mubr.f32.mxu0 %v16662_v6  ;;  %6618 = vmatprep.mubr.f32.mxu1 %v16666_v7  ;;  %v13331_v21 = vadd.f32 %v5243_v23, %v4643_v52  ;;  %v5273_v17 = vpop.f32.mrf.mxu1 }
 0x469   :  { %v4656_v25 = vpop.f32.mrf.mxu0 }
 0x46a   :  { %v4657_v54 = vadd.f32 %v4656_v25, %v13264_v35  ;;  %v5275_v39 = vpop.f32.mrf.mxu1 }
 0x46b   :  { %v4658_v30 = vpop.f32.mrf.mxu0  ;;  %6347 = vmatmul.mubr.f32.gmra.mxu0 %v16663_v56  ;;  %6620 = vmatmul.mubr.f32.gmra.mxu1 %v16667_v38 }
 0x46c   :  { %v4659_v55 = vadd.f32 %v4658_v30, %v13269_v10  ;;  %v13337_v43 = vadd.f32 %v5249_v48, %v4657_v54  ;;  %6353 = vmatprep.mubr.f32.mxu0 %v16664_v5  ;;  %6626 = vmatprep.mubr.f32.mxu1 %v16668_v8 }
 0x46d   :  { %v5281_v44 = vpop.f32.mrf.mxu1 }
 0x46e   :  { %v13341_v27 = vadd.f32 %v5251_v33, %v4659_v55 }
 0x46f   :  { %v4672_v34 = vpop.f32.mrf.mxu0  ;;  %6355 = vmatmul.mubr.f32.gmra.mxu0 %v16665_v47  ;;  %6628 = vmatmul.mubr.f32.gmra.mxu1 %v16669_v14  ;;  %v5283_v24 = vpop.f32.mrf.mxu1 }
 0x470   :  { %v4673_v3 = vadd.f32 %v4672_v34, %v13264_v35  ;;  %6361 = vmatprep.mubr.f32.mxu0 %v16666_v7  ;;  %6634 = vmatprep.mubr.f32.mxu1 %v16670_v16 }
 0x471   :  { %v4674_v18 = vpop.f32.mrf.mxu0 }
 0x472   :  { %v4675_v26 = vadd.f32 %v4674_v18, %v13269_v10  ;;  %v13349_v37 = vadd.f32 %v5257_v42, %v4673_v3 }
 0x473   :  { %v4688_v36 = vpop.f32.mrf.mxu0  ;;  %6363 = vmatmul.mubr.f32.gmra.mxu0 %v16667_v38  ;;  %6636 = vmatmul.mubr.f32.gmra.mxu1 %v16671_v49 }
 0x474   :  { %v4689_v13 = vadd.f32 %v4688_v36, %v13264_v35  ;;  %v13354_v23 = vadd.f32 %v5259_v4, %v4675_v26  ;;  %6369 = vmatprep.mubr.f32.mxu0 %v16668_v8  ;;  %6642 = vmatprep.mubr.f32.mxu1 %v16672_v22 }
 0x475   :  { %v4690_v48 = vpop.f32.mrf.mxu0  ;;  %v5289_v9 = vpop.f32.mrf.mxu1 }
 0x476   :  { %v4691_v40 = vadd.f32 %v4690_v48, %v13269_v10  ;;  %v13359_v31 = vadd.f32 %v5265_v11, %v4689_v13 }
 0x477   :  { %v4704_v0 = vpop.f32.mrf.mxu0  ;;  %6371 = vmatmul.mubr.f32.gmra.mxu0 %v16669_v14  ;;  %6644 = vmatmul.mubr.f32.gmra.mxu1 %v16673_v53  ;;  %v5291_v50 = vpop.f32.mrf.mxu1 }
 0x478   :  { %v4705_v33 = vadd.f32 %v4704_v0, %v13264_v35  ;;  %v13364_v32 = vadd.f32 %v5267_v59, %v4691_v40  ;;  %6377 = vmatprep.mubr.f32.mxu0 %v16670_v16 }
 0x479   :  { %v4706_v45 = vpop.f32.mrf.mxu0 }
 0x47a   :  { %v4707_v15 = vadd.f32 %v4706_v45, %v13269_v10  ;;  %v13368_v42 = vadd.f32 %v5273_v17, %v4705_v33 }
 0x47b   :  { %6379 = vmatmul.mubr.f32.gmra.mxu0 %v16671_v49  ;;  %v4720_v29 = vpop.f32.mrf.mxu0  ;;  %v5297_v4 = vpop.f32.mrf.mxu1 }
 0x47c   :  { %v13371_v12 = vadd.f32 %v5275_v39, %v4707_v15  ;;  %6385 = vmatprep.mubr.f32.mxu0 %v16672_v22  ;;  %v4721_v63 = vadd.f32 %v4720_v29, %v13264_v35 }
 0x47d   :  { %v4722_v6 = vpop.f32.mrf.mxu0  ;;  %v5299_v56 = vpop.f32.mrf.mxu1 }
 0x47e   :  { %v4723_v58 = vadd.f32 %v4722_v6, %v13269_v10  ;;  %v13376_v41 = vadd.f32 %v5281_v44, %v4721_v63 }
 0x47f   :  { %6387 = vmatmul.mubr.f32.gmra.mxu0 %v16673_v53 }
 0x480   :  { %v13379_v11 = vadd.f32 %v5283_v24, %v4723_v58 }
 0x481   :  { %v4736_v5 = vpop.f32.mrf.mxu0  ;;  %v5305_v2 = vpop.f32.mrf.mxu1 }
 0x482   :  { %v4737_v60 = vadd.f32 %v4736_v5, %v13264_v35 }
 0x483   :  { %v4738_v59 = vpop.f32.mrf.mxu0  ;;  %v5307_v47 = vpop.f32.mrf.mxu1 }
 0x484   :  { %v4739_v52 = vadd.f32 %v4738_v59, %v13269_v10  ;;  %v13383_v7 = vadd.f32 %v5289_v9, %v4737_v60 }
 0x486   :  { %v13385_v25 = vadd.f32 %v5291_v50, %v4739_v52 }
 0x487   :  { %v4752_v54 = vpop.f32.mrf.mxu0  ;;  %v5313_v30 = vpop.f32.mrf.mxu1 }
 0x488   :  { %v4753_v17 = vadd.f32 %v4752_v54, %v13264_v35 }
 0x489   :  { %v4754_v38 = vpop.f32.mrf.mxu0  ;;  %v5315_v39 = vpop.f32.mrf.mxu1 }
 0x48a   :  { %v4755_v55 = vadd.f32 %v4754_v38, %v13269_v10  ;;  %v13389_v8 = vadd.f32 %v5297_v4, %v4753_v17 }
 0x48c   :  { %v13391_v34 = vadd.f32 %v5299_v56, %v4755_v55 }
 0x48d   :  { %v4768_v14 = vpop.f32.mrf.mxu0  ;;  %v5321_v44 = vpop.f32.mrf.mxu1 }
 0x48e   :  { %v4769_v3 = vadd.f32 %v4768_v14, %v13264_v35 }
 0x48f   :  { %v4770_v16 = vpop.f32.mrf.mxu0  ;;  %v5323_v26 = vpop.f32.mrf.mxu1 }
 0x490   :  { %v4771_v18 = vadd.f32 %v4770_v16, %v13269_v10  ;;  %v13395_v36 = vadd.f32 %v5305_v2, %v4769_v3 }
 0x492   :  { %v13397_v24 = vadd.f32 %v5307_v47, %v4771_v18 }
 0x493   :  { %v4784_v49 = vpop.f32.mrf.mxu0  ;;  %v5329_v22 = vpop.f32.mrf.mxu1 }
 0x494   :  { %v4785_v13 = vadd.f32 %v4784_v49, %v13264_v35 }
 0x495   :  { %v4786_v48 = vpop.f32.mrf.mxu0  ;;  %v5331_v0 = vpop.f32.mrf.mxu1 }
 0x496   :  { %v4787_v40 = vadd.f32 %v4786_v48, %v13269_v10  ;;  %v13401_v9 = vadd.f32 %v5313_v30, %v4785_v13 }
 0x498   :  { %v13403_v53 = vadd.f32 %v5315_v39, %v4787_v40 }
 0x499   :  { %v4800_v33 = vpop.f32.mrf.mxu0 }
 0x49a   :  { %v4801_v45 = vadd.f32 %v4800_v33, %v13264_v35  ;;  %v5823_v50 = vpop.f32.mrf.mxu1 }
 0x49b   :  { %v4802_v15 = vpop.f32.mrf.mxu0 }
 0x49c   :  { %v4803_v29 = vadd.f32 %v4802_v15, %v13269_v10  ;;  %v5825_v63 = vpop.f32.mrf.mxu1  ;;  %v13407_v4 = vadd.f32 %v5321_v44, %v4801_v45 }
 0x49e   :  { %v13409_v6 = vadd.f32 %v5323_v26, %v4803_v29 }
 0x49f   :  { %v4816_v58 = vpop.f32.mrf.mxu0 }
 0x4a0   :  { %v4817_v56 = vadd.f32 %v4816_v58, %v13264_v35  ;;  %v5835_v5 = vpop.f32.mrf.mxu1 }
 0x4a1   :  { %v4818_v60 = vpop.f32.mrf.mxu0 }
 0x4a2   :  { %v4819_v2 = vadd.f32 %v4818_v60, %v13269_v10  ;;  %v5837_v59 = vpop.f32.mrf.mxu1  ;;  %v13413_v52 = vadd.f32 %v5329_v22, %v4817_v56 }
 0x4a4   :  { %v13415_v47 = vadd.f32 %v5331_v0, %v4819_v2 }
 0x4a5   :  { %v5532_v54 = vpop.f32.mrf.mxu0  ;;  %v5847_v30 = vpop.f32.mrf.mxu1 }
 0x4a6   :  { %v5533_v17 = vadd.f32 %v5532_v54, %v13277_v61 }
 0x4a7   :  { %v5534_v38 = vpop.f32.mrf.mxu0  ;;  %v5849_v39 = vpop.f32.mrf.mxu1 }
 0x4a8   :  { %v5535_v55 = vadd.f32 %v5534_v38, %v13281_v51  ;;  %v13419_v14 = vadd.f32 %v5823_v50, %v5533_v17 }
 0x4aa   :  { %v13421_v35 = vadd.f32 %v5825_v63, %v5535_v55 }
 0x4ab   :  { %v5542_v3 = vpop.f32.mrf.mxu0  ;;  %v5859_v44 = vpop.f32.mrf.mxu1 }
 0x4ac   :  { %v5543_v10 = vadd.f32 %v5542_v3, %v13287_v28 }
 0x4ad   :  { %v5544_v16 = vpop.f32.mrf.mxu0  ;;  %v5861_v26 = vpop.f32.mrf.mxu1 }
 0x4ae   :  { %v5545_v18 = vadd.f32 %v5544_v16, %v13293_v46  ;;  %v13425_v49 = vadd.f32 %v5835_v5, %v5543_v10 }
 0x4b0   :  { %v13427_v61 = vadd.f32 %v5837_v59, %v5545_v18 }
 0x4b1   :  { %v5552_v13 = vpop.f32.mrf.mxu0  ;;  %v5871_v22 = vpop.f32.mrf.mxu1 }
 0x4b2   :  { %v5553_v51 = vadd.f32 %v5552_v13, %v13301_v1 }
 0x4b3   :  { %v5554_v48 = vpop.f32.mrf.mxu0  ;;  %v5873_v0 = vpop.f32.mrf.mxu1 }
 0x4b4   :  { %v5555_v40 = vadd.f32 %v5554_v48, %v13307_v57  ;;  %v13431_v33 = vadd.f32 %v5847_v30, %v5553_v51 }
 0x4b6   :  { %v13433_v28 = vadd.f32 %v5849_v39, %v5555_v40 }
 0x4b7   :  { %v5562_v45 = vpop.f32.mrf.mxu0  ;;  %v5883_v50 = vpop.f32.mrf.mxu1 }
 0x4b8   :  { %v5563_v46 = vadd.f32 %v5562_v45, %v13315_v20 }
 0x4b9   :  { %v5564_v15 = vpop.f32.mrf.mxu0  ;;  %v5885_v63 = vpop.f32.mrf.mxu1 }
 0x4ba   :  { %v5565_v29 = vadd.f32 %v5564_v15, %v13317_v19  ;;  %v13437_v58 = vadd.f32 %v5859_v44, %v5563_v46 }
 0x4bc   :  { %v13439_v1 = vadd.f32 %v5861_v26, %v5565_v29 }
 0x4bd   :  { %v5572_v56 = vpop.f32.mrf.mxu0  ;;  %v5895_v5 = vpop.f32.mrf.mxu1 }
 0x4be   :  { %v5573_v57 = vadd.f32 %v5572_v56, %v13325_v62 }
 0x4bf   :  { %v5574_v60 = vpop.f32.mrf.mxu0  ;;  %v5897_v59 = vpop.f32.mrf.mxu1 }
 0x4c0   :  { %v5575_v2 = vadd.f32 %v5574_v60, %v13331_v21  ;;  %v13443_v54 = vadd.f32 %v5871_v22, %v5573_v57 }
 0x4c2   :  { %v13445_v20 = vadd.f32 %v5873_v0, %v5575_v2 }
 0x4c3   :  { %v5582_v17 = vpop.f32.mrf.mxu0  ;;  %v5907_v30 = vpop.f32.mrf.mxu1 }
 0x4c4   :  { %v5583_v19 = vadd.f32 %v5582_v17, %v13337_v43 }
 0x4c5   :  { %v5584_v38 = vpop.f32.mrf.mxu0  ;;  %v5909_v39 = vpop.f32.mrf.mxu1 }
 0x4c6   :  { %v5585_v55 = vadd.f32 %v5584_v38, %v13341_v27  ;;  %v13449_v3 = vadd.f32 %v5883_v50, %v5583_v19 }
 0x4c8   :  { %v13451_v62 = vadd.f32 %v5885_v63, %v5585_v55 }
 0x4c9   :  { %v5592_v10 = vpop.f32.mrf.mxu0  ;;  %v5919_v44 = vpop.f32.mrf.mxu1 }
 0x4ca   :  { %v5593_v21 = vadd.f32 %v5592_v10, %v13349_v37 }
 0x4cb   :  { %v5594_v16 = vpop.f32.mrf.mxu0  ;;  %v5921_v26 = vpop.f32.mrf.mxu1 }
 0x4cc   :  { %v5595_v18 = vadd.f32 %v5594_v16, %v13354_v23  ;;  %v13455_v13 = vadd.f32 %v5895_v5, %v5593_v21 }
 0x4ce   :  { %v13457_v43 = vadd.f32 %v5897_v59, %v5595_v18 }
 0x4cf   :  { %v5602_v51 = vpop.f32.mrf.mxu0  ;;  %v5931_v22 = vpop.f32.mrf.mxu1 }
 0x4d0   :  { %v5603_v27 = vadd.f32 %v5602_v51, %v13359_v31 }
 0x4d1   :  { %v5604_v48 = vpop.f32.mrf.mxu0  ;;  %v5933_v0 = vpop.f32.mrf.mxu1 }
 0x4d2   :  { %v5605_v40 = vadd.f32 %v5604_v48, %v13364_v32  ;;  %v13461_v45 = vadd.f32 %v5907_v30, %v5603_v27 }
 0x4d4   :  { %v13463_v37 = vadd.f32 %v5909_v39, %v5605_v40 }
 0x4d5   :  { %v5612_v46 = vpop.f32.mrf.mxu0  ;;  %v5943_v50 = vpop.f32.mrf.mxu1 }
 0x4d6   :  { %v5613_v23 = vadd.f32 %v5612_v46, %v13368_v42 }
 0x4d7   :  { %v5614_v15 = vpop.f32.mrf.mxu0  ;;  %v5945_v63 = vpop.f32.mrf.mxu1 }
 0x4d8   :  { %v5615_v29 = vadd.f32 %v5614_v15, %v13371_v12  ;;  %v13467_v56 = vadd.f32 %v5919_v44, %v5613_v23 }
 0x4da   :  { %v13469_v31 = vadd.f32 %v5921_v26, %v5615_v29 }
 0x4db   :  { %v5622_v57 = vpop.f32.mrf.mxu0  ;;  %v5955_v5 = vpop.f32.mrf.mxu1 }
 0x4dc   :  { %v5623_v32 = vadd.f32 %v5622_v57, %v13376_v41 }
 0x4dd   :  { %v5624_v60 = vpop.f32.mrf.mxu0  ;;  %v5957_v59 = vpop.f32.mrf.mxu1 }
 0x4de   :  { %v5625_v2 = vadd.f32 %v5624_v60, %v13379_v11  ;;  %v13473_v17 = vadd.f32 %v5931_v22, %v5623_v32 }
 0x4e0   :  { %v13475_v42 = vadd.f32 %v5933_v0, %v5625_v2 }
 0x4e1   :  { %v5632_v19 = vpop.f32.mrf.mxu0  ;;  %v5967_v30 = vpop.f32.mrf.mxu1 }
 0x4e2   :  { %v5633_v12 = vadd.f32 %v5632_v19, %v13383_v7 }
 0x4e3   :  { %v5634_v38 = vpop.f32.mrf.mxu0  ;;  %v5969_v39 = vpop.f32.mrf.mxu1 }
 0x4e4   :  { %v5635_v55 = vadd.f32 %v5634_v38, %v13385_v25  ;;  %v13479_v10 = vadd.f32 %v5943_v50, %v5633_v12 }
 0x4e6   :  { %v13481_v41 = vadd.f32 %v5945_v63, %v5635_v55 }
 0x4e7   :  { %v5642_v21 = vpop.f32.mrf.mxu0  ;;  %v5979_v44 = vpop.f32.mrf.mxu1 }
 0x4e8   :  { %v5643_v11 = vadd.f32 %v5642_v21, %v13389_v8 }
 0x4e9   :  { %v5644_v16 = vpop.f32.mrf.mxu0  ;;  %v5981_v26 = vpop.f32.mrf.mxu1 }
 0x4ea   :  { %v5645_v18 = vadd.f32 %v5644_v16, %v13391_v34  ;;  %v13485_v51 = vadd.f32 %v5955_v5, %v5643_v11 }
 0x4ec   :  { %v13487_v7 = vadd.f32 %v5957_v59, %v5645_v18 }
 0x4ed   :  { %v5652_v27 = vpop.f32.mrf.mxu0  ;;  %v5991_v22 = vpop.f32.mrf.mxu1 }
 0x4ee   :  { %v5653_v25 = vadd.f32 %v5652_v27, %v13395_v36 }
 0x4ef   :  { %v5654_v48 = vpop.f32.mrf.mxu0  ;;  %v5993_v0 = vpop.f32.mrf.mxu1 }
 0x4f0   :  { %v5655_v40 = vadd.f32 %v5654_v48, %v13397_v24  ;;  %v13491_v46 = vadd.f32 %v5967_v30, %v5653_v25 }
 0x4f2   :  { %v13493_v8 = vadd.f32 %v5969_v39, %v5655_v40 }
 0x4f3   :  { %v5662_v23 = vpop.f32.mrf.mxu0  ;;  %v13496_v50 = vpop.f32.mrf.mxu1 }
 0x4f4   :  { %v5663_v34 = vadd.f32 %v5662_v23, %v13401_v9 }
 0x4f5   :  { %v5664_v15 = vpop.f32.mrf.mxu0  ;;  %v13499_v63 = vpop.f32.mrf.mxu1 }
 0x4f6   :  { %v5665_v29 = vadd.f32 %v5664_v15, %v13403_v53  ;;  %v13501_v36 = vadd.f32 %v5979_v44, %v5663_v34 }
 0x4f8   :  { %v13503_v57 = vadd.f32 %v5981_v26, %v5665_v29 }
 0x4f9   :  { %v5672_v24 = vpop.f32.mrf.mxu0 }
 0x4fa   :  { %v5673_v32 = vadd.f32 %v5672_v24, %v13407_v4  ;;  %v6525_v5 = vpop.f32.mrf.mxu1 }
 0x4fb   :  { %v5674_v60 = vpop.f32.mrf.mxu0 }
 0x4fc   :  { %v5675_v2 = vadd.f32 %v5674_v60, %v13409_v6  ;;  %v6527_v59 = vpop.f32.mrf.mxu1  ;;  %v13507_v9 = vadd.f32 %v5991_v22, %v5673_v32 }
 0x4fe   :  { %v13509_v19 = vpop.f32.mrf.mxu0  ;;  %v13511_v12 = vadd.f32 %v5993_v0, %v5675_v2 }
 0x4ff   :  { %v6533_v53 = vpop.f32.mrf.mxu1 }
 0x500   :  { %v13513_v30 = vpop.f32.mrf.mxu0 }
 0x501   :  { %v6535_v38 = vpop.f32.mrf.mxu1 }
 0x503   :  { %v6268_v55 = vpop.f32.mrf.mxu0  ;;  %v6541_v39 = vpop.f32.mrf.mxu1 }
 0x504   :  { %v6269_v21 = vadd.f32 %v6268_v55, %v13419_v14 }
 0x505   :  { %v6270_v4 = vpop.f32.mrf.mxu0  ;;  %v6543_v11 = vpop.f32.mrf.mxu1 }
 0x506   :  { %v13516_v44 = vadd.f32 %v6525_v5, %v6269_v21  ;;  %v6271_v6 = vadd.f32 %v6270_v4, %v13421_v35 }
 0x507   :  { %v6276_v16 = vpop.f32.mrf.mxu0  ;;  %v6549_v18 = vpop.f32.mrf.mxu1 }
 0x508   :  { %16674 = vst [vmem:[#allocation77_spill] sm:$0xff] %v13516_v44  ;;  %v13519_v26 = vadd.f32 %v6527_v59, %v6271_v6  ;;  %v6277_v27 = vadd.f32 %v6276_v16, %v13425_v49 }
 0x509   :  { %v6278_v25 = vpop.f32.mrf.mxu0  ;;  %v6551_v22 = vpop.f32.mrf.mxu1 }
 0x50a   :  { %16675 = vst [vmem:[#allocation166_spill] sm:$0xff] %v13519_v26  ;;  %v13522_v48 = vadd.f32 %v6533_v53, %v6277_v27  ;;  %v6279_v40 = vadd.f32 %v6278_v25, %v13427_v61 }
 0x50b   :  { %v6284_v0 = vpop.f32.mrf.mxu0  ;;  %v6557_v14 = vpop.f32.mrf.mxu1 }
 0x50c   :  { %16676 = vst [vmem:[#allocation175_spill] sm:$0xff] %v13522_v48  ;;  %v6285_v23 = vadd.f32 %v6284_v0, %v13431_v33  ;;  %v13526_v34 = vadd.f32 %v6535_v38, %v6279_v40 }
 0x50d   :  { %v6286_v15 = vpop.f32.mrf.mxu0  ;;  %v6559_v35 = vpop.f32.mrf.mxu1 }
 0x50e   :  { %16677 = vst [vmem:[#allocation68_spill] sm:$0xff] %v13526_v34  ;;  %v13528_v29 = vadd.f32 %v6541_v39, %v6285_v23  ;;  %v6287_v24 = vadd.f32 %v6286_v15, %v13433_v28 }
 0x50f   :  { %v6292_v32 = vpop.f32.mrf.mxu0  ;;  %v6565_v49 = vpop.f32.mrf.mxu1 }
 0x510   :  { %16678 = vst [vmem:[#allocation48_spill] sm:$0xff] %v13528_v29  ;;  %v13531_v5 = vadd.f32 %v6543_v11, %v6287_v24  ;;  %v6293_v60 = vadd.f32 %v6292_v32, %v13437_v58 }
 0x511   :  { %v6294_v2 = vpop.f32.mrf.mxu0  ;;  %v6567_v61 = vpop.f32.mrf.mxu1 }
 0x512   :  { %16679 = vst [vmem:[#allocation176_spill] sm:$0xff] %v13531_v5  ;;  %v13534_v59 = vadd.f32 %v6549_v18, %v6293_v60  ;;  %v6295_v33 = vadd.f32 %v6294_v2, %v13439_v1 }
 0x513   :  { %v6300_v53 = vpop.f32.mrf.mxu0  ;;  %v6573_v38 = vpop.f32.mrf.mxu1 }
 0x514   :  { %16680 = vst [vmem:[#allocation36_spill] sm:$0xff] %v13534_v59  ;;  %v6301_v55 = vadd.f32 %v6300_v53, %v13443_v54  ;;  %v13538_v39 = vadd.f32 %v6551_v22, %v6295_v33 }
 0x515   :  { %v6302_v21 = vpop.f32.mrf.mxu0  ;;  %v6575_v28 = vpop.f32.mrf.mxu1 }
 0x516   :  { %v13540_v4 = vadd.f32 %v6557_v14, %v6301_v55  ;;  %v6303_v11 = vadd.f32 %v6302_v21, %v13445_v20 }
 0x517   :  { %v6308_v6 = vpop.f32.mrf.mxu0  ;;  %v6581_v58 = vpop.f32.mrf.mxu1 }
 0x518   :  { %v13543_v16 = vadd.f32 %v6559_v35, %v6303_v11  ;;  %v6309_v18 = vadd.f32 %v6308_v6, %v13449_v3 }
 0x519   :  { %v6310_v27 = vpop.f32.mrf.mxu0  ;;  %v13546_v1 = vpop.f32.mrf.mxu1 }
 0x51a   :  { %16681 = vst [vmem:[#allocation66_spill] sm:$0xff] %v13546_v1  ;;  %v13548_v25 = vadd.f32 %v6565_v49, %v6309_v18  ;;  %v6311_v54 = vadd.f32 %v6310_v27, %v13451_v62  ;;  %v6683_v27 = vmul.f32 0.70710677, %v13519_v26  ;;  %v6689_v26 = vmul.f32 0.70710677, %v13538_v39 }
 0x51b   :  { %v6316_v22 = vpop.f32.mrf.mxu0  ;;  %v13551_v40 = vpop.f32.mrf.mxu1 }
 0x51c   :  { %16682 = vst [vmem:[#allocation20_spill] sm:$0xff] %v13551_v40  ;;  %v6317_v0 = vadd.f32 %v6316_v22, %v13455_v13  ;;  %v13554_v14 = vadd.f32 %v6567_v61, %v6311_v54  ;;  %v6684_v54 = vmul.f32 0.70710677, %v13522_v48  ;;  %v6688_v40 = vmul.f32 0.70710677, %v13534_v59 }
 0x51d   :  { %v6318_v20 = vpop.f32.mrf.mxu0  ;;  %v13556_v23 = vpop.f32.mrf.mxu1  ;;  %v6690_v48 = vmul.f32 0.70710677, %v13540_v4 }
 0x51e   :  { %v13558_v15 = vadd.f32 %v6573_v38, %v6317_v0  ;;  %v6319_v3 = vadd.f32 %v6318_v20, %v13457_v43  ;;  %v6685_v20 = vmul.f32 0.70710677, %v13526_v34 }
 0x51f   :  { %v6324_v35 = vpop.f32.mrf.mxu0  ;;  %v13561_v24 = vpop.f32.mrf.mxu1 }
 0x520   :  { %v13563_v32 = vadd.f32 %v6575_v28, %v6319_v3  ;;  %v6325_v62 = vadd.f32 %v6324_v35, %v13461_v45  ;;  %v6686_v3 = vmul.f32 0.70710677, %v13528_v29 }
 0x521   :  { %v13566_v49 = vpop.f32.mrf.mxu0  ;;  %v13568_v60 = vpop.f32.mrf.mxu1 }
 0x522   :  { %v13570_v13 = vadd.f32 %v6581_v58, %v6325_v62  ;;  %v6682_v58 = vmul.f32 0.70710677, %v13516_v44  ;;  %v6687_v62 = vmul.f32 0.70710677, %v13531_v5 }
 0x523   :  { %v13572_v2 = vpop.f32.mrf.mxu0  ;;  %v13574_v61 = vpop.f32.mrf.mxu1 }
 0x524   :  { %16683 = vst [vmem:[#allocation90_spill] sm:$0xff] %v13570_v13  ;;  %7833 = verf.f32 %v6682_v58  ;;  %v6691_v58 = vmul.f32 0.70710677, %v13543_v16 }
 0x525   :  { %v13576_v33 = vpop.f32.mrf.mxu0  ;;  %v13578_v43 = vpop.f32.mrf.mxu1  ;;  %7835 = verf.f32 %v6683_v27 }
 0x526   :  { %7837 = verf.f32 %v6684_v54  ;;  %v5683_v54 = vadd.f32 %v13509_v19, %v13413_v52 }
 0x527   :  { %v13580_v53 = vpop.f32.mrf.mxu0  ;;  %v13582_v38 = vpop.f32.mrf.mxu1  ;;  %7839 = verf.f32 %v6685_v20  ;;  %v6692_v20 = vmul.f32 0.70710677, %v13548_v25 }
 0x528   :  { %7841 = verf.f32 %v6686_v3 }
 0x529   :  { %v13584_v55 = vpop.f32.mrf.mxu0  ;;  %v6615_v45 = vpop.f32.mrf.mxu1  ;;  %7843 = verf.f32 %v6687_v62 }
 0x52a   :  { %7845 = verf.f32 %v6688_v40  ;;  %v6693_v40 = vmul.f32 0.70710677, %v13554_v14 }
 0x52b   :  { %v13586_v21 = vpop.f32.mrf.mxu0  ;;  %v13588_v28 = vpop.f32.mrf.mxu1  ;;  %7847 = verf.f32 %v6689_v26 }
 0x52c   :  { %7849 = verf.f32 %v6690_v48 }
 0x52d   :  { %v6350_v11 = vpop.f32.mrf.mxu0  ;;  %v6623_v6 = vpop.f32.mrf.mxu1  ;;  %7851 = verf.f32 %v6691_v58 }
 0x52e   :  { %7853 = verf.f32 %v6692_v20 }
 0x52f   :  { %v6356_v18 = vpop.f32.mrf.mxu0  ;;  %v6629_v22 = vpop.f32.mrf.mxu1  ;;  %7855 = verf.f32 %v6693_v40 }
 0x531   :  { %v6358_v0 = vpop.f32.mrf.mxu0  ;;  %v6631_v44 = vpop.f32.mrf.mxu1 }
 0x533   :  { %v6364_v35 = vpop.f32.mrf.mxu0  ;;  %v6637_v27 = vpop.f32.mrf.mxu1 }
 0x534   :  { %v6365_v52 = vadd.f32 %v6364_v35, %v13491_v46 }
 0x535   :  { %v6366_v13 = vpop.f32.mrf.mxu0  ;;  %v6639_v19 = vpop.f32.mrf.mxu1 }
 0x536   :  { %v6367_v59 = vadd.f32 %v6366_v13, %v13493_v8  ;;  %v13624_v13 = vpop.eup %7833 }
 0x537   :  { %v6372_v1 = vpop.f32.mrf.mxu0 }
 0x538   :  { %v6373_v29 = vadd.f32 %v6372_v1, %v13501_v36  ;;  %v5685_v36 = vadd.f32 %v13513_v30, %v13415_v47  ;;  %v6359_v1 = vadd.f32 %v6358_v0, %v13487_v7  ;;  %v6004_v47 = vadd.f32 %v13496_v50, %v5683_v54  ;;  %v6645_v50 = vpop.f32.mrf.mxu1 }
 0x539   :  { %v6374_v34 = vpop.f32.mrf.mxu0  ;;  %v6351_v30 = vadd.f32 %v6350_v11, %v13481_v41  ;;  %v6357_v7 = vadd.f32 %v6356_v18, %v13485_v51  ;;  %v6343_v41 = vadd.f32 %v13584_v55, %v13475_v42  ;;  %v13637_v51 = vadd.f32 %v13588_v28, %v6365_v52 }
 0x53a   :  { %v13605_v3 = vadd.f32 %v6629_v22, %v6373_v29  ;;  %v6375_v62 = vadd.f32 %v6374_v34, %v13503_v57  ;;  %v13616_v29 = vadd.f32 %v6623_v6, %v6367_v59  ;;  %v13632_v6 = vpop.eup %7835  ;;  %v6006_v11 = vadd.f32 %v13499_v63, %v5685_v36 }
 0x53b   :  { %v6380_v5 = vpop.f32.mrf.mxu0  ;;  %v6349_v22 = vadd.f32 %v13586_v21, %v13479_v10  ;;  %v13649_v42 = vadd.f32 %v13578_v43, %v6351_v30  ;;  %v6706_v20 = vmul.f32 0.70710677, %v13637_v51  ;;  %v6647_v43 = vpop.f32.mrf.mxu1 }
 0x53c   :  { %v13613_v26 = vadd.f32 %v6631_v44, %v6375_v62  ;;  %v6381_v8 = vadd.f32 %v6380_v5, %v13507_v9  ;;  %v6708_v34 = vmul.f32 0.70710677, %v13605_v3  ;;  %v13626_v9 = vadd.f32 %v6615_v45, %v6359_v1  ;;  %v13640_v45 = vpop.eup %7837 }
 0x53d   :  { %v6382_v48 = vpop.f32.mrf.mxu0  ;;  %v6707_v0 = vmul.f32 0.70710677, %v13616_v29  ;;  %v13646_v58 = vpop.eup %7839  ;;  %v6335_v1 = vadd.f32 %v13576_v33, %v13469_v31  ;;  %v6327_v31 = vadd.f32 %v13566_v49, %v13463_v37 }
 0x53e   :  { %v6383_v57 = vadd.f32 %v6382_v48, %v13511_v12  ;;  %v6709_v46 = vmul.f32 0.70710677, %v13613_v26  ;;  %v13628_v5 = vadd.f32 %v6637_v27, %v6381_v8  ;;  %v13654_v28 = vpop.eup %7841  ;;  %v13657_v27 = vadd.f32 %v13582_v38, %v6357_v7 }
 0x53f   :  { %v6388_v44 = vpop.f32.mrf.mxu0  ;;  %v6705_v10 = vmul.f32 0.70710677, %v13626_v9  ;;  %v13660_v54 = vpop.eup %7843  ;;  %v13669_v38 = vadd.f32 %v13568_v60, %v6343_v41  ;;  %v13678_v8 = vadd.f32 %v13574_v61, %v6349_v22  ;;  %v6703_v48 = vmul.f32 0.70710677, %v13649_v42 }
 0x540   :  { %v13630_v59 = vadd.f32 %v6639_v19, %v6383_v57  ;;  %v6389_v12 = vadd.f32 %v6388_v44, %v6004_v47  ;;  %7857 = verf.f32 %v6709_v46  ;;  %v6710_v35 = vmul.f32 0.70710677, %v13628_v5  ;;  %v13664_v36 = vpop.eup %7845  ;;  %v16684_v46 = vld [vmem:[#allocation66_spill] sm:$0xff] }
 0x541   :  { %v6390_v18 = vpop.f32.mrf.mxu0  ;;  %7859 = verf.f32 %v6708_v34  ;;  %v13673_v52 = vpop.eup %7847  ;;  %v6341_v19 = vadd.f32 %v13580_v53, %v13473_v17  ;;  %v6704_v60 = vmul.f32 0.70710677, %v13657_v27  ;;  %v6694_v17 = vmul.f32 0.70710677, %v13558_v15 }
 0x542   :  { %v6711_v55 = vmul.f32 0.70710677, %v13630_v59  ;;  %v13652_v63 = vadd.f32 %v6645_v50, %v6389_v12  ;;  %7861 = verf.f32 %v6710_v35  ;;  %v6391_v21 = vadd.f32 %v6390_v18, %v6006_v11  ;;  %v13681_v57 = vpop.eup %7849  ;;  %v16686_v12 = vld [vmem:[#allocation20_spill] sm:$0xff] }
 0x543   :  { %v13687_v47 = vpop.eup %7851  ;;  %v6333_v61 = vadd.f32 %v13572_v2, %v13467_v56  ;;  %v6592_v53 = vadd.f32 %v13556_v23, %v6335_v1  ;;  %v6701_v30 = vmul.f32 0.70710677, %v13669_v38  ;;  %v13697_v37 = vadd.f32 %v13561_v24, %v6341_v19  ;;  %v16685_v56 = vld [vmem:[#allocation90_spill] sm:$0xff] }
 0x544   :  { %7863 = verf.f32 %v6711_v55  ;;  %v6712_v62 = vmul.f32 0.70710677, %v13652_v63  ;;  %v13671_v40 = vadd.f32 %v6647_v43, %v6391_v21  ;;  %v13694_v7 = vpop.eup %7853  ;;  %v6702_v49 = vmul.f32 0.70710677, %v13678_v8 }
 0x545   :  { %7865 = verf.f32 %v6707_v0  ;;  %v6695_v34 = vmul.f32 0.70710677, %v13563_v32  ;;  %v6584_v44 = vadd.f32 %v16684_v46, %v6327_v31  ;;  %v6696_v2 = vmul.f32 0.70710677, %v16685_v56  ;;  %v13703_v23 = vpop.eup %7855 }
 0x546   :  { %7867 = verf.f32 %v6712_v62  ;;  %v6713_v33 = vmul.f32 0.70710677, %v13671_v40  ;;  %v13706_v41 = vadd.f32 %v16686_v12, %v6333_v61  ;;  %v6699_v50 = vmul.f32 0.70710677, %v6592_v53 }
 0x547   :  { %7869 = verf.f32 %v6705_v10  ;;  %v6700_v11 = vmul.f32 0.70710677, %v13697_v37  ;;  %v13710_v22 = vmul.f32 0.5, %v13554_v14  ;;  %v6697_v0 = vmul.f32 0.70710677, %v6584_v44 }
 0x548   :  { %7871 = verf.f32 %v6706_v20  ;;  %v13713_v55 = vmul.f32 0.5, %v13558_v15  ;;  %v13716_v10 = vmul.f32 0.5, %v13563_v32  ;;  %v13719_v21 = vmul.f32 0.5, %v16685_v56 }
 0x549   :  { %7873 = verf.f32 %v6713_v33  ;;  %v6698_v43 = vmul.f32 0.70710677, %v13706_v41  ;;  %v6678_v19 = vmul.f32 0.5, %v13628_v5  ;;  %v6679_v15 = vmul.f32 0.5, %v13630_v59 }
 0x54a   :  { %7875 = verf.f32 %v6703_v48  ;;  %v13724_v32 = vmul.f32 0.5, %v6584_v44  ;;  %v6680_v33 = vmul.f32 0.5, %v13652_v63  ;;  %v13728_v56 = vmul.f32 0.5, %v6592_v53 }
 0x54b   :  { %7877 = verf.f32 %v6704_v60  ;;  %v6677_v60 = vmul.f32 0.5, %v13613_v26  ;;  %v6673_v44 = vmul.f32 0.5, %v13626_v9  ;;  %v6676_v12 = vmul.f32 0.5, %v13605_v3 }
 0x54c   :  { %7879 = verf.f32 %v6694_v17 }
 0x54d   :  { %7881 = verf.f32 %v6701_v30  ;;  %v7858_v24 = vpop.eup %7857 }
 0x54e   :  { %7883 = verf.f32 %v6702_v49  ;;  %v7860_v18 = vpop.eup %7859  ;;  %v6773_v62 = vadd.f32 1.0, %v7858_v24 }
 0x54f   :  { %7885 = verf.f32 %v6695_v34  ;;  %v7862_v35 = vpop.eup %7861  ;;  %v6772_v61 = vadd.f32 1.0, %v7860_v18  ;;  %v6681_v18 = vmul.f32 0.5, %v13671_v40  ;;  %v6671_v40 = vmul.f32 0.5, %v13649_v42 }
 0x550   :  { %7887 = verf.f32 %v6696_v2  ;;  %v6774_v14 = vadd.f32 1.0, %v7862_v35  ;;  %v6805_v59 = vmul.f32 %v6773_v62, %v6677_v60 }
 0x551   :  { %v7864_v20 = vpop.eup %7863  ;;  %7889 = verf.f32 %v6699_v50 }
 0x552   :  { %v7866_v1 = vpop.eup %7865  ;;  %7891 = verf.f32 %v6700_v11  ;;  %v6775_v48 = vadd.f32 1.0, %v7864_v20  ;;  %v6806_v30 = vmul.f32 %v6774_v14, %v6678_v19  ;;  %v6675_v11 = vmul.f32 0.5, %v13616_v29 }
 0x553   :  { %v7868_v31 = vpop.eup %7867  ;;  %7893 = verf.f32 %v6697_v0  ;;  %v6771_v5 = vadd.f32 1.0, %v7866_v1  ;;  %v6804_v20 = vmul.f32 %v6772_v61, %v6676_v12  ;;  %v13742_v1 = vand.u32 4294901760, %v6805_v59 }
 0x554   :  { %v7870_v17 = vpop.eup %7869  ;;  %v6807_v49 = vmul.f32 %v6775_v48, %v6679_v15  ;;  %v6776_v34 = vadd.f32 1.0, %v7868_v31  ;;  %7895 = verf.f32 %v6698_v43  ;;  %v13738_v62 = vand.u32 4294901760, %v6806_v30 }
 0x555   :  { %v7872_v46 = vpop.eup %7871  ;;  %v6769_v24 = vadd.f32 1.0, %v7870_v17  ;;  %v6803_v3 = vmul.f32 %v6771_v5, %v6675_v11  ;;  %16689 = vst [vmem:[#allocation128_spill] sm:$0xff] %v13742_v1  ;;  %v6672_v15 = vmul.f32 0.5, %v13657_v27  ;;  %v6674_v48 = vmul.f32 0.5, %v13637_v51 }
 0x556   :  { %v7874_v2 = vpop.eup %7873  ;;  %v6808_v50 = vmul.f32 %v6776_v34, %v6680_v33  ;;  %v13732_v26 = vand.u32 4294901760, %v6807_v49  ;;  %v6770_v53 = vadd.f32 1.0, %v7872_v46  ;;  %v13757_v5 = vand.u32 4294901760, %v6804_v20 }
 0x557   :  { %v7876_v63 = vpop.eup %7875  ;;  %v6777_v0 = vadd.f32 1.0, %v7874_v2  ;;  %v6801_v61 = vmul.f32 %v6769_v24, %v6673_v44  ;;  %v13761_v27 = vsub.f32 %v6806_v30, %v13738_v62  ;;  %v13769_v44 = vand.u32 4294901760, %v6803_v3 }
 0x558   :  { %16687 = vst [vmem:[#allocation91_spill] sm:$0xff] %v13732_v26  ;;  %v7878_v35 = vpop.eup %7877  ;;  %v13736_v43 = vand.u32 4294901760, %v6808_v50  ;;  %v13745_v19 = vsub.f32 %v6807_v49, %v13732_v26  ;;  %v6767_v33 = vadd.f32 1.0, %v7876_v63  ;;  %v6802_v49 = vmul.f32 %v6770_v53, %v6674_v48 }
 0x559   :  { %v13740_v9 = vpop.eup %7879  ;;  %v6809_v14 = vmul.f32 %v6777_v0, %v6681_v18  ;;  %v6768_v17 = vadd.f32 1.0, %v7878_v35  ;;  %v6669_v24 = vmul.f32 0.5, %v13669_v38  ;;  %v6670_v30 = vmul.f32 0.5, %v13678_v8 }
 0x55a   :  { %16688 = vst [vmem:[#allocation103_spill] sm:$0xff] %v13736_v43  ;;  %16690 = vst [vmem:[#allocation113_spill] sm:$0xff] %v13745_v19  ;;  %v7882_v29 = vpop.eup %7881  ;;  %v13751_v31 = vsub.f32 %v6808_v50, %v13736_v43  ;;  %v15218_v12 = vand.u32 4294901760, %v13745_v19  ;;  %v13773_v50 = vsub.f32 %v6805_v59, %v13742_v1  ;;  %v6799_v35 = vmul.f32 %v6767_v33, %v6671_v40 }
 0x55b   :  { %v7884_v60 = vpop.eup %7883  ;;  %v13753_v34 = vand.u32 4294901760, %v6809_v14  ;;  %v6765_v11 = vadd.f32 1.0, %v7882_v29  ;;  %v6800_v53 = vmul.f32 %v6768_v17, %v6672_v15  ;;  %v13780_v48 = vand.u32 4294901760, %v6801_v61 }
 0x55c   :  { %16691 = vst [vmem:[#allocation124_spill] sm:$0xff] %v13751_v31  ;;  %v13755_v46 = vpop.eup %7885  ;;  %v15208_v42 = vand.u32 4294901760, %v13751_v31  ;;  %v6766_v18 = vadd.f32 1.0, %v7884_v60  ;;  %v13785_v29 = vand.u32 4294901760, %v6802_v49  ;;  %v13789_v60 = vsub.f32 %v6804_v20, %v13757_v5 }
 0x55d   :  { %16692 = vst [vmem:[#allocation112_spill] sm:$0xff] %v13753_v34  ;;  %v13763_v51 = vpop.eup %7887  ;;  %6815 = vmatprep.subr.mxu0 %v13753_v34  ;;  %v13767_v2 = vsub.f32 %v6809_v14, %v13753_v34  ;;  %v6941_v15 = vsub.f32 %v13745_v19, %v15218_v12  ;;  %v13799_v17 = vsub.f32 %v6803_v3, %v13769_v44  ;;  %v6668_v8 = vmul.f32 0.5, %v13697_v37 }
 0x55e   :  { %v7890_v63 = vpop.eup %7889  ;;  %6817 = vmatpush1.xpose.msra.mxu0 %v13736_v43  ;;  %v6935_v38 = vsub.f32 %v13751_v31, %v15208_v42  ;;  %v6797_v20 = vmul.f32 %v6765_v11, %v6669_v24  ;;  %v6798_v34 = vmul.f32 %v6766_v18, %v6670_v30  ;;  %v13804_v31 = vand.u32 4294901760, %v6800_v53 }
 0x55f   :  { %v7892_v0 = vpop.eup %7891  ;;  %6819 = vmatprep.subr.mxu0 %v13732_v26  ;;  %v15215_v14 = vand.u32 4294901760, %v13767_v2  ;;  %v6763_v26 = vadd.f32 1.0, %v7890_v63  ;;  %v13806_v12 = vand.u32 4294901760, %v6799_v35  ;;  %v16694_v3 = vand.u32 4294901760, %v13761_v27 }
 0x560   :  { %v7894_v59 = vpop.eup %7893  ;;  %v6764_v43 = vadd.f32 1.0, %v7892_v0  ;;  %v6936_v33 = vand.u32 4294901760, %v6935_v38  ;;  %v13813_v37 = vsub.f32 %v6802_v49, %v13785_v29  ;;  %v6942_v24 = vand.u32 4294901760, %v6941_v15  ;;  %v6811_v38 = vld [vmem:[#allocation11 + $0x8] sm:$0xff] }
 0x561   :  { %v6929_v40 = vsub.f32 %v13767_v2, %v15215_v14  ;;  %v7896_v42 = vpop.eup %7895  ;;  %16693 = vst [vmem:[#allocation146_spill] sm:$0xff] %v13806_v12  ;;  %v6947_v19 = vsub.f32 %v13761_v27, %v16694_v3  ;;  %v16695_v11 = vand.u32 4294901760, %v13773_v50  ;;  %v15223_v18 = vand.u32 4294901760, %v13799_v17 }
 0x562   :  { %6821 = vmatpush1.xpose.msra.mxu0 %v13738_v62  ;;  %v13820_v0 = vsub.f32 %v6801_v61, %v13780_v48  ;;  %v6666_v3 = vmul.f32 0.5, %v13706_v41  ;;  %v6795_v63 = vmul.f32 %v6763_v26, %v13728_v56  ;;  %v6796_v49 = vmul.f32 %v6764_v43, %v6668_v8 }
 0x563   :  { %6823 = vmatprep.subr.mxu0 %v13742_v1  ;;  %v6930_v14 = vand.u32 4294901760, %v6929_v40  ;;  %v6953_v30 = vsub.f32 %v13773_v50, %v16695_v11  ;;  %v6761_v40 = vadd.f32 1.0, %v7894_v59  ;;  %v6762_v1 = vadd.f32 1.0, %v7896_v42 }
 0x564   :  { %v13828_v15 = vand.u32 4294901760, %v6797_v20  ;;  %v13831_v61 = vsub.f32 %v6800_v53, %v13804_v31  ;;  %v6948_v59 = vand.u32 4294901760, %v6947_v19  ;;  %v16696_v41 = vand.u32 4294901760, %v13789_v60 }
 0x565   :  { %6931 = vmatprep.subr.mxu1 %v6930_v14  ;;  %v13826_v14 = vand.u32 4294901760, %v6798_v34  ;;  %v15224_v56 = vand.u32 4294901760, %v13813_v37  ;;  %v13837_v26 = vand.u32 4294901760, %v6811_v38  ;;  %v6954_v43 = vand.u32 4294901760, %v6953_v30 }
 0x566   :  { %6825 = vmatpush1.xpose.msra.mxu0 %v13757_v5  ;;  %6937 = vmatpush1.xpose.msra.mxu1 %v6936_v33  ;;  %v6959_v42 = vsub.f32 %v13789_v60, %v16696_v41  ;;  %v6965_v8 = vsub.f32 %v13799_v17, %v15223_v18  ;;  %v15225_v33 = vand.u32 4294901760, %v13820_v0  ;;  %v6759_v19 = vadd.f32 1.0, %v13755_v46 }
 0x567   :  { %6827 = vmatprep.subr.mxu0 %v13769_v44  ;;  %6943 = vmatprep.subr.mxu1 %v6942_v24  ;;  %16697 = vst [vmem:[#allocation153_spill] sm:$0xff] %v13837_v26  ;;  %v13844_v24 = vsub.f32 %v6799_v35, %v13806_v12  ;;  %v6760_v53 = vadd.f32 1.0, %v13763_v51  ;;  %v6793_v11 = vmul.f32 %v6761_v40, %v13724_v32  ;;  %v13854_v18 = vand.u32 4294901760, %v6796_v49 }
 0x568   :  { %v13851_v30 = vsub.f32 %v6811_v38, %v13837_v26  ;;  %v6794_v41 = vmul.f32 %v6762_v1, %v6666_v3  ;;  %v13856_v35 = vand.u32 4294901760, %v6795_v63  ;;  %v13859_v46 = vsub.f32 %v6798_v34, %v13826_v14  ;;  %7151 = vmatprep.mubr.f32.mxu1 %v13837_v26 }
 0x569   :  { %v6960_v51 = vand.u32 4294901760, %v6959_v42  ;;  %v6971_v32 = vsub.f32 %v13813_v37, %v15224_v56  ;;  %v15231_v40 = vand.u32 4294901760, %v13831_v61  ;;  %v6966_v1 = vand.u32 4294901760, %v6965_v8 }
 0x56a   :  { %6829 = vmatpush1.xpose.msra.mxu0 %v13785_v29  ;;  %6949 = vmatpush1.xpose.msra.mxu1 %v6948_v59  ;;  %v15226_v38 = vand.u32 4294901760, %v13851_v30  ;;  %v6977_v3 = vsub.f32 %v13820_v0, %v15225_v33  ;;  %v13872_v34 = vsub.f32 %v6797_v20, %v13828_v15  ;;  %v6757_v42 = vadd.f32 1.0, %v13703_v23 }
 0x56b   :  { %6831 = vmatprep.subr.mxu0 %v13780_v48  ;;  %6955 = vmatprep.subr.mxu1 %v6954_v43  ;;  %v6758_v43 = vadd.f32 1.0, %v13740_v9  ;;  %v6791_v56 = vmul.f32 %v6759_v19, %v13716_v10  ;;  %v6792_v33 = vmul.f32 %v6760_v53, %v13719_v21  ;;  %v13883_v20 = vand.u32 4294901760, %v6794_v41 }
 0x56c   :  { %v6913_v8 = vsub.f32 %v13851_v30, %v15226_v38  ;;  %v13885_v59 = vand.u32 4294901760, %v6793_v11  ;;  %v13888_v23 = vsub.f32 %v6796_v49, %v13854_v18  ;;  %v6972_v10 = vand.u32 4294901760, %v6971_v32 }
 0x56d   :  { %16698 = vst [vmem:[#allocation161_spill] sm:$0xff] %v13883_v20  ;;  %v6983_v9 = vsub.f32 %v13831_v61, %v15231_v40  ;;  %v15233_v19 = vand.u32 4294901760, %v13859_v46  ;;  %v6978_v38 = vand.u32 4294901760, %v6977_v3  ;;  %v16700_v21 = vand.u32 4294901760, %v13844_v24 }
 0x56e   :  { %6833 = vmatpush1.xpose.msra.mxu0 %v13804_v31  ;;  %6961 = vmatpush1.xpose.msra.mxu1 %v6960_v51  ;;  %16699 = vst [vmem:[#allocation154_spill] sm:$0xff] %v13885_v59  ;;  %v6914_v51 = vand.u32 4294901760, %v6913_v8  ;;  %v13899_v26 = vsub.f32 %v6795_v63, %v13856_v35  ;;  %v6659_v49 = vmul.f32 0.5, %v13543_v16  ;;  %v6755_v32 = vadd.f32 1.0, %v13687_v47 }
 0x56f   :  { %6835 = vmatprep.subr.mxu0 %v13806_v12  ;;  %6967 = vmatprep.subr.mxu1 %v6966_v1  ;;  %v6989_v53 = vsub.f32 %v13844_v24, %v16700_v21  ;;  %v15232_v1 = vand.u32 4294901760, %v13872_v34  ;;  %v6660_v12 = vmul.f32 0.5, %v13548_v25  ;;  %v6756_v40 = vadd.f32 1.0, %v13694_v7 }
 0x570   :  { %v6789_v3 = vmul.f32 %v6757_v42, %v13710_v22  ;;  %v6790_v8 = vmul.f32 %v6758_v43, %v13713_v55  ;;  %v13909_v63 = vand.u32 4294901760, %v6792_v33  ;;  %v13911_v21 = vand.u32 4294901760, %v6791_v56  ;;  %6915 = vmatprep.mubr.f32.mxu0 %v6914_v51 }
 0x571   :  { %v6984_v16 = vand.u32 4294901760, %v6983_v9  ;;  %v6995_v25 = vsub.f32 %v13859_v46, %v15233_v19  ;;  %v15234_v47 = vand.u32 4294901760, %v13888_v23  ;;  %v13918_v7 = vsub.f32 %v6794_v41, %v13883_v20 }
 0x572   :  { %6837 = vmatpush1.xpose.msra.mxu0 %v13826_v14  ;;  %6973 = vmatpush1.xpose.msra.mxu1 %v6972_v10  ;;  %16701 = vst [vmem:[#allocation170_spill] sm:$0xff] %v13909_v63  ;;  %16702 = vst [vmem:[#allocation151_spill] sm:$0xff] %v13911_v21  ;;  %v6990_v22 = vand.u32 4294901760, %v6989_v53  ;;  %v7001_v55 = vsub.f32 %v13872_v34, %v15232_v1  ;;  %v13925_v42 = vsub.f32 %v6793_v11, %v13885_v59 }
 0x573   :  { %6839 = vmatprep.subr.mxu0 %v13828_v15  ;;  %6979 = vmatprep.subr.mxu1 %v6978_v38  ;;  %v15235_v38 = vand.u32 4294901760, %v13899_v26  ;;  %v6657_v43 = vmul.f32 0.5, %v13538_v39  ;;  %v6753_v10 = vadd.f32 1.0, %v13673_v52  ;;  %v6658_v9 = vmul.f32 0.5, %v13540_v4 }
 0x574   :  { %v6754_v41 = vadd.f32 1.0, %v13681_v57  ;;  %v6787_v51 = vmul.f32 %v6755_v32, %v6659_v49  ;;  %v6788_v53 = vmul.f32 %v6756_v40, %v6660_v12  ;;  %v13933_v1 = vand.u32 4294901760, %v6790_v8  ;;  %v16704_v32 = vld [vmem:[#allocation176_spill] sm:$0xff] }
 0x575   :  { %v13935_v11 = vand.u32 4294901760, %v6789_v3  ;;  %v6996_v19 = vand.u32 4294901760, %v6995_v25  ;;  %v7007_v39 = vsub.f32 %v13888_v23, %v15234_v47  ;;  %v13942_v52 = vsub.f32 %v6792_v33, %v13909_v63 }
 0x576   :  { %6841 = vmatpush1.xpose.msra.mxu0 %v13854_v18  ;;  %6985 = vmatpush1.xpose.msra.mxu1 %v6984_v16  ;;  %v7002_v57 = vand.u32 4294901760, %v7001_v55  ;;  %v7013_v12 = vsub.f32 %v13899_v26, %v15235_v38  ;;  %v13949_v49 = vsub.f32 %v6791_v56, %v13911_v21  ;;  %v6655_v16 = vmul.f32 0.5, %v16704_v32 }
 0x577   :  { %6843 = vmatprep.subr.mxu0 %v13856_v35  ;;  %6991 = vmatprep.subr.mxu1 %v6990_v22  ;;  %16703 = vst [vmem:[#allocation156_spill] sm:$0xff] %v13935_v11  ;;  %v6751_v25 = vadd.f32 1.0, %v13660_v54  ;;  %v16705_v22 = vld [vmem:[#allocation36_spill] sm:$0xff]  ;;  %v6752_v4 = vadd.f32 1.0, %v13664_v36  ;;  %v6785_v33 = vmul.f32 %v6753_v10, %v6657_v43  ;;  %v6786_v55 = vmul.f32 %v6754_v41, %v6658_v9 }
 0x578   :  { %v6656_v47 = vmul.f32 0.5, %v16705_v22  ;;  %v13957_v38 = vand.u32 4294901760, %v6788_v53  ;;  %v13959_v56 = vand.u32 4294901760, %v6787_v51  ;;  %v7008_v40 = vand.u32 4294901760, %v7007_v39  ;;  %v16709_v39 = vld [vmem:[#allocation68_spill] sm:$0xff] }
 0x579   :  { %v16707_v32 = vand.u32 4294901760, %v13918_v7  ;;  %v13966_v36 = vsub.f32 %v6790_v8, %v13933_v1  ;;  %v16708_v43 = vand.u32 4294901760, %v13925_v42  ;;  %v13973_v41 = vsub.f32 %v6789_v3, %v13935_v11 }
 0x57a   :  { %6845 = vmatpush1.xpose.msra.mxu0 %v13883_v20  ;;  %6997 = vmatpush1.xpose.msra.mxu1 %v6996_v19  ;;  %16706 = vst [vmem:[#allocation158_spill] sm:$0xff] %v13959_v56  ;;  %v7014_v19 = vand.u32 4294901760, %v7013_v12  ;;  %v6750_v22 = vadd.f32 1.0, %v13654_v28  ;;  %v6783_v8 = vmul.f32 %v6751_v25, %v6655_v16  ;;  %v6784_v12 = vmul.f32 %v6752_v4, %v6656_v47 }
 0x57b   :  { %6847 = vmatprep.subr.mxu0 %v13885_v59  ;;  %7003 = vmatprep.subr.mxu1 %v7002_v57  ;;  %v7019_v54 = vsub.f32 %v13918_v7, %v16707_v32  ;;  %v7025_v10 = vsub.f32 %v13925_v42, %v16708_v43  ;;  %v6653_v57 = vmul.f32 0.5, %v16709_v39  ;;  %v6749_v59 = vadd.f32 1.0, %v13646_v58  ;;  %v16710_v32 = vld [vmem:[#allocation48_spill] sm:$0xff] }
 0x57c   :  { %v6654_v20 = vmul.f32 0.5, %v16710_v32  ;;  %v13981_v43 = vand.u32 4294901760, %v6786_v55  ;;  %v13983_v3 = vand.u32 4294901760, %v6785_v33  ;;  %v16712_v39 = vand.u32 4294901760, %v13942_v52 }
 0x57d   :  { %v7020_v9 = vand.u32 4294901760, %v7019_v54  ;;  %v13990_v28 = vsub.f32 %v6788_v53, %v13957_v38  ;;  %v16713_v47 = vand.u32 4294901760, %v13949_v49  ;;  %v13997_v25 = vsub.f32 %v6787_v51, %v13959_v56  ;;  %v16714_v54 = vld [vmem:[#allocation166_spill] sm:$0xff] }
 0x57e   :  { %6849 = vmatpush1.xpose.msra.mxu0 %v13909_v63  ;;  %7009 = vmatpush1.xpose.msra.mxu1 %v7008_v40  ;;  %16711 = vst [vmem:[#allocation172_spill] sm:$0xff] %v13981_v43  ;;  %v7031_v58 = vsub.f32 %v13942_v52, %v16712_v39  ;;  %v7026_v40 = vand.u32 4294901760, %v7025_v10  ;;  %v16715_v39 = vld [vmem:[#allocation175_spill] sm:$0xff]  ;;  %v6748_v32 = vadd.f32 1.0, %v13640_v45  ;;  %v6781_v53 = vmul.f32 %v6749_v59, %v6653_v57  ;;  %v16719_v57 = vld [vmem:[#allocation77_spill] sm:$0xff] }
 0x57f   :  { %6851 = vmatprep.subr.mxu0 %v13911_v21  ;;  %7015 = vmatprep.subr.mxu1 %v7014_v19  ;;  %v7037_v4 = vsub.f32 %v13949_v49, %v16713_v47  ;;  %v6651_v19 = vmul.f32 0.5, %v16714_v54  ;;  %v6747_v21 = vadd.f32 1.0, %v13632_v6  ;;  %v6652_v63 = vmul.f32 0.5, %v16715_v39 }
 0x580   :  { %v6782_v10 = vmul.f32 %v6750_v22, %v6654_v20  ;;  %v14005_v47 = vand.u32 4294901760, %v6784_v12  ;;  %v14008_v51 = vsub.f32 %v6786_v55, %v13981_v43  ;;  %v7032_v54 = vand.u32 4294901760, %v7031_v58 }
 0x581   :  { %v16716_v6 = vand.u32 4294901760, %v13966_v36  ;;  %v14015_v16 = vsub.f32 %v6785_v33, %v13983_v3  ;;  %v7038_v59 = vand.u32 4294901760, %v7037_v4  ;;  %v16717_v20 = vand.u32 4294901760, %v13973_v41 }
 0x582   :  { %6853 = vmatpush1.xpose.msra.mxu0 %v13933_v1  ;;  %7021 = vmatpush1.xpose.msra.mxu1 %v7020_v9  ;;  %v14020_v9 = vand.u32 4294901760, %v6783_v8  ;;  %v6650_v58 = vmul.f32 0.5, %v16719_v57  ;;  %v6780_v33 = vmul.f32 %v6748_v32, %v6652_v63  ;;  %v14027_v4 = vand.u32 4294901760, %v6782_v10 }
 0x583   :  { %6855 = vmatprep.subr.mxu0 %v13935_v11  ;;  %7027 = vmatprep.subr.mxu1 %v7026_v40  ;;  %v7043_v39 = vsub.f32 %v13966_v36, %v16716_v6  ;;  %v7049_v22 = vsub.f32 %v13973_v41, %v16717_v20  ;;  %v6746_v40 = vadd.f32 1.0, %v13624_v13  ;;  %v6779_v11 = vmul.f32 %v6747_v21, %v6651_v19  ;;  %v6810_v6 = vld [vmem:[#allocation11] sm:$0xff] }
 0x584   :  { %16718 = vst [vmem:[#allocation171_spill] sm:$0xff] %v14020_v9  ;;  %v14030_v45 = vand.u32 4294901760, %v6781_v53  ;;  %v16721_v57 = vand.u32 4294901760, %v13990_v28  ;;  %v14037_v19 = vsub.f32 %v6784_v12, %v14005_v47  ;;  %v16722_v32 = vand.u32 4294901760, %v13997_v25 }
 0x585   :  { %v7044_v55 = vand.u32 4294901760, %v7043_v39  ;;  %v7050_v63 = vand.u32 4294901760, %v7049_v22  ;;  %v14045_v20 = vand.u32 4294901760, %v6810_v6  ;;  %v6778_v39 = vmul.f32 %v6746_v40, %v6650_v58 }
 0x586   :  { %6857 = vmatpush1.xpose.msra.mxu0 %v13957_v38  ;;  %7033 = vmatpush1.xpose.msra.mxu1 %v7032_v54  ;;  %16720 = vst [vmem:[#allocation167_spill] sm:$0xff] %v14030_v45  ;;  %v7055_v13 = vsub.f32 %v13990_v28, %v16721_v57  ;;  %v7061_v54 = vsub.f32 %v13997_v25, %v16722_v32  ;;  %v16724_v12 = vand.u32 4294901760, %v14008_v51  ;;  %v14052_v57 = vand.u32 4294901760, %v6780_v33 }
 0x587   :  { %6859 = vmatprep.subr.mxu0 %v13959_v56  ;;  %7039 = vmatprep.subr.mxu1 %v7038_v59  ;;  %v14043_v59 = vsub.f32 %v6783_v8, %v14020_v9  ;;  %16723 = vst [vmem:[#allocation108_spill] sm:$0xff] %v14045_v20  ;;  %v14054_v21 = vand.u32 4294901760, %v6779_v11  ;;  %v16725_v8 = vand.u32 4294901760, %v14015_v16 }
 0x588   :  { %v7067_v22 = vsub.f32 %v14008_v51, %v16724_v12  ;;  %v7056_v32 = vand.u32 4294901760, %v7055_v13  ;;  %v7062_v58 = vand.u32 4294901760, %v7061_v54  ;;  %v14068_v12 = vsub.f32 %v6810_v6, %v14045_v20 }
 0x589   :  { %v7073_v56 = vsub.f32 %v14015_v16, %v16725_v8  ;;  %v14072_v8 = vand.u32 4294901760, %v6778_v39  ;;  %v14079_v40 = vsub.f32 %v6780_v33, %v14052_v57  ;;  %v16727_v6 = vand.u32 4294901760, %v14043_v59 }
 0x58a   :  { %6861 = vmatpush1.xpose.msra.mxu0 %v13981_v43  ;;  %7045 = vmatpush1.xpose.msra.mxu1 %v7044_v55  ;;  %v15252_v43 = vand.u32 4294901760, %v14037_v19  ;;  %v14061_v55 = vsub.f32 %v6782_v10, %v14027_v4  ;;  %v7068_v13 = vand.u32 4294901760, %v7067_v22 }
 0x58b   :  { %6863 = vmatprep.subr.mxu0 %v13983_v3  ;;  %7051 = vmatprep.subr.mxu1 %v7050_v63  ;;  %v14065_v63 = vsub.f32 %v6781_v53, %v14030_v45  ;;  %v7074_v10 = vand.u32 4294901760, %v7073_v56  ;;  %16726 = vst [vmem:[#allocation159_spill] sm:$0xff] %v14079_v40 }
 0x58c   :  { %v7079_v54 = vsub.f32 %v14037_v19, %v15252_v43  ;;  %v15256_v53 = vand.u32 4294901760, %v14061_v55  ;;  %v14096_v43 = vsub.f32 %v6778_v39, %v14072_v8 }
 0x58e   :  { %6865 = vmatpush1.xpose.msra.mxu0 %v14005_v47  ;;  %7057 = vmatpush1.xpose.msra.mxu1 %v7056_v32  ;;  %v7085_v32 = vsub.f32 %v14043_v59, %v16727_v6  ;;  %v7080_v56 = vand.u32 4294901760, %v7079_v54  ;;  %v7091_v33 = vsub.f32 %v14061_v55, %v15256_v53  ;;  %v15259_v6 = vand.u32 4294901760, %v14079_v40  ;;  %16728 = vst [vmem:[#allocation125_spill] sm:$0xff] %v14096_v43 }
 0x58f   :  { %6867 = vmatprep.subr.mxu0 %v14020_v9  ;;  %7063 = vmatprep.subr.mxu1 %v7062_v58  ;;  %v15255_v9 = vand.u32 4294901760, %v14065_v63  ;;  %v14087_v58 = vsub.f32 %v6779_v11, %v14054_v21 }
 0x590   :  { %v7086_v22 = vand.u32 4294901760, %v7085_v32  ;;  %v7092_v54 = vand.u32 4294901760, %v7091_v33  ;;  %v7103_v39 = vsub.f32 %v14079_v40, %v15259_v6  ;;  %v15258_v32 = vand.u32 4294901760, %v14096_v43  ;;  %v16744_v6 = vld [vmem:[#allocation172_spill] sm:$0xff] }
 0x591   :  { %v7097_v11 = vsub.f32 %v14065_v63, %v15255_v9 }
 0x592   :  { %6869 = vmatpush1.xpose.msra.mxu0 %v14027_v4  ;;  %7069 = vmatpush1.xpose.msra.mxu1 %v7068_v13  ;;  %v16729_v13 = vand.u32 4294901760, %v14068_v12 }
 0x593   :  { %6871 = vmatprep.subr.mxu0 %v14030_v45  ;;  %7075 = vmatprep.subr.mxu1 %v7074_v10  ;;  %v15257_v10 = vand.u32 4294901760, %v14087_v58  ;;  %v7098_v9 = vand.u32 4294901760, %v7097_v11  ;;  %v16730_v11 = vld [vmem:[#allocation124_spill] sm:$0xff] }
 0x594   :  { %v6919_v45 = vsub.f32 %v14068_v12, %v16729_v13 }
 0x595   :  { %v7109_v13 = vsub.f32 %v14087_v58, %v15257_v10 }
 0x596   :  { %6873 = vmatpush1.xpose.msra.mxu0 %v14052_v57  ;;  %7081 = vmatpush1.xpose.msra.mxu1 %v7080_v56  ;;  %v6920_v53 = vand.u32 4294901760, %v6919_v45  ;;  %v7115_v56 = vsub.f32 %v14096_v43, %v15258_v32  ;;  %v16731_v45 = vld [vmem:[#allocation113_spill] sm:$0xff]  ;;  %v16743_v32 = vld [vmem:[#allocation158_spill] sm:$0xff] }
 0x597   :  { %6875 = vmatprep.subr.mxu0 %v14054_v21  ;;  %7087 = vmatprep.subr.mxu1 %v7086_v22  ;;  %v7104_v22 = vand.u32 4294901760, %v7103_v39  ;;  %v7110_v33 = vand.u32 4294901760, %v7109_v13  ;;  %v16735_v39 = vand.u32 4294901760, %v13851_v30  ;;  %v16738_v13 = vld [vmem:[#allocation161_spill] sm:$0xff] }
 0x598   :  { %v7116_v10 = vand.u32 4294901760, %v7115_v56  ;;  %v16740_v56 = vld [vmem:[#allocation170_spill] sm:$0xff] }
 0x59a   :  { %6877 = vmatpush1.xpose.msra.mxu0 %v14072_v8  ;;  %7093 = vmatpush1.xpose.msra.mxu1 %v7092_v54  ;;  %v16734_v54 = vld [vmem:[#allocation91_spill] sm:$0xff] }
 0x59b   :  { %7099 = vmatprep.subr.mxu1 %v7098_v9  ;;  %7160 = vmatprep.subr.mxu0 %v13767_v2  ;;  %v16732_v9 = vld [vmem:[#allocation112_spill] sm:$0xff] }
 0x59d   :  { %6921 = vmatmul.mubr.f32.vlgmr.msra.gmra.mxu0 %v6920_v53  ;;  %v16733_v53 = vld [vmem:[#allocation103_spill] sm:$0xff] }
 0x59e   :  { %7105 = vmatpush1.xpose.msra.mxu1 %v7104_v22  ;;  %7163 = vmatpush1.xpose.msra.mxu0 %v16730_v11  ;;  %v16739_v22 = vld [vmem:[#allocation154_spill] sm:$0xff] }
 0x59f   :  { %7111 = vmatprep.subr.mxu1 %v7110_v33  ;;  %7166 = vmatprep.subr.mxu0 %v16731_v45  ;;  %v16741_v33 = vld [vmem:[#allocation151_spill] sm:$0xff] }
 0x5a0   :  { %7288 = vmatprep.mubr.f32.mxu0 %v13851_v30  ;;  %v16737_v30 = vld [vmem:[#allocation146_spill] sm:$0xff] }
 0x5a2   :  { %7117 = vmatpush1.xpose.msra.mxu1 %v7116_v10  ;;  %7169 = vmatpush1.xpose.msra.mxu0 %v13761_v27  ;;  %v16736_v10 = vld [vmem:[#allocation128_spill] sm:$0xff] }
 0x5a3   :  { %7172 = vmatprep.subr.mxu0 %v13773_v50  ;;  %7297 = vmatprep.subr.mxu1 %v16732_v9 }
 0x5a5   :  { %7153 = vmatmul.mubr.f32.vlgmr.msra.gmra.mxu1 %v14045_v20  ;;  %v16745_v20 = vld [vmem:[#allocation171_spill] sm:$0xff] }
 0x5a6   :  { %7175 = vmatpush1.xpose.msra.mxu0 %v13789_v60  ;;  %7299 = vmatpush1.xpose.msra.mxu1 %v16733_v53 }
 0x5a7   :  { %7178 = vmatprep.subr.mxu0 %v13799_v17  ;;  %7301 = vmatprep.subr.mxu1 %v16734_v54 }
 0x5a8   :  { %7395 = vmatprep.mubr.f32.mxu1 %v16735_v39  ;;  %v16742_v39 = vld [vmem:[#allocation156_spill] sm:$0xff] }
 0x5aa   :  { %7181 = vmatpush1.xpose.msra.mxu0 %v13813_v37  ;;  %7303 = vmatpush1.xpose.msra.mxu1 %v13738_v62 }
 0x5ab   :  { %7184 = vmatprep.subr.mxu0 %v13820_v0  ;;  %7305 = vmatprep.subr.mxu1 %v16736_v10 }
 0x5ae   :  { %7187 = vmatpush1.xpose.msra.mxu0 %v13831_v61  ;;  %7307 = vmatpush1.xpose.msra.mxu1 %v13757_v5 }
 0x5af   :  { %7190 = vmatprep.subr.mxu0 %v13844_v24  ;;  %7309 = vmatprep.subr.mxu1 %v13769_v44 }
 0x5b2   :  { %7193 = vmatpush1.xpose.msra.mxu0 %v13859_v46  ;;  %7311 = vmatpush1.xpose.msra.mxu1 %v13785_v29 }
 0x5b3   :  { %7196 = vmatprep.subr.mxu0 %v13872_v34  ;;  %7313 = vmatprep.subr.mxu1 %v13780_v48 }
 0x5b6   :  { %7199 = vmatpush1.xpose.msra.mxu0 %v13888_v23  ;;  %7315 = vmatpush1.xpose.msra.mxu1 %v13804_v31 }
 0x5b7   :  { %7202 = vmatprep.subr.mxu0 %v13899_v26  ;;  %7317 = vmatprep.subr.mxu1 %v16737_v30 }
 0x5ba   :  { %7205 = vmatpush1.xpose.msra.mxu0 %v13918_v7  ;;  %7319 = vmatpush1.xpose.msra.mxu1 %v13826_v14 }
 0x5bb   :  { %7208 = vmatprep.subr.mxu0 %v13925_v42  ;;  %7321 = vmatprep.subr.mxu1 %v13828_v15 }
 0x5be   :  { %7211 = vmatpush1.xpose.msra.mxu0 %v13942_v52  ;;  %7323 = vmatpush1.xpose.msra.mxu1 %v13854_v18 }
 0x5bf   :  { %7214 = vmatprep.subr.mxu0 %v13949_v49  ;;  %7325 = vmatprep.subr.mxu1 %v13856_v35 }
 0x5c2   :  { %7217 = vmatpush1.xpose.msra.mxu0 %v13966_v36  ;;  %7327 = vmatpush1.xpose.msra.mxu1 %v16738_v13 }
 0x5c3   :  { %7220 = vmatprep.subr.mxu0 %v13973_v41  ;;  %7329 = vmatprep.subr.mxu1 %v16739_v22 }
 0x5c6   :  { %7223 = vmatpush1.xpose.msra.mxu0 %v13990_v28  ;;  %7331 = vmatpush1.xpose.msra.mxu1 %v16740_v56 }
 0x5c7   :  { %7226 = vmatprep.subr.mxu0 %v13997_v25  ;;  %7333 = vmatprep.subr.mxu1 %v16741_v33 }
 0x5ca   :  { %7229 = vmatpush1.xpose.msra.mxu0 %v14008_v51  ;;  %7335 = vmatpush1.xpose.msra.mxu1 %v13933_v1 }
 0x5cb   :  { %7232 = vmatprep.subr.mxu0 %v14015_v16  ;;  %7337 = vmatprep.subr.mxu1 %v16742_v39 }
 0x5ce   :  { %7235 = vmatpush1.xpose.msra.mxu0 %v14037_v19  ;;  %7339 = vmatpush1.xpose.msra.mxu1 %v13957_v38 }
 0x5cf   :  { %7238 = vmatprep.subr.mxu0 %v14043_v59  ;;  %7341 = vmatprep.subr.mxu1 %v16743_v32  ;;  %v16746_v32 = vld [vmem:[#allocation167_spill] sm:$0xff] }
 0x5d2   :  { %7241 = vmatpush1.xpose.msra.mxu0 %v14061_v55  ;;  %7343 = vmatpush1.xpose.msra.mxu1 %v16744_v6  ;;  %v16747_v6 = vand.u32 4294901760, %v13767_v2  ;;  %v16752_v2 = vand.u32 4294901760, %v13773_v50  ;;  %v16757_v50 = vand.u32 4294901760, %v13820_v0  ;;  %v16762_v0 = vand.u32 4294901760, %v13888_v23 }
 0x5d3   :  { %7244 = vmatprep.subr.mxu0 %v14065_v63  ;;  %7345 = vmatprep.subr.mxu1 %v13983_v3  ;;  %v16777_v23 = vand.u32 4294901760, %v14061_v55 }
 0x5d6   :  { %7247 = vmatpush1.xpose.msra.mxu0 %v14079_v40  ;;  %7347 = vmatpush1.xpose.msra.mxu1 %v14005_v47  ;;  %v16748_v40 = vand.u32 4294901760, %v16730_v11 }
 0x5d7   :  { %7250 = vmatprep.subr.mxu0 %v14087_v58  ;;  %7349 = vmatprep.subr.mxu1 %v16745_v20  ;;  %v16749_v20 = vand.u32 4294901760, %v16731_v45 }
 0x5da   :  { %7253 = vmatpush1.xpose.msra.mxu0 %v14096_v43  ;;  %7351 = vmatpush1.xpose.msra.mxu1 %v14027_v4  ;;  %v16750_v43 = vld [vmem:[#allocation153_spill] sm:$0xff] }
 0x5db   :  { %7353 = vmatprep.subr.mxu1 %v16746_v32  ;;  %7407 = vmatprep.subr.mxu0 %v16747_v6  ;;  %v16751_v32 = vand.u32 4294901760, %v13761_v27  ;;  %v16753_v6 = vand.u32 4294901760, %v14068_v12  ;;  %v16756_v27 = vand.u32 4294901760, %v13813_v37  ;;  %v16760_v37 = vand.u32 4294901760, %v13859_v46 }
 0x5dc   :  { %v16775_v46 = vand.u32 4294901760, %v14043_v59 }
 0x5dd   :  { %7291 = vmatmul.mubr.f32.vlgmr.msra.gmra.mxu0 %v14068_v12 }
 0x5de   :  { %7355 = vmatpush1.xpose.msra.mxu1 %v14052_v57  ;;  %7411 = vmatpush1.xpose.msra.mxu0 %v16748_v40  ;;  %v16754_v40 = vand.u32 4294901760, %v13789_v60  ;;  %v16758_v60 = vand.u32 4294901760, %v13831_v61  ;;  %v16768_v61 = vand.u32 4294901760, %v13966_v36  ;;  %v16784_v36 = vld [vmem:[#allocation125_spill] sm:$0xff] }
 0x5df   :  { %7357 = vmatprep.subr.mxu1 %v14054_v21  ;;  %7415 = vmatprep.subr.mxu0 %v16749_v20  ;;  %v16755_v20 = vand.u32 4294901760, %v13799_v17  ;;  %v16759_v17 = vand.u32 4294901760, %v13844_v24  ;;  %v16773_v24 = vand.u32 4294901760, %v14015_v16  ;;  %v6813_v16 = vstv %s14303_s8  ;;  %s7999_s8 = scalar_lea.vmem %s7684_s22, 128 }
 0x5e0   :  { %7565 = vmatprep.mubr.f32.mxu0 %v16750_v43  ;;  %p8000_p11 = scmp.ne.s32.totalorder %s7684_s22, %s7999_s8  ;;  %p8005_p13 = scmp.lt.s32.totalorder %s7999_s8, %s7999_s8 }
 0x5e2   :  { %7359 = vmatpush1.xpose.msra.mxu1 %v14072_v8  ;;  %7419 = vmatpush1.xpose.msra.mxu0 %v16751_v32  ;;  %p8006_p0 = por %p8005_p13, %p8004_p12 }
 0x5e3   :  { %7423 = vmatprep.subr.mxu0 %v16752_v2  ;;  %7573 = vmatprep.subr.mxu1 %v16732_v9 }
 0x5e4   :  { %p8007_p1 = pnand %p8006_p0, %p8000_p11 }
 0x5e5   :  { %7399 = vmatmul.mubr.f32.vlgmr.msra.gmra.mxu1 %v16753_v6 }
 0x5e6   :  { %7427 = vmatpush1.xpose.msra.mxu0 %v16754_v40  ;;  %7575 = vmatpush1.xpose.msra.mxu1 %v16733_v53 }
 0x5e7   :  { %7431 = vmatprep.subr.mxu0 %v16755_v20  ;;  %7577 = vmatprep.subr.mxu1 %v16734_v54 }
 0x5e8   :  { %7669 = vmatprep.mubr.f32.mxu1 %v16750_v43  ;;  %v16786_v43 = vld [vmem:[#allocation167_spill] sm:$0xff] }
 0x5ea   :  { %7435 = vmatpush1.xpose.msra.mxu0 %v16756_v27  ;;  %7579 = vmatpush1.xpose.msra.mxu1 %v13738_v62  ;;  %v16761_v62 = vand.u32 4294901760, %v13872_v34  ;;  %v16776_v34 = vld [vmem:[#allocation158_spill] sm:$0xff] }
 0x5eb   :  { %7439 = vmatprep.subr.mxu0 %v16757_v50  ;;  %7581 = vmatprep.subr.mxu1 %v16736_v10 }
 0x5ee   :  { %7443 = vmatpush1.xpose.msra.mxu0 %v16758_v60  ;;  %7583 = vmatpush1.xpose.msra.mxu1 %v13757_v5  ;;  %v16763_v5 = vand.u32 4294901760, %v13899_v26  ;;  %v16772_v26 = vand.u32 4294901760, %v14008_v51 }
 0x5ef   :  { %7447 = vmatprep.subr.mxu0 %v16759_v17  ;;  %7585 = vmatprep.subr.mxu1 %v13769_v44  ;;  %v16764_v44 = vand.u32 4294901760, %v13918_v7  ;;  %v16778_v7 = vld [vmem:[#allocation172_spill] sm:$0xff] }
 0x5f2   :  { %7451 = vmatpush1.xpose.msra.mxu0 %v16760_v37  ;;  %7587 = vmatpush1.xpose.msra.mxu1 %v13785_v29  ;;  %v16765_v29 = vand.u32 4294901760, %v13925_v42  ;;  %v16780_v42 = vld [vmem:[#allocation159_spill] sm:$0xff] }
 0x5f3   :  { %7455 = vmatprep.subr.mxu0 %v16761_v62  ;;  %7589 = vmatprep.subr.mxu1 %v13780_v48  ;;  %v16766_v48 = vand.u32 4294901760, %v13942_v52  ;;  %v16781_v52 = vand.u32 4294901760, %v16780_v42 }
 0x5f6   :  { %7459 = vmatpush1.xpose.msra.mxu0 %v16762_v0  ;;  %7591 = vmatpush1.xpose.msra.mxu1 %v13804_v31  ;;  %v16767_v31 = vand.u32 4294901760, %v13949_v49  ;;  %v16783_v49 = vld [vmem:[#allocation171_spill] sm:$0xff] }
 0x5f7   :  { %7463 = vmatprep.subr.mxu0 %v16763_v5  ;;  %7593 = vmatprep.subr.mxu1 %v16737_v30 }
 0x5fa   :  { %7467 = vmatpush1.xpose.msra.mxu0 %v16764_v44  ;;  %7595 = vmatpush1.xpose.msra.mxu1 %v13826_v14  ;;  %v16769_v14 = vand.u32 4294901760, %v13973_v41  ;;  %v16785_v41 = vand.u32 4294901760, %v16784_v36 }
 0x5fb   :  { %7471 = vmatprep.subr.mxu0 %v16765_v29  ;;  %7597 = vmatprep.subr.mxu1 %v13828_v15  ;;  %v16770_v15 = vand.u32 4294901760, %v13990_v28  ;;  %v16787_v28 = vld [vmem:[#allocation108_spill] sm:$0xff] }
 0x5fe   :  { %7475 = vmatpush1.xpose.msra.mxu0 %v16766_v48  ;;  %7599 = vmatpush1.xpose.msra.mxu1 %v13854_v18  ;;  %v16771_v18 = vand.u32 4294901760, %v13997_v25 }
 0x5ff   :  { %7479 = vmatprep.subr.mxu0 %v16767_v31  ;;  %7601 = vmatprep.subr.mxu1 %v13856_v35  ;;  %v16774_v35 = vand.u32 4294901760, %v14037_v19 }
 0x602   :  { %7483 = vmatpush1.xpose.msra.mxu0 %v16768_v61  ;;  %7603 = vmatpush1.xpose.msra.mxu1 %v16738_v13 }
 0x603   :  { %7487 = vmatprep.subr.mxu0 %v16769_v14  ;;  %7605 = vmatprep.subr.mxu1 %v16739_v22 }
 0x606   :  { %7491 = vmatpush1.xpose.msra.mxu0 %v16770_v15  ;;  %7607 = vmatpush1.xpose.msra.mxu1 %v16740_v56 }
 0x607   :  { %7495 = vmatprep.subr.mxu0 %v16771_v18  ;;  %7609 = vmatprep.subr.mxu1 %v16741_v33 }
 0x60a   :  { %7499 = vmatpush1.xpose.msra.mxu0 %v16772_v26  ;;  %7611 = vmatpush1.xpose.msra.mxu1 %v13933_v1  ;;  %v16779_v1 = vand.u32 4294901760, %v14065_v63 }
 0x60b   :  { %7503 = vmatprep.subr.mxu0 %v16773_v24  ;;  %7613 = vmatprep.subr.mxu1 %v16742_v39 }
 0x60e   :  { %7507 = vmatpush1.xpose.msra.mxu0 %v16774_v35  ;;  %7615 = vmatpush1.xpose.msra.mxu1 %v13957_v38  ;;  %v16782_v38 = vand.u32 4294901760, %v14087_v58 }
 0x60f   :  { %7511 = vmatprep.subr.mxu0 %v16775_v46  ;;  %7617 = vmatprep.subr.mxu1 %v16776_v34 }
 0x612   :  { %7515 = vmatpush1.xpose.msra.mxu0 %v16777_v23  ;;  %7619 = vmatpush1.xpose.msra.mxu1 %v16778_v7 }
 0x613   :  { %7519 = vmatprep.subr.mxu0 %v16779_v1  ;;  %7621 = vmatprep.subr.mxu1 %v13983_v3 }
 0x616   :  { %7523 = vmatpush1.xpose.msra.mxu0 %v16781_v52  ;;  %7623 = vmatpush1.xpose.msra.mxu1 %v14005_v47 }
 0x617   :  { %7527 = vmatprep.subr.mxu0 %v16782_v38  ;;  %7625 = vmatprep.subr.mxu1 %v16783_v49 }
 0x61a   :  { %7531 = vmatpush1.xpose.msra.mxu0 %v16785_v41  ;;  %7627 = vmatpush1.xpose.msra.mxu1 %v14027_v4 }
 0x61b   :  { %7629 = vmatprep.subr.mxu1 %v16786_v43 }
 0x61d   :  { %7567 = vmatmul.mubr.f32.vlgmr.msra.gmra.mxu0 %v16787_v28 }
 0x61e   :  { %7631 = vmatpush1.xpose.msra.mxu1 %v14052_v57 }
 0x61f   :  { %7633 = vmatprep.subr.mxu1 %v14054_v21 }
 0x622   :  { %7635 = vmatpush1.xpose.msra.mxu1 %v14072_v8 }
 0x625   :  { %7671 = vmatmul.mubr.f32.vlgmr.msra.gmra.mxu1 %v16787_v28 }
 0x65d   :  { %v6922_v3 = vpop.f32.mrf.mxu0 }
 0x65e   :  { %v6923_v47 = vadd.f32 %v6922_v3, %v6813_v16 }
 0x65f   :  { %v6924_v25 = vpop.f32.mrf.mxu0 }
 0x665   :  { %v7154_v51 = vpop.f32.mrf.mxu1 }
 0x666   :  { %v7155_v4 = vadd.f32 %v7154_v51, %v6923_v47 }
 0x667   :  { %v7156_v19 = vpop.f32.mrf.mxu1 }
 0x69d   :  { %v7292_v59 = vpop.f32.mrf.mxu0 }
 0x69e   :  { %v7293_v55 = vadd.f32 %v7292_v59, %v7155_v4 }
 0x69f   :  { %v7294_v63 = vpop.f32.mrf.mxu0 }
 0x6a5   :  { %v7400_v57 = vpop.f32.mrf.mxu1 }
 0x6a6   :  { %v7401_v8 = vadd.f32 %v7400_v57, %v7293_v55 }
 0x6a7   :  { %v7402_v12 = vpop.f32.mrf.mxu1 }
 0x6dd   :  { %v7568_v21 = vpop.f32.mrf.mxu0 }
 0x6de   :  { %v7569_v32 = vadd.f32 %v7568_v21, %v7401_v8 }
 0x6df   :  { %v7570_v58 = vpop.f32.mrf.mxu0 }
 0x6e5   :  { %v7672_v11 = vpop.f32.mrf.mxu1 }
 0x6e6   :  { %v7673_v45 = vadd.f32 %v7672_v11, %v7569_v32 }
 0x6e7   :  { %v7674_v9 = vpop.f32.mrf.mxu1 }
 0x6e8   :  { %7676 = vst [vmem:[#allocation12] sm:$0xff] %v7673_v45 }
 0x6e9   :  { %8010 = shalt.err (!%p8007_p1)
}
 0x6ea   :  { %7686 = dma.vmem_to_hbm [thread:$0]  %s7684_s22, 128, %s14304_s9, [#allocation5]  }
 0x6eb   :  { %8025 = dma.done.wait [#allocation5], 128  }
 0x6ec   :  { %8026 = vsyncadd [#allocation5], 4294967168 }
 0x6ed   :  { %7690 = vsyncpa [#allocation4], 1 }
 0x6ee   :  { %7691 = vsyncpa [#allocation7], 1 }
 0x6ef   :  { %7692 = vsyncpa [#allocation10], 1 }
 0x6f0   :  { %7693 = vsyncpa [#allocation5], 1 }

</bundles_post_ra>
